<compile_context>
chip_gen: v5e
topology: v5e:2x2
jax: 0.10.0
libtpu: 0.0.40
codegen_flags: <defaults>
</compile_context>

<pallas_src>
import functools
import math

import jax
import jax.numpy as jnp
import numpy as np
from jax.experimental import pallas as pl
from jax.experimental.pallas import tpu as pltpu

_BF16 = jnp.bfloat16
_BN_EPS = 1e-5


# ----------------------------------------------------------------------------
# small helpers
# ----------------------------------------------------------------------------
def _round_up(x, m):
    return ((x + m - 1) // m) * m


def _pick_tile(m, target=256):
    """Largest divisor of m that is <= target and a multiple of 8 (else m)."""
    if m <= target:
        return m
    for t in range(target, 7, -1):
        if m % t == 0 and t % 8 == 0:
            return t
    return m


def _vmem_limit(block_defs):
    """Explicit scoped-VMEM limit sized from the block footprint + headroom."""
    total = 0
    for shape, dtype in block_defs:
        total += int(np.prod(shape)) * np.dtype(dtype).itemsize
    return int(min(64 * 2**20, max(16 * 2**20, 4 * total)))


# ----------------------------------------------------------------------------
# Pallas kernels
# ----------------------------------------------------------------------------
def _matmul_bn_act_kernel(x_ref, w_ref, s_ref, b_ref, o_ref, *, relu):
    """o = act((x @ w) * s + b).  x:(tm,K) bf16, w:(K,C) bf16, s/b:(1,C) f32."""
    acc = jnp.dot(x_ref[...], w_ref[...], preferred_element_type=jnp.float32)
    acc = acc * s_ref[...] + b_ref[...]
    if relu:
        acc = jnp.maximum(acc, 0.0)
    o_ref[...] = acc.astype(o_ref.dtype)


def _bottleneck_tail_kernel(taps_ref, xs_ref, w2_ref, s2_ref, b2_ref,
                            w3_ref, s3_ref, b3_ref, wd_ref, sd_ref, bd_ref,
                            o_ref, *, n_taps):
    """Fused bottleneck tail on a tile of M2 = N*Ho*Wo rows.

    taps: (9, tm, width) bf16  -- shifted stride-2 windows of relu(bn1(conv1)).
    xs  : (tm, Cin)      bf16  -- stride-2 subsampled original input (shortcut).
    Main: 3x3/s2 conv as 9 accumulating MXU matmuls -> relu(bn2) -> bn3(1x1).
    Out : relu(main + bn_d(1x1 shortcut)).
    """
    acc = jnp.dot(taps_ref[0], w2_ref[0], preferred_element_type=jnp.float32)
    for t in range(1, n_taps):
        acc = acc + jnp.dot(taps_ref[t], w2_ref[t],
                            preferred_element_type=jnp.float32)
    y = jnp.maximum(acc * s2_ref[...] + b2_ref[...], 0.0)
    y = jnp.dot(y.astype(w3_ref.dtype), w3_ref[...],
                preferred_element_type=jnp.float32)
    y = y * s3_ref[...] + b3_ref[...]
    sc = jnp.dot(xs_ref[...], wd_ref[...], preferred_element_type=jnp.float32)
    sc = sc * sd_ref[...] + bd_ref[...]
    o_ref[...] = jnp.maximum(y + sc, 0.0).astype(o_ref.dtype)


def _vit_block_kernel(tok_ref, wemb_ref, bemb_ref, pos_ref,
                      wq_ref, bq_ref, wk_ref, bk_ref, wv_ref, bv_ref,
                      wo_ref, bo_ref, g1_ref, be1_ref, g2_ref, be2_ref,
                      wm1_ref, bm1_ref, wm2_ref, bm2_ref,
                      o_ref, x_carry, *, num_heads, head_dim):
    """One (sample, layer) grid step of the ViT.

    grid = (N, num_blocks): sample axis "parallel", layer axis "arbitrary".
    Token state (T, D) is carried across layers in a VMEM scratch; only one
    layer's weights are resident per step (streamed via BlockSpec index_map).
    Attention is per-sample with heads as a dot_general batch dimension.
    """
    l = pl.program_id(1)

    def layer_norm(z, g, b):
        mu = jnp.mean(z, axis=-1, keepdims=True)
        zc = z - mu
        var = jnp.mean(zc * zc, axis=-1, keepdims=True)
        return zc * jax.lax.rsqrt(var + 1e-5) * g + b

    @pl.when(l == 0)
    def _():  # linear patch embedding + learned positional embedding
        emb = jnp.dot(tok_ref[0], wemb_ref[...],
                      preferred_element_type=jnp.float32)
        x_carry[...] = emb + bemb_ref[...] + pos_ref[...]

    x = x_carry[...]                                   # (T, D) f32
    T, D = x.shape
    H, hd = num_heads, head_dim
    scale = 1.0 / math.sqrt(hd)

    # --- multi-head self-attention (heads batched, per-sample) ---------------
    xb = jnp.broadcast_to(x.astype(_BF16)[None], (H, T, D))
    q = jnp.einsum('htd,hde->hte', xb, wq_ref[0],
                   preferred_element_type=jnp.float32) + bq_ref[0]
    k = jnp.einsum('htd,hde->hte', xb, wk_ref[0],
                   preferred_element_type=jnp.float32) + bk_ref[0]
    v = jnp.einsum('htd,hde->hte', xb, wv_ref[0],
                   preferred_element_type=jnp.float32) + bv_ref[0]
    s = jnp.einsum('hte,hse->hts', q.astype(_BF16), k.astype(_BF16),
                   preferred_element_type=jnp.float32) * scale
    s = s - jnp.max(s, axis=-1, keepdims=True)
    probs = jnp.exp(s)
    probs = probs * pl.reciprocal(jnp.sum(probs, axis=-1, keepdims=True),
                                  approx=True)
    oh = jnp.einsum('hts,hse->hte', probs.astype(_BF16), v.astype(_BF16),
                    preferred_element_type=jnp.float32)
    proj = jnp.einsum('hte,hed->htd', oh.astype(_BF16), wo_ref[0],
                      preferred_element_type=jnp.float32)
    attn = jnp.sum(proj, axis=0) + bo_ref[0]           # (T, D)

    x = layer_norm(x + attn, g1_ref[0], be1_ref[0])

    # --- MLP ------------------------------------------------------------------
    m = jnp.dot(x.astype(_BF16), wm1_ref[0],
                preferred_element_type=jnp.float32) + bm1_ref[0]
    # TODO(synk): PyTorch nn.GELU default is exact erf; tanh approximation used.
    m = jax.nn.gelu(m)
    m = jnp.dot(m.astype(_BF16), wm2_ref[0],
                preferred_element_type=jnp.float32) + bm2_ref[0]
    x = layer_norm(x + m, g2_ref[0], be2_ref[0])

    x_carry[...] = x
    o_ref[0] = x.astype(o_ref.dtype)


# ----------------------------------------------------------------------------
# XLA-side window extraction (tiny tensors; keeps kernels free of strided
# in-kernel gathers).
# ----------------------------------------------------------------------------
def _out_size(h, k, stride, pad):
    return (h + 2 * pad - k) // stride + 1


def _shift_slabs(xp, k, stride, ho, wo):
    n, _, _, c = xp.shape
    slabs = []
    for dy in range(k):
        for dx in range(k):
            slabs.append(jax.lax.slice(
                xp, (0, dy, dx, 0),
                (n, dy + (ho - 1) * stride + 1, dx + (wo - 1) * stride + 1, c),
                (1, stride, stride, 1)))
    return slabs


def _im2col(x, k, stride, pad, dtype):
    """(N,H,W,C) -> (N*Ho*Wo, round_up(k*k*C,128)) matching a padded weight."""
    n, h, w, c = x.shape
    ho, wo = _out_size(h, k, stride, pad), _out_size(w, k, stride, pad)
    xp = jnp.pad(x, ((0, 0), (pad, pad), (pad, pad), (0, 0)))
    pat = jnp.concatenate(_shift_slabs(xp, k, stride, ho, wo), axis=-1)
    kdim = k * k * c
    pat = pat.reshape(n * ho * wo, kdim)
    kpad = _round_up(kdim, 128) - kdim
    if kpad:
        pat = jnp.pad(pat, ((0, 0), (0, kpad)))
    return pat.astype(dtype), (n, ho, wo)


def _tap_stack(y, k, stride, pad, dtype):
    """(N,H,W,C) -> (k*k, N*Ho*Wo, C) stride-`stride` taps (zero padded)."""
    n, h, w, c = y.shape
    ho, wo = _out_size(h, k, stride, pad), _out_size(w, k, stride, pad)
    yp = jnp.pad(y, ((0, 0), (pad, pad), (pad, pad), (0, 0)))
    slabs = _shift_slabs(yp, k, stride, ho, wo)
    taps = jnp.stack([s.reshape(n * ho * wo, c) for s in slabs], 0)
    return taps.astype(dtype), (n, ho, wo)


# ----------------------------------------------------------------------------
# pallas_call wrappers (M-tiled grids, resident weights, explicit VMEM limits)
# ----------------------------------------------------------------------------
def _matmul_bn_act(x2d, w, s, b, *, relu, out_dtype):
    m, k = x2d.shape
    cout = w.shape[1]
    assert w.shape[0] == k
    tm = _pick_tile(m)
    limit = _vmem_limit([((tm, k), x2d.dtype), ((k, cout), w.dtype),
                         ((tm, cout), out_dtype)])
    return pl.pallas_call(
        functools.partial(_matmul_bn_act_kernel, relu=relu),
        out_shape=jax.ShapeDtypeStruct((m, cout), out_dtype),
        grid=(m // tm,),
        in_specs=[pl.BlockSpec((tm, k), lambda i: (i, 0)),
                  pl.BlockSpec((k, cout), lambda i: (0, 0)),
                  pl.BlockSpec((1, cout), lambda i: (0, 0)),
                  pl.BlockSpec((1, cout), lambda i: (0, 0))],
        out_specs=pl.BlockSpec((tm, cout), lambda i: (i, 0)),
        compiler_params=pltpu.CompilerParams(
            dimension_semantics=("parallel",), vmem_limit_bytes=limit),
    )(x2d, w, s, b)


def _conv_bn_relu(p, x, k, stride, pad, out_dtype):
    pat, (n, ho, wo) = _im2col(x, k, stride, pad, _BF16)
    y = _matmul_bn_act(pat, p["w"], p["s"], p["b"], relu=True,
                       out_dtype=out_dtype)
    return y.reshape(n, ho, wo, -1)


def _bottleneck(p, x, out_dtype):
    n, h, w, cin = x.shape
    width = p["w1"].shape[1]
    cout = p["w3"].shape[1]

    # conv1 (1x1) + BN + ReLU once at full resolution (not per tap).
    y1 = _matmul_bn_act(x.reshape(n * h * w, cin).astype(_BF16),
                        p["w1"], p["s1"], p["b1"], relu=True, out_dtype=_BF16)
    y1 = y1.reshape(n, h, w, width)

    taps, (n, ho, wo) = _tap_stack(y1, 3, 2, 1, _BF16)        # (9, M2, width)
    xs = x[:, ::2, ::2, :].reshape(n * ho * wo, cin).astype(_BF16)

    m2 = n * ho * wo
    tm = _pick_tile(m2)
    limit = _vmem_limit([((9, tm, width), _BF16), ((tm, cin), _BF16),
                         ((9, width, width), _BF16), ((width, cout), _BF16),
                         ((cin, cout), _BF16), ((tm, cout), out_dtype)])
    y = pl.pallas_call(
        functools.partial(_bottleneck_tail_kernel, n_taps=9),
        out_shape=jax.ShapeDtypeStruct((m2, cout), out_dtype),
        grid=(m2 // tm,),
        in_specs=[pl.BlockSpec((9, tm, width), lambda i: (0, i, 0)),
                  pl.BlockSpec((tm, cin), lambda i: (i, 0)),
                  pl.BlockSpec((9, width, width), lambda i: (0, 0, 0)),
                  pl.BlockSpec((1, width), lambda i: (0, 0)),
                  pl.BlockSpec((1, width), lambda i: (0, 0)),
                  pl.BlockSpec((width, cout), lambda i: (0, 0)),
                  pl.BlockSpec((1, cout), lambda i: (0, 0)),
                  pl.BlockSpec((1, cout), lambda i: (0, 0)),
                  pl.BlockSpec((cin, cout), lambda i: (0, 0)),
                  pl.BlockSpec((1, cout), lambda i: (0, 0)),
                  pl.BlockSpec((1, cout), lambda i: (0, 0))],
        out_specs=pl.BlockSpec((tm, cout), lambda i: (i, 0)),
        compiler_params=pltpu.CompilerParams(
            dimension_semantics=("parallel",), vmem_limit_bytes=limit),
    )(taps, xs, p["w2"], p["s2"], p["b2"], p["w3"], p["s3"], p["b3"],
      p["wd"], p["sd"], p["bd"])
    return y.reshape(n, ho, wo, cout)


def _vit(p, x, head_num):
    n, h, w, d = x.shape
    t = h * w
    tokens = x.reshape(n, t, d).astype(_BF16)
    blocks = p["wq"].shape[0]
    hd = d // head_num
    mlp = p["wm1"].shape[2]

    limit = _vmem_limit([((1, t, d), _BF16), ((d, d), _BF16),
                         ((t, d), jnp.float32),
                         ((1, head_num, d, hd), _BF16),
                         ((1, head_num, d, hd), _BF16),
                         ((1, head_num, d, hd), _BF16),
                         ((1, head_num, hd, d), _BF16),
                         ((1, d, mlp), _BF16), ((1, mlp, d), _BF16),
                         ((1, t, d), _BF16)])

    tokm = lambda i, l: (i, 0, 0)
    cst2 = lambda i, l: (0, 0)
    lyr4 = lambda i, l: (l, 0, 0, 0)
    lyr3 = lambda i, l: (l, 0, 0)

    y = pl.pallas_call(
        functools.partial(_vit_block_kernel, num_heads=head_num, head_dim=hd),
        out_shape=jax.ShapeDtypeStruct((n, t, d), _BF16),
        grid=(n, blocks),
        in_specs=[
            pl.BlockSpec((1, t, d), tokm),
            pl.BlockSpec((d, d), cst2),
            pl.BlockSpec((1, d), cst2),
            pl.BlockSpec((t, d), cst2),
            pl.BlockSpec((1, head_num, d, hd), lyr4),
            pl.BlockSpec((1, head_num, 1, hd), lyr4),
            pl.BlockSpec((1, head_num, d, hd), lyr4),
            pl.BlockSpec((1, head_num, 1, hd), lyr4),
            pl.BlockSpec((1, head_num, d, hd), lyr4),
            pl.BlockSpec((1, head_num, 1, hd), lyr4),
            pl.BlockSpec((1, head_num, hd, d), lyr4),
            pl.BlockSpec((1, 1, d), lyr3),
            pl.BlockSpec((1, 1, d), lyr3),
            pl.BlockSpec((1, 1, d), lyr3),
            pl.BlockSpec((1, 1, d), lyr3),
            pl.BlockSpec((1, 1, d), lyr3),
            pl.BlockSpec((1, d, mlp), lyr3),
            pl.BlockSpec((1, 1, mlp), lyr3),
            pl.BlockSpec((1, mlp, d), lyr3),
            pl.BlockSpec((1, 1, d), lyr3),
        ],
        out_specs=pl.BlockSpec((1, t, d), tokm),
        scratch_shapes=[pltpu.VMEM((t, d), jnp.float32)],
        compiler_params=pltpu.CompilerParams(
            dimension_semantics=("parallel", "arbitrary"),
            vmem_limit_bytes=limit),
    )(tokens, p["wemb"], p["bemb"], p["pos"],
      p["wq"], p["bq"], p["wk"], p["bk"], p["wv"], p["bv"],
      p["wo"], p["bo"], p["g1"], p["be1"], p["g2"], p["be2"],
      p["wm1"], p["bm1"], p["wm2"], p["bm2"])
    return y.reshape(n, h, w, d)


# ----------------------------------------------------------------------------
# Parameters (deterministic).  BatchNorm (inference mode) folded to scale/shift.
# ----------------------------------------------------------------------------
def _bn_fold(key, c, conv_bias=None):
    k1, k2 = jax.random.split(key)
    gamma = 1.0 + 0.1 * jax.random.normal(k1, (c,), jnp.float32)
    beta = 0.1 * jax.random.normal(k2, (c,), jnp.float32)
    mean = jnp.zeros((c,), jnp.float32)
    var = jnp.ones((c,), jnp.float32)
    s = gamma / jnp.sqrt(var + _BN_EPS)
    b = beta - mean * s
    if conv_bias is not None:
        b = b + conv_bias * s
    return s.reshape(1, c), b.reshape(1, c)


def _conv_w(key, kh, kw, cin, cout):
    w = jax.random.normal(key, (kh, kw, cin, cout), jnp.float32)
    return w * math.sqrt(2.0 / (kh * kw * cin))


def _dense_w(key, din, dout):
    return jax.random.normal(key, (din, dout), jnp.float32) * math.sqrt(1.0 / din)


def init_bottleneck(key, cin, cout, base_width=64):
    width = int(cout * (base_width / 64))
    ks = jax.random.split(key, 8)
    w1 = _conv_w(ks[0], 1, 1, cin, width).reshape(cin, width)
    w2 = _conv_w(ks[1], 3, 3, width, width).reshape(9, width, width)
    w3 = _conv_w(ks[2], 1, 1, width, cout).reshape(width, cout)
    wd = _conv_w(ks[3], 1, 1, cin, cout).reshape(cin, cout)
    s1, b1 = _bn_fold(ks[4], width)
    s2, b2 = _bn_fold(ks[5], width)
    s3, b3 = _bn_fold(ks[6], cout)
    sd, bd = _bn_fold(ks[7], cout)
    return dict(w1=w1.astype(_BF16), s1=s1, b1=b1,
                w2=w2.astype(_BF16), s2=s2, b2=b2,
                w3=w3.astype(_BF16), s3=s3, b3=b3,
                wd=wd.astype(_BF16), sd=sd, bd=bd)


def init_vit(key, dim, heads, mlp_dim, blocks, tokens):
    hd = dim // heads
    ks = jax.random.split(key, 8)
    d_s = math.sqrt(1.0 / dim)
    m_s = math.sqrt(1.0 / mlp_dim)
    zeros = lambda *s: jnp.zeros(s, jnp.float32)

    def stack(k, shape, scale):
        return (jax.random.normal(k, (blocks,) + shape, jnp.float32)
                * scale).astype(_BF16)

    return dict(
        wemb=_dense_w(ks[0], dim, dim).astype(_BF16), bemb=zeros(1, dim),
        pos=0.02 * jax.random.normal(ks[1], (tokens, dim), jnp.float32),
        wq=stack(ks[2], (heads, dim, hd), d_s), bq=zeros(blocks, heads, 1, hd),
        wk=stack(ks[3], (heads, dim, hd), d_s), bk=zeros(blocks, heads, 1, hd),
        wv=stack(ks[4], (heads, dim, hd), d_s), bv=zeros(blocks, heads, 1, hd),
        wo=stack(ks[5], (heads, hd, dim), d_s), bo=zeros(blocks, 1, dim),
        g1=jnp.ones((blocks, 1, dim), jnp.float32), be1=zeros(blocks, 1, dim),
        g2=jnp.ones((blocks, 1, dim), jnp.float32), be2=zeros(blocks, 1, dim),
        wm1=stack(ks[6], (dim, mlp_dim), d_s), bm1=zeros(blocks, 1, mlp_dim),
        wm2=stack(ks[7], (mlp_dim, dim), m_s), bm2=zeros(blocks, 1, dim),
    )


def init_encoder(key, in_channels, out_channels, img_size, head_num,
                 mlp_dim, block_num, patch_size):
    ks = jax.random.split(key, 8)
    c0 = out_channels
    # stem: Conv2d(in, c0, 7, stride=2, padding=3, bias=False) + BN
    k_stem = 49 * in_channels
    w_stem = _conv_w(ks[0], 7, 7, in_channels, c0).reshape(k_stem, c0)
    w_stem = jnp.pad(w_stem, ((0, _round_up(k_stem, 128) - k_stem), (0, 0)))
    s_stem, b_stem = _bn_fold(ks[1], c0)
    # head: Conv2d(8*c0, 512, 3, stride=1, padding=1, bias=True) + BN
    k_head = 9 * 8 * c0
    w_head = _conv_w(ks[2], 3, 3, 8 * c0, 512).reshape(k_head, 512)
    w_head = jnp.pad(w_head, ((0, _round_up(k_head, 128) - k_head), (0, 0)))
    head_bias = jnp.zeros((512,), jnp.float32)
    s_head, b_head = _bn_fold(ks[3], 512, conv_bias=head_bias)
    vit_tokens = (img_size // patch_size) ** 2
    return dict(
        stem=dict(w=w_stem.astype(_BF16), s=s_stem, b=b_stem),
        enc1=init_bottleneck(ks[4], c0, 2 * c0),
        enc2=init_bottleneck(ks[5], 2 * c0, 4 * c0),
        enc3=init_bottleneck(ks[6], 4 * c0, 8 * c0),
        vit=init_vit(ks[7], 8 * c0, head_num, mlp_dim, block_num, vit_tokens),
        head=dict(w=w_head.astype(_BF16), s=s_head, b=b_head),
    )


# ----------------------------------------------------------------------------
# Forward pass (NCHW in / NCHW out; kernels run NHWC with batch folded into M)
# ----------------------------------------------------------------------------
def encoder_forward(params, x_nchw, *, head_num):
    x = jnp.transpose(x_nchw, (0, 2, 3, 1)).astype(jnp.float32)       # NHWC
    x1 = _conv_bn_relu(params["stem"], x, 7, 2, 3, jnp.float32)       # (N,H/2,W/2,C0)
    x2 = _bottleneck(params["enc1"], x1, jnp.float32)                 # (N,H/4,W/4,2C0)
    x3 = _bottleneck(params["enc2"], x2, jnp.float32)                 # (N,H/8,W/8,4C0)
    x4 = _bottleneck(params["enc3"], x3, _BF16)                       # not returned -> bf16
    xv = _vit(params["vit"], x4, head_num)                            # bf16
    y = _conv_bn_relu(params["head"], xv, 3, 1, 1, jnp.float32)       # (N,H/16,W/16,512)
    to_nchw = lambda a: jnp.transpose(a, (0, 3, 1, 2))
    return to_nchw(y), to_nchw(x1), to_nchw(x2), to_nchw(x3)


# ----------------------------------------------------------------------------
if __name__ == "__main__":
    in_channels = 4
    out_channels = 16
    img_size = 32            # /16 downsample -> 2x2 feature map into the ViT
    head_num = 4
    mlp_dim = 128
    block_num = 2
    patch_size = 16

    key = jax.random.PRNGKey(0)
    pkey, xkey = jax.random.split(key)
    params = init_encoder(pkey, in_channels, out_channels, img_size,
                          head_num, mlp_dim, block_num, patch_size)
    x = jax.random.normal(xkey, (2, in_channels, img_size, img_size),
                          jnp.float32)

    fwd = jax.jit(functools.partial(encoder_forward, head_num=head_num))
    out, x1, x2, x3 = fwd(params, x)
    jax.block_until_ready((out, x1, x2, x3))

    assert out.shape == (2, 512, 2, 2), out.shape
    assert x1.shape == (2, out_channels, 16, 16), x1.shape
    assert x2.shape == (2, 2 * out_channels, 8, 8), x2.shape
    assert x3.shape == (2, 4 * out_channels, 4, 4), x3.shape
    for a in (out, x1, x2, x3):
        assert bool(jnp.all(jnp.isfinite(a.astype(jnp.float32))))
    print("KERNEL_OK")
</pallas_src>

<mosaic_0001>
module attributes {stable_mosaic.version = 11 : i64} {
  func.func @_matmul_bn_act_kernel(%arg0: i32, %arg1: memref<256x256xbf16, #tpu.memory_space<vmem>>, %arg2: memref<256x16xbf16, #tpu.memory_space<vmem>>, %arg3: memref<1x16xf32, #tpu.memory_space<vmem>>, %arg4: memref<1x16xf32, #tpu.memory_space<vmem>>, %arg5: memref<256x16xf32, #tpu.memory_space<vmem>>) attributes {dimension_semantics = [#tpu.dimension_semantics<parallel>], iteration_bounds = array<i64: 2>, scalar_prefetch = 0 : i64, scratch_operands = 0 : i64, tpu.core_type = #tpu.core_type<tc>, window_params = [{transform_indices = @transform_0, window_bounds = array<i64: 256, 256>}, {pipeline_mode = #tpu.pipeline_mode<synchronous>, transform_indices = @transform_1, window_bounds = array<i64: 256, 16>}, {pipeline_mode = #tpu.pipeline_mode<synchronous>, transform_indices = @transform_2, window_bounds = array<i64: 1, 16>}, {pipeline_mode = #tpu.pipeline_mode<synchronous>, transform_indices = @transform_3, window_bounds = array<i64: 1, 16>}, {transform_indices = @transform_4, window_bounds = array<i64: 256, 16>}]} {
    %c0 = arith.constant 0 : index
    %c0_0 = arith.constant 0 : index
    %0 = vector.load %arg1[%c0, %c0_0] : memref<256x256xbf16, #tpu.memory_space<vmem>>, vector<256x256xbf16>
    %c0_1 = arith.constant 0 : index
    %c0_2 = arith.constant 0 : index
    %1 = vector.load %arg2[%c0_1, %c0_2] : memref<256x16xbf16, #tpu.memory_space<vmem>>, vector<256x16xbf16>
    %cst = arith.constant dense<0.000000e+00> : vector<256x16xf32>
    %2 = tpu.matmul %0, %1, %cst {dimension_numbers = #tpu.dot_dimension_numbers<[1], [0], [0], [1], [0, 0, 1, 1], [], []>} : vector<256x256xbf16>, vector<256x16xbf16>, vector<256x16xf32> -> vector<256x16xf32>
    %c0_3 = arith.constant 0 : index
    %c0_4 = arith.constant 0 : index
    %3 = vector.load %arg3[%c0_3, %c0_4] : memref<1x16xf32, #tpu.memory_space<vmem>>, vector<1x16xf32>
    %4 = vector.broadcast %3 : vector<1x16xf32> to vector<256x16xf32>
    %5 = arith.mulf %2, %4 : vector<256x16xf32>
    %c0_5 = arith.constant 0 : index
    %c0_6 = arith.constant 0 : index
    %6 = vector.load %arg4[%c0_5, %c0_6] : memref<1x16xf32, #tpu.memory_space<vmem>>, vector<1x16xf32>
    %7 = vector.broadcast %6 : vector<1x16xf32> to vector<256x16xf32>
    %8 = arith.addf %5, %7 : vector<256x16xf32>
    %cst_7 = arith.constant 0.000000e+00 : f32
    %9 = vector.broadcast %cst_7 : f32 to vector<256x16xf32>
    %10 = arith.maximumf %8, %9 : vector<256x16xf32>
    %c0_8 = arith.constant 0 : index
    %c0_9 = arith.constant 0 : index
    %11 = vector.load %arg5[%c0_8, %c0_9] : memref<256x16xf32, #tpu.memory_space<vmem>>, vector<256x16xf32>
    tpu.vector_store %arg5[%c0_8, %c0_9], %10 {strides = array<i32>} : memref<256x16xf32, #tpu.memory_space<vmem>>, vector<256x16xf32>,
    return
  }
  func.func @transform_0(%arg0: i32) -> (i32, i32) {
    %c0_i32 = arith.constant 0 : i32
    %c0_i32_0 = arith.constant 0 : i32
    return %arg0, %c0_i32 : i32, i32
  }
  func.func @transform_1(%arg0: i32) -> (i32, i32) {
    %c0_i32 = arith.constant 0 : i32
    %c0_i32_0 = arith.constant 0 : i32
    %c0_i32_1 = arith.constant 0 : i32
    return %c0_i32, %c0_i32_0 : i32, i32
  }
  func.func @transform_2(%arg0: i32) -> (i32, i32) {
    %c0_i32 = arith.constant 0 : i32
    %c0_i32_0 = arith.constant 0 : i32
    %c0_i32_1 = arith.constant 0 : i32
    return %c0_i32, %c0_i32_0 : i32, i32
  }
  func.func @transform_3(%arg0: i32) -> (i32, i32) {
    %c0_i32 = arith.constant 0 : i32
    %c0_i32_0 = arith.constant 0 : i32
    %c0_i32_1 = arith.constant 0 : i32
    return %c0_i32, %c0_i32_0 : i32, i32
  }
  func.func @transform_4(%arg0: i32) -> (i32, i32) {
    %c0_i32 = arith.constant 0 : i32
    %c0_i32_0 = arith.constant 0 : i32
    return %arg0, %c0_i32 : i32, i32
  }
}

module attributes {stable_mosaic.version = 11 : i64} {
  func.func @_matmul_bn_act_kernel(%arg0: i32, %arg1: memref<256x16xbf16, #tpu.memory_space<vmem>>, %arg2: memref<16x32xbf16, #tpu.memory_space<vmem>>, %arg3: memref<1x32xf32, #tpu.memory_space<vmem>>, %arg4: memref<1x32xf32, #tpu.memory_space<vmem>>, %arg5: memref<256x32xbf16, #tpu.memory_space<vmem>>) attributes {dimension_semantics = [#tpu.dimension_semantics<parallel>], iteration_bounds = array<i64: 2>, scalar_prefetch = 0 : i64, scratch_operands = 0 : i64, tpu.core_type = #tpu.core_type<tc>, window_params = [{transform_indices = @transform_0, window_bounds = array<i64: 256, 16>}, {pipeline_mode = #tpu.pipeline_mode<synchronous>, transform_indices = @transform_1, window_bounds = array<i64: 16, 32>}, {pipeline_mode = #tpu.pipeline_mode<synchronous>, transform_indices = @transform_2, window_bounds = array<i64: 1, 32>}, {pipeline_mode = #tpu.pipeline_mode<synchronous>, transform_indices = @transform_3, window_bounds = array<i64: 1, 32>}, {transform_indices = @transform_4, window_bounds = array<i64: 256, 32>}]} {
    %c0 = arith.constant 0 : index
    %c0_0 = arith.constant 0 : index
    %0 = vector.load %arg1[%c0, %c0_0] : memref<256x16xbf16, #tpu.memory_space<vmem>>, vector<256x16xbf16>
    %c0_1 = arith.constant 0 : index
    %c0_2 = arith.constant 0 : index
    %1 = vector.load %arg2[%c0_1, %c0_2] : memref<16x32xbf16, #tpu.memory_space<vmem>>, vector<16x32xbf16>
    %cst = arith.constant dense<0.000000e+00> : vector<256x32xf32>
    %2 = tpu.matmul %0, %1, %cst {dimension_numbers = #tpu.dot_dimension_numbers<[1], [0], [0], [1], [0, 0, 1, 1], [], []>} : vector<256x16xbf16>, vector<16x32xbf16>, vector<256x32xf32> -> vector<256x32xf32>
    %c0_3 = arith.constant 0 : index
    %c0_4 = arith.constant 0 : index
    %3 = vector.load %arg3[%c0_3, %c0_4] : memref<1x32xf32, #tpu.memory_space<vmem>>, vector<1x32xf32>
    %4 = vector.broadcast %3 : vector<1x32xf32> to vector<256x32xf32>
    %5 = arith.mulf %2, %4 : vector<256x32xf32>
    %c0_5 = arith.constant 0 : index
    %c0_6 = arith.constant 0 : index
    %6 = vector.load %arg4[%c0_5, %c0_6] : memref<1x32xf32, #tpu.memory_space<vmem>>, vector<1x32xf32>
    %7 = vector.broadcast %6 : vector<1x32xf32> to vector<256x32xf32>
    %8 = arith.addf %5, %7 : vector<256x32xf32>
    %cst_7 = arith.constant 0.000000e+00 : f32
    %9 = vector.broadcast %cst_7 : f32 to vector<256x32xf32>
    %10 = arith.maximumf %8, %9 : vector<256x32xf32>
    %11 = arith.truncf %10 : vector<256x32xf32> to vector<256x32xbf16>
    %c0_8 = arith.constant 0 : index
    %c0_9 = arith.constant 0 : index
    %12 = vector.load %arg5[%c0_8, %c0_9] : memref<256x32xbf16, #tpu.memory_space<vmem>>, vector<256x32xbf16>
    tpu.vector_store %arg5[%c0_8, %c0_9], %11 {strides = array<i32>} : memref<256x32xbf16, #tpu.memory_space<vmem>>, vector<256x32xbf16>,
    return
  }
  func.func @transform_0(%arg0: i32) -> (i32, i32) {
    %c0_i32 = arith.constant 0 : i32
    %c0_i32_0 = arith.constant 0 : i32
    return %arg0, %c0_i32 : i32, i32
  }
  func.func @transform_1(%arg0: i32) -> (i32, i32) {
    %c0_i32 = arith.constant 0 : i32
    %c0_i32_0 = arith.constant 0 : i32
    %c0_i32_1 = arith.constant 0 : i32
    return %c0_i32, %c0_i32_0 : i32, i32
  }
  func.func @transform_2(%arg0: i32) -> (i32, i32) {
    %c0_i32 = arith.constant 0 : i32
    %c0_i32_0 = arith.constant 0 : i32
    %c0_i32_1 = arith.constant 0 : i32
    return %c0_i32, %c0_i32_0 : i32, i32
  }
  func.func @transform_3(%arg0: i32) -> (i32, i32) {
    %c0_i32 = arith.constant 0 : i32
    %c0_i32_0 = arith.constant 0 : i32
    %c0_i32_1 = arith.constant 0 : i32
    return %c0_i32, %c0_i32_0 : i32, i32
  }
  func.func @transform_4(%arg0: i32) -> (i32, i32) {
    %c0_i32 = arith.constant 0 : i32
    %c0_i32_0 = arith.constant 0 : i32
    return %arg0, %c0_i32 : i32, i32
  }
}

module attributes {stable_mosaic.version = 11 : i64} {
  func.func @_bottleneck_tail_kernel(%arg0: i32, %arg1: memref<9x128x32xbf16, #tpu.memory_space<vmem>>, %arg2: memref<128x16xbf16, #tpu.memory_space<vmem>>, %arg3: memref<9x32x32xbf16, #tpu.memory_space<vmem>>, %arg4: memref<1x32xf32, #tpu.memory_space<vmem>>, %arg5: memref<1x32xf32, #tpu.memory_space<vmem>>, %arg6: memref<32x32xbf16, #tpu.memory_space<vmem>>, %arg7: memref<1x32xf32, #tpu.memory_space<vmem>>, %arg8: memref<1x32xf32, #tpu.memory_space<vmem>>, %arg9: memref<16x32xbf16, #tpu.memory_space<vmem>>, %arg10: memref<1x32xf32, #tpu.memory_space<vmem>>, %arg11: memref<1x32xf32, #tpu.memory_space<vmem>>, %arg12: memref<128x32xf32, #tpu.memory_space<vmem>>) attributes {dimension_semantics = [#tpu.dimension_semantics<parallel>], iteration_bounds = array<i64: 1>, scalar_prefetch = 0 : i64, scratch_operands = 0 : i64, tpu.core_type = #tpu.core_type<tc>, window_params = [{transform_indices = @transform_0, window_bounds = array<i64: 9, 128, 32>}, {transform_indices = @transform_1, window_bounds = array<i64: 128, 16>}, {pipeline_mode = #tpu.pipeline_mode<synchronous>, transform_indices = @transform_2, window_bounds = array<i64: 9, 32, 32>}, {pipeline_mode = #tpu.pipeline_mode<synchronous>, transform_indices = @transform_3, window_bounds = array<i64: 1, 32>}, {pipeline_mode = #tpu.pipeline_mode<synchronous>, transform_indices = @transform_4, window_bounds = array<i64: 1, 32>}, {pipeline_mode = #tpu.pipeline_mode<synchronous>, transform_indices = @transform_5, window_bounds = array<i64: 32, 32>}, {pipeline_mode = #tpu.pipeline_mode<synchronous>, transform_indices = @transform_6, window_bounds = array<i64: 1, 32>}, {pipeline_mode = #tpu.pipeline_mode<synchronous>, transform_indices = @transform_7, window_bounds = array<i64: 1, 32>}, {pipeline_mode = #tpu.pipeline_mode<synchronous>, transform_indices = @transform_8, window_bounds = array<i64: 16, 32>}, {pipeline_mode = #tpu.pipeline_mode<synchronous>, transform_indices = @transform_9, window_bounds = array<i64: 1, 32>}, {pipeline_mode = #tpu.pipeline_mode<synchronous>, transform_indices = @transform_10, window_bounds = array<i64: 1, 32>}, {transform_indices = @transform_11, window_bounds = array<i64: 128, 32>}]} {
    %c0 = arith.constant 0 : index
    %c0_0 = arith.constant 0 : index
    %c0_1 = arith.constant 0 : index
    %0 = vector.load %arg1[%c0, %c0_0, %c0_1] : memref<9x128x32xbf16, #tpu.memory_space<vmem>>, vector<1x128x32xbf16>
    %1 = vector.shape_cast %0 : vector<1x128x32xbf16> to vector<128x32xbf16>
    %c0_2 = arith.constant 0 : index
    %c0_3 = arith.constant 0 : index
    %c0_4 = arith.constant 0 : index
    %2 = vector.load %arg3[%c0_2, %c0_3, %c0_4] : memref<9x32x32xbf16, #tpu.memory_space<vmem>>, vector<1x32x32xbf16>
    %3 = vector.shape_cast %2 : vector<1x32x32xbf16> to vector<32x32xbf16>
    %cst = arith.constant dense<0.000000e+00> : vector<128x32xf32>
    %4 = tpu.matmul %1, %3, %cst {dimension_numbers = #tpu.dot_dimension_numbers<[1], [0], [0], [1], [0, 0, 1, 1], [], []>} : vector<128x32xbf16>, vector<32x32xbf16>, vector<128x32xf32> -> vector<128x32xf32>
    %c1 = arith.constant 1 : index
    %c0_5 = arith.constant 0 : index
    %c0_6 = arith.constant 0 : index
    %5 = vector.load %arg1[%c1, %c0_5, %c0_6] : memref<9x128x32xbf16, #tpu.memory_space<vmem>>, vector<1x128x32xbf16>
    %6 = vector.shape_cast %5 : vector<1x128x32xbf16> to vector<128x32xbf16>
    %c1_7 = arith.constant 1 : index
    %c0_8 = arith.constant 0 : index
    %c0_9 = arith.constant 0 : index
    %7 = vector.load %arg3[%c1_7, %c0_8, %c0_9] : memref<9x32x32xbf16, #tpu.memory_space<vmem>>, vector<1x32x32xbf16>
    %8 = vector.shape_cast %7 : vector<1x32x32xbf16> to vector<32x32xbf16>
    %cst_10 = arith.constant dense<0.000000e+00> : vector<128x32xf32>
    %9 = tpu.matmul %6, %8, %cst_10 {dimension_numbers = #tpu.dot_dimension_numbers<[1], [0], [0], [1], [0, 0, 1, 1], [], []>} : vector<128x32xbf16>, vector<32x32xbf16>, vector<128x32xf32> -> vector<128x32xf32>
    %10 = arith.addf %4, %9 : vector<128x32xf32>
    %c2 = arith.constant 2 : index
    %c0_11 = arith.constant 0 : index
    %c0_12 = arith.constant 0 : index
    %11 = vector.load %arg1[%c2, %c0_11, %c0_12] : memref<9x128x32xbf16, #tpu.memory_space<vmem>>, vector<1x128x32xbf16>
    %12 = vector.shape_cast %11 : vector<1x128x32xbf16> to vector<128x32xbf16>
    %c2_13 = arith.constant 2 : index
    %c0_14 = arith.constant 0 : index
    %c0_15 = arith.constant 0 : index
    %13 = vector.load %arg3[%c2_13, %c0_14, %c0_15] : memref<9x32x32xbf16, #tpu.memory_space<vmem>>, vector<1x32x32xbf16>
    %14 = vector.shape_cast %13 : vector<1x32x32xbf16> to vector<32x32xbf16>
    %cst_16 = arith.constant dense<0.000000e+00> : vector<128x32xf32>
    %15 = tpu.matmul %12, %14, %cst_16 {dimension_numbers = #tpu.dot_dimension_numbers<[1], [0], [0], [1], [0, 0, 1, 1], [], []>} : vector<128x32xbf16>, vector<32x32xbf16>, vector<128x32xf32> -> vector<128x32xf32>
    %16 = arith.addf %10, %15 : vector<128x32xf32>
    %c3 = arith.constant 3 : index
    %c0_17 = arith.constant 0 : index
    %c0_18 = arith.constant 0 : index
    %17 = vector.load %arg1[%c3, %c0_17, %c0_18] : memref<9x128x32xbf16, #tpu.memory_space<vmem>>, vector<1x128x32xbf16>
    %18 = vector.shape_cast %17 : vector<1x128x32xbf16> to vector<128x32xbf16>
    %c3_19 = arith.constant 3 : index
    %c0_20 = arith.constant 0 : index
    %c0_21 = arith.constant 0 : index
    %19 = vector.load %arg3[%c3_19, %c0_20, %c0_21] : memref<9x32x32xbf16, #tpu.memory_space<vmem>>, vector<1x32x32xbf16>
    %20 = vector.shape_cast %19 : vector<1x32x32xbf16> to vector<32x32xbf16>
    %cst_22 = arith.constant dense<0.000000e+00> : vector<128x32xf32>
    %21 = tpu.matmul %18, %20, %cst_22 {dimension_numbers = #tpu.dot_dimension_numbers<[1], [0], [0], [1], [0, 0, 1, 1], [], []>} : vector<128x32xbf16>, vector<32x32xbf16>, vector<128x32xf32> -> vector<128x32xf32>
    %22 = arith.addf %16, %21 : vector<128x32xf32>
    %c4 = arith.constant 4 : index
    %c0_23 = arith.constant 0 : index
    %c0_24 = arith.constant 0 : index
    %23 = vector.load %arg1[%c4, %c0_23, %c0_24] : memref<9x128x32xbf16, #tpu.memory_space<vmem>>, vector<1x128x32xbf16>
    %24 = vector.shape_cast %23 : vector<1x128x32xbf16> to vector<128x32xbf16>
    %c4_25 = arith.constant 4 : index
    %c0_26 = arith.constant 0 : index
    %c0_27 = arith.constant 0 : index
    %25 = vector.load %arg3[%c4_25, %c0_26, %c0_27] : memref<9x32x32xbf16, #tpu.memory_space<vmem>>, vector<1x32x32xbf16>
    %26 = vector.shape_cast %25 : vector<1x32x32xbf16> to vector<32x32xbf16>
    %cst_28 = arith.constant dense<0.000000e+00> : vector<128x32xf32>
    %27 = tpu.matmul %24, %26, %cst_28 {dimension_numbers = #tpu.dot_dimension_numbers<[1], [0], [0], [1], [0, 0, 1, 1], [], []>} : vector<128x32xbf16>, vector<32x32xbf16>, vector<128x32xf32> -> vector<128x32xf32>
    %28 = arith.addf %22, %27 : vector<128x32xf32>
    %c5 = arith.constant 5 : index
    %c0_29 = arith.constant 0 : index
    %c0_30 = arith.constant 0 : index
    %29 = vector.load %arg1[%c5, %c0_29, %c0_30] : memref<9x128x32xbf16, #tpu.memory_space<vmem>>, vector<1x128x32xbf16>
    %30 = vector.shape_cast %29 : vector<1x128x32xbf16> to vector<128x32xbf16>
    %c5_31 = arith.constant 5 : index
    %c0_32 = arith.constant 0 : index
    %c0_33 = arith.constant 0 : index
    %31 = vector.load %arg3[%c5_31, %c0_32, %c0_33] : memref<9x32x32xbf16, #tpu.memory_space<vmem>>, vector<1x32x32xbf16>
    %32 = vector.shape_cast %31 : vector<1x32x32xbf16> to vector<32x32xbf16>
    %cst_34 = arith.constant dense<0.000000e+00> : vector<128x32xf32>
    %33 = tpu.matmul %30, %32, %cst_34 {dimension_numbers = #tpu.dot_dimension_numbers<[1], [0], [0], [1], [0, 0, 1, 1], [], []>} : vector<128x32xbf16>, vector<32x32xbf16>, vector<128x32xf32> -> vector<128x32xf32>
    %34 = arith.addf %28, %33 : vector<128x32xf32>
    %c6 = arith.constant 6 : index
    %c0_35 = arith.constant 0 : index
    %c0_36 = arith.constant 0 : index
    %35 = vector.load %arg1[%c6, %c0_35, %c0_36] : memref<9x128x32xbf16, #tpu.memory_space<vmem>>, vector<1x128x32xbf16>
    %36 = vector.shape_cast %35 : vector<1x128x32xbf16> to vector<128x32xbf16>
    %c6_37 = arith.constant 6 : index
    %c0_38 = arith.constant 0 : index
    %c0_39 = arith.constant 0 : index
    %37 = vector.load %arg3[%c6_37, %c0_38, %c0_39] : memref<9x32x32xbf16, #tpu.memory_space<vmem>>, vector<1x32x32xbf16>
    %38 = vector.shape_cast %37 : vector<1x32x32xbf16> to vector<32x32xbf16>
    %cst_40 = arith.constant dense<0.000000e+00> : vector<128x32xf32>
    %39 = tpu.matmul %36, %38, %cst_40 {dimension_numbers = #tpu.dot_dimension_numbers<[1], [0], [0], [1], [0, 0, 1, 1], [], []>} : vector<128x32xbf16>, vector<32x32xbf16>, vector<128x32xf32> -> vector<128x32xf32>
    %40 = arith.addf %34, %39 : vector<128x32xf32>
    %c7 = arith.constant 7 : index
    %c0_41 = arith.constant 0 : index
    %c0_42 = arith.constant 0 : index
    %41 = vector.load %arg1[%c7, %c0_41, %c0_42] : memref<9x128x32xbf16, #tpu.memory_space<vmem>>, vector<1x128x32xbf16>
    %42 = vector.shape_cast %41 : vector<1x128x32xbf16> to vector<128x32xbf16>
    %c7_43 = arith.constant 7 : index
    %c0_44 = arith.constant 0 : index
    %c0_45 = arith.constant 0 : index
    %43 = vector.load %arg3[%c7_43, %c0_44, %c0_45] : memref<9x32x32xbf16, #tpu.memory_space<vmem>>, vector<1x32x32xbf16>
    %44 = vector.shape_cast %43 : vector<1x32x32xbf16> to vector<32x32xbf16>
    %cst_46 = arith.constant dense<0.000000e+00> : vector<128x32xf32>
    %45 = tpu.matmul %42, %44, %cst_46 {dimension_numbers = #tpu.dot_dimension_numbers<[1], [0], [0], [1], [0, 0, 1, 1], [], []>} : vector<128x32xbf16>, vector<32x32xbf16>, vector<128x32xf32> -> vector<128x32xf32>
    %46 = arith.addf %40, %45 : vector<128x32xf32>
    %c8 = arith.constant 8 : index
    %c0_47 = arith.constant 0 : index
    %c0_48 = arith.constant 0 : index
    %47 = vector.load %arg1[%c8, %c0_47, %c0_48] : memref<9x128x32xbf16, #tpu.memory_space<vmem>>, vector<1x128x32xbf16>
    %48 = vector.shape_cast %47 : vector<1x128x32xbf16> to vector<128x32xbf16>
    %c8_49 = arith.constant 8 : index
    %c0_50 = arith.constant 0 : index
    %c0_51 = arith.constant 0 : index
    %49 = vector.load %arg3[%c8_49, %c0_50, %c0_51] : memref<9x32x32xbf16, #tpu.memory_space<vmem>>, vector<1x32x32xbf16>
    %50 = vector.shape_cast %49 : vector<1x32x32xbf16> to vector<32x32xbf16>
    %cst_52 = arith.constant dense<0.000000e+00> : vector<128x32xf32>
    %51 = tpu.matmul %48, %50, %cst_52 {dimension_numbers = #tpu.dot_dimension_numbers<[1], [0], [0], [1], [0, 0, 1, 1], [], []>} : vector<128x32xbf16>, vector<32x32xbf16>, vector<128x32xf32> -> vector<128x32xf32>
    %52 = arith.addf %46, %51 : vector<128x32xf32>
    %c0_53 = arith.constant 0 : index
    %c0_54 = arith.constant 0 : index
    %53 = vector.load %arg4[%c0_53, %c0_54] : memref<1x32xf32, #tpu.memory_space<vmem>>, vector<1x32xf32>
    %54 = vector.broadcast %53 : vector<1x32xf32> to vector<128x32xf32>
    %55 = arith.mulf %52, %54 : vector<128x32xf32>
    %c0_55 = arith.constant 0 : index
    %c0_56 = arith.constant 0 : index
    %56 = vector.load %arg5[%c0_55, %c0_56] : memref<1x32xf32, #tpu.memory_space<vmem>>, vector<1x32xf32>
    %57 = vector.broadcast %56 : vector<1x32xf32> to vector<128x32xf32>
    %58 = arith.addf %55, %57 : vector<128x32xf32>
    %cst_57 = arith.constant 0.000000e+00 : f32
    %59 = vector.broadcast %cst_57 : f32 to vector<128x32xf32>
    %60 = arith.maximumf %58, %59 : vector<128x32xf32>
    %61 = arith.truncf %60 : vector<128x32xf32> to vector<128x32xbf16>
    %c0_58 = arith.constant 0 : index
    %c0_59 = arith.constant 0 : index
    %62 = vector.load %arg6[%c0_58, %c0_59] : memref<32x32xbf16, #tpu.memory_space<vmem>>, vector<32x32xbf16>
    %cst_60 = arith.constant dense<0.000000e+00> : vector<128x32xf32>
    %63 = tpu.matmul %61, %62, %cst_60 {dimension_numbers = #tpu.dot_dimension_numbers<[1], [0], [0], [1], [0, 0, 1, 1], [], []>} : vector<128x32xbf16>, vector<32x32xbf16>, vector<128x32xf32> -> vector<128x32xf32>
    %c0_61 = arith.constant 0 : index
    %c0_62 = arith.constant 0 : index
    %64 = vector.load %arg7[%c0_61, %c0_62] : memref<1x32xf32, #tpu.memory_space<vmem>>, vector<1x32xf32>
    %65 = vector.broadcast %64 : vector<1x32xf32> to vector<128x32xf32>
    %66 = arith.mulf %63, %65 : vector<128x32xf32>
    %c0_63 = arith.constant 0 : index
    %c0_64 = arith.constant 0 : index
    %67 = vector.load %arg8[%c0_63, %c0_64] : memref<1x32xf32, #tpu.memory_space<vmem>>, vector<1x32xf32>
    %68 = vector.broadcast %67 : vector<1x32xf32> to vector<128x32xf32>
    %69 = arith.addf %66, %68 : vector<128x32xf32>
    %c0_65 = arith.constant 0 : index
    %c0_66 = arith.constant 0 : index
    %70 = vector.load %arg2[%c0_65, %c0_66] : memref<128x16xbf16, #tpu.memory_space<vmem>>, vector<128x16xbf16>
    %c0_67 = arith.constant 0 : index
    %c0_68 = arith.constant 0 : index
    %71 = vector.load %arg9[%c0_67, %c0_68] : memref<16x32xbf16, #tpu.memory_space<vmem>>, vector<16x32xbf16>
    %cst_69 = arith.constant dense<0.000000e+00> : vector<128x32xf32>
    %72 = tpu.matmul %70, %71, %cst_69 {dimension_numbers = #tpu.dot_dimension_numbers<[1], [0], [0], [1], [0, 0, 1, 1], [], []>} : vector<128x16xbf16>, vector<16x32xbf16>, vector<128x32xf32> -> vector<128x32xf32>
    %c0_70 = arith.constant 0 : index
    %c0_71 = arith.constant 0 : index
    %73 = vector.load %arg10[%c0_70, %c0_71] : memref<1x32xf32, #tpu.memory_space<vmem>>, vector<1x32xf32>
    %74 = vector.broadcast %73 : vector<1x32xf32> to vector<128x32xf32>
    %75 = arith.mulf %72, %74 : vector<128x32xf32>
    %c0_72 = arith.constant 0 : index
    %c0_73 = arith.constant 0 : index
    %76 = vector.load %arg11[%c0_72, %c0_73] : memref<1x32xf32, #tpu.memory_space<vmem>>, vector<1x32xf32>
    %77 = vector.broadcast %76 : vector<1x32xf32> to vector<128x32xf32>
    %78 = arith.addf %75, %77 : vector<128x32xf32>
    %79 = arith.addf %69, %78 : vector<128x32xf32>
    %cst_74 = arith.constant 0.000000e+00 : f32
    %80 = vector.broadcast %cst_74 : f32 to vector<128x32xf32>
    %81 = arith.maximumf %79, %80 : vector<128x32xf32>
    %c0_75 = arith.constant 0 : index
    %c0_76 = arith.constant 0 : index
    %82 = vector.load %arg12[%c0_75, %c0_76] : memref<128x32xf32, #tpu.memory_space<vmem>>, vector<128x32xf32>
    tpu.vector_store %arg12[%c0_75, %c0_76], %81 {strides = array<i32>} : memref<128x32xf32, #tpu.memory_space<vmem>>, vector<128x32xf32>,
    return
  }
  func.func @transform_0(%arg0: i32) -> (i32, i32, i32) {
    %c0_i32 = arith.constant 0 : i32
    %c0_i32_0 = arith.constant 0 : i32
    %c0_i32_1 = arith.constant 0 : i32
    return %c0_i32, %arg0, %c0_i32_0 : i32, i32, i32
  }
  func.func @transform_1(%arg0: i32) -> (i32, i32) {
    %c0_i32 = arith.constant 0 : i32
    %c0_i32_0 = arith.constant 0 : i32
    return %arg0, %c0_i32 : i32, i32
  }
  func.func @transform_2(%arg0: i32) -> (i32, i32, i32) {
    %c0_i32 = arith.constant 0 : i32
    %c0_i32_0 = arith.constant 0 : i32
    %c0_i32_1 = arith.constant 0 : i32
    %c0_i32_2 = arith.constant 0 : i32
    return %c0_i32, %c0_i32_0, %c0_i32_1 : i32, i32, i32
  }
  func.func @transform_3(%arg0: i32) -> (i32, i32) {
    %c0_i32 = arith.constant 0 : i32
    %c0_i32_0 = arith.constant 0 : i32
    %c0_i32_1 = arith.constant 0 : i32
    return %c0_i32, %c0_i32_0 : i32, i32
  }
  func.func @transform_4(%arg0: i32) -> (i32, i32) {
    %c0_i32 = arith.constant 0 : i32
    %c0_i32_0 = arith.constant 0 : i32
    %c0_i32_1 = arith.constant 0 : i32
    return %c0_i32, %c0_i32_0 : i32, i32
  }
  func.func @transform_5(%arg0: i32) -> (i32, i32) {
    %c0_i32 = arith.constant 0 : i32
    %c0_i32_0 = arith.constant 0 : i32
    %c0_i32_1 = arith.constant 0 : i32
    return %c0_i32, %c0_i32_0 : i32, i32
  }
  func.func @transform_6(%arg0: i32) -> (i32, i32) {
    %c0_i32 = arith.constant 0 : i32
    %c0_i32_0 = arith.constant 0 : i32
    %c0_i32_1 = arith.constant 0 : i32
    return %c0_i32, %c0_i32_0 : i32, i32
  }
  func.func @transform_7(%arg0: i32) -> (i32, i32) {
    %c0_i32 = arith.constant 0 : i32
    %c0_i32_0 = arith.constant 0 : i32
    %c0_i32_1 = arith.constant 0 : i32
    return %c0_i32, %c0_i32_0 : i32, i32
  }
  func.func @transform_8(%arg0: i32) -> (i32, i32) {
    %c0_i32 = arith.constant 0 : i32
    %c0_i32_0 = arith.constant 0 : i32
    %c0_i32_1 = arith.constant 0 : i32
    return %c0_i32, %c0_i32_0 : i32, i32
  }
  func.func @transform_9(%arg0: i32) -> (i32, i32) {
    %c0_i32 = arith.constant 0 : i32
    %c0_i32_0 = arith.constant 0 : i32
    %c0_i32_1 = arith.constant 0 : i32
    return %c0_i32, %c0_i32_0 : i32, i32
  }
  func.func @transform_10(%arg0: i32) -> (i32, i32) {
    %c0_i32 = arith.constant 0 : i32
    %c0_i32_0 = arith.constant 0 : i32
    %c0_i32_1 = arith.constant 0 : i32
    return %c0_i32, %c0_i32_0 : i32, i32
  }
  func.func @transform_11(%arg0: i32) -> (i32, i32) {
    %c0_i32 = arith.constant 0 : i32
    %c0_i32_0 = arith.constant 0 : i32
    return %arg0, %c0_i32 : i32, i32
  }
}

module attributes {stable_mosaic.version = 11 : i64} {
  func.func @_matmul_bn_act_kernel(%arg0: i32, %arg1: memref<128x32xbf16, #tpu.memory_space<vmem>>, %arg2: memref<32x64xbf16, #tpu.memory_space<vmem>>, %arg3: memref<1x64xf32, #tpu.memory_space<vmem>>, %arg4: memref<1x64xf32, #tpu.memory_space<vmem>>, %arg5: memref<128x64xbf16, #tpu.memory_space<vmem>>) attributes {dimension_semantics = [#tpu.dimension_semantics<parallel>], iteration_bounds = array<i64: 1>, scalar_prefetch = 0 : i64, scratch_operands = 0 : i64, tpu.core_type = #tpu.core_type<tc>, window_params = [{transform_indices = @transform_0, window_bounds = array<i64: 128, 32>}, {pipeline_mode = #tpu.pipeline_mode<synchronous>, transform_indices = @transform_1, window_bounds = array<i64: 32, 64>}, {pipeline_mode = #tpu.pipeline_mode<synchronous>, transform_indices = @transform_2, window_bounds = array<i64: 1, 64>}, {pipeline_mode = #tpu.pipeline_mode<synchronous>, transform_indices = @transform_3, window_bounds = array<i64: 1, 64>}, {transform_indices = @transform_4, window_bounds = array<i64: 128, 64>}]} {
    %c0 = arith.constant 0 : index
    %c0_0 = arith.constant 0 : index
    %0 = vector.load %arg1[%c0, %c0_0] : memref<128x32xbf16, #tpu.memory_space<vmem>>, vector<128x32xbf16>
    %c0_1 = arith.constant 0 : index
    %c0_2 = arith.constant 0 : index
    %1 = vector.load %arg2[%c0_1, %c0_2] : memref<32x64xbf16, #tpu.memory_space<vmem>>, vector<32x64xbf16>
    %cst = arith.constant dense<0.000000e+00> : vector<128x64xf32>
    %2 = tpu.matmul %0, %1, %cst {dimension_numbers = #tpu.dot_dimension_numbers<[1], [0], [0], [1], [0, 0, 1, 1], [], []>} : vector<128x32xbf16>, vector<32x64xbf16>, vector<128x64xf32> -> vector<128x64xf32>
    %c0_3 = arith.constant 0 : index
    %c0_4 = arith.constant 0 : index
    %3 = vector.load %arg3[%c0_3, %c0_4] : memref<1x64xf32, #tpu.memory_space<vmem>>, vector<1x64xf32>
    %4 = vector.broadcast %3 : vector<1x64xf32> to vector<128x64xf32>
    %5 = arith.mulf %2, %4 : vector<128x64xf32>
    %c0_5 = arith.constant 0 : index
    %c0_6 = arith.constant 0 : index
    %6 = vector.load %arg4[%c0_5, %c0_6] : memref<1x64xf32, #tpu.memory_space<vmem>>, vector<1x64xf32>
    %7 = vector.broadcast %6 : vector<1x64xf32> to vector<128x64xf32>
    %8 = arith.addf %5, %7 : vector<128x64xf32>
    %cst_7 = arith.constant 0.000000e+00 : f32
    %9 = vector.broadcast %cst_7 : f32 to vector<128x64xf32>
    %10 = arith.maximumf %8, %9 : vector<128x64xf32>
    %11 = arith.truncf %10 : vector<128x64xf32> to vector<128x64xbf16>
    %c0_8 = arith.constant 0 : index
    %c0_9 = arith.constant 0 : index
    %12 = vector.load %arg5[%c0_8, %c0_9] : memref<128x64xbf16, #tpu.memory_space<vmem>>, vector<128x64xbf16>
    tpu.vector_store %arg5[%c0_8, %c0_9], %11 {strides = array<i32>} : memref<128x64xbf16, #tpu.memory_space<vmem>>, vector<128x64xbf16>,
    return
  }
  func.func @transform_0(%arg0: i32) -> (i32, i32) {
    %c0_i32 = arith.constant 0 : i32
    %c0_i32_0 = arith.constant 0 : i32
    return %arg0, %c0_i32 : i32, i32
  }
  func.func @transform_1(%arg0: i32) -> (i32, i32) {
    %c0_i32 = arith.constant 0 : i32
    %c0_i32_0 = arith.constant 0 : i32
    %c0_i32_1 = arith.constant 0 : i32
    return %c0_i32, %c0_i32_0 : i32, i32
  }
  func.func @transform_2(%arg0: i32) -> (i32, i32) {
    %c0_i32 = arith.constant 0 : i32
    %c0_i32_0 = arith.constant 0 : i32
    %c0_i32_1 = arith.constant 0 : i32
    return %c0_i32, %c0_i32_0 : i32, i32
  }
  func.func @transform_3(%arg0: i32) -> (i32, i32) {
    %c0_i32 = arith.constant 0 : i32
    %c0_i32_0 = arith.constant 0 : i32
    %c0_i32_1 = arith.constant 0 : i32
    return %c0_i32, %c0_i32_0 : i32, i32
  }
  func.func @transform_4(%arg0: i32) -> (i32, i32) {
    %c0_i32 = arith.constant 0 : i32
    %c0_i32_0 = arith.constant 0 : i32
    return %arg0, %c0_i32 : i32, i32
  }
}

module attributes {stable_mosaic.version = 11 : i64} {
  func.func @_bottleneck_tail_kernel(%arg0: i32, %arg1: memref<9x32x64xbf16, #tpu.memory_space<vmem>>, %arg2: memref<32x32xbf16, #tpu.memory_space<vmem>>, %arg3: memref<9x64x64xbf16, #tpu.memory_space<vmem>>, %arg4: memref<1x64xf32, #tpu.memory_space<vmem>>, %arg5: memref<1x64xf32, #tpu.memory_space<vmem>>, %arg6: memref<64x64xbf16, #tpu.memory_space<vmem>>, %arg7: memref<1x64xf32, #tpu.memory_space<vmem>>, %arg8: memref<1x64xf32, #tpu.memory_space<vmem>>, %arg9: memref<32x64xbf16, #tpu.memory_space<vmem>>, %arg10: memref<1x64xf32, #tpu.memory_space<vmem>>, %arg11: memref<1x64xf32, #tpu.memory_space<vmem>>, %arg12: memref<32x64xf32, #tpu.memory_space<vmem>>) attributes {dimension_semantics = [#tpu.dimension_semantics<parallel>], iteration_bounds = array<i64: 1>, scalar_prefetch = 0 : i64, scratch_operands = 0 : i64, tpu.core_type = #tpu.core_type<tc>, window_params = [{transform_indices = @transform_0, window_bounds = array<i64: 9, 32, 64>}, {transform_indices = @transform_1, window_bounds = array<i64: 32, 32>}, {pipeline_mode = #tpu.pipeline_mode<synchronous>, transform_indices = @transform_2, window_bounds = array<i64: 9, 64, 64>}, {pipeline_mode = #tpu.pipeline_mode<synchronous>, transform_indices = @transform_3, window_bounds = array<i64: 1, 64>}, {pipeline_mode = #tpu.pipeline_mode<synchronous>, transform_indices = @transform_4, window_bounds = array<i64: 1, 64>}, {pipeline_mode = #tpu.pipeline_mode<synchronous>, transform_indices = @transform_5, window_bounds = array<i64: 64, 64>}, {pipeline_mode = #tpu.pipeline_mode<synchronous>, transform_indices = @transform_6, window_bounds = array<i64: 1, 64>}, {pipeline_mode = #tpu.pipeline_mode<synchronous>, transform_indices = @transform_7, window_bounds = array<i64: 1, 64>}, {pipeline_mode = #tpu.pipeline_mode<synchronous>, transform_indices = @transform_8, window_bounds = array<i64: 32, 64>}, {pipeline_mode = #tpu.pipeline_mode<synchronous>, transform_indices = @transform_9, window_bounds = array<i64: 1, 64>}, {pipeline_mode = #tpu.pipeline_mode<synchronous>, transform_indices = @transform_10, window_bounds = array<i64: 1, 64>}, {transform_indices = @transform_11, window_bounds = array<i64: 32, 64>}]} {
    %c0 = arith.constant 0 : index
    %c0_0 = arith.constant 0 : index
    %c0_1 = arith.constant 0 : index
    %0 = vector.load %arg1[%c0, %c0_0, %c0_1] : memref<9x32x64xbf16, #tpu.memory_space<vmem>>, vector<1x32x64xbf16>
    %1 = vector.shape_cast %0 : vector<1x32x64xbf16> to vector<32x64xbf16>
    %c0_2 = arith.constant 0 : index
    %c0_3 = arith.constant 0 : index
    %c0_4 = arith.constant 0 : index
    %2 = vector.load %arg3[%c0_2, %c0_3, %c0_4] : memref<9x64x64xbf16, #tpu.memory_space<vmem>>, vector<1x64x64xbf16>
    %3 = vector.shape_cast %2 : vector<1x64x64xbf16> to vector<64x64xbf16>
    %cst = arith.constant dense<0.000000e+00> : vector<32x64xf32>
    %4 = tpu.matmul %1, %3, %cst {dimension_numbers = #tpu.dot_dimension_numbers<[1], [0], [0], [1], [0, 0, 1, 1], [], []>} : vector<32x64xbf16>, vector<64x64xbf16>, vector<32x64xf32> -> vector<32x64xf32>
    %c1 = arith.constant 1 : index
    %c0_5 = arith.constant 0 : index
    %c0_6 = arith.constant 0 : index
    %5 = vector.load %arg1[%c1, %c0_5, %c0_6] : memref<9x32x64xbf16, #tpu.memory_space<vmem>>, vector<1x32x64xbf16>
    %6 = vector.shape_cast %5 : vector<1x32x64xbf16> to vector<32x64xbf16>
    %c1_7 = arith.constant 1 : index
    %c0_8 = arith.constant 0 : index
    %c0_9 = arith.constant 0 : index
    %7 = vector.load %arg3[%c1_7, %c0_8, %c0_9] : memref<9x64x64xbf16, #tpu.memory_space<vmem>>, vector<1x64x64xbf16>
    %8 = vector.shape_cast %7 : vector<1x64x64xbf16> to vector<64x64xbf16>
    %cst_10 = arith.constant dense<0.000000e+00> : vector<32x64xf32>
    %9 = tpu.matmul %6, %8, %cst_10 {dimension_numbers = #tpu.dot_dimension_numbers<[1], [0], [0], [1], [0, 0, 1, 1], [], []>} : vector<32x64xbf16>, vector<64x64xbf16>, vector<32x64xf32> -> vector<32x64xf32>
    %10 = arith.addf %4, %9 : vector<32x64xf32>
    %c2 = arith.constant 2 : index
    %c0_11 = arith.constant 0 : index
    %c0_12 = arith.constant 0 : index
    %11 = vector.load %arg1[%c2, %c0_11, %c0_12] : memref<9x32x64xbf16, #tpu.memory_space<vmem>>, vector<1x32x64xbf16>
    %12 = vector.shape_cast %11 : vector<1x32x64xbf16> to vector<32x64xbf16>
    %c2_13 = arith.constant 2 : index
    %c0_14 = arith.constant 0 : index
    %c0_15 = arith.constant 0 : index
    %13 = vector.load %arg3[%c2_13, %c0_14, %c0_15] : memref<9x64x64xbf16, #tpu.memory_space<vmem>>, vector<1x64x64xbf16>
    %14 = vector.shape_cast %13 : vector<1x64x64xbf16> to vector<64x64xbf16>
    %cst_16 = arith.constant dense<0.000000e+00> : vector<32x64xf32>
    %15 = tpu.matmul %12, %14, %cst_16 {dimension_numbers = #tpu.dot_dimension_numbers<[1], [0], [0], [1], [0, 0, 1, 1], [], []>} : vector<32x64xbf16>, vector<64x64xbf16>, vector<32x64xf32> -> vector<32x64xf32>
    %16 = arith.addf %10, %15 : vector<32x64xf32>
    %c3 = arith.constant 3 : index
    %c0_17 = arith.constant 0 : index
    %c0_18 = arith.constant 0 : index
    %17 = vector.load %arg1[%c3, %c0_17, %c0_18] : memref<9x32x64xbf16, #tpu.memory_space<vmem>>, vector<1x32x64xbf16>
    %18 = vector.shape_cast %17 : vector<1x32x64xbf16> to vector<32x64xbf16>
    %c3_19 = arith.constant 3 : index
    %c0_20 = arith.constant 0 : index
    %c0_21 = arith.constant 0 : index
    %19 = vector.load %arg3[%c3_19, %c0_20, %c0_21] : memref<9x64x64xbf16, #tpu.memory_space<vmem>>, vector<1x64x64xbf16>
    %20 = vector.shape_cast %19 : vector<1x64x64xbf16> to vector<64x64xbf16>
    %cst_22 = arith.constant dense<0.000000e+00> : vector<32x64xf32>
    %21 = tpu.matmul %18, %20, %cst_22 {dimension_numbers = #tpu.dot_dimension_numbers<[1], [0], [0], [1], [0, 0, 1, 1], [], []>} : vector<32x64xbf16>, vector<64x64xbf16>, vector<32x64xf32> -> vector<32x64xf32>
    %22 = arith.addf %16, %21 : vector<32x64xf32>
    %c4 = arith.constant 4 : index
    %c0_23 = arith.constant 0 : index
    %c0_24 = arith.constant 0 : index
    %23 = vector.load %arg1[%c4, %c0_23, %c0_24] : memref<9x32x64xbf16, #tpu.memory_space<vmem>>, vector<1x32x64xbf16>
    %24 = vector.shape_cast %23 : vector<1x32x64xbf16> to vector<32x64xbf16>
    %c4_25 = arith.constant 4 : index
    %c0_26 = arith.constant 0 : index
    %c0_27 = arith.constant 0 : index
    %25 = vector.load %arg3[%c4_25, %c0_26, %c0_27] : memref<9x64x64xbf16, #tpu.memory_space<vmem>>, vector<1x64x64xbf16>
    %26 = vector.shape_cast %25 : vector<1x64x64xbf16> to vector<64x64xbf16>
    %cst_28 = arith.constant dense<0.000000e+00> : vector<32x64xf32>
    %27 = tpu.matmul %24, %26, %cst_28 {dimension_numbers = #tpu.dot_dimension_numbers<[1], [0], [0], [1], [0, 0, 1, 1], [], []>} : vector<32x64xbf16>, vector<64x64xbf16>, vector<32x64xf32> -> vector<32x64xf32>
    %28 = arith.addf %22, %27 : vector<32x64xf32>
    %c5 = arith.constant 5 : index
    %c0_29 = arith.constant 0 : index
    %c0_30 = arith.constant 0 : index
    %29 = vector.load %arg1[%c5, %c0_29, %c0_30] : memref<9x32x64xbf16, #tpu.memory_space<vmem>>, vector<1x32x64xbf16>
    %30 = vector.shape_cast %29 : vector<1x32x64xbf16> to vector<32x64xbf16>
    %c5_31 = arith.constant 5 : index
    %c0_32 = arith.constant 0 : index
    %c0_33 = arith.constant 0 : index
    %31 = vector.load %arg3[%c5_31, %c0_32, %c0_33] : memref<9x64x64xbf16, #tpu.memory_space<vmem>>, vector<1x64x64xbf16>
    %32 = vector.shape_cast %31 : vector<1x64x64xbf16> to vector<64x64xbf16>
    %cst_34 = arith.constant dense<0.000000e+00> : vector<32x64xf32>
    %33 = tpu.matmul %30, %32, %cst_34 {dimension_numbers = #tpu.dot_dimension_numbers<[1], [0], [0], [1], [0, 0, 1, 1], [], []>} : vector<32x64xbf16>, vector<64x64xbf16>, vector<32x64xf32> -> vector<32x64xf32>
    %34 = arith.addf %28, %33 : vector<32x64xf32>
    %c6 = arith.constant 6 : index
    %c0_35 = arith.constant 0 : index
    %c0_36 = arith.constant 0 : index
    %35 = vector.load %arg1[%c6, %c0_35, %c0_36] : memref<9x32x64xbf16, #tpu.memory_space<vmem>>, vector<1x32x64xbf16>
    %36 = vector.shape_cast %35 : vector<1x32x64xbf16> to vector<32x64xbf16>
    %c6_37 = arith.constant 6 : index
    %c0_38 = arith.constant 0 : index
    %c0_39 = arith.constant 0 : index
    %37 = vector.load %arg3[%c6_37, %c0_38, %c0_39] : memref<9x64x64xbf16, #tpu.memory_space<vmem>>, vector<1x64x64xbf16>
    %38 = vector.shape_cast %37 : vector<1x64x64xbf16> to vector<64x64xbf16>
    %cst_40 = arith.constant dense<0.000000e+00> : vector<32x64xf32>
    %39 = tpu.matmul %36, %38, %cst_40 {dimension_numbers = #tpu.dot_dimension_numbers<[1], [0], [0], [1], [0, 0, 1, 1], [], []>} : vector<32x64xbf16>, vector<64x64xbf16>, vector<32x64xf32> -> vector<32x64xf32>
    %40 = arith.addf %34, %39 : vector<32x64xf32>
    %c7 = arith.constant 7 : index
    %c0_41 = arith.constant 0 : index
    %c0_42 = arith.constant 0 : index
    %41 = vector.load %arg1[%c7, %c0_41, %c0_42] : memref<9x32x64xbf16, #tpu.memory_space<vmem>>, vector<1x32x64xbf16>
    %42 = vector.shape_cast %41 : vector<1x32x64xbf16> to vector<32x64xbf16>
    %c7_43 = arith.constant 7 : index
    %c0_44 = arith.constant 0 : index
    %c0_45 = arith.constant 0 : index
    %43 = vector.load %arg3[%c7_43, %c0_44, %c0_45] : memref<9x64x64xbf16, #tpu.memory_space<vmem>>, vector<1x64x64xbf16>
    %44 = vector.shape_cast %43 : vector<1x64x64xbf16> to vector<64x64xbf16>
    %cst_46 = arith.constant dense<0.000000e+00> : vector<32x64xf32>
    %45 = tpu.matmul %42, %44, %cst_46 {dimension_numbers = #tpu.dot_dimension_numbers<[1], [0], [0], [1], [0, 0, 1, 1], [], []>} : vector<32x64xbf16>, vector<64x64xbf16>, vector<32x64xf32> -> vector<32x64xf32>
    %46 = arith.addf %40, %45 : vector<32x64xf32>
    %c8 = arith.constant 8 : index
    %c0_47 = arith.constant 0 : index
    %c0_48 = arith.constant 0 : index
    %47 = vector.load %arg1[%c8, %c0_47, %c0_48] : memref<9x32x64xbf16, #tpu.memory_space<vmem>>, vector<1x32x64xbf16>
    %48 = vector.shape_cast %47 : vector<1x32x64xbf16> to vector<32x64xbf16>
    %c8_49 = arith.constant 8 : index
    %c0_50 = arith.constant 0 : index
    %c0_51 = arith.constant 0 : index
    %49 = vector.load %arg3[%c8_49, %c0_50, %c0_51] : memref<9x64x64xbf16, #tpu.memory_space<vmem>>, vector<1x64x64xbf16>
    %50 = vector.shape_cast %49 : vector<1x64x64xbf16> to vector<64x64xbf16>
    %cst_52 = arith.constant dense<0.000000e+00> : vector<32x64xf32>
    %51 = tpu.matmul %48, %50, %cst_52 {dimension_numbers = #tpu.dot_dimension_numbers<[1], [0], [0], [1], [0, 0, 1, 1], [], []>} : vector<32x64xbf16>, vector<64x64xbf16>, vector<32x64xf32> -> vector<32x64xf32>
    %52 = arith.addf %46, %51 : vector<32x64xf32>
    %c0_53 = arith.constant 0 : index
    %c0_54 = arith.constant 0 : index
    %53 = vector.load %arg4[%c0_53, %c0_54] : memref<1x64xf32, #tpu.memory_space<vmem>>, vector<1x64xf32>
    %54 = vector.broadcast %53 : vector<1x64xf32> to vector<32x64xf32>
    %55 = arith.mulf %52, %54 : vector<32x64xf32>
    %c0_55 = arith.constant 0 : index
    %c0_56 = arith.constant 0 : index
    %56 = vector.load %arg5[%c0_55, %c0_56] : memref<1x64xf32, #tpu.memory_space<vmem>>, vector<1x64xf32>
    %57 = vector.broadcast %56 : vector<1x64xf32> to vector<32x64xf32>
    %58 = arith.addf %55, %57 : vector<32x64xf32>
    %cst_57 = arith.constant 0.000000e+00 : f32
    %59 = vector.broadcast %cst_57 : f32 to vector<32x64xf32>
    %60 = arith.maximumf %58, %59 : vector<32x64xf32>
    %61 = arith.truncf %60 : vector<32x64xf32> to vector<32x64xbf16>
    %c0_58 = arith.constant 0 : index
    %c0_59 = arith.constant 0 : index
    %62 = vector.load %arg6[%c0_58, %c0_59] : memref<64x64xbf16, #tpu.memory_space<vmem>>, vector<64x64xbf16>
    %cst_60 = arith.constant dense<0.000000e+00> : vector<32x64xf32>
    %63 = tpu.matmul %61, %62, %cst_60 {dimension_numbers = #tpu.dot_dimension_numbers<[1], [0], [0], [1], [0, 0, 1, 1], [], []>} : vector<32x64xbf16>, vector<64x64xbf16>, vector<32x64xf32> -> vector<32x64xf32>
    %c0_61 = arith.constant 0 : index
    %c0_62 = arith.constant 0 : index
    %64 = vector.load %arg7[%c0_61, %c0_62] : memref<1x64xf32, #tpu.memory_space<vmem>>, vector<1x64xf32>
    %65 = vector.broadcast %64 : vector<1x64xf32> to vector<32x64xf32>
    %66 = arith.mulf %63, %65 : vector<32x64xf32>
    %c0_63 = arith.constant 0 : index
    %c0_64 = arith.constant 0 : index
    %67 = vector.load %arg8[%c0_63, %c0_64] : memref<1x64xf32, #tpu.memory_space<vmem>>, vector<1x64xf32>
    %68 = vector.broadcast %67 : vector<1x64xf32> to vector<32x64xf32>
    %69 = arith.addf %66, %68 : vector<32x64xf32>
    %c0_65 = arith.constant 0 : index
    %c0_66 = arith.constant 0 : index
    %70 = vector.load %arg2[%c0_65, %c0_66] : memref<32x32xbf16, #tpu.memory_space<vmem>>, vector<32x32xbf16>
    %c0_67 = arith.constant 0 : index
    %c0_68 = arith.constant 0 : index
    %71 = vector.load %arg9[%c0_67, %c0_68] : memref<32x64xbf16, #tpu.memory_space<vmem>>, vector<32x64xbf16>
    %cst_69 = arith.constant dense<0.000000e+00> : vector<32x64xf32>
    %72 = tpu.matmul %70, %71, %cst_69 {dimension_numbers = #tpu.dot_dimension_numbers<[1], [0], [0], [1], [0, 0, 1, 1], [], []>} : vector<32x32xbf16>, vector<32x64xbf16>, vector<32x64xf32> -> vector<32x64xf32>
    %c0_70 = arith.constant 0 : index
    %c0_71 = arith.constant 0 : index
    %73 = vector.load %arg10[%c0_70, %c0_71] : memref<1x64xf32, #tpu.memory_space<vmem>>, vector<1x64xf32>
    %74 = vector.broadcast %73 : vector<1x64xf32> to vector<32x64xf32>
    %75 = arith.mulf %72, %74 : vector<32x64xf32>
    %c0_72 = arith.constant 0 : index
    %c0_73 = arith.constant 0 : index
    %76 = vector.load %arg11[%c0_72, %c0_73] : memref<1x64xf32, #tpu.memory_space<vmem>>, vector<1x64xf32>
    %77 = vector.broadcast %76 : vector<1x64xf32> to vector<32x64xf32>
    %78 = arith.addf %75, %77 : vector<32x64xf32>
    %79 = arith.addf %69, %78 : vector<32x64xf32>
    %cst_74 = arith.constant 0.000000e+00 : f32
    %80 = vector.broadcast %cst_74 : f32 to vector<32x64xf32>
    %81 = arith.maximumf %79, %80 : vector<32x64xf32>
    %c0_75 = arith.constant 0 : index
    %c0_76 = arith.constant 0 : index
    %82 = vector.load %arg12[%c0_75, %c0_76] : memref<32x64xf32, #tpu.memory_space<vmem>>, vector<32x64xf32>
    tpu.vector_store %arg12[%c0_75, %c0_76], %81 {strides = array<i32>} : memref<32x64xf32, #tpu.memory_space<vmem>>, vector<32x64xf32>,
    return
  }
  func.func @transform_0(%arg0: i32) -> (i32, i32, i32) {
    %c0_i32 = arith.constant 0 : i32
    %c0_i32_0 = arith.constant 0 : i32
    %c0_i32_1 = arith.constant 0 : i32
    return %c0_i32, %arg0, %c0_i32_0 : i32, i32, i32
  }
  func.func @transform_1(%arg0: i32) -> (i32, i32) {
    %c0_i32 = arith.constant 0 : i32
    %c0_i32_0 = arith.constant 0 : i32
    return %arg0, %c0_i32 : i32, i32
  }
  func.func @transform_2(%arg0: i32) -> (i32, i32, i32) {
    %c0_i32 = arith.constant 0 : i32
    %c0_i32_0 = arith.constant 0 : i32
    %c0_i32_1 = arith.constant 0 : i32
    %c0_i32_2 = arith.constant 0 : i32
    return %c0_i32, %c0_i32_0, %c0_i32_1 : i32, i32, i32
  }
  func.func @transform_3(%arg0: i32) -> (i32, i32) {
    %c0_i32 = arith.constant 0 : i32
    %c0_i32_0 = arith.constant 0 : i32
    %c0_i32_1 = arith.constant 0 : i32
    return %c0_i32, %c0_i32_0 : i32, i32
  }
  func.func @transform_4(%arg0: i32) -> (i32, i32) {
    %c0_i32 = arith.constant 0 : i32
    %c0_i32_0 = arith.constant 0 : i32
    %c0_i32_1 = arith.constant 0 : i32
    return %c0_i32, %c0_i32_0 : i32, i32
  }
  func.func @transform_5(%arg0: i32) -> (i32, i32) {
    %c0_i32 = arith.constant 0 : i32
    %c0_i32_0 = arith.constant 0 : i32
    %c0_i32_1 = arith.constant 0 : i32
    return %c0_i32, %c0_i32_0 : i32, i32
  }
  func.func @transform_6(%arg0: i32) -> (i32, i32) {
    %c0_i32 = arith.constant 0 : i32
    %c0_i32_0 = arith.constant 0 : i32
    %c0_i32_1 = arith.constant 0 : i32
    return %c0_i32, %c0_i32_0 : i32, i32
  }
  func.func @transform_7(%arg0: i32) -> (i32, i32) {
    %c0_i32 = arith.constant 0 : i32
    %c0_i32_0 = arith.constant 0 : i32
    %c0_i32_1 = arith.constant 0 : i32
    return %c0_i32, %c0_i32_0 : i32, i32
  }
  func.func @transform_8(%arg0: i32) -> (i32, i32) {
    %c0_i32 = arith.constant 0 : i32
    %c0_i32_0 = arith.constant 0 : i32
    %c0_i32_1 = arith.constant 0 : i32
    return %c0_i32, %c0_i32_0 : i32, i32
  }
  func.func @transform_9(%arg0: i32) -> (i32, i32) {
    %c0_i32 = arith.constant 0 : i32
    %c0_i32_0 = arith.constant 0 : i32
    %c0_i32_1 = arith.constant 0 : i32
    return %c0_i32, %c0_i32_0 : i32, i32
  }
  func.func @transform_10(%arg0: i32) -> (i32, i32) {
    %c0_i32 = arith.constant 0 : i32
    %c0_i32_0 = arith.constant 0 : i32
    %c0_i32_1 = arith.constant 0 : i32
    return %c0_i32, %c0_i32_0 : i32, i32
  }
  func.func @transform_11(%arg0: i32) -> (i32, i32) {
    %c0_i32 = arith.constant 0 : i32
    %c0_i32_0 = arith.constant 0 : i32
    return %arg0, %c0_i32 : i32, i32
  }
}

module attributes {stable_mosaic.version = 11 : i64} {
  func.func @_matmul_bn_act_kernel(%arg0: i32, %arg1: memref<32x64xbf16, #tpu.memory_space<vmem>>, %arg2: memref<64x128xbf16, #tpu.memory_space<vmem>>, %arg3: memref<1x128xf32, #tpu.memory_space<vmem>>, %arg4: memref<1x128xf32, #tpu.memory_space<vmem>>, %arg5: memref<32x128xbf16, #tpu.memory_space<vmem>>) attributes {dimension_semantics = [#tpu.dimension_semantics<parallel>], iteration_bounds = array<i64: 1>, scalar_prefetch = 0 : i64, scratch_operands = 0 : i64, tpu.core_type = #tpu.core_type<tc>, window_params = [{transform_indices = @transform_0, window_bounds = array<i64: 32, 64>}, {pipeline_mode = #tpu.pipeline_mode<synchronous>, transform_indices = @transform_1, window_bounds = array<i64: 64, 128>}, {pipeline_mode = #tpu.pipeline_mode<synchronous>, transform_indices = @transform_2, window_bounds = array<i64: 1, 128>}, {pipeline_mode = #tpu.pipeline_mode<synchronous>, transform_indices = @transform_3, window_bounds = array<i64: 1, 128>}, {transform_indices = @transform_4, window_bounds = array<i64: 32, 128>}]} {
    %c0 = arith.constant 0 : index
    %c0_0 = arith.constant 0 : index
    %0 = vector.load %arg1[%c0, %c0_0] : memref<32x64xbf16, #tpu.memory_space<vmem>>, vector<32x64xbf16>
    %c0_1 = arith.constant 0 : index
    %c0_2 = arith.constant 0 : index
    %1 = vector.load %arg2[%c0_1, %c0_2] : memref<64x128xbf16, #tpu.memory_space<vmem>>, vector<64x128xbf16>
    %cst = arith.constant dense<0.000000e+00> : vector<32x128xf32>
    %2 = tpu.matmul %0, %1, %cst {dimension_numbers = #tpu.dot_dimension_numbers<[1], [0], [0], [1], [0, 0, 1, 1], [], []>} : vector<32x64xbf16>, vector<64x128xbf16>, vector<32x128xf32> -> vector<32x128xf32>
    %c0_3 = arith.constant 0 : index
    %c0_4 = arith.constant 0 : index
    %3 = vector.load %arg3[%c0_3, %c0_4] : memref<1x128xf32, #tpu.memory_space<vmem>>, vector<1x128xf32>
    %4 = vector.broadcast %3 : vector<1x128xf32> to vector<32x128xf32>
    %5 = arith.mulf %2, %4 : vector<32x128xf32>
    %c0_5 = arith.constant 0 : index
    %c0_6 = arith.constant 0 : index
    %6 = vector.load %arg4[%c0_5, %c0_6] : memref<1x128xf32, #tpu.memory_space<vmem>>, vector<1x128xf32>
    %7 = vector.broadcast %6 : vector<1x128xf32> to vector<32x128xf32>
    %8 = arith.addf %5, %7 : vector<32x128xf32>
    %cst_7 = arith.constant 0.000000e+00 : f32
    %9 = vector.broadcast %cst_7 : f32 to vector<32x128xf32>
    %10 = arith.maximumf %8, %9 : vector<32x128xf32>
    %11 = arith.truncf %10 : vector<32x128xf32> to vector<32x128xbf16>
    %c0_8 = arith.constant 0 : index
    %c0_9 = arith.constant 0 : index
    %12 = vector.load %arg5[%c0_8, %c0_9] : memref<32x128xbf16, #tpu.memory_space<vmem>>, vector<32x128xbf16>
    tpu.vector_store %arg5[%c0_8, %c0_9], %11 {strides = array<i32>} : memref<32x128xbf16, #tpu.memory_space<vmem>>, vector<32x128xbf16>,
    return
  }
  func.func @transform_0(%arg0: i32) -> (i32, i32) {
    %c0_i32 = arith.constant 0 : i32
    %c0_i32_0 = arith.constant 0 : i32
    return %arg0, %c0_i32 : i32, i32
  }
  func.func @transform_1(%arg0: i32) -> (i32, i32) {
    %c0_i32 = arith.constant 0 : i32
    %c0_i32_0 = arith.constant 0 : i32
    %c0_i32_1 = arith.constant 0 : i32
    return %c0_i32, %c0_i32_0 : i32, i32
  }
  func.func @transform_2(%arg0: i32) -> (i32, i32) {
    %c0_i32 = arith.constant 0 : i32
    %c0_i32_0 = arith.constant 0 : i32
    %c0_i32_1 = arith.constant 0 : i32
    return %c0_i32, %c0_i32_0 : i32, i32
  }
  func.func @transform_3(%arg0: i32) -> (i32, i32) {
    %c0_i32 = arith.constant 0 : i32
    %c0_i32_0 = arith.constant 0 : i32
    %c0_i32_1 = arith.constant 0 : i32
    return %c0_i32, %c0_i32_0 : i32, i32
  }
  func.func @transform_4(%arg0: i32) -> (i32, i32) {
    %c0_i32 = arith.constant 0 : i32
    %c0_i32_0 = arith.constant 0 : i32
    return %arg0, %c0_i32 : i32, i32
  }
}

module attributes {stable_mosaic.version = 11 : i64} {
  func.func @_vit_block_kernel(%arg0: i32, %arg1: i32, %arg2: memref<1x4x128xbf16, #tpu.memory_space<vmem>>, %arg3: memref<128x128xbf16, #tpu.memory_space<vmem>>, %arg4: memref<1x128xf32, #tpu.memory_space<vmem>>, %arg5: memref<4x128xf32, #tpu.memory_space<vmem>>, %arg6: memref<1x4x128x32xbf16, #tpu.memory_space<vmem>>, %arg7: memref<1x4x1x32xf32, #tpu.memory_space<vmem>>, %arg8: memref<1x4x128x32xbf16, #tpu.memory_space<vmem>>, %arg9: memref<1x4x1x32xf32, #tpu.memory_space<vmem>>, %arg10: memref<1x4x128x32xbf16, #tpu.memory_space<vmem>>, %arg11: memref<1x4x1x32xf32, #tpu.memory_space<vmem>>, %arg12: memref<1x4x32x128xbf16, #tpu.memory_space<vmem>>, %arg13: memref<1x1x128xf32, #tpu.memory_space<vmem>>, %arg14: memref<1x1x128xf32, #tpu.memory_space<vmem>>, %arg15: memref<1x1x128xf32, #tpu.memory_space<vmem>>, %arg16: memref<1x1x128xf32, #tpu.memory_space<vmem>>, %arg17: memref<1x1x128xf32, #tpu.memory_space<vmem>>, %arg18: memref<1x128x128xbf16, #tpu.memory_space<vmem>>, %arg19: memref<1x1x128xf32, #tpu.memory_space<vmem>>, %arg20: memref<1x128x128xbf16, #tpu.memory_space<vmem>>, %arg21: memref<1x1x128xf32, #tpu.memory_space<vmem>>, %arg22: memref<1x4x128xbf16, #tpu.memory_space<vmem>>, %arg23: memref<4x128xf32, #tpu.memory_space<vmem>>) attributes {dimension_semantics = [#tpu.dimension_semantics<parallel>, #tpu.dimension_semantics<arbitrary>], iteration_bounds = array<i64: 2, 2>, scalar_prefetch = 0 : i64, scratch_operands = 1 : i64, tpu.core_type = #tpu.core_type<tc>, window_params = [{transform_indices = @transform_0, window_bounds = array<i64: 1, 4, 128>}, {pipeline_mode = #tpu.pipeline_mode<synchronous>, transform_indices = @transform_1, window_bounds = array<i64: 128, 128>}, {pipeline_mode = #tpu.pipeline_mode<synchronous>, transform_indices = @transform_2, window_bounds = array<i64: 1, 128>}, {pipeline_mode = #tpu.pipeline_mode<synchronous>, transform_indices = @transform_3, window_bounds = array<i64: 4, 128>}, {transform_indices = @transform_4, window_bounds = array<i64: 1, 4, 128, 32>}, {transform_indices = @transform_5, window_bounds = array<i64: 1, 4, 1, 32>}, {transform_indices = @transform_6, window_bounds = array<i64: 1, 4, 128, 32>}, {transform_indices = @transform_7, window_bounds = array<i64: 1, 4, 1, 32>}, {transform_indices = @transform_8, window_bounds = array<i64: 1, 4, 128, 32>}, {transform_indices = @transform_9, window_bounds = array<i64: 1, 4, 1, 32>}, {transform_indices = @transform_10, window_bounds = array<i64: 1, 4, 32, 128>}, {transform_indices = @transform_11, window_bounds = array<i64: 1, 1, 128>}, {transform_indices = @transform_12, window_bounds = array<i64: 1, 1, 128>}, {transform_indices = @transform_13, window_bounds = array<i64: 1, 1, 128>}, {transform_indices = @transform_14, window_bounds = array<i64: 1, 1, 128>}, {transform_indices = @transform_15, window_bounds = array<i64: 1, 1, 128>}, {transform_indices = @transform_16, window_bounds = array<i64: 1, 128, 128>}, {transform_indices = @transform_17, window_bounds = array<i64: 1, 1, 128>}, {transform_indices = @transform_18, window_bounds = array<i64: 1, 128, 128>}, {transform_indices = @transform_19, window_bounds = array<i64: 1, 1, 128>}, {transform_indices = @transform_20, window_bounds = array<i64: 1, 4, 128>}]} {
    %c0_i32 = arith.constant 0 : i32
    %0 = arith.cmpi eq, %arg1, %c0_i32 : i32
    %1 = arith.extui %0 : i1 to i32
    %c0_i32_0 = arith.constant 0 : i32
    %2 = arith.cmpi ne, %1, %c0_i32_0 : i32
    scf.if %2 {
      %c0_87 = arith.constant 0 : index
      %c0_88 = arith.constant 0 : index
      %c0_89 = arith.constant 0 : index
      %140 = vector.load %arg2[%c0_87, %c0_88, %c0_89] : memref<1x4x128xbf16, #tpu.memory_space<vmem>>, vector<1x4x128xbf16>
      %141 = vector.shape_cast %140 : vector<1x4x128xbf16> to vector<4x128xbf16>
      %c0_90 = arith.constant 0 : index
      %c0_91 = arith.constant 0 : index
      %142 = vector.load %arg3[%c0_90, %c0_91] : memref<128x128xbf16, #tpu.memory_space<vmem>>, vector<128x128xbf16>
      %cst_92 = arith.constant dense<0.000000e+00> : vector<4x128xf32>
      %143 = tpu.matmul %141, %142, %cst_92 {dimension_numbers = #tpu.dot_dimension_numbers<[1], [0], [0], [1], [0, 0, 1, 1], [], []>} : vector<4x128xbf16>, vector<128x128xbf16>, vector<4x128xf32> -> vector<4x128xf32>
      %c0_93 = arith.constant 0 : index
      %c0_94 = arith.constant 0 : index
      %144 = vector.load %arg4[%c0_93, %c0_94] : memref<1x128xf32, #tpu.memory_space<vmem>>, vector<1x128xf32>
      %145 = vector.broadcast %144 : vector<1x128xf32> to vector<4x128xf32>
      %146 = arith.addf %143, %145 : vector<4x128xf32>
      %c0_95 = arith.constant 0 : index
      %c0_96 = arith.constant 0 : index
      %147 = vector.load %arg5[%c0_95, %c0_96] : memref<4x128xf32, #tpu.memory_space<vmem>>, vector<4x128xf32>
      %148 = arith.addf %146, %147 : vector<4x128xf32>
      %c0_97 = arith.constant 0 : index
      %c0_98 = arith.constant 0 : index
      %149 = vector.load %arg23[%c0_97, %c0_98] : memref<4x128xf32, #tpu.memory_space<vmem>>, vector<4x128xf32>
      tpu.vector_store %arg23[%c0_97, %c0_98], %148 {strides = array<i32>} : memref<4x128xf32, #tpu.memory_space<vmem>>, vector<4x128xf32>,
    } else {
    }
    %c0 = arith.constant 0 : index
    %c0_1 = arith.constant 0 : index
    %3 = vector.load %arg23[%c0, %c0_1] : memref<4x128xf32, #tpu.memory_space<vmem>>, vector<4x128xf32>
    %4 = arith.truncf %3 : vector<4x128xf32> to vector<4x128xbf16>
    %5 = vector.shape_cast %4 : vector<4x128xbf16> to vector<1x4x128xbf16>
    %6 = vector.shape_cast %5 : vector<1x4x128xbf16> to vector<1x4x128xbf16>
    %7 = vector.broadcast %6 : vector<1x4x128xbf16> to vector<4x4x128xbf16>
    %c0_2 = arith.constant 0 : index
    %c0_3 = arith.constant 0 : index
    %c0_4 = arith.constant 0 : index
    %c0_5 = arith.constant 0 : index
    %8 = vector.load %arg6[%c0_2, %c0_3, %c0_4, %c0_5] : memref<1x4x128x32xbf16, #tpu.memory_space<vmem>>, vector<1x4x128x32xbf16>
    %9 = vector.shape_cast %8 : vector<1x4x128x32xbf16> to vector<4x128x32xbf16>
    "tpu.trace_start"() <{level = 10 : i32, message = "htd,hde->hte"}> : () -> ()
    %cst = arith.constant dense<0.000000e+00> : vector<4x4x32xf32>
    %10 = tpu.matmul %7, %9, %cst {dimension_numbers = #tpu.dot_dimension_numbers<[2], [1], [1], [2], [0, 0, 0, 1, 1, 2], [0], [0]>} : vector<4x4x128xbf16>, vector<4x128x32xbf16>, vector<4x4x32xf32> -> vector<4x4x32xf32>
    "tpu.trace_stop"() : () -> ()
    %c0_6 = arith.constant 0 : index
    %c0_7 = arith.constant 0 : index
    %c0_8 = arith.constant 0 : index
    %c0_9 = arith.constant 0 : index
    %11 = vector.load %arg7[%c0_6, %c0_7, %c0_8, %c0_9] : memref<1x4x1x32xf32, #tpu.memory_space<vmem>>, vector<1x4x1x32xf32>
    %12 = vector.shape_cast %11 : vector<1x4x1x32xf32> to vector<4x1x32xf32>
    %13 = vector.broadcast %12 : vector<4x1x32xf32> to vector<4x4x32xf32>
    %14 = arith.addf %10, %13 : vector<4x4x32xf32>
    %c0_10 = arith.constant 0 : index
    %c0_11 = arith.constant 0 : index
    %c0_12 = arith.constant 0 : index
    %c0_13 = arith.constant 0 : index
    %15 = vector.load %arg8[%c0_10, %c0_11, %c0_12, %c0_13] : memref<1x4x128x32xbf16, #tpu.memory_space<vmem>>, vector<1x4x128x32xbf16>
    %16 = vector.shape_cast %15 : vector<1x4x128x32xbf16> to vector<4x128x32xbf16>
    "tpu.trace_start"() <{level = 10 : i32, message = "htd,hde->hte"}> : () -> ()
    %cst_14 = arith.constant dense<0.000000e+00> : vector<4x4x32xf32>
    %17 = tpu.matmul %7, %16, %cst_14 {dimension_numbers = #tpu.dot_dimension_numbers<[2], [1], [1], [2], [0, 0, 0, 1, 1, 2], [0], [0]>} : vector<4x4x128xbf16>, vector<4x128x32xbf16>, vector<4x4x32xf32> -> vector<4x4x32xf32>
    "tpu.trace_stop"() : () -> ()
    %c0_15 = arith.constant 0 : index
    %c0_16 = arith.constant 0 : index
    %c0_17 = arith.constant 0 : index
    %c0_18 = arith.constant 0 : index
    %18 = vector.load %arg9[%c0_15, %c0_16, %c0_17, %c0_18] : memref<1x4x1x32xf32, #tpu.memory_space<vmem>>, vector<1x4x1x32xf32>
    %19 = vector.shape_cast %18 : vector<1x4x1x32xf32> to vector<4x1x32xf32>
    %20 = vector.broadcast %19 : vector<4x1x32xf32> to vector<4x4x32xf32>
    %21 = arith.addf %17, %20 : vector<4x4x32xf32>
    %c0_19 = arith.constant 0 : index
    %c0_20 = arith.constant 0 : index
    %c0_21 = arith.constant 0 : index
    %c0_22 = arith.constant 0 : index
    %22 = vector.load %arg10[%c0_19, %c0_20, %c0_21, %c0_22] : memref<1x4x128x32xbf16, #tpu.memory_space<vmem>>, vector<1x4x128x32xbf16>
    %23 = vector.shape_cast %22 : vector<1x4x128x32xbf16> to vector<4x128x32xbf16>
    "tpu.trace_start"() <{level = 10 : i32, message = "htd,hde->hte"}> : () -> ()
    %cst_23 = arith.constant dense<0.000000e+00> : vector<4x4x32xf32>
    %24 = tpu.matmul %7, %23, %cst_23 {dimension_numbers = #tpu.dot_dimension_numbers<[2], [1], [1], [2], [0, 0, 0, 1, 1, 2], [0], [0]>} : vector<4x4x128xbf16>, vector<4x128x32xbf16>, vector<4x4x32xf32> -> vector<4x4x32xf32>
    "tpu.trace_stop"() : () -> ()
    %c0_24 = arith.constant 0 : index
    %c0_25 = arith.constant 0 : index
    %c0_26 = arith.constant 0 : index
    %c0_27 = arith.constant 0 : index
    %25 = vector.load %arg11[%c0_24, %c0_25, %c0_26, %c0_27] : memref<1x4x1x32xf32, #tpu.memory_space<vmem>>, vector<1x4x1x32xf32>
    %26 = vector.shape_cast %25 : vector<1x4x1x32xf32> to vector<4x1x32xf32>
    %27 = vector.broadcast %26 : vector<4x1x32xf32> to vector<4x4x32xf32>
    %28 = arith.addf %24, %27 : vector<4x4x32xf32>
    %29 = arith.truncf %14 : vector<4x4x32xf32> to vector<4x4x32xbf16>
    %30 = arith.truncf %21 : vector<4x4x32xf32> to vector<4x4x32xbf16>
    "tpu.trace_start"() <{level = 10 : i32, message = "hte,hse->hts"}> : () -> ()
    %cst_28 = arith.constant dense<0.000000e+00> : vector<4x4x4xf32>
    %31 = tpu.matmul %29, %30, %cst_28 {dimension_numbers = #tpu.dot_dimension_numbers<[2], [2], [1], [1], [0, 0, 0, 1, 1, 1], [0], [0]>} : vector<4x4x32xbf16>, vector<4x4x32xbf16>, vector<4x4x4xf32> -> vector<4x4x4xf32>
    "tpu.trace_stop"() : () -> ()
    %cst_29 = arith.constant 0.176776692 : f32
    %32 = vector.broadcast %cst_29 : f32 to vector<4x4x4xf32>
    %33 = arith.mulf %31, %32 : vector<4x4x4xf32>
    %cst_30 = arith.constant dense<0xFF800000> : vector<4x4xf32>
    %34 = vector.multi_reduction <maximumf>, %33, %cst_30 [2] : vector<4x4x4xf32> to vector<4x4xf32>
    %35 = vector.shape_cast %34 : vector<4x4xf32> to vector<4x4x1xf32>
    %36 = vector.broadcast %35 : vector<4x4x1xf32> to vector<4x4x4xf32>
    %37 = arith.subf %33, %36 : vector<4x4x4xf32>
    %38 = math.exp %37 : vector<4x4x4xf32>
    %cst_31 = arith.constant dense<0.000000e+00> : vector<4x4xf32>
    %39 = vector.multi_reduction <add>, %38, %cst_31 [2] : vector<4x4x4xf32> to vector<4x4xf32>
    %40 = vector.shape_cast %39 : vector<4x4xf32> to vector<4x4x1xf32>
    %41 = tpu.reciprocal %40 {approx = true} : vector<4x4x1xf32> -> vector<4x4x1xf32>
    %42 = vector.broadcast %41 : vector<4x4x1xf32> to vector<4x4x4xf32>
    %43 = arith.mulf %38, %42 : vector<4x4x4xf32>
    %44 = arith.truncf %43 : vector<4x4x4xf32> to vector<4x4x4xbf16>
    %45 = arith.truncf %28 : vector<4x4x32xf32> to vector<4x4x32xbf16>
    "tpu.trace_start"() <{level = 10 : i32, message = "hts,hse->hte"}> : () -> ()
    %cst_32 = arith.constant dense<0.000000e+00> : vector<4x4x32xf32>
    %46 = tpu.matmul %44, %45, %cst_32 {dimension_numbers = #tpu.dot_dimension_numbers<[2], [1], [1], [2], [0, 0, 0, 1, 1, 2], [0], [0]>} : vector<4x4x4xbf16>, vector<4x4x32xbf16>, vector<4x4x32xf32> -> vector<4x4x32xf32>
    "tpu.trace_stop"() : () -> ()
    %47 = arith.truncf %46 : vector<4x4x32xf32> to vector<4x4x32xbf16>
    %c0_33 = arith.constant 0 : index
    %c0_34 = arith.constant 0 : index
    %c0_35 = arith.constant 0 : index
    %c0_36 = arith.constant 0 : index
    %48 = vector.load %arg12[%c0_33, %c0_34, %c0_35, %c0_36] : memref<1x4x32x128xbf16, #tpu.memory_space<vmem>>, vector<1x4x32x128xbf16>
    %49 = vector.shape_cast %48 : vector<1x4x32x128xbf16> to vector<4x32x128xbf16>
    "tpu.trace_start"() <{level = 10 : i32, message = "hte,hed->htd"}> : () -> ()
    %cst_37 = arith.constant dense<0.000000e+00> : vector<4x4x128xf32>
    %50 = tpu.matmul %47, %49, %cst_37 {dimension_numbers = #tpu.dot_dimension_numbers<[2], [1], [1], [2], [0, 0, 0, 1, 1, 2], [0], [0]>} : vector<4x4x32xbf16>, vector<4x32x128xbf16>, vector<4x4x128xf32> -> vector<4x4x128xf32>
    "tpu.trace_stop"() : () -> ()
    %cst_38 = arith.constant dense<0.000000e+00> : vector<4x128xf32>
    %51 = vector.multi_reduction <add>, %50, %cst_38 [0] : vector<4x4x128xf32> to vector<4x128xf32>
    %c0_39 = arith.constant 0 : index
    %c0_40 = arith.constant 0 : index
    %c0_41 = arith.constant 0 : index
    %52 = vector.load %arg13[%c0_39, %c0_40, %c0_41] : memref<1x1x128xf32, #tpu.memory_space<vmem>>, vector<1x1x128xf32>
    %53 = vector.shape_cast %52 : vector<1x1x128xf32> to vector<1x128xf32>
    %54 = vector.broadcast %53 : vector<1x128xf32> to vector<4x128xf32>
    %55 = arith.addf %51, %54 : vector<4x128xf32>
    %56 = arith.addf %3, %55 : vector<4x128xf32>
    %c0_42 = arith.constant 0 : index
    %c0_43 = arith.constant 0 : index
    %c0_44 = arith.constant 0 : index
    %57 = vector.load %arg14[%c0_42, %c0_43, %c0_44] : memref<1x1x128xf32, #tpu.memory_space<vmem>>, vector<1x1x128xf32>
    %58 = vector.shape_cast %57 : vector<1x1x128xf32> to vector<1x128xf32>
    %c0_45 = arith.constant 0 : index
    %c0_46 = arith.constant 0 : index
    %c0_47 = arith.constant 0 : index
    %59 = vector.load %arg15[%c0_45, %c0_46, %c0_47] : memref<1x1x128xf32, #tpu.memory_space<vmem>>, vector<1x1x128xf32>
    %60 = vector.shape_cast %59 : vector<1x1x128xf32> to vector<1x128xf32>
    %cst_48 = arith.constant dense<0.000000e+00> : vector<4xf32>
    %61 = vector.multi_reduction <add>, %56, %cst_48 [1] : vector<4x128xf32> to vector<4xf32>
    %62 = vector.shape_cast %61 : vector<4xf32> to vector<4x1xf32>
    %cst_49 = arith.constant 1.280000e+02 : f32
    %63 = vector.broadcast %cst_49 : f32 to vector<4x1xf32>
    %64 = arith.divf %62, %63 : vector<4x1xf32>
    %65 = vector.broadcast %64 : vector<4x1xf32> to vector<4x128xf32>
    %66 = arith.subf %56, %65 : vector<4x128xf32>
    %67 = arith.mulf %66, %66 : vector<4x128xf32>
    %cst_50 = arith.constant dense<0.000000e+00> : vector<4xf32>
    %68 = vector.multi_reduction <add>, %67, %cst_50 [1] : vector<4x128xf32> to vector<4xf32>
    %69 = vector.shape_cast %68 : vector<4xf32> to vector<4x1xf32>
    %cst_51 = arith.constant 1.280000e+02 : f32
    %70 = vector.broadcast %cst_51 : f32 to vector<4x1xf32>
    %71 = arith.divf %69, %70 : vector<4x1xf32>
    %cst_52 = arith.constant 9.99999974E-6 : f32
    %72 = vector.broadcast %cst_52 : f32 to vector<4x1xf32>
    %73 = arith.addf %71, %72 : vector<4x1xf32>
    %74 = math.rsqrt %73 : vector<4x1xf32>
    %75 = vector.broadcast %74 : vector<4x1xf32> to vector<4x128xf32>
    %76 = arith.mulf %66, %75 : vector<4x128xf32>
    %77 = vector.broadcast %58 : vector<1x128xf32> to vector<4x128xf32>
    %78 = arith.mulf %76, %77 : vector<4x128xf32>
    %79 = vector.broadcast %60 : vector<1x128xf32> to vector<4x128xf32>
    %80 = arith.addf %78, %79 : vector<4x128xf32>
    %81 = arith.truncf %80 : vector<4x128xf32> to vector<4x128xbf16>
    %c0_53 = arith.constant 0 : index
    %c0_54 = arith.constant 0 : index
    %c0_55 = arith.constant 0 : index
    %82 = vector.load %arg18[%c0_53, %c0_54, %c0_55] : memref<1x128x128xbf16, #tpu.memory_space<vmem>>, vector<1x128x128xbf16>
    %83 = vector.shape_cast %82 : vector<1x128x128xbf16> to vector<128x128xbf16>
    %cst_56 = arith.constant dense<0.000000e+00> : vector<4x128xf32>
    %84 = tpu.matmul %81, %83, %cst_56 {dimension_numbers = #tpu.dot_dimension_numbers<[1], [0], [0], [1], [0, 0, 1, 1], [], []>} : vector<4x128xbf16>, vector<128x128xbf16>, vector<4x128xf32> -> vector<4x128xf32>
    %c0_57 = arith.constant 0 : index
    %c0_58 = arith.constant 0 : index
    %c0_59 = arith.constant 0 : index
    %85 = vector.load %arg19[%c0_57, %c0_58, %c0_59] : memref<1x1x128xf32, #tpu.memory_space<vmem>>, vector<1x1x128xf32>
    %86 = vector.shape_cast %85 : vector<1x1x128xf32> to vector<1x128xf32>
    %87 = vector.broadcast %86 : vector<1x128xf32> to vector<4x128xf32>
    %88 = arith.addf %84, %87 : vector<4x128xf32>
    %89 = arith.mulf %88, %88 : vector<4x128xf32>
    %90 = arith.mulf %88, %89 : vector<4x128xf32>
    %cst_60 = arith.constant 4.471500e-02 : f32
    %91 = vector.broadcast %cst_60 : f32 to vector<4x128xf32>
    %92 = arith.mulf %91, %90 : vector<4x128xf32>
    %93 = arith.addf %88, %92 : vector<4x128xf32>
    %cst_61 = arith.constant 0.797884583 : f32
    %94 = vector.broadcast %cst_61 : f32 to vector<4x128xf32>
    %95 = arith.mulf %94, %93 : vector<4x128xf32>
    %96 = math.tanh %95 : vector<4x128xf32>
    %cst_62 = arith.constant 1.000000e+00 : f32
    %97 = vector.broadcast %cst_62 : f32 to vector<4x128xf32>
    %98 = arith.addf %97, %96 : vector<4x128xf32>
    %cst_63 = arith.constant 5.000000e-01 : f32
    %99 = vector.broadcast %cst_63 : f32 to vector<4x128xf32>
    %100 = arith.mulf %99, %98 : vector<4x128xf32>
    %101 = arith.mulf %88, %100 : vector<4x128xf32>
    %102 = arith.truncf %101 : vector<4x128xf32> to vector<4x128xbf16>
    %c0_64 = arith.constant 0 : index
    %c0_65 = arith.constant 0 : index
    %c0_66 = arith.constant 0 : index
    %103 = vector.load %arg20[%c0_64, %c0_65, %c0_66] : memref<1x128x128xbf16, #tpu.memory_space<vmem>>, vector<1x128x128xbf16>
    %104 = vector.shape_cast %103 : vector<1x128x128xbf16> to vector<128x128xbf16>
    %cst_67 = arith.constant dense<0.000000e+00> : vector<4x128xf32>
    %105 = tpu.matmul %102, %104, %cst_67 {dimension_numbers = #tpu.dot_dimension_numbers<[1], [0], [0], [1], [0, 0, 1, 1], [], []>} : vector<4x128xbf16>, vector<128x128xbf16>, vector<4x128xf32> -> vector<4x128xf32>
    %c0_68 = arith.constant 0 : index
    %c0_69 = arith.constant 0 : index
    %c0_70 = arith.constant 0 : index
    %106 = vector.load %arg21[%c0_68, %c0_69, %c0_70] : memref<1x1x128xf32, #tpu.memory_space<vmem>>, vector<1x1x128xf32>
    %107 = vector.shape_cast %106 : vector<1x1x128xf32> to vector<1x128xf32>
    %108 = vector.broadcast %107 : vector<1x128xf32> to vector<4x128xf32>
    %109 = arith.addf %105, %108 : vector<4x128xf32>
    %110 = arith.addf %80, %109 : vector<4x128xf32>
    %c0_71 = arith.constant 0 : index
    %c0_72 = arith.constant 0 : index
    %c0_73 = arith.constant 0 : index
    %111 = vector.load %arg16[%c0_71, %c0_72, %c0_73] : memref<1x1x128xf32, #tpu.memory_space<vmem>>, vector<1x1x128xf32>
    %112 = vector.shape_cast %111 : vector<1x1x128xf32> to vector<1x128xf32>
    %c0_74 = arith.constant 0 : index
    %c0_75 = arith.constant 0 : index
    %c0_76 = arith.constant 0 : index
    %113 = vector.load %arg17[%c0_74, %c0_75, %c0_76] : memref<1x1x128xf32, #tpu.memory_space<vmem>>, vector<1x1x128xf32>
    %114 = vector.shape_cast %113 : vector<1x1x128xf32> to vector<1x128xf32>
    %cst_77 = arith.constant dense<0.000000e+00> : vector<4xf32>
    %115 = vector.multi_reduction <add>, %110, %cst_77 [1] : vector<4x128xf32> to vector<4xf32>
    %116 = vector.shape_cast %115 : vector<4xf32> to vector<4x1xf32>
    %cst_78 = arith.constant 1.280000e+02 : f32
    %117 = vector.broadcast %cst_78 : f32 to vector<4x1xf32>
    %118 = arith.divf %116, %117 : vector<4x1xf32>
    %119 = vector.broadcast %118 : vector<4x1xf32> to vector<4x128xf32>
    %120 = arith.subf %110, %119 : vector<4x128xf32>
    %121 = arith.mulf %120, %120 : vector<4x128xf32>
    %cst_79 = arith.constant dense<0.000000e+00> : vector<4xf32>
    %122 = vector.multi_reduction <add>, %121, %cst_79 [1] : vector<4x128xf32> to vector<4xf32>
    %123 = vector.shape_cast %122 : vector<4xf32> to vector<4x1xf32>
    %cst_80 = arith.constant 1.280000e+02 : f32
    %124 = vector.broadcast %cst_80 : f32 to vector<4x1xf32>
    %125 = arith.divf %123, %124 : vector<4x1xf32>
    %cst_81 = arith.constant 9.99999974E-6 : f32
    %126 = vector.broadcast %cst_81 : f32 to vector<4x1xf32>
    %127 = arith.addf %125, %126 : vector<4x1xf32>
    %128 = math.rsqrt %127 : vector<4x1xf32>
    %129 = vector.broadcast %128 : vector<4x1xf32> to vector<4x128xf32>
    %130 = arith.mulf %120, %129 : vector<4x128xf32>
    %131 = vector.broadcast %112 : vector<1x128xf32> to vector<4x128xf32>
    %132 = arith.mulf %130, %131 : vector<4x128xf32>
    %133 = vector.broadcast %114 : vector<1x128xf32> to vector<4x128xf32>
    %134 = arith.addf %132, %133 : vector<4x128xf32>
    %c0_82 = arith.constant 0 : index
    %c0_83 = arith.constant 0 : index
    %135 = vector.load %arg23[%c0_82, %c0_83] : memref<4x128xf32, #tpu.memory_space<vmem>>, vector<4x128xf32>
    tpu.vector_store %arg23[%c0_82, %c0_83], %134 {strides = array<i32>} : memref<4x128xf32, #tpu.memory_space<vmem>>, vector<4x128xf32>,
    %136 = arith.truncf %134 : vector<4x128xf32> to vector<4x128xbf16>
    %c0_84 = arith.constant 0 : index
    %c0_85 = arith.constant 0 : index
    %c0_86 = arith.constant 0 : index
    %137 = vector.load %arg22[%c0_84, %c0_85, %c0_86] : memref<1x4x128xbf16, #tpu.memory_space<vmem>>, vector<1x4x128xbf16>
    %138 = vector.shape_cast %137 : vector<1x4x128xbf16> to vector<4x128xbf16>
    %139 = vector.shape_cast %136 : vector<4x128xbf16> to vector<1x4x128xbf16>
    tpu.vector_store %arg22[%c0_84, %c0_85, %c0_86], %139 {strides = array<i32>} : memref<1x4x128xbf16, #tpu.memory_space<vmem>>, vector<1x4x128xbf16>,
    return
  }
  func.func @transform_0(%arg0: i32, %arg1: i32) -> (i32, i32, i32) {
    %c0_i32 = arith.constant 0 : i32
    %c0_i32_0 = arith.constant 0 : i32
    %c0_i32_1 = arith.constant 0 : i32
    return %arg0, %c0_i32, %c0_i32_0 : i32, i32, i32
  }
  func.func @transform_1(%arg0: i32, %arg1: i32) -> (i32, i32) {
    %c0_i32 = arith.constant 0 : i32
    %c0_i32_0 = arith.constant 0 : i32
    %c0_i32_1 = arith.constant 0 : i32
    return %c0_i32, %c0_i32_0 : i32, i32
  }
  func.func @transform_2(%arg0: i32, %arg1: i32) -> (i32, i32) {
    %c0_i32 = arith.constant 0 : i32
    %c0_i32_0 = arith.constant 0 : i32
    %c0_i32_1 = arith.constant 0 : i32
    return %c0_i32, %c0_i32_0 : i32, i32
  }
  func.func @transform_3(%arg0: i32, %arg1: i32) -> (i32, i32) {
    %c0_i32 = arith.constant 0 : i32
    %c0_i32_0 = arith.constant 0 : i32
    %c0_i32_1 = arith.constant 0 : i32
    return %c0_i32, %c0_i32_0 : i32, i32
  }
  func.func @transform_4(%arg0: i32, %arg1: i32) -> (i32, i32, i32, i32) {
    %c0_i32 = arith.constant 0 : i32
    %c0_i32_0 = arith.constant 0 : i32
    %c0_i32_1 = arith.constant 0 : i32
    %c0_i32_2 = arith.constant 0 : i32
    return %arg1, %c0_i32, %c0_i32_0, %c0_i32_1 : i32, i32, i32, i32
  }
  func.func @transform_5(%arg0: i32, %arg1: i32) -> (i32, i32, i32, i32) {
    %c0_i32 = arith.constant 0 : i32
    %c0_i32_0 = arith.constant 0 : i32
    %c0_i32_1 = arith.constant 0 : i32
    %c0_i32_2 = arith.constant 0 : i32
    return %arg1, %c0_i32, %c0_i32_0, %c0_i32_1 : i32, i32, i32, i32
  }
  func.func @transform_6(%arg0: i32, %arg1: i32) -> (i32, i32, i32, i32) {
    %c0_i32 = arith.constant 0 : i32
    %c0_i32_0 = arith.constant 0 : i32
    %c0_i32_1 = arith.constant 0 : i32
    %c0_i32_2 = arith.constant 0 : i32
    return %arg1, %c0_i32, %c0_i32_0, %c0_i32_1 : i32, i32, i32, i32
  }
  func.func @transform_7(%arg0: i32, %arg1: i32) -> (i32, i32, i32, i32) {
    %c0_i32 = arith.constant 0 : i32
    %c0_i32_0 = arith.constant 0 : i32
    %c0_i32_1 = arith.constant 0 : i32
    %c0_i32_2 = arith.constant 0 : i32
    return %arg1, %c0_i32, %c0_i32_0, %c0_i32_1 : i32, i32, i32, i32
  }
  func.func @transform_8(%arg0: i32, %arg1: i32) -> (i32, i32, i32, i32) {
    %c0_i32 = arith.constant 0 : i32
    %c0_i32_0 = arith.constant 0 : i32
    %c0_i32_1 = arith.constant 0 : i32
    %c0_i32_2 = arith.constant 0 : i32
    return %arg1, %c0_i32, %c0_i32_0, %c0_i32_1 : i32, i32, i32, i32
  }
  func.func @transform_9(%arg0: i32, %arg1: i32) -> (i32, i32, i32, i32) {
    %c0_i32 = arith.constant 0 : i32
    %c0_i32_0 = arith.constant 0 : i32
    %c0_i32_1 = arith.constant 0 : i32
    %c0_i32_2 = arith.constant 0 : i32
    return %arg1, %c0_i32, %c0_i32_0, %c0_i32_1 : i32, i32, i32, i32
  }
  func.func @transform_10(%arg0: i32, %arg1: i32) -> (i32, i32, i32, i32) {
    %c0_i32 = arith.constant 0 : i32
    %c0_i32_0 = arith.constant 0 : i32
    %c0_i32_1 = arith.constant 0 : i32
    %c0_i32_2 = arith.constant 0 : i32
    return %arg1, %c0_i32, %c0_i32_0, %c0_i32_1 : i32, i32, i32, i32
  }
  func.func @transform_11(%arg0: i32, %arg1: i32) -> (i32, i32, i32) {
    %c0_i32 = arith.constant 0 : i32
    %c0_i32_0 = arith.constant 0 : i32
    %c0_i32_1 = arith.constant 0 : i32
    return %arg1, %c0_i32, %c0_i32_0 : i32, i32, i32
  }
  func.func @transform_12(%arg0: i32, %arg1: i32) -> (i32, i32, i32) {
    %c0_i32 = arith.constant 0 : i32
    %c0_i32_0 = arith.constant 0 : i32
    %c0_i32_1 = arith.constant 0 : i32
    return %arg1, %c0_i32, %c0_i32_0 : i32, i32, i32
  }
  func.func @transform_13(%arg0: i32, %arg1: i32) -> (i32, i32, i32) {
    %c0_i32 = arith.constant 0 : i32
    %c0_i32_0 = arith.constant 0 : i32
    %c0_i32_1 = arith.constant 0 : i32
    return %arg1, %c0_i32, %c0_i32_0 : i32, i32, i32
  }
  func.func @transform_14(%arg0: i32, %arg1: i32) -> (i32, i32, i32) {
    %c0_i32 = arith.constant 0 : i32
    %c0_i32_0 = arith.constant 0 : i32
    %c0_i32_1 = arith.constant 0 : i32
    return %arg1, %c0_i32, %c0_i32_0 : i32, i32, i32
  }
  func.func @transform_15(%arg0: i32, %arg1: i32) -> (i32, i32, i32) {
    %c0_i32 = arith.constant 0 : i32
    %c0_i32_0 = arith.constant 0 : i32
    %c0_i32_1 = arith.constant 0 : i32
    return %arg1, %c0_i32, %c0_i32_0 : i32, i32, i32
  }
  func.func @transform_16(%arg0: i32, %arg1: i32) -> (i32, i32, i32) {
    %c0_i32 = arith.constant 0 : i32
    %c0_i32_0 = arith.constant 0 : i32
    %c0_i32_1 = arith.constant 0 : i32
    return %arg1, %c0_i32, %c0_i32_0 : i32, i32, i32
  }
  func.func @transform_17(%arg0: i32, %arg1: i32) -> (i32, i32, i32) {
    %c0_i32 = arith.constant 0 : i32
    %c0_i32_0 = arith.constant 0 : i32
    %c0_i32_1 = arith.constant 0 : i32
    return %arg1, %c0_i32, %c0_i32_0 : i32, i32, i32
  }
  func.func @transform_18(%arg0: i32, %arg1: i32) -> (i32, i32, i32) {
    %c0_i32 = arith.constant 0 : i32
    %c0_i32_0 = arith.constant 0 : i32
    %c0_i32_1 = arith.constant 0 : i32
    return %arg1, %c0_i32, %c0_i32_0 : i32, i32, i32
  }
  func.func @transform_19(%arg0: i32, %arg1: i32) -> (i32, i32, i32) {
    %c0_i32 = arith.constant 0 : i32
    %c0_i32_0 = arith.constant 0 : i32
    %c0_i32_1 = arith.constant 0 : i32
    return %arg1, %c0_i32, %c0_i32_0 : i32, i32, i32
  }
  func.func @transform_20(%arg0: i32, %arg1: i32) -> (i32, i32, i32) {
    %c0_i32 = arith.constant 0 : i32
    %c0_i32_0 = arith.constant 0 : i32
    %c0_i32_1 = arith.constant 0 : i32
    return %arg0, %c0_i32, %c0_i32_0 : i32, i32, i32
  }
}

module attributes {stable_mosaic.version = 11 : i64} {
  func.func @_bottleneck_tail_kernel(%arg0: i32, %arg1: memref<9x8x128xbf16, #tpu.memory_space<vmem>>, %arg2: memref<8x64xbf16, #tpu.memory_space<vmem>>, %arg3: memref<9x128x128xbf16, #tpu.memory_space<vmem>>, %arg4: memref<1x128xf32, #tpu.memory_space<vmem>>, %arg5: memref<1x128xf32, #tpu.memory_space<vmem>>, %arg6: memref<128x128xbf16, #tpu.memory_space<vmem>>, %arg7: memref<1x128xf32, #tpu.memory_space<vmem>>, %arg8: memref<1x128xf32, #tpu.memory_space<vmem>>, %arg9: memref<64x128xbf16, #tpu.memory_space<vmem>>, %arg10: memref<1x128xf32, #tpu.memory_space<vmem>>, %arg11: memref<1x128xf32, #tpu.memory_space<vmem>>, %arg12: memref<8x128xbf16, #tpu.memory_space<vmem>>) attributes {dimension_semantics = [#tpu.dimension_semantics<parallel>], iteration_bounds = array<i64: 1>, scalar_prefetch = 0 : i64, scratch_operands = 0 : i64, tpu.core_type = #tpu.core_type<tc>, window_params = [{transform_indices = @transform_0, window_bounds = array<i64: 9, 8, 128>}, {transform_indices = @transform_1, window_bounds = array<i64: 8, 64>}, {pipeline_mode = #tpu.pipeline_mode<synchronous>, transform_indices = @transform_2, window_bounds = array<i64: 9, 128, 128>}, {pipeline_mode = #tpu.pipeline_mode<synchronous>, transform_indices = @transform_3, window_bounds = array<i64: 1, 128>}, {pipeline_mode = #tpu.pipeline_mode<synchronous>, transform_indices = @transform_4, window_bounds = array<i64: 1, 128>}, {pipeline_mode = #tpu.pipeline_mode<synchronous>, transform_indices = @transform_5, window_bounds = array<i64: 128, 128>}, {pipeline_mode = #tpu.pipeline_mode<synchronous>, transform_indices = @transform_6, window_bounds = array<i64: 1, 128>}, {pipeline_mode = #tpu.pipeline_mode<synchronous>, transform_indices = @transform_7, window_bounds = array<i64: 1, 128>}, {pipeline_mode = #tpu.pipeline_mode<synchronous>, transform_indices = @transform_8, window_bounds = array<i64: 64, 128>}, {pipeline_mode = #tpu.pipeline_mode<synchronous>, transform_indices = @transform_9, window_bounds = array<i64: 1, 128>}, {pipeline_mode = #tpu.pipeline_mode<synchronous>, transform_indices = @transform_10, window_bounds = array<i64: 1, 128>}, {transform_indices = @transform_11, window_bounds = array<i64: 8, 128>}]} {
    %c0 = arith.constant 0 : index
    %c0_0 = arith.constant 0 : index
    %c0_1 = arith.constant 0 : index
    %0 = vector.load %arg1[%c0, %c0_0, %c0_1] : memref<9x8x128xbf16, #tpu.memory_space<vmem>>, vector<1x8x128xbf16>
    %1 = vector.shape_cast %0 : vector<1x8x128xbf16> to vector<8x128xbf16>
    %c0_2 = arith.constant 0 : index
    %c0_3 = arith.constant 0 : index
    %c0_4 = arith.constant 0 : index
    %2 = vector.load %arg3[%c0_2, %c0_3, %c0_4] : memref<9x128x128xbf16, #tpu.memory_space<vmem>>, vector<1x128x128xbf16>
    %3 = vector.shape_cast %2 : vector<1x128x128xbf16> to vector<128x128xbf16>
    %cst = arith.constant dense<0.000000e+00> : vector<8x128xf32>
    %4 = tpu.matmul %1, %3, %cst {dimension_numbers = #tpu.dot_dimension_numbers<[1], [0], [0], [1], [0, 0, 1, 1], [], []>} : vector<8x128xbf16>, vector<128x128xbf16>, vector<8x128xf32> -> vector<8x128xf32>
    %c1 = arith.constant 1 : index
    %c0_5 = arith.constant 0 : index
    %c0_6 = arith.constant 0 : index
    %5 = vector.load %arg1[%c1, %c0_5, %c0_6] : memref<9x8x128xbf16, #tpu.memory_space<vmem>>, vector<1x8x128xbf16>
    %6 = vector.shape_cast %5 : vector<1x8x128xbf16> to vector<8x128xbf16>
    %c1_7 = arith.constant 1 : index
    %c0_8 = arith.constant 0 : index
    %c0_9 = arith.constant 0 : index
    %7 = vector.load %arg3[%c1_7, %c0_8, %c0_9] : memref<9x128x128xbf16, #tpu.memory_space<vmem>>, vector<1x128x128xbf16>
    %8 = vector.shape_cast %7 : vector<1x128x128xbf16> to vector<128x128xbf16>
    %cst_10 = arith.constant dense<0.000000e+00> : vector<8x128xf32>
    %9 = tpu.matmul %6, %8, %cst_10 {dimension_numbers = #tpu.dot_dimension_numbers<[1], [0], [0], [1], [0, 0, 1, 1], [], []>} : vector<8x128xbf16>, vector<128x128xbf16>, vector<8x128xf32> -> vector<8x128xf32>
    %10 = arith.addf %4, %9 : vector<8x128xf32>
    %c2 = arith.constant 2 : index
    %c0_11 = arith.constant 0 : index
    %c0_12 = arith.constant 0 : index
    %11 = vector.load %arg1[%c2, %c0_11, %c0_12] : memref<9x8x128xbf16, #tpu.memory_space<vmem>>, vector<1x8x128xbf16>
    %12 = vector.shape_cast %11 : vector<1x8x128xbf16> to vector<8x128xbf16>
    %c2_13 = arith.constant 2 : index
    %c0_14 = arith.constant 0 : index
    %c0_15 = arith.constant 0 : index
    %13 = vector.load %arg3[%c2_13, %c0_14, %c0_15] : memref<9x128x128xbf16, #tpu.memory_space<vmem>>, vector<1x128x128xbf16>
    %14 = vector.shape_cast %13 : vector<1x128x128xbf16> to vector<128x128xbf16>
    %cst_16 = arith.constant dense<0.000000e+00> : vector<8x128xf32>
    %15 = tpu.matmul %12, %14, %cst_16 {dimension_numbers = #tpu.dot_dimension_numbers<[1], [0], [0], [1], [0, 0, 1, 1], [], []>} : vector<8x128xbf16>, vector<128x128xbf16>, vector<8x128xf32> -> vector<8x128xf32>
    %16 = arith.addf %10, %15 : vector<8x128xf32>
    %c3 = arith.constant 3 : index
    %c0_17 = arith.constant 0 : index
    %c0_18 = arith.constant 0 : index
    %17 = vector.load %arg1[%c3, %c0_17, %c0_18] : memref<9x8x128xbf16, #tpu.memory_space<vmem>>, vector<1x8x128xbf16>
    %18 = vector.shape_cast %17 : vector<1x8x128xbf16> to vector<8x128xbf16>
    %c3_19 = arith.constant 3 : index
    %c0_20 = arith.constant 0 : index
    %c0_21 = arith.constant 0 : index
    %19 = vector.load %arg3[%c3_19, %c0_20, %c0_21] : memref<9x128x128xbf16, #tpu.memory_space<vmem>>, vector<1x128x128xbf16>
    %20 = vector.shape_cast %19 : vector<1x128x128xbf16> to vector<128x128xbf16>
    %cst_22 = arith.constant dense<0.000000e+00> : vector<8x128xf32>
    %21 = tpu.matmul %18, %20, %cst_22 {dimension_numbers = #tpu.dot_dimension_numbers<[1], [0], [0], [1], [0, 0, 1, 1], [], []>} : vector<8x128xbf16>, vector<128x128xbf16>, vector<8x128xf32> -> vector<8x128xf32>
    %22 = arith.addf %16, %21 : vector<8x128xf32>
    %c4 = arith.constant 4 : index
    %c0_23 = arith.constant 0 : index
    %c0_24 = arith.constant 0 : index
    %23 = vector.load %arg1[%c4, %c0_23, %c0_24] : memref<9x8x128xbf16, #tpu.memory_space<vmem>>, vector<1x8x128xbf16>
    %24 = vector.shape_cast %23 : vector<1x8x128xbf16> to vector<8x128xbf16>
    %c4_25 = arith.constant 4 : index
    %c0_26 = arith.constant 0 : index
    %c0_27 = arith.constant 0 : index
    %25 = vector.load %arg3[%c4_25, %c0_26, %c0_27] : memref<9x128x128xbf16, #tpu.memory_space<vmem>>, vector<1x128x128xbf16>
    %26 = vector.shape_cast %25 : vector<1x128x128xbf16> to vector<128x128xbf16>
    %cst_28 = arith.constant dense<0.000000e+00> : vector<8x128xf32>
    %27 = tpu.matmul %24, %26, %cst_28 {dimension_numbers = #tpu.dot_dimension_numbers<[1], [0], [0], [1], [0, 0, 1, 1], [], []>} : vector<8x128xbf16>, vector<128x128xbf16>, vector<8x128xf32> -> vector<8x128xf32>
    %28 = arith.addf %22, %27 : vector<8x128xf32>
    %c5 = arith.constant 5 : index
    %c0_29 = arith.constant 0 : index
    %c0_30 = arith.constant 0 : index
    %29 = vector.load %arg1[%c5, %c0_29, %c0_30] : memref<9x8x128xbf16, #tpu.memory_space<vmem>>, vector<1x8x128xbf16>
    %30 = vector.shape_cast %29 : vector<1x8x128xbf16> to vector<8x128xbf16>
    %c5_31 = arith.constant 5 : index
    %c0_32 = arith.constant 0 : index
    %c0_33 = arith.constant 0 : index
    %31 = vector.load %arg3[%c5_31, %c0_32, %c0_33] : memref<9x128x128xbf16, #tpu.memory_space<vmem>>, vector<1x128x128xbf16>
    %32 = vector.shape_cast %31 : vector<1x128x128xbf16> to vector<128x128xbf16>
    %cst_34 = arith.constant dense<0.000000e+00> : vector<8x128xf32>
    %33 = tpu.matmul %30, %32, %cst_34 {dimension_numbers = #tpu.dot_dimension_numbers<[1], [0], [0], [1], [0, 0, 1, 1], [], []>} : vector<8x128xbf16>, vector<128x128xbf16>, vector<8x128xf32> -> vector<8x128xf32>
    %34 = arith.addf %28, %33 : vector<8x128xf32>
    %c6 = arith.constant 6 : index
    %c0_35 = arith.constant 0 : index
    %c0_36 = arith.constant 0 : index
    %35 = vector.load %arg1[%c6, %c0_35, %c0_36] : memref<9x8x128xbf16, #tpu.memory_space<vmem>>, vector<1x8x128xbf16>
    %36 = vector.shape_cast %35 : vector<1x8x128xbf16> to vector<8x128xbf16>
    %c6_37 = arith.constant 6 : index
    %c0_38 = arith.constant 0 : index
    %c0_39 = arith.constant 0 : index
    %37 = vector.load %arg3[%c6_37, %c0_38, %c0_39] : memref<9x128x128xbf16, #tpu.memory_space<vmem>>, vector<1x128x128xbf16>
    %38 = vector.shape_cast %37 : vector<1x128x128xbf16> to vector<128x128xbf16>
    %cst_40 = arith.constant dense<0.000000e+00> : vector<8x128xf32>
    %39 = tpu.matmul %36, %38, %cst_40 {dimension_numbers = #tpu.dot_dimension_numbers<[1], [0], [0], [1], [0, 0, 1, 1], [], []>} : vector<8x128xbf16>, vector<128x128xbf16>, vector<8x128xf32> -> vector<8x128xf32>
    %40 = arith.addf %34, %39 : vector<8x128xf32>
    %c7 = arith.constant 7 : index
    %c0_41 = arith.constant 0 : index
    %c0_42 = arith.constant 0 : index
    %41 = vector.load %arg1[%c7, %c0_41, %c0_42] : memref<9x8x128xbf16, #tpu.memory_space<vmem>>, vector<1x8x128xbf16>
    %42 = vector.shape_cast %41 : vector<1x8x128xbf16> to vector<8x128xbf16>
    %c7_43 = arith.constant 7 : index
    %c0_44 = arith.constant 0 : index
    %c0_45 = arith.constant 0 : index
    %43 = vector.load %arg3[%c7_43, %c0_44, %c0_45] : memref<9x128x128xbf16, #tpu.memory_space<vmem>>, vector<1x128x128xbf16>
    %44 = vector.shape_cast %43 : vector<1x128x128xbf16> to vector<128x128xbf16>
    %cst_46 = arith.constant dense<0.000000e+00> : vector<8x128xf32>
    %45 = tpu.matmul %42, %44, %cst_46 {dimension_numbers = #tpu.dot_dimension_numbers<[1], [0], [0], [1], [0, 0, 1, 1], [], []>} : vector<8x128xbf16>, vector<128x128xbf16>, vector<8x128xf32> -> vector<8x128xf32>
    %46 = arith.addf %40, %45 : vector<8x128xf32>
    %c8 = arith.constant 8 : index
    %c0_47 = arith.constant 0 : index
    %c0_48 = arith.constant 0 : index
    %47 = vector.load %arg1[%c8, %c0_47, %c0_48] : memref<9x8x128xbf16, #tpu.memory_space<vmem>>, vector<1x8x128xbf16>
    %48 = vector.shape_cast %47 : vector<1x8x128xbf16> to vector<8x128xbf16>
    %c8_49 = arith.constant 8 : index
    %c0_50 = arith.constant 0 : index
    %c0_51 = arith.constant 0 : index
    %49 = vector.load %arg3[%c8_49, %c0_50, %c0_51] : memref<9x128x128xbf16, #tpu.memory_space<vmem>>, vector<1x128x128xbf16>
    %50 = vector.shape_cast %49 : vector<1x128x128xbf16> to vector<128x128xbf16>
    %cst_52 = arith.constant dense<0.000000e+00> : vector<8x128xf32>
    %51 = tpu.matmul %48, %50, %cst_52 {dimension_numbers = #tpu.dot_dimension_numbers<[1], [0], [0], [1], [0, 0, 1, 1], [], []>} : vector<8x128xbf16>, vector<128x128xbf16>, vector<8x128xf32> -> vector<8x128xf32>
    %52 = arith.addf %46, %51 : vector<8x128xf32>
    %c0_53 = arith.constant 0 : index
    %c0_54 = arith.constant 0 : index
    %53 = vector.load %arg4[%c0_53, %c0_54] : memref<1x128xf32, #tpu.memory_space<vmem>>, vector<1x128xf32>
    %54 = vector.broadcast %53 : vector<1x128xf32> to vector<8x128xf32>
    %55 = arith.mulf %52, %54 : vector<8x128xf32>
    %c0_55 = arith.constant 0 : index
    %c0_56 = arith.constant 0 : index
    %56 = vector.load %arg5[%c0_55, %c0_56] : memref<1x128xf32, #tpu.memory_space<vmem>>, vector<1x128xf32>
    %57 = vector.broadcast %56 : vector<1x128xf32> to vector<8x128xf32>
    %58 = arith.addf %55, %57 : vector<8x128xf32>
    %cst_57 = arith.constant 0.000000e+00 : f32
    %59 = vector.broadcast %cst_57 : f32 to vector<8x128xf32>
    %60 = arith.maximumf %58, %59 : vector<8x128xf32>
    %61 = arith.truncf %60 : vector<8x128xf32> to vector<8x128xbf16>
    %c0_58 = arith.constant 0 : index
    %c0_59 = arith.constant 0 : index
    %62 = vector.load %arg6[%c0_58, %c0_59] : memref<128x128xbf16, #tpu.memory_space<vmem>>, vector<128x128xbf16>
    %cst_60 = arith.constant dense<0.000000e+00> : vector<8x128xf32>
    %63 = tpu.matmul %61, %62, %cst_60 {dimension_numbers = #tpu.dot_dimension_numbers<[1], [0], [0], [1], [0, 0, 1, 1], [], []>} : vector<8x128xbf16>, vector<128x128xbf16>, vector<8x128xf32> -> vector<8x128xf32>
    %c0_61 = arith.constant 0 : index
    %c0_62 = arith.constant 0 : index
    %64 = vector.load %arg7[%c0_61, %c0_62] : memref<1x128xf32, #tpu.memory_space<vmem>>, vector<1x128xf32>
    %65 = vector.broadcast %64 : vector<1x128xf32> to vector<8x128xf32>
    %66 = arith.mulf %63, %65 : vector<8x128xf32>
    %c0_63 = arith.constant 0 : index
    %c0_64 = arith.constant 0 : index
    %67 = vector.load %arg8[%c0_63, %c0_64] : memref<1x128xf32, #tpu.memory_space<vmem>>, vector<1x128xf32>
    %68 = vector.broadcast %67 : vector<1x128xf32> to vector<8x128xf32>
    %69 = arith.addf %66, %68 : vector<8x128xf32>
    %c0_65 = arith.constant 0 : index
    %c0_66 = arith.constant 0 : index
    %70 = vector.load %arg2[%c0_65, %c0_66] : memref<8x64xbf16, #tpu.memory_space<vmem>>, vector<8x64xbf16>
    %c0_67 = arith.constant 0 : index
    %c0_68 = arith.constant 0 : index
    %71 = vector.load %arg9[%c0_67, %c0_68] : memref<64x128xbf16, #tpu.memory_space<vmem>>, vector<64x128xbf16>
    %cst_69 = arith.constant dense<0.000000e+00> : vector<8x128xf32>
    %72 = tpu.matmul %70, %71, %cst_69 {dimension_numbers = #tpu.dot_dimension_numbers<[1], [0], [0], [1], [0, 0, 1, 1], [], []>} : vector<8x64xbf16>, vector<64x128xbf16>, vector<8x128xf32> -> vector<8x128xf32>
    %c0_70 = arith.constant 0 : index
    %c0_71 = arith.constant 0 : index
    %73 = vector.load %arg10[%c0_70, %c0_71] : memref<1x128xf32, #tpu.memory_space<vmem>>, vector<1x128xf32>
    %74 = vector.broadcast %73 : vector<1x128xf32> to vector<8x128xf32>
    %75 = arith.mulf %72, %74 : vector<8x128xf32>
    %c0_72 = arith.constant 0 : index
    %c0_73 = arith.constant 0 : index
    %76 = vector.load %arg11[%c0_72, %c0_73] : memref<1x128xf32, #tpu.memory_space<vmem>>, vector<1x128xf32>
    %77 = vector.broadcast %76 : vector<1x128xf32> to vector<8x128xf32>
    %78 = arith.addf %75, %77 : vector<8x128xf32>
    %79 = arith.addf %69, %78 : vector<8x128xf32>
    %cst_74 = arith.constant 0.000000e+00 : f32
    %80 = vector.broadcast %cst_74 : f32 to vector<8x128xf32>
    %81 = arith.maximumf %79, %80 : vector<8x128xf32>
    %82 = arith.truncf %81 : vector<8x128xf32> to vector<8x128xbf16>
    %c0_75 = arith.constant 0 : index
    %c0_76 = arith.constant 0 : index
    %83 = vector.load %arg12[%c0_75, %c0_76] : memref<8x128xbf16, #tpu.memory_space<vmem>>, vector<8x128xbf16>
    tpu.vector_store %arg12[%c0_75, %c0_76], %82 {strides = array<i32>} : memref<8x128xbf16, #tpu.memory_space<vmem>>, vector<8x128xbf16>,
    return
  }
  func.func @transform_0(%arg0: i32) -> (i32, i32, i32) {
    %c0_i32 = arith.constant 0 : i32
    %c0_i32_0 = arith.constant 0 : i32
    %c0_i32_1 = arith.constant 0 : i32
    return %c0_i32, %arg0, %c0_i32_0 : i32, i32, i32
  }
  func.func @transform_1(%arg0: i32) -> (i32, i32) {
    %c0_i32 = arith.constant 0 : i32
    %c0_i32_0 = arith.constant 0 : i32
    return %arg0, %c0_i32 : i32, i32
  }
  func.func @transform_2(%arg0: i32) -> (i32, i32, i32) {
    %c0_i32 = arith.constant 0 : i32
    %c0_i32_0 = arith.constant 0 : i32
    %c0_i32_1 = arith.constant 0 : i32
    %c0_i32_2 = arith.constant 0 : i32
    return %c0_i32, %c0_i32_0, %c0_i32_1 : i32, i32, i32
  }
  func.func @transform_3(%arg0: i32) -> (i32, i32) {
    %c0_i32 = arith.constant 0 : i32
    %c0_i32_0 = arith.constant 0 : i32
    %c0_i32_1 = arith.constant 0 : i32
    return %c0_i32, %c0_i32_0 : i32, i32
  }
  func.func @transform_4(%arg0: i32) -> (i32, i32) {
    %c0_i32 = arith.constant 0 : i32
    %c0_i32_0 = arith.constant 0 : i32
    %c0_i32_1 = arith.constant 0 : i32
    return %c0_i32, %c0_i32_0 : i32, i32
  }
  func.func @transform_5(%arg0: i32) -> (i32, i32) {
    %c0_i32 = arith.constant 0 : i32
    %c0_i32_0 = arith.constant 0 : i32
    %c0_i32_1 = arith.constant 0 : i32
    return %c0_i32, %c0_i32_0 : i32, i32
  }
  func.func @transform_6(%arg0: i32) -> (i32, i32) {
    %c0_i32 = arith.constant 0 : i32
    %c0_i32_0 = arith.constant 0 : i32
    %c0_i32_1 = arith.constant 0 : i32
    return %c0_i32, %c0_i32_0 : i32, i32
  }
  func.func @transform_7(%arg0: i32) -> (i32, i32) {
    %c0_i32 = arith.constant 0 : i32
    %c0_i32_0 = arith.constant 0 : i32
    %c0_i32_1 = arith.constant 0 : i32
    return %c0_i32, %c0_i32_0 : i32, i32
  }
  func.func @transform_8(%arg0: i32) -> (i32, i32) {
    %c0_i32 = arith.constant 0 : i32
    %c0_i32_0 = arith.constant 0 : i32
    %c0_i32_1 = arith.constant 0 : i32
    return %c0_i32, %c0_i32_0 : i32, i32
  }
  func.func @transform_9(%arg0: i32) -> (i32, i32) {
    %c0_i32 = arith.constant 0 : i32
    %c0_i32_0 = arith.constant 0 : i32
    %c0_i32_1 = arith.constant 0 : i32
    return %c0_i32, %c0_i32_0 : i32, i32
  }
  func.func @transform_10(%arg0: i32) -> (i32, i32) {
    %c0_i32 = arith.constant 0 : i32
    %c0_i32_0 = arith.constant 0 : i32
    %c0_i32_1 = arith.constant 0 : i32
    return %c0_i32, %c0_i32_0 : i32, i32
  }
  func.func @transform_11(%arg0: i32) -> (i32, i32) {
    %c0_i32 = arith.constant 0 : i32
    %c0_i32_0 = arith.constant 0 : i32
    return %arg0, %c0_i32 : i32, i32
  }
}

module attributes {stable_mosaic.version = 11 : i64} {
  func.func @_matmul_bn_act_kernel(%arg0: i32, %arg1: memref<8x1152xbf16, #tpu.memory_space<vmem>>, %arg2: memref<1152x512xbf16, #tpu.memory_space<vmem>>, %arg3: memref<1x512xf32, #tpu.memory_space<vmem>>, %arg4: memref<1x512xf32, #tpu.memory_space<vmem>>, %arg5: memref<8x512xf32, #tpu.memory_space<vmem>>) attributes {dimension_semantics = [#tpu.dimension_semantics<parallel>], iteration_bounds = array<i64: 1>, scalar_prefetch = 0 : i64, scratch_operands = 0 : i64, tpu.core_type = #tpu.core_type<tc>, window_params = [{transform_indices = @transform_0, window_bounds = array<i64: 8, 1152>}, {pipeline_mode = #tpu.pipeline_mode<synchronous>, transform_indices = @transform_1, window_bounds = array<i64: 1152, 512>}, {pipeline_mode = #tpu.pipeline_mode<synchronous>, transform_indices = @transform_2, window_bounds = array<i64: 1, 512>}, {pipeline_mode = #tpu.pipeline_mode<synchronous>, transform_indices = @transform_3, window_bounds = array<i64: 1, 512>}, {transform_indices = @transform_4, window_bounds = array<i64: 8, 512>}]} {
    %c0 = arith.constant 0 : index
    %c0_0 = arith.constant 0 : index
    %0 = vector.load %arg1[%c0, %c0_0] : memref<8x1152xbf16, #tpu.memory_space<vmem>>, vector<8x1152xbf16>
    %c0_1 = arith.constant 0 : index
    %c0_2 = arith.constant 0 : index
    %1 = vector.load %arg2[%c0_1, %c0_2] : memref<1152x512xbf16, #tpu.memory_space<vmem>>, vector<1152x512xbf16>
    %cst = arith.constant dense<0.000000e+00> : vector<8x512xf32>
    %2 = tpu.matmul %0, %1, %cst {dimension_numbers = #tpu.dot_dimension_numbers<[1], [0], [0], [1], [0, 0, 1, 1], [], []>} : vector<8x1152xbf16>, vector<1152x512xbf16>, vector<8x512xf32> -> vector<8x512xf32>
    %c0_3 = arith.constant 0 : index
    %c0_4 = arith.constant 0 : index
    %3 = vector.load %arg3[%c0_3, %c0_4] : memref<1x512xf32, #tpu.memory_space<vmem>>, vector<1x512xf32>
    %4 = vector.broadcast %3 : vector<1x512xf32> to vector<8x512xf32>
    %5 = arith.mulf %2, %4 : vector<8x512xf32>
    %c0_5 = arith.constant 0 : index
    %c0_6 = arith.constant 0 : index
    %6 = vector.load %arg4[%c0_5, %c0_6] : memref<1x512xf32, #tpu.memory_space<vmem>>, vector<1x512xf32>
    %7 = vector.broadcast %6 : vector<1x512xf32> to vector<8x512xf32>
    %8 = arith.addf %5, %7 : vector<8x512xf32>
    %cst_7 = arith.constant 0.000000e+00 : f32
    %9 = vector.broadcast %cst_7 : f32 to vector<8x512xf32>
    %10 = arith.maximumf %8, %9 : vector<8x512xf32>
    %c0_8 = arith.constant 0 : index
    %c0_9 = arith.constant 0 : index
    %11 = vector.load %arg5[%c0_8, %c0_9] : memref<8x512xf32, #tpu.memory_space<vmem>>, vector<8x512xf32>
    tpu.vector_store %arg5[%c0_8, %c0_9], %10 {strides = array<i32>} : memref<8x512xf32, #tpu.memory_space<vmem>>, vector<8x512xf32>,
    return
  }
  func.func @transform_0(%arg0: i32) -> (i32, i32) {
    %c0_i32 = arith.constant 0 : i32
    %c0_i32_0 = arith.constant 0 : i32
    return %arg0, %c0_i32 : i32, i32
  }
  func.func @transform_1(%arg0: i32) -> (i32, i32) {
    %c0_i32 = arith.constant 0 : i32
    %c0_i32_0 = arith.constant 0 : i32
    %c0_i32_1 = arith.constant 0 : i32
    return %c0_i32, %c0_i32_0 : i32, i32
  }
  func.func @transform_2(%arg0: i32) -> (i32, i32) {
    %c0_i32 = arith.constant 0 : i32
    %c0_i32_0 = arith.constant 0 : i32
    %c0_i32_1 = arith.constant 0 : i32
    return %c0_i32, %c0_i32_0 : i32, i32
  }
  func.func @transform_3(%arg0: i32) -> (i32, i32) {
    %c0_i32 = arith.constant 0 : i32
    %c0_i32_0 = arith.constant 0 : i32
    %c0_i32_1 = arith.constant 0 : i32
    return %c0_i32, %c0_i32_0 : i32, i32
  }
  func.func @transform_4(%arg0: i32) -> (i32, i32) {
    %c0_i32 = arith.constant 0 : i32
    %c0_i32_0 = arith.constant 0 : i32
    return %arg0, %c0_i32 : i32, i32
  }
}

</mosaic_0001>

<bundles_post_ra>
// kernel: encoder_forward.9
= control target key start
LH: loop header
LB: loop body
LE: loop exit
PB: predicated region body
PF: predicated region fallthrough
CT: control target
= control target key end

     0   :  { %s1207_s15 = smov 0   ;;  %s1485_s0 = inlined_call_operand.vmem [shape: bf16[512,256], index: 0, kind: input, shape index: {}]   ;;  %s1486_s1 = inlined_call_operand.vmem [shape: bf16[256,16], index: 1, kind: input, shape index: {}]   ;;  %s1487_s2 = inlined_call_operand.vmem [shape: f32[1,16], index: 2, kind: input, shape index: {}]   ;;  %s1488_s3 = inlined_call_operand.vmem [shape: f32[1,16], index: 3, kind: input, shape index: {}]   ;;  %s1489_s4 = inlined_call_operand.vmem [shape: f32[512,16], index: 4, kind: output, shape index: {}]  }
   0x1 LB: > { %s895_s16 = sadd.s32 4294967295, %s1180_s15   ;;  %p899_p0 = scmp.ge.s32.totalorder %s1180_s15, 1  ;;  %s1180_s15 = sphi %s1207_s15, %s14_s15  }
   0x2   : > { %p164_p1 = scmp.lt.s32.totalorder %s1180_s15, 3 }
   0x4   : > { %p165_p2 = pnand %p899_p0, %p164_p1 }
   0x5   : > { %s900_s29 = sshll.u32 (!%p165_p2), %s895_s16, 5 }
   0x6   : > { %168 = sbr.rel (%p165_p2) target bundleno = 305 (0x131), region = 36  ;;  %p192_p3 = scmp.lt.s32.totalorder (!%p165_p2), %s900_s29, 63 }
   0xb   : > { %v1139_v0 = vld [vmem:[%s1486_s1 + $0x38] sm:$0xff]  ;;  %v1138_v2 = vld [vmem:[%s1486_s1 + $0x30] sm:$0xff]  ;;  %v1137_v4 = vld [vmem:[%s1486_s1 + $0x28] sm:$0xff]  ;;  %s1491_s29 = smov (!%p192_p3, %s900_s29), 63  ;;  %vm806_vm0 = vcmask 130048  }
   0xc   : > { %v1147_v1 = vld [vmem:[%s1486_s1 + $0x78] sm:$0xff]  ;;  %524 = vmatpush.bf16.msra.mxu0 %v1139_v0  ;;  %1148 = vmatpush.bf16.msra.mxu2 %v1139_v0  ;;  %v1146_v3 = vld [vmem:[%s1486_s1 + $0x70] sm:$0xff]  ;;  %v1145_v5 = vld [vmem:[%s1486_s1 + $0x68] sm:$0xff]  ;;  %s1099_s17 = sshll.u32 %s1491_s29, 3 }
   0xd   : > { %613 = vmatpush.bf16.msra.mxu1 %v1147_v1  ;;  %1156 = vmatpush.bf16.msra.mxu3 %v1147_v1  ;;  %v1136_v6 = vld [vmem:[%s1486_s1 + $0x20] sm:$0xff]  ;;  %v1135_v8 = vld [vmem:[%s1486_s1 + $0x18] sm:$0xff]  ;;  %v1134_v10 = vld [vmem:[%s1486_s1 + $0x10] sm:$0xff]  ;;  %s1262_s22 = scalar_lea.vmem %s1485_s0, %s1099_s17  ;;  %s1354_s10 = scalar_lea.vmem %s1489_s4, %s1099_s17 }
   0xe   : > { %v1144_v7 = vld [vmem:[%s1486_s1 + $0x60] sm:$0xff]  ;;  %v1143_v9 = vld [vmem:[%s1486_s1 + $0x58] sm:$0xff]  ;;  %v1142_v11 = vld [vmem:[%s1486_s1 + $0x50] sm:$0xff] }
   0xf   : > { %v1133_v12 = vld [vmem:[%s1486_s1 + $0x8] sm:$0xff]  ;;  %v1132_v14 = vld [vmem:[%s1486_s1] sm:$0xff]  ;;  %v915_v28 = vld [vmem:[%s1262_s22 + $0x10] sm:$0xf] }
  0x10   : > { %525 = vmatpush.bf16.msra.mxu0 %v1138_v2  ;;  %1149 = vmatpush.bf16.msra.mxu2 %v1138_v2  ;;  %v1141_v13 = vld [vmem:[%s1486_s1 + $0x48] sm:$0xff]  ;;  %v1140_v15 = vld [vmem:[%s1486_s1 + $0x40] sm:$0xff]  ;;  %v1103_v29 = vld [vmem:[%s1262_s22 + $0x14] sm:$0xf0] }
  0x11   : > { %614 = vmatpush.bf16.msra.mxu1 %v1146_v3  ;;  %1157 = vmatpush.bf16.msra.mxu3 %v1146_v3  ;;  %v907_v16 = vld [vmem:[%s1262_s22] sm:$0xf]  ;;  %v1101_v17 = vld [vmem:[%s1262_s22 + $0x4] sm:$0xf0]  ;;  %v1100_v20 = vld [vmem:[%s1262_s22 + $0x4] sm:$0xf]  ;;  %v916_v36 = vor.u32 %v1103_v29, %v915_v28 }
  0x12   : > { %v971_v18 = vld [vmem:[%s1262_s22 + $0x80] sm:$0xf]  ;;  %v1117_v19 = vld [vmem:[%s1262_s22 + $0x84] sm:$0xf0]  ;;  %v909_v21 = vld [vmem:[%s1262_s22 + $0x8] sm:$0xf0]  ;;  %v908_v24 = vor.u32 %v1101_v17, %v907_v16 }
  0x13   : > { %v1116_v22 = vld [vmem:[%s1262_s22 + $0x84] sm:$0xf]  ;;  %v973_v23 = vld [vmem:[%s1262_s22 + $0x88] sm:$0xf0]  ;;  %v972_v25 = vor.u32 %v1117_v19, %v971_v18  ;;  %v912_v26 = vor.u32 %v1100_v20, %v909_v21  ;;  %v979_v30 = vld [vmem:[%s1262_s22 + $0x90] sm:$0xf] }
  0x14   : > { %526 = vmatpush.bf16.msra.mxu0 %v1137_v4  ;;  %1150 = vmatpush.bf16.msra.mxu2 %v1137_v4  ;;  %v976_v27 = vor.u32 %v1116_v22, %v973_v23  ;;  %v1119_v31 = vld [vmem:[%s1262_s22 + $0x94] sm:$0xf0]  ;;  %v1102_v32 = vld [vmem:[%s1262_s22 + $0x14] sm:$0xf]  ;;  %v917_v33 = vld [vmem:[%s1262_s22 + $0x18] sm:$0xf0] }
  0x15   : > { %615 = vmatpush.bf16.msra.mxu1 %v1145_v5  ;;  %1158 = vmatpush.bf16.msra.mxu3 %v1145_v5  ;;  %v1118_v34 = vld [vmem:[%s1262_s22 + $0x94] sm:$0xf]  ;;  %v981_v35 = vld [vmem:[%s1262_s22 + $0x98] sm:$0xf0]  ;;  %v980_v37 = vor.u32 %v1119_v31, %v979_v30  ;;  %v920_v38 = vor.u32 %v1102_v32, %v917_v33  ;;  %v923_v40 = vld [vmem:[%s1262_s22 + $0x20] sm:$0xf] }
  0x16   : > { %v984_v39 = vor.u32 %v1118_v34, %v981_v35  ;;  %v1105_v41 = vld [vmem:[%s1262_s22 + $0x24] sm:$0xf0]  ;;  %v987_v42 = vld [vmem:[%s1262_s22 + $0xa0] sm:$0xf]  ;;  %v1104_v44 = vld [vmem:[%s1262_s22 + $0x24] sm:$0xf] }
  0x17   : > { %v1121_v43 = vld [vmem:[%s1262_s22 + $0xa4] sm:$0xf0]  ;;  %v925_v45 = vld [vmem:[%s1262_s22 + $0x28] sm:$0xf0]  ;;  %v1120_v46 = vld [vmem:[%s1262_s22 + $0xa4] sm:$0xf]  ;;  %v924_v48 = vor.u32 %v1105_v41, %v923_v40 }
  0x18   : > { %527 = vmatpush.bf16.msra.mxu0 %v1136_v6  ;;  %1151 = vmatpush.bf16.msra.mxu2 %v1136_v6  ;;  %v989_v47 = vld [vmem:[%s1262_s22 + $0xa8] sm:$0xf0]  ;;  %v988_v49 = vor.u32 %v1121_v43, %v987_v42  ;;  %v928_v50 = vor.u32 %v1104_v44, %v925_v45  ;;  %v931_v52 = vld [vmem:[%s1262_s22 + $0x30] sm:$0xf]  ;;  %v1107_v53 = vld [vmem:[%s1262_s22 + $0x34] sm:$0xf0] }
  0x19   : > { %616 = vmatpush.bf16.msra.mxu1 %v1144_v7  ;;  %1159 = vmatpush.bf16.msra.mxu3 %v1144_v7  ;;  %v992_v51 = vor.u32 %v1120_v46, %v989_v47  ;;  %v995_v54 = vld [vmem:[%s1262_s22 + $0xb0] sm:$0xf]  ;;  %v1123_v55 = vld [vmem:[%s1262_s22 + $0xb4] sm:$0xf0]  ;;  %v1106_v56 = vld [vmem:[%s1262_s22 + $0x34] sm:$0xf]  ;;  %v932_v60 = vor.u32 %v1107_v53, %v931_v52 }
  0x1a   : > { %v933_v57 = vld [vmem:[%s1262_s22 + $0x38] sm:$0xf0]  ;;  %v1122_v58 = vld [vmem:[%s1262_s22 + $0xb4] sm:$0xf]  ;;  %v996_v61 = vor.u32 %v1123_v55, %v995_v54  ;;  %v939_v0 = vld [vmem:[%s1262_s22 + $0x40] sm:$0xf] }
  0x1b   : > { %v997_v59 = vld [vmem:[%s1262_s22 + $0xb8] sm:$0xf0]  ;;  %v936_v62 = vor.u32 %v1106_v56, %v933_v57  ;;  %v1109_v1 = vld [vmem:[%s1262_s22 + $0x44] sm:$0xf0]  ;;  %v1003_v2 = vld [vmem:[%s1262_s22 + $0xc0] sm:$0xf] }
  0x1c   : > { %528 = vmatpush.bf16.msra.mxu0 %v1135_v8  ;;  %1152 = vmatpush.bf16.msra.mxu2 %v1135_v8  ;;  %v1000_v63 = vor.u32 %v1122_v58, %v997_v59  ;;  %v1125_v3 = vld [vmem:[%s1262_s22 + $0xc4] sm:$0xf0]  ;;  %v1108_v4 = vld [vmem:[%s1262_s22 + $0x44] sm:$0xf]  ;;  %v941_v5 = vld [vmem:[%s1262_s22 + $0x48] sm:$0xf0]  ;;  %v940_v8 = vor.u32 %v1109_v1, %v939_v0 }
  0x1d   : > { %617 = vmatpush.bf16.msra.mxu1 %v1143_v9  ;;  %1160 = vmatpush.bf16.msra.mxu3 %v1143_v9  ;;  %v1124_v6 = vld [vmem:[%s1262_s22 + $0xc4] sm:$0xf]  ;;  %v1005_v7 = vld [vmem:[%s1262_s22 + $0xc8] sm:$0xf0]  ;;  %v1004_v9 = vor.u32 %v1125_v3, %v1003_v2  ;;  %v1110_v16 = vld [vmem:[%s1262_s22 + $0x54] sm:$0xf] }
  0x1e   : > { %v949_v17 = vld [vmem:[%s1262_s22 + $0x58] sm:$0xf0]  ;;  %v1126_v18 = vld [vmem:[%s1262_s22 + $0xd4] sm:$0xf]  ;;  %v1112_v28 = vld [vmem:[%s1262_s22 + $0x64] sm:$0xf] }
  0x1f   : > { %v1013_v19 = vld [vmem:[%s1262_s22 + $0xd8] sm:$0xf0]  ;;  %v952_v22 = vor.u32 %v1110_v16, %v949_v17  ;;  %v957_v29 = vld [vmem:[%s1262_s22 + $0x68] sm:$0xf0]  ;;  %v1128_v30 = vld [vmem:[%s1262_s22 + $0xe4] sm:$0xf] }
  0x20   : > { %529 = vmatpush.bf16.msra.mxu0 %v1134_v10  ;;  %1153 = vmatpush.bf16.msra.mxu2 %v1134_v10  ;;  %v944_v10 = vor.u32 %v1108_v4, %v941_v5  ;;  %v1016_v23 = vor.u32 %v1126_v18, %v1013_v19  ;;  %v1021_v31 = vld [vmem:[%s1262_s22 + $0xe8] sm:$0xf0]  ;;  %v960_v34 = vor.u32 %v1112_v28, %v957_v29  ;;  %v1114_v40 = vld [vmem:[%s1262_s22 + $0x74] sm:$0xf]  ;;  %v965_v41 = vld [vmem:[%s1262_s22 + $0x78] sm:$0xf0] }
  0x21   : > { %618 = vmatpush.bf16.msra.mxu1 %v1142_v11  ;;  %1161 = vmatpush.bf16.msra.mxu3 %v1142_v11  ;;  %v1008_v11 = vor.u32 %v1124_v6, %v1005_v7  ;;  %v1024_v35 = vor.u32 %v1128_v30, %v1021_v31  ;;  %v1130_v42 = vld [vmem:[%s1262_s22 + $0xf4] sm:$0xf]  ;;  %v1029_v43 = vld [vmem:[%s1262_s22 + $0xf8] sm:$0xf0]  ;;  %v968_v46 = vor.u32 %v1114_v40, %v965_v41  ;;  %v1345_v52 = vld [vmem:[%s1488_s3] ss:$0 sm:$0xff] }
  0x22   : > { %v1032_v47 = vor.u32 %v1130_v42, %v1029_v43 }
  0x24   : > { %530 = vmatpush.bf16.msra.mxu0 %v1133_v12  ;;  %1154 = vmatpush.bf16.msra.mxu2 %v1133_v12  ;;  %v947_v12 = vld [vmem:[%s1262_s22 + $0x50] sm:$0xf] }
  0x25   : > { %619 = vmatpush.bf16.msra.mxu1 %v1141_v13  ;;  %1162 = vmatpush.bf16.msra.mxu3 %v1141_v13  ;;  %v1111_v13 = vld [vmem:[%s1262_s22 + $0x54] sm:$0xf0] }
  0x26   : > { %v948_v20 = vor.u32 %v1111_v13, %v947_v12 }
  0x28   : > { %531 = vmatpush.bf16.msra.mxu0 %v1132_v14  ;;  %1155 = vmatpush.bf16.msra.mxu2 %v1132_v14  ;;  %v1011_v14 = vld [vmem:[%s1262_s22 + $0xd0] sm:$0xf] }
  0x29   : > { %620 = vmatpush.bf16.msra.mxu1 %v1140_v15  ;;  %1163 = vmatpush.bf16.msra.mxu3 %v1140_v15  ;;  %v1127_v15 = vld [vmem:[%s1262_s22 + $0xd4] sm:$0xf0] }
  0x2a   : > { %v1012_v21 = vor.u32 %v1127_v15, %v1011_v14 }
  0x2b   : > { %532 = vmatmul.bf16.vlgmr.msra.gmra.mxu0 %v908_v24  ;;  %572 = vmatmul.bf16.vlgmr.msra.gmra.mxu2 %v972_v25  ;;  %v955_v24 = vld [vmem:[%s1262_s22 + $0x60] sm:$0xf]  ;;  %v1113_v25 = vld [vmem:[%s1262_s22 + $0x64] sm:$0xf0] }
  0x2c   : > { %621 = vmatmul.bf16.vlgmr.msra.gmra.mxu1 %v912_v26  ;;  %661 = vmatmul.bf16.vlgmr.msra.gmra.mxu3 %v976_v27  ;;  %v1019_v26 = vld [vmem:[%s1262_s22 + $0xe0] sm:$0xf]  ;;  %v1129_v27 = vld [vmem:[%s1262_s22 + $0xe4] sm:$0xf0]  ;;  %v956_v32 = vor.u32 %v1113_v25, %v955_v24 }
  0x2d   : > { %v1020_v33 = vor.u32 %v1129_v27, %v1019_v26 }
  0x3b   : > { %537 = vmatmul.bf16.gmra.mxu0 %v916_v36  ;;  %577 = vmatmul.bf16.gmra.mxu2 %v980_v37  ;;  %v963_v36 = vld [vmem:[%s1262_s22 + $0x70] sm:$0xf]  ;;  %v1115_v37 = vld [vmem:[%s1262_s22 + $0x74] sm:$0xf0] }
  0x3c   : > { %626 = vmatmul.bf16.gmra.mxu1 %v920_v38  ;;  %666 = vmatmul.bf16.gmra.mxu3 %v984_v39  ;;  %v1027_v38 = vld [vmem:[%s1262_s22 + $0xf0] sm:$0xf]  ;;  %v1131_v39 = vld [vmem:[%s1262_s22 + $0xf4] sm:$0xf0]  ;;  %v964_v44 = vor.u32 %v1115_v37, %v963_v36 }
  0x3d   : > { %v1028_v45 = vor.u32 %v1131_v39, %v1027_v38 }
  0x4b   : > { %542 = vmatmul.bf16.gmra.mxu0 %v924_v48  ;;  %582 = vmatmul.bf16.gmra.mxu2 %v988_v49  ;;  %v1340_v49 = vld [vmem:[%s1487_s2] ss:$0 sm:$0xff] }
  0x4c   : > { %631 = vmatmul.bf16.gmra.mxu1 %v928_v50  ;;  %671 = vmatmul.bf16.gmra.mxu3 %v992_v51 }
  0x5b   : > { %547 = vmatmul.bf16.gmra.mxu0 %v932_v60  ;;  %587 = vmatmul.bf16.gmra.mxu2 %v996_v61 }
  0x5c   : > { %636 = vmatmul.bf16.gmra.mxu1 %v936_v62  ;;  %676 = vmatmul.bf16.gmra.mxu3 %v1000_v63 }
  0x6b   : > { %552 = vmatmul.bf16.gmra.mxu0 %v940_v8  ;;  %592 = vmatmul.bf16.gmra.mxu2 %v1004_v9 }
  0x6c   : > { %641 = vmatmul.bf16.gmra.mxu1 %v944_v10  ;;  %681 = vmatmul.bf16.gmra.mxu3 %v1008_v11 }
  0x7b   : > { %557 = vmatmul.bf16.gmra.mxu0 %v948_v20  ;;  %597 = vmatmul.bf16.gmra.mxu2 %v1012_v21 }
  0x7c   : > { %646 = vmatmul.bf16.gmra.mxu1 %v952_v22  ;;  %686 = vmatmul.bf16.gmra.mxu3 %v1016_v23 }
  0x8b   : > { %562 = vmatmul.bf16.gmra.mxu0 %v956_v32  ;;  %602 = vmatmul.bf16.gmra.mxu2 %v1020_v33 }
  0x8c   : > { %651 = vmatmul.bf16.gmra.mxu1 %v960_v34  ;;  %691 = vmatmul.bf16.gmra.mxu3 %v1024_v35 }
  0x9b   : > { %567 = vmatmul.bf16.gmra.mxu0 %v964_v44  ;;  %607 = vmatmul.bf16.gmra.mxu2 %v1028_v45 }
  0x9c   : > { %656 = vmatmul.bf16.gmra.mxu1 %v968_v46  ;;  %696 = vmatmul.bf16.gmra.mxu3 %v1032_v47 }
  0xa8   : > { %v533_v48 = vpop.f32.mrf.mxu0 }
  0xa9   : > { %v622_v50 = vpop.f32.mrf.mxu1 }
  0xaa   : > { %v623_v51 = vadd.f32 %v622_v50, %v533_v48 }
  0xac   : > { %v706_v53 = vmul.f32 %v1340_v49, %v623_v51 }
  0xae   : > { %v742_v54 = vadd.f32 %v1345_v52, %v706_v53  ;;  %v573_v55 = vpop.f32.mrf.mxu2 }
  0xaf   : > { %v662_v56 = vpop.f32.mrf.mxu3 }
  0xb0   : > { %v774_v57 = vmax.f32 %v742_v54, 0.0  ;;  %v663_v58 = vadd.f32 %v662_v56, %v573_v55  ;;  %v535_v59 = vpop.f32.mrf.mxu0 }
  0xb1   : > { %v624_v60 = vpop.f32.mrf.mxu1 }
  0xb2   : > { %807 = vst.msk [vmem:[%s1354_s10] sm:$0xff] %vm806_vm0, %v774_v57  ;;  %v722_v61 = vmul.f32 %v1340_v49, %v663_v58  ;;  %v625_v62 = vadd.f32 %v624_v60, %v535_v59 }
  0xb4   : > { %v758_v63 = vadd.f32 %v1345_v52, %v722_v61  ;;  %v707_v0 = vmul.f32 %v1340_v49, %v625_v62 }
  0xb6   : > { %v790_v1 = vmax.f32 %v758_v63, 0.0  ;;  %v743_v2 = vadd.f32 %v1345_v52, %v707_v0  ;;  %v575_v3 = vpop.f32.mrf.mxu2 }
  0xb7   : > { %v664_v4 = vpop.f32.mrf.mxu3 }
  0xb8   : > { %823 = vst.msk [vmem:[%s1354_s10 + $0x80] sm:$0xff] %vm806_vm0, %v790_v1  ;;  %v775_v5 = vmax.f32 %v743_v2, 0.0  ;;  %v665_v6 = vadd.f32 %v664_v4, %v575_v3  ;;  %v538_v7 = vpop.f32.mrf.mxu0 }
  0xb9   : > { %v627_v8 = vpop.f32.mrf.mxu1 }
  0xba   : > { %808 = vst.msk [vmem:[%s1354_s10 + $0x8] sm:$0xff] %vm806_vm0, %v775_v5  ;;  %v723_v9 = vmul.f32 %v1340_v49, %v665_v6  ;;  %v628_v10 = vadd.f32 %v627_v8, %v538_v7 }
  0xbc   : > { %v759_v11 = vadd.f32 %v1345_v52, %v723_v9  ;;  %v708_v12 = vmul.f32 %v1340_v49, %v628_v10 }
  0xbe   : > { %v791_v13 = vmax.f32 %v759_v11, 0.0  ;;  %v744_v14 = vadd.f32 %v1345_v52, %v708_v12  ;;  %v578_v15 = vpop.f32.mrf.mxu2 }
  0xbf   : > { %v667_v16 = vpop.f32.mrf.mxu3 }
  0xc0   : > { %824 = vst.msk [vmem:[%s1354_s10 + $0x88] sm:$0xff] %vm806_vm0, %v791_v13  ;;  %v776_v17 = vmax.f32 %v744_v14, 0.0  ;;  %v668_v18 = vadd.f32 %v667_v16, %v578_v15  ;;  %v540_v19 = vpop.f32.mrf.mxu0 }
  0xc1   : > { %v629_v20 = vpop.f32.mrf.mxu1 }
  0xc2   : > { %809 = vst.msk [vmem:[%s1354_s10 + $0x10] sm:$0xff] %vm806_vm0, %v776_v17  ;;  %v724_v21 = vmul.f32 %v1340_v49, %v668_v18  ;;  %v630_v22 = vadd.f32 %v629_v20, %v540_v19 }
  0xc4   : > { %v760_v23 = vadd.f32 %v1345_v52, %v724_v21  ;;  %v709_v24 = vmul.f32 %v1340_v49, %v630_v22 }
  0xc6   : > { %v792_v25 = vmax.f32 %v760_v23, 0.0  ;;  %v745_v26 = vadd.f32 %v1345_v52, %v709_v24  ;;  %v580_v27 = vpop.f32.mrf.mxu2 }
  0xc7   : > { %v669_v28 = vpop.f32.mrf.mxu3 }
  0xc8   : > { %825 = vst.msk [vmem:[%s1354_s10 + $0x90] sm:$0xff] %vm806_vm0, %v792_v25  ;;  %v777_v29 = vmax.f32 %v745_v26, 0.0  ;;  %v670_v30 = vadd.f32 %v669_v28, %v580_v27  ;;  %v543_v31 = vpop.f32.mrf.mxu0 }
  0xc9   : > { %v632_v32 = vpop.f32.mrf.mxu1 }
  0xca   : > { %810 = vst.msk [vmem:[%s1354_s10 + $0x18] sm:$0xff] %vm806_vm0, %v777_v29  ;;  %v725_v33 = vmul.f32 %v1340_v49, %v670_v30  ;;  %v633_v34 = vadd.f32 %v632_v32, %v543_v31 }
  0xcc   : > { %v761_v35 = vadd.f32 %v1345_v52, %v725_v33  ;;  %v710_v36 = vmul.f32 %v1340_v49, %v633_v34 }
  0xce   : > { %v793_v37 = vmax.f32 %v761_v35, 0.0  ;;  %v746_v38 = vadd.f32 %v1345_v52, %v710_v36  ;;  %v583_v39 = vpop.f32.mrf.mxu2 }
  0xcf   : > { %v672_v40 = vpop.f32.mrf.mxu3 }
  0xd0   : > { %826 = vst.msk [vmem:[%s1354_s10 + $0x98] sm:$0xff] %vm806_vm0, %v793_v37  ;;  %v778_v41 = vmax.f32 %v746_v38, 0.0  ;;  %v673_v42 = vadd.f32 %v672_v40, %v583_v39  ;;  %v545_v43 = vpop.f32.mrf.mxu0 }
  0xd1   : > { %v634_v44 = vpop.f32.mrf.mxu1 }
  0xd2   : > { %811 = vst.msk [vmem:[%s1354_s10 + $0x20] sm:$0xff] %vm806_vm0, %v778_v41  ;;  %v726_v45 = vmul.f32 %v1340_v49, %v673_v42  ;;  %v635_v46 = vadd.f32 %v634_v44, %v545_v43 }
  0xd4   : > { %v762_v47 = vadd.f32 %v1345_v52, %v726_v45  ;;  %v711_v48 = vmul.f32 %v1340_v49, %v635_v46 }
  0xd6   : > { %v794_v50 = vmax.f32 %v762_v47, 0.0  ;;  %v747_v51 = vadd.f32 %v1345_v52, %v711_v48  ;;  %v585_v53 = vpop.f32.mrf.mxu2 }
  0xd7   : > { %v674_v54 = vpop.f32.mrf.mxu3 }
  0xd8   : > { %827 = vst.msk [vmem:[%s1354_s10 + $0xa0] sm:$0xff] %vm806_vm0, %v794_v50  ;;  %v779_v55 = vmax.f32 %v747_v51, 0.0  ;;  %v675_v56 = vadd.f32 %v674_v54, %v585_v53  ;;  %v548_v57 = vpop.f32.mrf.mxu0 }
  0xd9   : > { %v637_v58 = vpop.f32.mrf.mxu1 }
  0xda   : > { %812 = vst.msk [vmem:[%s1354_s10 + $0x28] sm:$0xff] %vm806_vm0, %v779_v55  ;;  %v727_v59 = vmul.f32 %v1340_v49, %v675_v56  ;;  %v638_v60 = vadd.f32 %v637_v58, %v548_v57 }
  0xdc   : > { %v763_v61 = vadd.f32 %v1345_v52, %v727_v59  ;;  %v712_v62 = vmul.f32 %v1340_v49, %v638_v60 }
  0xde   : > { %v795_v63 = vmax.f32 %v763_v61, 0.0  ;;  %v748_v0 = vadd.f32 %v1345_v52, %v712_v62  ;;  %v588_v1 = vpop.f32.mrf.mxu2 }
  0xdf   : > { %v677_v2 = vpop.f32.mrf.mxu3 }
  0xe0   : > { %828 = vst.msk [vmem:[%s1354_s10 + $0xa8] sm:$0xff] %vm806_vm0, %v795_v63  ;;  %v780_v3 = vmax.f32 %v748_v0, 0.0  ;;  %v678_v4 = vadd.f32 %v677_v2, %v588_v1  ;;  %v550_v5 = vpop.f32.mrf.mxu0 }
  0xe1   : > { %v639_v6 = vpop.f32.mrf.mxu1 }
  0xe2   : > { %813 = vst.msk [vmem:[%s1354_s10 + $0x30] sm:$0xff] %vm806_vm0, %v780_v3  ;;  %v728_v7 = vmul.f32 %v1340_v49, %v678_v4  ;;  %v640_v8 = vadd.f32 %v639_v6, %v550_v5 }
  0xe4   : > { %v764_v9 = vadd.f32 %v1345_v52, %v728_v7  ;;  %v713_v10 = vmul.f32 %v1340_v49, %v640_v8 }
  0xe6   : > { %v796_v11 = vmax.f32 %v764_v9, 0.0  ;;  %v749_v12 = vadd.f32 %v1345_v52, %v713_v10  ;;  %v590_v13 = vpop.f32.mrf.mxu2 }
  0xe7   : > { %v679_v14 = vpop.f32.mrf.mxu3 }
  0xe8   : > { %829 = vst.msk [vmem:[%s1354_s10 + $0xb0] sm:$0xff] %vm806_vm0, %v796_v11  ;;  %v781_v15 = vmax.f32 %v749_v12, 0.0  ;;  %v680_v16 = vadd.f32 %v679_v14, %v590_v13  ;;  %v553_v17 = vpop.f32.mrf.mxu0 }
  0xe9   : > { %v642_v18 = vpop.f32.mrf.mxu1 }
  0xea   : > { %814 = vst.msk [vmem:[%s1354_s10 + $0x38] sm:$0xff] %vm806_vm0, %v781_v15  ;;  %v729_v19 = vmul.f32 %v1340_v49, %v680_v16  ;;  %v643_v20 = vadd.f32 %v642_v18, %v553_v17 }
  0xec   : > { %v765_v21 = vadd.f32 %v1345_v52, %v729_v19  ;;  %v714_v22 = vmul.f32 %v1340_v49, %v643_v20 }
  0xee   : > { %v797_v23 = vmax.f32 %v765_v21, 0.0  ;;  %v750_v24 = vadd.f32 %v1345_v52, %v714_v22  ;;  %v593_v25 = vpop.f32.mrf.mxu2 }
  0xef   : > { %v682_v26 = vpop.f32.mrf.mxu3 }
  0xf0   : > { %830 = vst.msk [vmem:[%s1354_s10 + $0xb8] sm:$0xff] %vm806_vm0, %v797_v23  ;;  %v782_v27 = vmax.f32 %v750_v24, 0.0  ;;  %v683_v28 = vadd.f32 %v682_v26, %v593_v25  ;;  %v555_v29 = vpop.f32.mrf.mxu0 }
  0xf1   : > { %v644_v30 = vpop.f32.mrf.mxu1 }
  0xf2   : > { %815 = vst.msk [vmem:[%s1354_s10 + $0x40] sm:$0xff] %vm806_vm0, %v782_v27  ;;  %v730_v31 = vmul.f32 %v1340_v49, %v683_v28  ;;  %v645_v32 = vadd.f32 %v644_v30, %v555_v29 }
  0xf4   : > { %v766_v33 = vadd.f32 %v1345_v52, %v730_v31  ;;  %v715_v34 = vmul.f32 %v1340_v49, %v645_v32 }
  0xf6   : > { %v798_v35 = vmax.f32 %v766_v33, 0.0  ;;  %v751_v36 = vadd.f32 %v1345_v52, %v715_v34  ;;  %v595_v37 = vpop.f32.mrf.mxu2 }
  0xf7   : > { %v684_v38 = vpop.f32.mrf.mxu3 }
  0xf8   : > { %831 = vst.msk [vmem:[%s1354_s10 + $0xc0] sm:$0xff] %vm806_vm0, %v798_v35  ;;  %v783_v39 = vmax.f32 %v751_v36, 0.0  ;;  %v685_v40 = vadd.f32 %v684_v38, %v595_v37  ;;  %v558_v41 = vpop.f32.mrf.mxu0 }
  0xf9   : > { %v647_v42 = vpop.f32.mrf.mxu1 }
  0xfa   : > { %816 = vst.msk [vmem:[%s1354_s10 + $0x48] sm:$0xff] %vm806_vm0, %v783_v39  ;;  %v731_v43 = vmul.f32 %v1340_v49, %v685_v40  ;;  %v648_v44 = vadd.f32 %v647_v42, %v558_v41 }
  0xfc   : > { %v767_v45 = vadd.f32 %v1345_v52, %v731_v43  ;;  %v716_v46 = vmul.f32 %v1340_v49, %v648_v44 }
  0xfe   : > { %v799_v47 = vmax.f32 %v767_v45, 0.0  ;;  %v752_v48 = vadd.f32 %v1345_v52, %v716_v46  ;;  %v598_v50 = vpop.f32.mrf.mxu2 }
  0xff   : > { %v687_v51 = vpop.f32.mrf.mxu3 }
 0x100   : > { %832 = vst.msk [vmem:[%s1354_s10 + $0xc8] sm:$0xff] %vm806_vm0, %v799_v47  ;;  %v784_v53 = vmax.f32 %v752_v48, 0.0  ;;  %v688_v54 = vadd.f32 %v687_v51, %v598_v50  ;;  %v560_v55 = vpop.f32.mrf.mxu0 }
 0x101   : > { %v649_v56 = vpop.f32.mrf.mxu1 }
 0x102   : > { %817 = vst.msk [vmem:[%s1354_s10 + $0x50] sm:$0xff] %vm806_vm0, %v784_v53  ;;  %v732_v57 = vmul.f32 %v1340_v49, %v688_v54  ;;  %v650_v58 = vadd.f32 %v649_v56, %v560_v55 }
 0x104   : > { %v768_v59 = vadd.f32 %v1345_v52, %v732_v57  ;;  %v717_v60 = vmul.f32 %v1340_v49, %v650_v58 }
 0x106   : > { %v800_v61 = vmax.f32 %v768_v59, 0.0  ;;  %v753_v62 = vadd.f32 %v1345_v52, %v717_v60  ;;  %v600_v63 = vpop.f32.mrf.mxu2 }
 0x107   : > { %v689_v0 = vpop.f32.mrf.mxu3 }
 0x108   : > { %833 = vst.msk [vmem:[%s1354_s10 + $0xd0] sm:$0xff] %vm806_vm0, %v800_v61  ;;  %v785_v1 = vmax.f32 %v753_v62, 0.0  ;;  %v690_v2 = vadd.f32 %v689_v0, %v600_v63  ;;  %v563_v3 = vpop.f32.mrf.mxu0 }
 0x109   : > { %v652_v4 = vpop.f32.mrf.mxu1 }
 0x10a   : > { %818 = vst.msk [vmem:[%s1354_s10 + $0x58] sm:$0xff] %vm806_vm0, %v785_v1  ;;  %v733_v5 = vmul.f32 %v1340_v49, %v690_v2  ;;  %v653_v6 = vadd.f32 %v652_v4, %v563_v3 }
 0x10c   : > { %v769_v7 = vadd.f32 %v1345_v52, %v733_v5  ;;  %v718_v8 = vmul.f32 %v1340_v49, %v653_v6 }
 0x10e   : > { %v801_v9 = vmax.f32 %v769_v7, 0.0  ;;  %v754_v10 = vadd.f32 %v1345_v52, %v718_v8  ;;  %v603_v11 = vpop.f32.mrf.mxu2 }
 0x10f   : > { %v692_v12 = vpop.f32.mrf.mxu3 }
 0x110   : > { %834 = vst.msk [vmem:[%s1354_s10 + $0xd8] sm:$0xff] %vm806_vm0, %v801_v9  ;;  %v786_v13 = vmax.f32 %v754_v10, 0.0  ;;  %v693_v14 = vadd.f32 %v692_v12, %v603_v11  ;;  %v565_v15 = vpop.f32.mrf.mxu0 }
 0x111   : > { %v654_v16 = vpop.f32.mrf.mxu1 }
 0x112   : > { %819 = vst.msk [vmem:[%s1354_s10 + $0x60] sm:$0xff] %vm806_vm0, %v786_v13  ;;  %v734_v17 = vmul.f32 %v1340_v49, %v693_v14  ;;  %v655_v18 = vadd.f32 %v654_v16, %v565_v15 }
 0x114   : > { %v770_v19 = vadd.f32 %v1345_v52, %v734_v17  ;;  %v719_v20 = vmul.f32 %v1340_v49, %v655_v18 }
 0x116   : > { %v802_v21 = vmax.f32 %v770_v19, 0.0  ;;  %v755_v22 = vadd.f32 %v1345_v52, %v719_v20  ;;  %v605_v23 = vpop.f32.mrf.mxu2 }
 0x117   : > { %v694_v24 = vpop.f32.mrf.mxu3 }
 0x118   : > { %835 = vst.msk [vmem:[%s1354_s10 + $0xe0] sm:$0xff] %vm806_vm0, %v802_v21  ;;  %v787_v25 = vmax.f32 %v755_v22, 0.0  ;;  %v695_v26 = vadd.f32 %v694_v24, %v605_v23  ;;  %v568_v27 = vpop.f32.mrf.mxu0 }
 0x119   : > { %v657_v28 = vpop.f32.mrf.mxu1 }
 0x11a   : > { %820 = vst.msk [vmem:[%s1354_s10 + $0x68] sm:$0xff] %vm806_vm0, %v787_v25  ;;  %v735_v29 = vmul.f32 %v1340_v49, %v695_v26  ;;  %v658_v30 = vadd.f32 %v657_v28, %v568_v27 }
 0x11c   : > { %v771_v31 = vadd.f32 %v1345_v52, %v735_v29  ;;  %v720_v32 = vmul.f32 %v1340_v49, %v658_v30 }
 0x11e   : > { %v803_v33 = vmax.f32 %v771_v31, 0.0  ;;  %v756_v34 = vadd.f32 %v1345_v52, %v720_v32  ;;  %v608_v35 = vpop.f32.mrf.mxu2 }
 0x11f   : > { %v697_v36 = vpop.f32.mrf.mxu3 }
 0x120   : > { %836 = vst.msk [vmem:[%s1354_s10 + $0xe8] sm:$0xff] %vm806_vm0, %v803_v33  ;;  %v788_v37 = vmax.f32 %v756_v34, 0.0  ;;  %v698_v38 = vadd.f32 %v697_v36, %v608_v35  ;;  %v570_v39 = vpop.f32.mrf.mxu0 }
 0x121   : > { %v659_v40 = vpop.f32.mrf.mxu1 }
 0x122   : > { %821 = vst.msk [vmem:[%s1354_s10 + $0x70] sm:$0xff] %vm806_vm0, %v788_v37  ;;  %v736_v41 = vmul.f32 %v1340_v49, %v698_v38  ;;  %v660_v42 = vadd.f32 %v659_v40, %v570_v39 }
 0x124   : > { %v772_v43 = vadd.f32 %v1345_v52, %v736_v41  ;;  %v721_v44 = vmul.f32 %v1340_v49, %v660_v42 }
 0x126   : > { %v804_v45 = vmax.f32 %v772_v43, 0.0  ;;  %v757_v46 = vadd.f32 %v1345_v52, %v721_v44  ;;  %v610_v47 = vpop.f32.mrf.mxu2 }
 0x127   : > { %v699_v48 = vpop.f32.mrf.mxu3 }
 0x128   : > { %837 = vst.msk [vmem:[%s1354_s10 + $0xf0] sm:$0xff] %vm806_vm0, %v804_v45  ;;  %v789_v50 = vmax.f32 %v757_v46, 0.0  ;;  %v700_v51 = vadd.f32 %v699_v48, %v610_v47 }
 0x12a   : > { %822 = vst.msk [vmem:[%s1354_s10 + $0x78] sm:$0xff] %vm806_vm0, %v789_v50  ;;  %v737_v53 = vmul.f32 %v1340_v49, %v700_v51 }
 0x12c   : > { %v773_v54 = vadd.f32 %v1345_v52, %v737_v53 }
 0x12e   : > { %v805_v55 = vmax.f32 %v773_v54, 0.0 }
 0x130   : > { %838 = vst.msk [vmem:[%s1354_s10 + $0xf8] sm:$0xff] %vm806_vm0, %v805_v55 }
 0x131 PF: > { %s14_s15 = sadd.s32 1, %s1180_s15  }
 0x132   : > { %p11_p4 = scmp.ge.s32.totalorder %s14_s15, 4  }
 0x134   :  { %13 = sbr.rel (!%p11_p4) target bundleno = 1 (0x1), region = 66 }

// kernel: encoder_forward.10
= control target key start
LH: loop header
LB: loop body
LE: loop exit
PB: predicated region body
PF: predicated region fallthrough
CT: control target
= control target key end

     0   :  { %s843_s15 = smov 0   ;;  %s1026_s0 = inlined_call_operand.vmem [shape: bf16[512,16], index: 0, kind: input, shape index: {}]   ;;  %s1027_s1 = inlined_call_operand.vmem [shape: bf16[16,32], index: 1, kind: input, shape index: {}]   ;;  %s1028_s2 = inlined_call_operand.vmem [shape: f32[1,32], index: 2, kind: input, shape index: {}]   ;;  %s1029_s3 = inlined_call_operand.vmem [shape: f32[1,32], index: 3, kind: input, shape index: {}]   ;;  %s1030_s4 = inlined_call_operand.vmem [shape: bf16[512,32], index: 4, kind: output, shape index: {}]  }
   0x1 LB: > { %s685_s16 = sadd.s32 4294967295, %s816_s15   ;;  %p689_p0 = scmp.ge.s32.totalorder %s816_s15, 1  ;;  %s816_s15 = sphi %s843_s15, %s14_s15  }
   0x2   : > { %p163_p1 = scmp.lt.s32.totalorder %s816_s15, 3 }
   0x4   : > { %p164_p2 = pnand %p689_p0, %p163_p1 }
   0x5   : > { %s690_s19 = sshll.u32 (!%p164_p2), %s685_s16, 5 }
   0x6   : > { %167 = sbr.rel (%p164_p2) target bundleno = 215 (0xd7), region = 36  ;;  %p190_p3 = scmp.lt.s32.totalorder (!%p164_p2), %s690_s19, 63 }
   0xb   : > { %v796_v0 = vld [vmem:[%s1027_s1] sm:$0xff]  ;;  %s1032_s19 = smov (!%p190_p3, %s690_s19), 63  ;;  %vm322_vm0 = vcmask 130048   ;;  %vm596_vm1 = vcmask 257024  }
   0xc   : > { %378 = vmatpush.bf16.msra.mxu0 %v796_v0  ;;  %797 = vmatpush.bf16.msra.mxu1 %v796_v0  ;;  %s691_s20 = sshll.u32 %s1032_s19, 2  ;;  %v881_v17 = vld [vmem:[%s1028_s2] ss:$0 sm:$0xff] }
   0xd   : > { %798 = vmatpush.bf16.msra.mxu2 %v796_v0  ;;  %799 = vmatpush.bf16.msra.mxu3 %v796_v0  ;;  %s193_s23 = scalar_lea.vmem %s1026_s0, %s691_s20  ;;  %v886_v18 = vld [vmem:[%s1029_s3] ss:$0 sm:$0xff]  ;;  %s897_s30 = scalar_lea.vmem %s1030_s4, %s691_s20 }
   0xe   : > { %v780_v1 = vld [vmem:[%s193_s23] sm:$0xff]  ;;  %v781_v5 = vld [vmem:[%s193_s23 + $0x8] sm:$0xff]  ;;  %v782_v9 = vld [vmem:[%s193_s23 + $0x10] sm:$0xff] }
   0xf   : > { %v784_v2 = vld [vmem:[%s193_s23 + $0x20] sm:$0xff]  ;;  %762 = vmatmul.msk.bf16.vlgmr.msra.gmra.mxu0 %vm322_vm0, %v780_v1  ;;  %v785_v6 = vld [vmem:[%s193_s23 + $0x28] sm:$0xff]  ;;  %v786_v10 = vld [vmem:[%s193_s23 + $0x30] sm:$0xff] }
  0x10   : > { %v788_v3 = vld [vmem:[%s193_s23 + $0x40] sm:$0xff]  ;;  %766 = vmatmul.msk.bf16.vlgmr.msra.gmra.mxu1 %vm322_vm0, %v784_v2  ;;  %v789_v7 = vld [vmem:[%s193_s23 + $0x48] sm:$0xff]  ;;  %v790_v11 = vld [vmem:[%s193_s23 + $0x50] sm:$0xff] }
  0x11   : > { %v792_v4 = vld [vmem:[%s193_s23 + $0x60] sm:$0xff]  ;;  %770 = vmatmul.msk.bf16.vlgmr.msra.gmra.mxu2 %vm322_vm0, %v788_v3  ;;  %v793_v8 = vld [vmem:[%s193_s23 + $0x68] sm:$0xff]  ;;  %v794_v12 = vld [vmem:[%s193_s23 + $0x70] sm:$0xff] }
  0x12   : > { %774 = vmatmul.msk.bf16.vlgmr.msra.gmra.mxu3 %vm322_vm0, %v792_v4  ;;  %v783_v13 = vld [vmem:[%s193_s23 + $0x18] sm:$0xff] }
  0x13   : > { %v787_v14 = vld [vmem:[%s193_s23 + $0x38] sm:$0xff] }
  0x14   : > { %v791_v15 = vld [vmem:[%s193_s23 + $0x58] sm:$0xff] }
  0x15   : > { %v795_v16 = vld [vmem:[%s193_s23 + $0x78] sm:$0xff] }
  0x1f   : > { %763 = vmatmul.msk.bf16.gmra.mxu0 %vm322_vm0, %v781_v5 }
  0x20   : > { %767 = vmatmul.msk.bf16.gmra.mxu1 %vm322_vm0, %v785_v6 }
  0x21   : > { %771 = vmatmul.msk.bf16.gmra.mxu2 %vm322_vm0, %v789_v7 }
  0x22   : > { %775 = vmatmul.msk.bf16.gmra.mxu3 %vm322_vm0, %v793_v8 }
  0x2f   : > { %764 = vmatmul.msk.bf16.gmra.mxu0 %vm322_vm0, %v782_v9 }
  0x30   : > { %768 = vmatmul.msk.bf16.gmra.mxu1 %vm322_vm0, %v786_v10 }
  0x31   : > { %772 = vmatmul.msk.bf16.gmra.mxu2 %vm322_vm0, %v790_v11 }
  0x32   : > { %776 = vmatmul.msk.bf16.gmra.mxu3 %vm322_vm0, %v794_v12 }
  0x3f   : > { %765 = vmatmul.msk.bf16.gmra.mxu0 %vm322_vm0, %v783_v13 }
  0x40   : > { %769 = vmatmul.msk.bf16.gmra.mxu1 %vm322_vm0, %v787_v14 }
  0x41   : > { %773 = vmatmul.msk.bf16.gmra.mxu2 %vm322_vm0, %v791_v15 }
  0x42   : > { %777 = vmatmul.msk.bf16.gmra.mxu3 %vm322_vm0, %v795_v16 }
  0x8c   : > { %v380_v19 = vpop.f32.mrf.mxu0 }
  0x8d   : > { %v400_v20 = vpop.f32.mrf.mxu1  ;;  %v464_v21 = vmul.f32 %v881_v17, %v380_v19 }
  0x8e   : > { %v472_v22 = vmul.f32 %v881_v17, %v400_v20 }
  0x8f   : > { %v500_v23 = vadd.f32 %v886_v18, %v464_v21 }
  0x90   : > { %v508_v24 = vadd.f32 %v886_v18, %v472_v22 }
  0x91   : > { %v532_v25 = vmax.f32 %v500_v23, 0.0 }
  0x92   : > { %v540_v26 = vmax.f32 %v508_v24, 0.0 }
  0x93   : > { %v564_v27 = vpack.c.bf16 %v532_v25, %v532_v25 }
  0x94   : > { %v572_v28 = vpack.c.bf16 %v540_v26, %v540_v26  ;;  %v420_v29 = vpop.f32.mrf.mxu2  ;;  %v382_v33 = vpop.f32.mrf.mxu0 }
  0x95   : > { %v440_v30 = vpop.f32.mrf.mxu3  ;;  %v480_v31 = vmul.f32 %v881_v17, %v420_v29  ;;  %v402_v34 = vpop.f32.mrf.mxu1  ;;  %597 = vst.msk [vmem:[%s897_s30] sm:$0xf] %vm596_vm1, %v564_v27  ;;  %v465_v35 = vmul.f32 %v881_v17, %v382_v33 }
  0x96   : > { %v488_v32 = vmul.f32 %v881_v17, %v440_v30  ;;  %v473_v36 = vmul.f32 %v881_v17, %v402_v34  ;;  %605 = vst.msk [vmem:[%s897_s30 + $0x20] sm:$0xf] %vm596_vm1, %v572_v28 }
  0x97   : > { %v516_v37 = vadd.f32 %v886_v18, %v480_v31  ;;  %v501_v39 = vadd.f32 %v886_v18, %v465_v35 }
  0x98   : > { %v524_v38 = vadd.f32 %v886_v18, %v488_v32  ;;  %v509_v40 = vadd.f32 %v886_v18, %v473_v36 }
  0x99   : > { %v548_v41 = vmax.f32 %v516_v37, 0.0  ;;  %v533_v43 = vmax.f32 %v501_v39, 0.0 }
  0x9a   : > { %v556_v42 = vmax.f32 %v524_v38, 0.0  ;;  %v541_v44 = vmax.f32 %v509_v40, 0.0 }
  0x9b   : > { %v580_v45 = vpack.c.bf16 %v548_v41, %v548_v41  ;;  %v565_v47 = vpack.c.bf16 %v533_v43, %v533_v43 }
  0x9c   : > { %v588_v46 = vpack.c.bf16 %v556_v42, %v556_v42  ;;  %v573_v48 = vpack.c.bf16 %v541_v44, %v541_v44  ;;  %v422_v49 = vpop.f32.mrf.mxu2  ;;  %v385_v53 = vpop.f32.mrf.mxu0 }
  0x9d   : > { %v442_v50 = vpop.f32.mrf.mxu3  ;;  %613 = vst.msk [vmem:[%s897_s30 + $0x40] sm:$0xf] %vm596_vm1, %v580_v45  ;;  %v481_v51 = vmul.f32 %v881_v17, %v422_v49  ;;  %v405_v54 = vpop.f32.mrf.mxu1  ;;  %v466_v55 = vmul.f32 %v881_v17, %v385_v53 }
  0x9e   : > { %v489_v52 = vmul.f32 %v881_v17, %v442_v50  ;;  %621 = vst.msk [vmem:[%s897_s30 + $0x60] sm:$0xf] %vm596_vm1, %v588_v46  ;;  %v474_v56 = vmul.f32 %v881_v17, %v405_v54 }
  0x9f   : > { %598 = vst.msk [vmem:[%s897_s30 + $0x4] sm:$0xf] %vm596_vm1, %v565_v47  ;;  %v517_v57 = vadd.f32 %v886_v18, %v481_v51  ;;  %v502_v59 = vadd.f32 %v886_v18, %v466_v55 }
  0xa0   : > { %v525_v58 = vadd.f32 %v886_v18, %v489_v52  ;;  %606 = vst.msk [vmem:[%s897_s30 + $0x24] sm:$0xf] %vm596_vm1, %v573_v48  ;;  %v510_v60 = vadd.f32 %v886_v18, %v474_v56 }
  0xa1   : > { %v549_v61 = vmax.f32 %v517_v57, 0.0  ;;  %v534_v63 = vmax.f32 %v502_v59, 0.0 }
  0xa2   : > { %v557_v62 = vmax.f32 %v525_v58, 0.0  ;;  %v542_v0 = vmax.f32 %v510_v60, 0.0 }
  0xa3   : > { %v581_v1 = vpack.c.bf16 %v549_v61, %v549_v61  ;;  %v566_v3 = vpack.c.bf16 %v534_v63, %v534_v63 }
  0xa4   : > { %v589_v2 = vpack.c.bf16 %v557_v62, %v557_v62  ;;  %v574_v4 = vpack.c.bf16 %v542_v0, %v542_v0  ;;  %v425_v5 = vpop.f32.mrf.mxu2  ;;  %v387_v9 = vpop.f32.mrf.mxu0 }
  0xa5   : > { %v445_v6 = vpop.f32.mrf.mxu3  ;;  %614 = vst.msk [vmem:[%s897_s30 + $0x44] sm:$0xf] %vm596_vm1, %v581_v1  ;;  %v482_v7 = vmul.f32 %v881_v17, %v425_v5  ;;  %v407_v10 = vpop.f32.mrf.mxu1  ;;  %v467_v11 = vmul.f32 %v881_v17, %v387_v9 }
  0xa6   : > { %v490_v8 = vmul.f32 %v881_v17, %v445_v6  ;;  %622 = vst.msk [vmem:[%s897_s30 + $0x64] sm:$0xf] %vm596_vm1, %v589_v2  ;;  %v475_v12 = vmul.f32 %v881_v17, %v407_v10 }
  0xa7   : > { %599 = vst.msk [vmem:[%s897_s30 + $0x8] sm:$0xf] %vm596_vm1, %v566_v3  ;;  %v518_v13 = vadd.f32 %v886_v18, %v482_v7  ;;  %v503_v15 = vadd.f32 %v886_v18, %v467_v11 }
  0xa8   : > { %v526_v14 = vadd.f32 %v886_v18, %v490_v8  ;;  %607 = vst.msk [vmem:[%s897_s30 + $0x28] sm:$0xf] %vm596_vm1, %v574_v4  ;;  %v511_v16 = vadd.f32 %v886_v18, %v475_v12 }
  0xa9   : > { %v550_v19 = vmax.f32 %v518_v13, 0.0  ;;  %v535_v21 = vmax.f32 %v503_v15, 0.0 }
  0xaa   : > { %v558_v20 = vmax.f32 %v526_v14, 0.0  ;;  %v543_v22 = vmax.f32 %v511_v16, 0.0 }
  0xab   : > { %v582_v23 = vpack.c.bf16 %v550_v19, %v550_v19  ;;  %v567_v25 = vpack.c.bf16 %v535_v21, %v535_v21 }
  0xac   : > { %v590_v24 = vpack.c.bf16 %v558_v20, %v558_v20  ;;  %v575_v26 = vpack.c.bf16 %v543_v22, %v543_v22  ;;  %v427_v27 = vpop.f32.mrf.mxu2  ;;  %v390_v31 = vpop.f32.mrf.mxu0 }
  0xad   : > { %v447_v28 = vpop.f32.mrf.mxu3  ;;  %615 = vst.msk [vmem:[%s897_s30 + $0x48] sm:$0xf] %vm596_vm1, %v582_v23  ;;  %v483_v29 = vmul.f32 %v881_v17, %v427_v27  ;;  %v410_v32 = vpop.f32.mrf.mxu1  ;;  %v468_v33 = vmul.f32 %v881_v17, %v390_v31 }
  0xae   : > { %v491_v30 = vmul.f32 %v881_v17, %v447_v28  ;;  %623 = vst.msk [vmem:[%s897_s30 + $0x68] sm:$0xf] %vm596_vm1, %v590_v24  ;;  %v476_v34 = vmul.f32 %v881_v17, %v410_v32 }
  0xaf   : > { %600 = vst.msk [vmem:[%s897_s30 + $0xc] sm:$0xf] %vm596_vm1, %v567_v25  ;;  %v519_v35 = vadd.f32 %v886_v18, %v483_v29  ;;  %v504_v37 = vadd.f32 %v886_v18, %v468_v33 }
  0xb0   : > { %v527_v36 = vadd.f32 %v886_v18, %v491_v30  ;;  %608 = vst.msk [vmem:[%s897_s30 + $0x2c] sm:$0xf] %vm596_vm1, %v575_v26  ;;  %v512_v38 = vadd.f32 %v886_v18, %v476_v34 }
  0xb1   : > { %v551_v39 = vmax.f32 %v519_v35, 0.0  ;;  %v536_v41 = vmax.f32 %v504_v37, 0.0 }
  0xb2   : > { %v559_v40 = vmax.f32 %v527_v36, 0.0  ;;  %v544_v42 = vmax.f32 %v512_v38, 0.0 }
  0xb3   : > { %v583_v43 = vpack.c.bf16 %v551_v39, %v551_v39  ;;  %v568_v45 = vpack.c.bf16 %v536_v41, %v536_v41 }
  0xb4   : > { %v591_v44 = vpack.c.bf16 %v559_v40, %v559_v40  ;;  %v576_v46 = vpack.c.bf16 %v544_v42, %v544_v42  ;;  %v430_v47 = vpop.f32.mrf.mxu2  ;;  %v392_v51 = vpop.f32.mrf.mxu0 }
  0xb5   : > { %v450_v48 = vpop.f32.mrf.mxu3  ;;  %616 = vst.msk [vmem:[%s897_s30 + $0x4c] sm:$0xf] %vm596_vm1, %v583_v43  ;;  %v484_v49 = vmul.f32 %v881_v17, %v430_v47  ;;  %v412_v52 = vpop.f32.mrf.mxu1  ;;  %v469_v53 = vmul.f32 %v881_v17, %v392_v51 }
  0xb6   : > { %v492_v50 = vmul.f32 %v881_v17, %v450_v48  ;;  %624 = vst.msk [vmem:[%s897_s30 + $0x6c] sm:$0xf] %vm596_vm1, %v591_v44  ;;  %v477_v54 = vmul.f32 %v881_v17, %v412_v52 }
  0xb7   : > { %601 = vst.msk [vmem:[%s897_s30 + $0x10] sm:$0xf] %vm596_vm1, %v568_v45  ;;  %v520_v55 = vadd.f32 %v886_v18, %v484_v49  ;;  %v505_v57 = vadd.f32 %v886_v18, %v469_v53 }
  0xb8   : > { %v528_v56 = vadd.f32 %v886_v18, %v492_v50  ;;  %609 = vst.msk [vmem:[%s897_s30 + $0x30] sm:$0xf] %vm596_vm1, %v576_v46  ;;  %v513_v58 = vadd.f32 %v886_v18, %v477_v54 }
  0xb9   : > { %v552_v59 = vmax.f32 %v520_v55, 0.0  ;;  %v537_v61 = vmax.f32 %v505_v57, 0.0 }
  0xba   : > { %v560_v60 = vmax.f32 %v528_v56, 0.0  ;;  %v545_v62 = vmax.f32 %v513_v58, 0.0 }
  0xbb   : > { %v584_v63 = vpack.c.bf16 %v552_v59, %v552_v59  ;;  %v569_v1 = vpack.c.bf16 %v537_v61, %v537_v61 }
  0xbc   : > { %v592_v0 = vpack.c.bf16 %v560_v60, %v560_v60  ;;  %v577_v2 = vpack.c.bf16 %v545_v62, %v545_v62  ;;  %v432_v3 = vpop.f32.mrf.mxu2  ;;  %v395_v7 = vpop.f32.mrf.mxu0 }
  0xbd   : > { %v452_v4 = vpop.f32.mrf.mxu3  ;;  %617 = vst.msk [vmem:[%s897_s30 + $0x50] sm:$0xf] %vm596_vm1, %v584_v63  ;;  %v485_v5 = vmul.f32 %v881_v17, %v432_v3  ;;  %v415_v8 = vpop.f32.mrf.mxu1  ;;  %v470_v9 = vmul.f32 %v881_v17, %v395_v7 }
  0xbe   : > { %v493_v6 = vmul.f32 %v881_v17, %v452_v4  ;;  %625 = vst.msk [vmem:[%s897_s30 + $0x70] sm:$0xf] %vm596_vm1, %v592_v0  ;;  %v478_v10 = vmul.f32 %v881_v17, %v415_v8 }
  0xbf   : > { %602 = vst.msk [vmem:[%s897_s30 + $0x14] sm:$0xf] %vm596_vm1, %v569_v1  ;;  %v521_v11 = vadd.f32 %v886_v18, %v485_v5  ;;  %v506_v13 = vadd.f32 %v886_v18, %v470_v9 }
  0xc0   : > { %v529_v12 = vadd.f32 %v886_v18, %v493_v6  ;;  %610 = vst.msk [vmem:[%s897_s30 + $0x34] sm:$0xf] %vm596_vm1, %v577_v2  ;;  %v514_v14 = vadd.f32 %v886_v18, %v478_v10 }
  0xc1   : > { %v553_v15 = vmax.f32 %v521_v11, 0.0  ;;  %v538_v19 = vmax.f32 %v506_v13, 0.0 }
  0xc2   : > { %v561_v16 = vmax.f32 %v529_v12, 0.0  ;;  %v546_v20 = vmax.f32 %v514_v14, 0.0 }
  0xc3   : > { %v585_v21 = vpack.c.bf16 %v553_v15, %v553_v15  ;;  %v570_v23 = vpack.c.bf16 %v538_v19, %v538_v19 }
  0xc4   : > { %v593_v22 = vpack.c.bf16 %v561_v16, %v561_v16  ;;  %v578_v24 = vpack.c.bf16 %v546_v20, %v546_v20  ;;  %v435_v25 = vpop.f32.mrf.mxu2  ;;  %v397_v29 = vpop.f32.mrf.mxu0 }
  0xc5   : > { %v455_v26 = vpop.f32.mrf.mxu3  ;;  %618 = vst.msk [vmem:[%s897_s30 + $0x54] sm:$0xf] %vm596_vm1, %v585_v21  ;;  %v486_v27 = vmul.f32 %v881_v17, %v435_v25  ;;  %v417_v30 = vpop.f32.mrf.mxu1  ;;  %v471_v31 = vmul.f32 %v881_v17, %v397_v29 }
  0xc6   : > { %v494_v28 = vmul.f32 %v881_v17, %v455_v26  ;;  %626 = vst.msk [vmem:[%s897_s30 + $0x74] sm:$0xf] %vm596_vm1, %v593_v22  ;;  %v479_v32 = vmul.f32 %v881_v17, %v417_v30 }
  0xc7   : > { %603 = vst.msk [vmem:[%s897_s30 + $0x18] sm:$0xf] %vm596_vm1, %v570_v23  ;;  %v522_v33 = vadd.f32 %v886_v18, %v486_v27  ;;  %v507_v35 = vadd.f32 %v886_v18, %v471_v31 }
  0xc8   : > { %v530_v34 = vadd.f32 %v886_v18, %v494_v28  ;;  %611 = vst.msk [vmem:[%s897_s30 + $0x38] sm:$0xf] %vm596_vm1, %v578_v24  ;;  %v515_v36 = vadd.f32 %v886_v18, %v479_v32 }
  0xc9   : > { %v554_v37 = vmax.f32 %v522_v33, 0.0  ;;  %v539_v39 = vmax.f32 %v507_v35, 0.0 }
  0xca   : > { %v562_v38 = vmax.f32 %v530_v34, 0.0  ;;  %v547_v40 = vmax.f32 %v515_v36, 0.0 }
  0xcb   : > { %v586_v41 = vpack.c.bf16 %v554_v37, %v554_v37  ;;  %v571_v43 = vpack.c.bf16 %v539_v39, %v539_v39 }
  0xcc   : > { %v594_v42 = vpack.c.bf16 %v562_v38, %v562_v38  ;;  %v579_v44 = vpack.c.bf16 %v547_v40, %v547_v40  ;;  %v437_v45 = vpop.f32.mrf.mxu2 }
  0xcd   : > { %v457_v46 = vpop.f32.mrf.mxu3  ;;  %619 = vst.msk [vmem:[%s897_s30 + $0x58] sm:$0xf] %vm596_vm1, %v586_v41  ;;  %v487_v47 = vmul.f32 %v881_v17, %v437_v45 }
  0xce   : > { %v495_v48 = vmul.f32 %v881_v17, %v457_v46  ;;  %627 = vst.msk [vmem:[%s897_s30 + $0x78] sm:$0xf] %vm596_vm1, %v594_v42 }
  0xcf   : > { %604 = vst.msk [vmem:[%s897_s30 + $0x1c] sm:$0xf] %vm596_vm1, %v571_v43  ;;  %v523_v49 = vadd.f32 %v886_v18, %v487_v47 }
  0xd0   : > { %v531_v50 = vadd.f32 %v886_v18, %v495_v48  ;;  %612 = vst.msk [vmem:[%s897_s30 + $0x3c] sm:$0xf] %vm596_vm1, %v579_v44 }
  0xd1   : > { %v555_v51 = vmax.f32 %v523_v49, 0.0 }
  0xd2   : > { %v563_v52 = vmax.f32 %v531_v50, 0.0 }
  0xd3   : > { %v587_v53 = vpack.c.bf16 %v555_v51, %v555_v51 }
  0xd4   : > { %v595_v54 = vpack.c.bf16 %v563_v52, %v563_v52 }
  0xd5   : > { %620 = vst.msk [vmem:[%s897_s30 + $0x5c] sm:$0xf] %vm596_vm1, %v587_v53 }
  0xd6   : > { %628 = vst.msk [vmem:[%s897_s30 + $0x7c] sm:$0xf] %vm596_vm1, %v595_v54 }
  0xd7 PF: > { %s14_s15 = sadd.s32 1, %s816_s15  }
  0xd8   : > { %p11_p4 = scmp.ge.s32.totalorder %s14_s15, 4  }
  0xda   :  { %13 = sbr.rel (!%p11_p4) target bundleno = 1 (0x1), region = 66 }

// kernel: encoder_forward.12
= control target key start
LH: loop header
LB: loop body
LE: loop exit
PB: predicated region body
PF: predicated region fallthrough
CT: control target
= control target key end

     0   :  { %9 = vsyncpa [#allocation3], 0  ;;  %s365_s18 = smov [#allocation2]   ;;  %s535_s0 = inlined_call_operand.vmem [shape: bf16[128,32], index: 0, kind: input, shape index: {}]   ;;  %s536_s1 = inlined_call_operand.vmem [shape: bf16[32,64], index: 1, kind: input, shape index: {}]   ;;  %s537_s2 = inlined_call_operand.vmem [shape: f32[1,64], index: 2, kind: input, shape index: {}]   ;;  %s538_s3 = inlined_call_operand.hbm [shape: f32[1,64], index: 3, kind: input, shape index: {}]   ;;  %s539_s4 = inlined_call_operand.vmem [shape: bf16[128,64], index: 4, kind: output, shape index: {}]  }
   0x1   :  { %s21_s17 = sshll.u32 %s538_s3, 4  ;;  %s23_s19 = sshll.u32 %s365_s18, 4  ;;  %s22_s17 = int_to_ptr.hbm [resolvable:$true] %s21_s17  ;;  %s24_s19 = int_to_ptr.vmem [resolvable:$true] %s23_s19 }
   0x2   :  { %26 = dma.hbm_to_vmem [thread:$0]  %s22_s17, 16, %s24_s19, [#allocation3]  }
   0x3   :  { %363 = dma.done.wait [#allocation3], 16  }
   0x4   :  { %364 = vsyncadd [#allocation3], 4294967280  ;;  %v329_v0 = vld [vmem:[%s536_s1 + $0x8] sm:$0xff]  ;;  %v328_v1 = vld [vmem:[%s536_s1] sm:$0xff]  ;;  %vm104_vm0 = vcmask 261120   ;;  %vm250_vm1 = vcmask 519168  }
   0x5   :  { %135 = vmatpush.bf16.msra.mxu0 %v329_v0  ;;  %330 = vmatpush.bf16.msra.mxu1 %v329_v0  ;;  %v320_v2 = vld [vmem:[%s535_s0] sm:$0xff]  ;;  %v322_v3 = vld [vmem:[%s535_s0 + $0x10] sm:$0xff]  ;;  %v321_v6 = vld [vmem:[%s535_s0 + $0x8] sm:$0xff] }
   0x6   :  { %331 = vmatpush.bf16.msra.mxu2 %v329_v0  ;;  %332 = vmatpush.bf16.msra.mxu3 %v329_v0  ;;  %v324_v4 = vld [vmem:[%s535_s0 + $0x20] sm:$0xff]  ;;  %v326_v5 = vld [vmem:[%s535_s0 + $0x30] sm:$0xff]  ;;  %v323_v7 = vld [vmem:[%s535_s0 + $0x18] sm:$0xff] }
   0x7   :  { %v325_v8 = vld [vmem:[%s535_s0 + $0x28] sm:$0xff]  ;;  %v327_v9 = vld [vmem:[%s535_s0 + $0x38] sm:$0xff]  ;;  %v435_v10 = vld [vmem:[%s537_s2] ss:$0 sm:$0xff] }
   0x8   :  { %v437_v11 = vld [vmem:[#allocation2] ss:$0 sm:$0xff] }
   0x9   :  { %136 = vmatpush.bf16.msra.mxu0 %v328_v1  ;;  %333 = vmatpush.bf16.msra.mxu1 %v328_v1 }
   0xa   :  { %334 = vmatpush.bf16.msra.mxu2 %v328_v1  ;;  %335 = vmatpush.bf16.msra.mxu3 %v328_v1 }
   0xc   :  { %312 = vmatmul.msk.bf16.vlgmr.msra.gmra.mxu0 %vm104_vm0, %v320_v2  ;;  %314 = vmatmul.msk.bf16.vlgmr.msra.gmra.mxu1 %vm104_vm0, %v322_v3 }
   0xd   :  { %316 = vmatmul.msk.bf16.vlgmr.msra.gmra.mxu2 %vm104_vm0, %v324_v4  ;;  %318 = vmatmul.msk.bf16.vlgmr.msra.gmra.mxu3 %vm104_vm0, %v326_v5 }
  0x1c   :  { %313 = vmatmul.msk.bf16.gmra.mxu0 %vm104_vm0, %v321_v6  ;;  %315 = vmatmul.msk.bf16.gmra.mxu1 %vm104_vm0, %v323_v7 }
  0x1d   :  { %317 = vmatmul.msk.bf16.gmra.mxu2 %vm104_vm0, %v325_v8  ;;  %319 = vmatmul.msk.bf16.gmra.mxu3 %vm104_vm0, %v327_v9 }
  0x89   :  { %v138_v12 = vpop.f32.mrf.mxu0  ;;  %v148_v13 = vpop.f32.mrf.mxu1 }
  0x8a   :  { %v182_v14 = vmul.f32 %v435_v10, %v138_v12  ;;  %v186_v15 = vmul.f32 %v435_v10, %v148_v13 }
  0x8c   :  { %v202_v16 = vadd.f32 %v437_v11, %v182_v14  ;;  %v206_v17 = vadd.f32 %v437_v11, %v186_v15 }
  0x8e   :  { %v218_v18 = vmax.f32 %v202_v16, 0.0  ;;  %v222_v19 = vmax.f32 %v206_v17, 0.0 }
  0x90   :  { %v234_v20 = vpack.c.bf16 %v218_v18, %v218_v18  ;;  %v238_v21 = vpack.c.bf16 %v222_v19, %v222_v19  ;;  %v158_v22 = vpop.f32.mrf.mxu2  ;;  %v168_v23 = vpop.f32.mrf.mxu3 }
  0x91   :  { %v190_v24 = vmul.f32 %v435_v10, %v158_v22  ;;  %v194_v25 = vmul.f32 %v435_v10, %v168_v23  ;;  %v140_v26 = vpop.f32.mrf.mxu0  ;;  %v150_v27 = vpop.f32.mrf.mxu1 }
  0x92   :  { %251 = vst.msk [vmem:[%s539_s4] sm:$0xf] %vm250_vm1, %v234_v20  ;;  %v183_v28 = vmul.f32 %v435_v10, %v140_v26  ;;  %v187_v29 = vmul.f32 %v435_v10, %v150_v27 }
  0x93   :  { %255 = vst.msk [vmem:[%s539_s4 + $0x10] sm:$0xf] %vm250_vm1, %v238_v21  ;;  %v210_v30 = vadd.f32 %v437_v11, %v190_v24  ;;  %v214_v31 = vadd.f32 %v437_v11, %v194_v25 }
  0x94   :  { %v203_v32 = vadd.f32 %v437_v11, %v183_v28  ;;  %v207_v33 = vadd.f32 %v437_v11, %v187_v29 }
  0x95   :  { %v226_v34 = vmax.f32 %v210_v30, 0.0  ;;  %v230_v35 = vmax.f32 %v214_v31, 0.0 }
  0x96   :  { %v219_v36 = vmax.f32 %v203_v32, 0.0  ;;  %v223_v37 = vmax.f32 %v207_v33, 0.0 }
  0x97   :  { %v242_v38 = vpack.c.bf16 %v226_v34, %v226_v34  ;;  %v246_v39 = vpack.c.bf16 %v230_v35, %v230_v35 }
  0x98   :  { %v235_v40 = vpack.c.bf16 %v219_v36, %v219_v36  ;;  %v239_v41 = vpack.c.bf16 %v223_v37, %v223_v37  ;;  %v160_v42 = vpop.f32.mrf.mxu2  ;;  %v170_v43 = vpop.f32.mrf.mxu3 }
  0x99   :  { %259 = vst.msk [vmem:[%s539_s4 + $0x20] sm:$0xf] %vm250_vm1, %v242_v38  ;;  %v191_v44 = vmul.f32 %v435_v10, %v160_v42  ;;  %v195_v45 = vmul.f32 %v435_v10, %v170_v43  ;;  %v143_v46 = vpop.f32.mrf.mxu0  ;;  %v153_v47 = vpop.f32.mrf.mxu1 }
  0x9a   :  { %263 = vst.msk [vmem:[%s539_s4 + $0x30] sm:$0xf] %vm250_vm1, %v246_v39  ;;  %v184_v48 = vmul.f32 %v435_v10, %v143_v46  ;;  %v188_v49 = vmul.f32 %v435_v10, %v153_v47 }
  0x9b   :  { %252 = vst.msk [vmem:[%s539_s4 + $0x4] sm:$0xf] %vm250_vm1, %v235_v40  ;;  %v211_v50 = vadd.f32 %v437_v11, %v191_v44  ;;  %v215_v51 = vadd.f32 %v437_v11, %v195_v45 }
  0x9c   :  { %256 = vst.msk [vmem:[%s539_s4 + $0x14] sm:$0xf] %vm250_vm1, %v239_v41  ;;  %v204_v52 = vadd.f32 %v437_v11, %v184_v48  ;;  %v208_v53 = vadd.f32 %v437_v11, %v188_v49 }
  0x9d   :  { %v227_v54 = vmax.f32 %v211_v50, 0.0  ;;  %v231_v55 = vmax.f32 %v215_v51, 0.0 }
  0x9e   :  { %v220_v56 = vmax.f32 %v204_v52, 0.0  ;;  %v224_v57 = vmax.f32 %v208_v53, 0.0 }
  0x9f   :  { %v243_v58 = vpack.c.bf16 %v227_v54, %v227_v54  ;;  %v247_v59 = vpack.c.bf16 %v231_v55, %v231_v55 }
  0xa0   :  { %v236_v60 = vpack.c.bf16 %v220_v56, %v220_v56  ;;  %v240_v61 = vpack.c.bf16 %v224_v57, %v224_v57  ;;  %v163_v62 = vpop.f32.mrf.mxu2  ;;  %v173_v63 = vpop.f32.mrf.mxu3 }
  0xa1   :  { %260 = vst.msk [vmem:[%s539_s4 + $0x24] sm:$0xf] %vm250_vm1, %v243_v58  ;;  %v192_v0 = vmul.f32 %v435_v10, %v163_v62  ;;  %v196_v1 = vmul.f32 %v435_v10, %v173_v63  ;;  %v145_v2 = vpop.f32.mrf.mxu0  ;;  %v155_v3 = vpop.f32.mrf.mxu1 }
  0xa2   :  { %264 = vst.msk [vmem:[%s539_s4 + $0x34] sm:$0xf] %vm250_vm1, %v247_v59  ;;  %v185_v4 = vmul.f32 %v435_v10, %v145_v2  ;;  %v189_v5 = vmul.f32 %v435_v10, %v155_v3 }
  0xa3   :  { %253 = vst.msk [vmem:[%s539_s4 + $0x8] sm:$0xf] %vm250_vm1, %v236_v60  ;;  %v212_v6 = vadd.f32 %v437_v11, %v192_v0  ;;  %v216_v7 = vadd.f32 %v437_v11, %v196_v1 }
  0xa4   :  { %257 = vst.msk [vmem:[%s539_s4 + $0x18] sm:$0xf] %vm250_vm1, %v240_v61  ;;  %v205_v8 = vadd.f32 %v437_v11, %v185_v4  ;;  %v209_v9 = vadd.f32 %v437_v11, %v189_v5 }
  0xa5   :  { %v228_v12 = vmax.f32 %v212_v6, 0.0  ;;  %v232_v13 = vmax.f32 %v216_v7, 0.0 }
  0xa6   :  { %v221_v14 = vmax.f32 %v205_v8, 0.0  ;;  %v225_v15 = vmax.f32 %v209_v9, 0.0 }
  0xa7   :  { %v244_v16 = vpack.c.bf16 %v228_v12, %v228_v12  ;;  %v248_v17 = vpack.c.bf16 %v232_v13, %v232_v13 }
  0xa8   :  { %v237_v18 = vpack.c.bf16 %v221_v14, %v221_v14  ;;  %v241_v19 = vpack.c.bf16 %v225_v15, %v225_v15  ;;  %v165_v20 = vpop.f32.mrf.mxu2  ;;  %v175_v21 = vpop.f32.mrf.mxu3 }
  0xa9   :  { %261 = vst.msk [vmem:[%s539_s4 + $0x28] sm:$0xf] %vm250_vm1, %v244_v16  ;;  %v193_v22 = vmul.f32 %v435_v10, %v165_v20  ;;  %v197_v23 = vmul.f32 %v435_v10, %v175_v21 }
  0xaa   :  { %265 = vst.msk [vmem:[%s539_s4 + $0x38] sm:$0xf] %vm250_vm1, %v248_v17 }
  0xab   :  { %254 = vst.msk [vmem:[%s539_s4 + $0xc] sm:$0xf] %vm250_vm1, %v237_v18  ;;  %v213_v24 = vadd.f32 %v437_v11, %v193_v22  ;;  %v217_v25 = vadd.f32 %v437_v11, %v197_v23 }
  0xac   :  { %258 = vst.msk [vmem:[%s539_s4 + $0x1c] sm:$0xf] %vm250_vm1, %v241_v19 }
  0xad   :  { %v229_v10 = vmax.f32 %v213_v24, 0.0  ;;  %v233_v26 = vmax.f32 %v217_v25, 0.0 }
  0xaf   :  { %v245_v27 = vpack.c.bf16 %v229_v10, %v229_v10  ;;  %v249_v28 = vpack.c.bf16 %v233_v26, %v233_v26 }
  0xb1   :  { %262 = vst.msk [vmem:[%s539_s4 + $0x2c] sm:$0xf] %vm250_vm1, %v245_v27 }
  0xb2   :  { %266 = vst.msk [vmem:[%s539_s4 + $0x3c] sm:$0xf] %vm250_vm1, %v249_v28 }
  0xb3   :  { %271 = vsyncpa [#allocation3], 1 }

// kernel: encoder_forward.11
= control target key start
LH: loop header
LB: loop body
LE: loop exit
PB: predicated region body
PF: predicated region fallthrough
CT: control target
= control target key end

     0   :  { %vm133_vm0 = vcmask 261120   ;;  %vm1730_vm1 = vcmask 130048   ;;  %s3416_s2 = inlined_call_operand.vmem [shape: bf16[9,32,32], index: 2, kind: input, shape index: {}]   ;;  %s3417_s0 = inlined_call_operand.vmem [shape: bf16[9,128,32], index: 0, kind: input, shape index: {}]   ;;  %s3418_s8 = inlined_call_operand.vmem [shape: bf16[16,32], index: 8, kind: input, shape index: {}]   ;;  %s3419_s5 = inlined_call_operand.vmem [shape: bf16[32,32], index: 5, kind: input, shape index: {}]   ;;  %s3420_s3 = inlined_call_operand.vmem [shape: f32[1,32], index: 3, kind: input, shape index: {}]   ;;  %s3421_s4 = inlined_call_operand.vmem [shape: f32[1,32], index: 4, kind: input, shape index: {}]   ;;  %s3422_s1 = inlined_call_operand.vmem [shape: bf16[128,16], index: 1, kind: input, shape index: {}]   ;;  %s3423_s9 = inlined_call_operand.vmem [shape: f32[1,32], index: 9, kind: input, shape index: {}]   ;;  %s3424_s10 = inlined_call_operand.vmem [shape: f32[1,32], index: 10, kind: input, shape index: {}]   ;;  %s3425_s6 = inlined_call_operand.vmem [shape: f32[1,32], index: 6, kind: input, shape index: {}]   ;;  %s3426_s7 = inlined_call_operand.vmem [shape: f32[1,32], index: 7, kind: input, shape index: {}]   ;;  %s3427_s11 = inlined_call_operand.vmem [shape: f32[128,32], index: 11, kind: output, shape index: {}]  }
   0x1   :  { %v2567_v0 = vld [vmem:[%s3416_s2 + $0x18] sm:$0xff]  ;;  %v2557_v1 = vld [vmem:[%s3416_s2 + $0x8] sm:$0xff]  ;;  %v2566_v3 = vld [vmem:[%s3416_s2 + $0x10] sm:$0xff] }
   0x2   :  { %v2577_v2 = vld [vmem:[%s3416_s2 + $0x28] sm:$0xff]  ;;  %164 = vmatpush.bf16.msra.mxu0 %v2567_v0  ;;  %2649 = vmatpush.bf16.msra.mxu3 %v2567_v0  ;;  %v2556_v4 = vld [vmem:[%s3416_s2] sm:$0xff]  ;;  %v2564_v8 = vld [vmem:[%s3417_s0 + $0x70] sm:$0xff] }
   0x3   :  { %289 = vmatpush.bf16.msra.mxu1 %v2557_v1  ;;  %436 = vmatpush.bf16.msra.mxu2 %v2577_v2  ;;  %v2576_v5 = vld [vmem:[%s3416_s2 + $0x20] sm:$0xff]  ;;  %v2597_v6 = vld [vmem:[%s3416_s2 + $0x48] sm:$0xff]  ;;  %v2565_v12 = vld [vmem:[%s3417_s0 + $0x78] sm:$0xff] }
   0x4   :  { %v2558_v7 = vld [vmem:[%s3417_s0 + $0x40] sm:$0xff]  ;;  %v2559_v11 = vld [vmem:[%s3417_s0 + $0x48] sm:$0xff]  ;;  %v2560_v16 = vld [vmem:[%s3417_s0 + $0x50] sm:$0xff] }
   0x5   :  { %v2548_v9 = vld [vmem:[%s3417_s0] sm:$0xff]  ;;  %v2549_v13 = vld [vmem:[%s3417_s0 + $0x8] sm:$0xff]  ;;  %v2554_v17 = vld [vmem:[%s3417_s0 + $0x30] sm:$0xff] }
   0x6   :  { %165 = vmatpush.bf16.msra.mxu0 %v2566_v3  ;;  %2650 = vmatpush.bf16.msra.mxu3 %v2566_v3  ;;  %v2568_v10 = vld [vmem:[%s3417_s0 + $0x80] sm:$0xff]  ;;  %v2569_v14 = vld [vmem:[%s3417_s0 + $0x88] sm:$0xff]  ;;  %v2550_v18 = vld [vmem:[%s3417_s0 + $0x10] sm:$0xff] }
   0x7   :  { %290 = vmatpush.bf16.msra.mxu1 %v2556_v4  ;;  %437 = vmatpush.bf16.msra.mxu2 %v2576_v5  ;;  %v2596_v15 = vld [vmem:[%s3416_s2 + $0x40] sm:$0xff]  ;;  %v2570_v19 = vld [vmem:[%s3417_s0 + $0x90] sm:$0xff]  ;;  %v2587_v20 = vld [vmem:[%s3416_s2 + $0x38] sm:$0xff] }
   0x8   :  { %v2561_v21 = vld [vmem:[%s3417_s0 + $0x58] sm:$0xff]  ;;  %v2586_v25 = vld [vmem:[%s3416_s2 + $0x30] sm:$0xff]  ;;  %v2617_v26 = vld [vmem:[%s3416_s2 + $0x68] sm:$0xff] }
   0x9   :  { %1956 = vmatmul.msk.bf16.vlgmr.msra.gmra.mxu0 %vm133_vm0, %v2558_v7  ;;  %1962 = vmatmul.msk.bf16.vlgmr.msra.gmra.mxu3 %vm133_vm0, %v2564_v8  ;;  %v2555_v22 = vld [vmem:[%s3417_s0 + $0x38] sm:$0xff]  ;;  %v2562_v27 = vld [vmem:[%s3417_s0 + $0x60] sm:$0xff]  ;;  %v2574_v28 = vld [vmem:[%s3417_s0 + $0xb0] sm:$0xff] }
   0xa   :  { %2651 = vmatpush.bf16.msrb.mxu3 %v2557_v1  ;;  %762 = vmatpush.bf16.msrb.mxu0 %v2597_v6  ;;  %v2551_v23 = vld [vmem:[%s3417_s0 + $0x18] sm:$0xff]  ;;  %v2552_v29 = vld [vmem:[%s3417_s0 + $0x20] sm:$0xff]  ;;  %v2637_v34 = vld [vmem:[%s3416_s2 + $0x88] sm:$0xff] }
   0xb   :  { %2004 = vmatmul.msk.bf16.vlgmr.msra.gmra.mxu1 %vm133_vm0, %v2548_v9  ;;  %2072 = vmatmul.msk.bf16.vlgmr.msra.gmra.mxu2 %vm133_vm0, %v2568_v10  ;;  %v2571_v24 = vld [vmem:[%s3417_s0 + $0x98] sm:$0xff]  ;;  %v2572_v30 = vld [vmem:[%s3417_s0 + $0xa0] sm:$0xff]  ;;  %v2606_v35 = vld [vmem:[%s3416_s2 + $0x50] sm:$0xff] }
   0xc   :  { %1088 = vmatpush.bf16.msrb.mxu2 %v2617_v26  ;;  %v2627_v31 = vld [vmem:[%s3416_s2 + $0x78] sm:$0xff]  ;;  %v2616_v33 = vld [vmem:[%s3416_s2 + $0x60] sm:$0xff]  ;;  %v2563_v36 = vld [vmem:[%s3417_s0 + $0x68] sm:$0xff] }
   0xd   :  { %v2607_v32 = vld [vmem:[%s3416_s2 + $0x58] sm:$0xff]  ;;  %v2553_v38 = vld [vmem:[%s3417_s0 + $0x28] sm:$0xff]  ;;  %v2578_v40 = vld [vmem:[%s3417_s0 + $0xc0] sm:$0xff] }
   0xe   :  { %2652 = vmatpush.bf16.msrb.mxu3 %v2556_v4  ;;  %763 = vmatpush.bf16.msrb.mxu0 %v2596_v15  ;;  %v2575_v37 = vld [vmem:[%s3417_s0 + $0xb8] sm:$0xff]  ;;  %v2573_v39 = vld [vmem:[%s3417_s0 + $0xa8] sm:$0xff]  ;;  %v2588_v41 = vld [vmem:[%s3417_s0 + $0x100] sm:$0xff] }
   0xf   :  { %925 = vmatpush.bf16.msrb.mxu1 %v2607_v32  ;;  %v2608_v42 = vld [vmem:[%s3417_s0 + $0x180] sm:$0xff]  ;;  %v2579_v44 = vld [vmem:[%s3417_s0 + $0xc8] sm:$0xff]  ;;  %v2580_v48 = vld [vmem:[%s3417_s0 + $0xd0] sm:$0xff] }
  0x10   :  { %1089 = vmatpush.bf16.msrb.mxu2 %v2616_v33  ;;  %v2598_v43 = vld [vmem:[%s3417_s0 + $0x140] sm:$0xff]  ;;  %v2589_v45 = vld [vmem:[%s3417_s0 + $0x108] sm:$0xff]  ;;  %v2590_v49 = vld [vmem:[%s3417_s0 + $0x110] sm:$0xff] }
  0x11   :  { %v2609_v46 = vld [vmem:[%s3417_s0 + $0x188] sm:$0xff]  ;;  %v2610_v51 = vld [vmem:[%s3417_s0 + $0x190] sm:$0xff]  ;;  %v2636_v62 = vld [vmem:[%s3416_s2 + $0x80] sm:$0xff] }
  0x12   :  { %2653 = vmatpush.bf16.msra.mxu3 %v2577_v2  ;;  %1414 = vmatpush.bf16.msra.mxu0 %v2637_v34  ;;  %v2599_v47 = vld [vmem:[%s3417_s0 + $0x148] sm:$0xff]  ;;  %v2600_v52 = vld [vmem:[%s3417_s0 + $0x150] sm:$0xff]  ;;  %v2581_v1 = vld [vmem:[%s3417_s0 + $0xd8] sm:$0xff] }
  0x13   :  { %926 = vmatpush.bf16.msrb.mxu1 %v2606_v35  ;;  %v2626_v55 = vld [vmem:[%s3416_s2 + $0x70] sm:$0xff]  ;;  %v2591_v2 = vld [vmem:[%s3417_s0 + $0x118] sm:$0xff]  ;;  %v2583_v34 = vld [vmem:[%s3417_s0 + $0xe8] sm:$0xff] }
  0x14   :  { %v2601_v6 = vld [vmem:[%s3417_s0 + $0x158] sm:$0xff]  ;;  %v2593_v35 = vld [vmem:[%s3417_s0 + $0x128] sm:$0xff] }
  0x16   :  { %2654 = vmatpush.bf16.msra.mxu3 %v2576_v5  ;;  %1415 = vmatpush.bf16.msra.mxu0 %v2636_v62  ;;  %v2611_v5 = vld [vmem:[%s3417_s0 + $0x198] sm:$0xff] }
  0x19   :  { %1957 = vmatmul.msk.bf16.gmra.mxu0 %vm133_vm0, %v2559_v11  ;;  %1963 = vmatmul.msk.bf16.gmra.mxu3 %vm133_vm0, %v2565_v12 }
  0x1b   :  { %2005 = vmatmul.msk.bf16.gmra.mxu1 %vm133_vm0, %v2549_v13  ;;  %2073 = vmatmul.msk.bf16.gmra.mxu2 %vm133_vm0, %v2569_v14 }
  0x29   :  { %1958 = vmatmul.msk.bf16.gmra.mxu0 %vm133_vm0, %v2560_v16  ;;  %2010 = vmatmul.msk.bf16.vlgmr.msrb.gmra.mxu3 %vm133_vm0, %v2554_v17  ;;  %v2582_v17 = vld [vmem:[%s3417_s0 + $0xe0] sm:$0xff] }
  0x2a   :  { %599 = vmatpush.bf16.msrb.mxu3 %v2587_v20 }
  0x2b   :  { %2006 = vmatmul.msk.bf16.gmra.mxu1 %vm133_vm0, %v2550_v18  ;;  %2074 = vmatmul.msk.bf16.gmra.mxu2 %vm133_vm0, %v2570_v19  ;;  %v2592_v18 = vld [vmem:[%s3417_s0 + $0x120] sm:$0xff] }
  0x2e   :  { %600 = vmatpush.bf16.msrb.mxu3 %v2586_v25 }
  0x39   :  { %1959 = vmatmul.msk.bf16.gmra.mxu0 %vm133_vm0, %v2561_v21  ;;  %2011 = vmatmul.msk.bf16.gmra.mxu3 %vm133_vm0, %v2555_v22  ;;  %v2612_v21 = vld [vmem:[%s3417_s0 + $0x1a0] sm:$0xff] }
  0x3a   :  { %v2602_v22 = vld [vmem:[%s3417_s0 + $0x160] sm:$0xff] }
  0x3b   :  { %2007 = vmatmul.msk.bf16.gmra.mxu1 %vm133_vm0, %v2551_v23  ;;  %2075 = vmatmul.msk.bf16.gmra.mxu2 %vm133_vm0, %v2571_v24 }
  0x49   :  { %1960 = vmatmul.msk.bf16.gmra.mxu0 %vm133_vm0, %v2562_v27  ;;  %2078 = vmatmul.msk.bf16.vlgmr.msra.gmra.mxu3 %vm133_vm0, %v2574_v28 }
  0x4a   :  { %1251 = vmatpush.bf16.msra.mxu3 %v2627_v31 }
  0x4b   :  { %2008 = vmatmul.msk.bf16.gmra.mxu1 %vm133_vm0, %v2552_v29  ;;  %2076 = vmatmul.msk.bf16.gmra.mxu2 %vm133_vm0, %v2572_v30 }
  0x4e   :  { %1252 = vmatpush.bf16.msra.mxu3 %v2626_v55 }
  0x59   :  { %1961 = vmatmul.msk.bf16.gmra.mxu0 %vm133_vm0, %v2563_v36  ;;  %2079 = vmatmul.msk.bf16.gmra.mxu3 %vm133_vm0, %v2575_v37  ;;  %v2613_v37 = vld [vmem:[%s3417_s0 + $0x1a8] sm:$0xff] }
  0x5b   :  { %2009 = vmatmul.msk.bf16.gmra.mxu1 %vm133_vm0, %v2553_v38  ;;  %2077 = vmatmul.msk.bf16.gmra.mxu2 %vm133_vm0, %v2573_v39  ;;  %v2603_v38 = vld [vmem:[%s3417_s0 + $0x168] sm:$0xff] }
  0x69   :  { %2140 = vmatmul.msk.bf16.vlgmr.msrb.gmra.mxu3 %vm133_vm0, %v2578_v40  ;;  %2208 = vmatmul.msk.bf16.vlgmr.msrb.gmra.mxu0 %vm133_vm0, %v2588_v41 }
  0x6b   :  { %2344 = vmatmul.msk.bf16.vlgmr.msrb.gmra.mxu2 %vm133_vm0, %v2608_v42  ;;  %2276 = vmatmul.msk.bf16.vlgmr.msrb.gmra.mxu1 %vm133_vm0, %v2598_v43 }
  0x79   :  { %2141 = vmatmul.msk.bf16.gmra.mxu3 %vm133_vm0, %v2579_v44  ;;  %2209 = vmatmul.msk.bf16.gmra.mxu0 %vm133_vm0, %v2589_v45 }
  0x7b   :  { %2345 = vmatmul.msk.bf16.gmra.mxu2 %vm133_vm0, %v2609_v46  ;;  %2277 = vmatmul.msk.bf16.gmra.mxu1 %vm133_vm0, %v2599_v47 }
  0x86   :  { %v167_v50 = vpop.f32.mrf.mxu0 }
  0x88   :  { %v292_v53 = vpop.f32.mrf.mxu1 }
  0x89   :  { %v293_v54 = vadd.f32 %v292_v53, %v167_v50  ;;  %2142 = vmatmul.msk.bf16.gmra.mxu3 %vm133_vm0, %v2580_v48  ;;  %2210 = vmatmul.msk.bf16.gmra.mxu0 %vm133_vm0, %v2590_v49  ;;  %v2584_v50 = vld [vmem:[%s3417_s0 + $0xf0] sm:$0xff] }
  0x8a   :  { %v2614_v53 = vld [vmem:[%s3417_s0 + $0x1b0] sm:$0xff] }
  0x8b   :  { %2346 = vmatmul.msk.bf16.gmra.mxu2 %vm133_vm0, %v2610_v51  ;;  %2278 = vmatmul.msk.bf16.gmra.mxu1 %vm133_vm0, %v2600_v52  ;;  %v2594_v51 = vld [vmem:[%s3417_s0 + $0x130] sm:$0xff] }
  0x8c   :  { %v197_v56 = vpop.f32.mrf.mxu3 }
  0x8e   :  { %v439_v57 = vpop.f32.mrf.mxu2  ;;  %v169_v59 = vpop.f32.mrf.mxu0 }
  0x8f   :  { %v2916_v58 = vadd.f32 %v439_v57, %v293_v54  ;;  %v2604_v54 = vld [vmem:[%s3417_s0 + $0x170] sm:$0xff] }
  0x90   :  { %v294_v60 = vpop.f32.mrf.mxu1 }
  0x91   :  { %v295_v61 = vadd.f32 %v294_v60, %v169_v59 }
  0x94   :  { %v199_v63 = vpop.f32.mrf.mxu3 }
  0x96   :  { %v441_v0 = vpop.f32.mrf.mxu2  ;;  %v172_v4 = vpop.f32.mrf.mxu0 }
  0x97   :  { %v2927_v3 = vadd.f32 %v441_v0, %v295_v61 }
  0x98   :  { %v297_v7 = vpop.f32.mrf.mxu1 }
  0x99   :  { %v298_v8 = vadd.f32 %v297_v7, %v172_v4  ;;  %2143 = vmatmul.msk.bf16.gmra.mxu3 %vm133_vm0, %v2581_v1  ;;  %2211 = vmatmul.msk.bf16.gmra.mxu0 %vm133_vm0, %v2591_v2  ;;  %v2585_v4 = vld [vmem:[%s3417_s0 + $0xf8] sm:$0xff] }
  0x9a   :  { %v2615_v7 = vld [vmem:[%s3417_s0 + $0x1b8] sm:$0xff] }
  0x9b   :  { %2347 = vmatmul.msk.bf16.gmra.mxu2 %vm133_vm0, %v2611_v5  ;;  %2279 = vmatmul.msk.bf16.gmra.mxu1 %vm133_vm0, %v2601_v6  ;;  %v2595_v5 = vld [vmem:[%s3417_s0 + $0x138] sm:$0xff] }
  0x9c   :  { %v202_v9 = vpop.f32.mrf.mxu3 }
  0x9e   :  { %v444_v10 = vpop.f32.mrf.mxu2  ;;  %v174_v12 = vpop.f32.mrf.mxu0 }
  0x9f   :  { %v2939_v11 = vadd.f32 %v444_v10, %v298_v8  ;;  %v2605_v8 = vld [vmem:[%s3417_s0 + $0x178] sm:$0xff] }
  0xa0   :  { %v299_v13 = vpop.f32.mrf.mxu1 }
  0xa1   :  { %v300_v14 = vadd.f32 %v299_v13, %v174_v12  ;;  %v2648_v12 = vld [vmem:[%s3418_s8] sm:$0xff] }
  0xa2   :  { %1762 = vmatpush.bf16.msra.mxu2 %v2648_v12 }
  0xa4   :  { %v204_v15 = vpop.f32.mrf.mxu3 }
  0xa6   :  { %v446_v16 = vpop.f32.mrf.mxu2  ;;  %v177_v20 = vpop.f32.mrf.mxu0 }
  0xa7   :  { %v2947_v19 = vadd.f32 %v446_v16, %v300_v14 }
  0xa8   :  { %v302_v23 = vpop.f32.mrf.mxu1 }
  0xa9   :  { %v303_v24 = vadd.f32 %v302_v23, %v177_v20  ;;  %2144 = vmatmul.msk.bf16.gmra.mxu3 %vm133_vm0, %v2582_v17  ;;  %2212 = vmatmul.msk.bf16.gmra.mxu0 %vm133_vm0, %v2592_v18  ;;  %v2639_v18 = vld [vmem:[%s3419_s5 + $0x8] sm:$0xff]  ;;  %v2628_v23 = vld [vmem:[%s3417_s0 + $0x200] sm:$0xff] }
  0xaa   :  { %1583 = vmatpush.bf16.msra.mxu1 %v2639_v18 }
  0xab   :  { %2348 = vmatmul.msk.bf16.gmra.mxu2 %vm133_vm0, %v2612_v21  ;;  %2280 = vmatmul.msk.bf16.gmra.mxu1 %vm133_vm0, %v2602_v22  ;;  %v2618_v22 = vld [vmem:[%s3417_s0 + $0x1c0] sm:$0xff] }
  0xac   :  { %v322_v25 = vpop.f32.mrf.mxu3 }
  0xad   :  { %v323_v26 = vadd.f32 %v322_v25, %v197_v56 }
  0xae   :  { %v449_v27 = vpop.f32.mrf.mxu2  ;;  %v2961_v29 = vpop.f32.mrf.mxu0 }
  0xaf   :  { %v2959_v28 = vadd.f32 %v449_v27, %v303_v24 }
  0xb0   :  { %v2963_v30 = vpop.f32.mrf.mxu1 }
  0xb4   :  { %v324_v31 = vpop.f32.mrf.mxu3 }
  0xb5   :  { %v325_v32 = vadd.f32 %v324_v31, %v199_v63 }
  0xb6   :  { %v2965_v33 = vpop.f32.mrf.mxu2  ;;  %v182_v36 = vpop.f32.mrf.mxu0 }
  0xb8   :  { %v307_v39 = vpop.f32.mrf.mxu1 }
  0xb9   :  { %v308_v40 = vadd.f32 %v307_v39, %v182_v36  ;;  %2145 = vmatmul.msk.bf16.gmra.mxu3 %vm133_vm0, %v2583_v34  ;;  %2213 = vmatmul.msk.bf16.gmra.mxu0 %vm133_vm0, %v2593_v35  ;;  %v2619_v35 = vld [vmem:[%s3417_s0 + $0x1c8] sm:$0xff] }
  0xba   :  { %v2629_v36 = vld [vmem:[%s3417_s0 + $0x208] sm:$0xff] }
  0xbb   :  { %2349 = vmatmul.msk.bf16.gmra.mxu2 %vm133_vm0, %v2613_v37  ;;  %2281 = vmatmul.msk.bf16.gmra.mxu1 %vm133_vm0, %v2603_v38 }
  0xbc   :  { %v327_v41 = vpop.f32.mrf.mxu3 }
  0xbd   :  { %v328_v42 = vadd.f32 %v327_v41, %v202_v9 }
  0xbe   :  { %v454_v43 = vpop.f32.mrf.mxu2  ;;  %v2985_v45 = vpop.f32.mrf.mxu0 }
  0xbf   :  { %v2983_v44 = vadd.f32 %v454_v43, %v308_v40  ;;  %v2620_v43 = vld [vmem:[%s3417_s0 + $0x1d0] sm:$0xff] }
  0xc0   :  { %v2987_v46 = vpop.f32.mrf.mxu1 }
  0xc4   :  { %v329_v47 = vpop.f32.mrf.mxu3 }
  0xc5   :  { %v330_v48 = vadd.f32 %v329_v47, %v204_v15  ;;  %v2630_v47 = vld [vmem:[%s3417_s0 + $0x210] sm:$0xff] }
  0xc6   :  { %v2989_v49 = vpop.f32.mrf.mxu2  ;;  %v187_v52 = vpop.f32.mrf.mxu0 }
  0xc8   :  { %v312_v55 = vpop.f32.mrf.mxu1 }
  0xc9   :  { %v313_v56 = vadd.f32 %v312_v55, %v187_v52  ;;  %2146 = vmatmul.msk.bf16.gmra.mxu3 %vm133_vm0, %v2584_v50  ;;  %2214 = vmatmul.msk.bf16.gmra.mxu0 %vm133_vm0, %v2594_v51 }
  0xcb   :  { %2350 = vmatmul.msk.bf16.gmra.mxu2 %vm133_vm0, %v2614_v53  ;;  %2282 = vmatmul.msk.bf16.gmra.mxu1 %vm133_vm0, %v2604_v54  ;;  %v305_v53 = vadd.f32 %v2963_v30, %v2961_v29 }
  0xcc   :  { %v469_v57 = vpop.f32.mrf.mxu3 }
  0xcd   :  { %v3007_v60 = vadd.f32 %v469_v57, %v323_v26  ;;  %v484_v54 = vadd.f32 %v2965_v33, %v305_v53  ;;  %v2621_v57 = vld [vmem:[%s3417_s0 + $0x1d8] sm:$0xff] }
  0xce   :  { %v459_v59 = vpop.f32.mrf.mxu2  ;;  %v3011_v62 = vpop.f32.mrf.mxu0 }
  0xcf   :  { %v3009_v61 = vadd.f32 %v459_v59, %v313_v56  ;;  %v2631_v59 = vld [vmem:[%s3417_s0 + $0x218] sm:$0xff] }
  0xd0   :  { %v3013_v63 = vpop.f32.mrf.mxu1 }
  0xd1   :  { %v315_v18 = vadd.f32 %v3013_v63, %v3011_v62 }
  0xd4   :  { %v471_v0 = vpop.f32.mrf.mxu3 }
  0xd5   :  { %v3017_v2 = vadd.f32 %v471_v0, %v325_v32 }
  0xd6   :  { %v3015_v1 = vpop.f32.mrf.mxu2  ;;  %v192_v6 = vpop.f32.mrf.mxu0 }
  0xd8   :  { %v317_v9 = vpop.f32.mrf.mxu1 }
  0xd9   :  { %v318_v10 = vadd.f32 %v317_v9, %v192_v6  ;;  %2147 = vmatmul.msk.bf16.gmra.mxu3 %vm133_vm0, %v2585_v4  ;;  %2215 = vmatmul.msk.bf16.gmra.mxu0 %vm133_vm0, %v2595_v5  ;;  %v310_v5 = vadd.f32 %v2987_v46, %v2985_v45  ;;  %v2638_v6 = vld [vmem:[%s3419_s5] sm:$0xff] }
  0xda   :  { %1584 = vmatpush.bf16.msra.mxu1 %v2638_v6 }
  0xdb   :  { %2351 = vmatmul.msk.bf16.gmra.mxu2 %vm133_vm0, %v2615_v7  ;;  %2283 = vmatmul.msk.bf16.gmra.mxu1 %vm133_vm0, %v2605_v8  ;;  %v486_v7 = vadd.f32 %v2989_v49, %v310_v5 }
  0xdc   :  { %v474_v13 = vpop.f32.mrf.mxu3 }
  0xdd   :  { %v3038_v15 = vadd.f32 %v474_v13, %v328_v42 }
  0xde   :  { %v464_v14 = vpop.f32.mrf.mxu2  ;;  %v3042_v17 = vpop.f32.mrf.mxu0 }
  0xdf   :  { %v3040_v16 = vadd.f32 %v464_v14, %v318_v10  ;;  %v2622_v10 = vld [vmem:[%s3417_s0 + $0x1e0] sm:$0xff] }
  0xe0   :  { %v319_v63 = vpop.f32.mrf.mxu1 }
  0xe4   :  { %v476_v20 = vpop.f32.mrf.mxu3 }
  0xe5   :  { %v3047_v21 = vadd.f32 %v476_v20, %v330_v48  ;;  %v488_v20 = vadd.f32 %v3015_v1, %v315_v18 }
  0xe6   :  { %v765_v24 = vpop.f32.mrf.mxu0 }
  0xe9   :  { %2412 = vmatmul.msk.bf16.vlgmr.msra.gmra.mxu3 %vm133_vm0, %v2618_v22  ;;  %2480 = vmatmul.msk.bf16.vlgmr.msra.gmra.mxu0 %vm133_vm0, %v2628_v23 }
  0xec   :  { %v602_v25 = vpop.f32.mrf.mxu3 }
  0xed   :  { %v642_v26 = vadd.f32 %v602_v25, %v2916_v58  ;;  %v2633_v25 = vld [vmem:[%s3417_s0 + $0x228] sm:$0xff] }
  0xee   :  { %v767_v27 = vpop.f32.mrf.mxu0 }
  0xef   :  { %v3058_v31 = vadd.f32 %v765_v24, %v642_v26  ;;  %v2623_v24 = vld [vmem:[%s3417_s0 + $0x1e8] sm:$0xff]  ;;  %v466_v26 = vpop.f32.mrf.mxu2 }
  0xf4   :  { %v604_v32 = vpop.f32.mrf.mxu3 }
  0xf5   :  { %v643_v34 = vadd.f32 %v604_v32, %v2927_v3 }
  0xf6   :  { %v770_v37 = vpop.f32.mrf.mxu0 }
  0xf7   :  { %v3067_v38 = vadd.f32 %v767_v27, %v643_v34  ;;  %v1091_v32 = vpop.f32.mrf.mxu2 }
  0xf9   :  { %2413 = vmatmul.msk.bf16.gmra.mxu3 %vm133_vm0, %v2619_v35  ;;  %2481 = vmatmul.msk.bf16.gmra.mxu0 %vm133_vm0, %v2629_v36  ;;  %v320_v36 = vadd.f32 %v319_v63, %v3042_v17 }
  0xfc   :  { %v607_v58 = vpop.f32.mrf.mxu3 }
  0xfd   :  { %v644_v39 = vadd.f32 %v607_v58, %v2939_v11 }
  0xfe   :  { %v772_v40 = vpop.f32.mrf.mxu0 }
  0xff   :  { %v3072_v3 = vadd.f32 %v770_v37, %v644_v39  ;;  %v490_v37 = vadd.f32 %v466_v26, %v320_v36  ;;  %v928_v39 = vpop.f32.mrf.mxu1  ;;  %v3183_v26 = vld [vmem:[%s3420_s3] ss:$0 sm:$0xff] }
 0x104   :  { %v609_v41 = vpop.f32.mrf.mxu3 }
 0x105   :  { %v645_v42 = vadd.f32 %v609_v41, %v2947_v19  ;;  %v2624_v41 = vld [vmem:[%s3417_s0 + $0x1f0] sm:$0xff] }
 0x106   :  { %v775_v48 = vpop.f32.mrf.mxu0 }
 0x107   :  { %v3081_v50 = vadd.f32 %v772_v40, %v645_v42  ;;  %v2634_v42 = vld [vmem:[%s3417_s0 + $0x230] sm:$0xff] }
 0x109   :  { %2414 = vmatmul.msk.bf16.gmra.mxu3 %vm133_vm0, %v2620_v43  ;;  %2482 = vmatmul.msk.bf16.gmra.mxu0 %vm133_vm0, %v2630_v47  ;;  %v1093_v47 = vpop.f32.mrf.mxu2 }
 0x10c   :  { %v612_v11 = vpop.f32.mrf.mxu3 }
 0x10d   :  { %v646_v51 = vadd.f32 %v612_v11, %v2959_v28 }
 0x10e   :  { %v777_v52 = vpop.f32.mrf.mxu0 }
 0x10f   :  { %v3086_v19 = vadd.f32 %v775_v48, %v646_v51  ;;  %v930_v51 = vpop.f32.mrf.mxu1 }
 0x111   :  { %v1096_v53 = vpop.f32.mrf.mxu2 }
 0x114   :  { %v614_v55 = vpop.f32.mrf.mxu3 }
 0x115   :  { %v647_v56 = vadd.f32 %v614_v55, %v484_v54  ;;  %v2640_v54 = vld [vmem:[%s3422_s1] sm:$0xff] }
 0x116   :  { %v780_v0 = vpop.f32.mrf.mxu0  ;;  %2540 = vmatmul.msk.bf16.vlgmr.msra.gmra.mxu2 %vm1730_vm1, %v2640_v54 }
 0x117   :  { %v3097_v28 = vadd.f32 %v777_v52, %v647_v56 }
 0x119   :  { %2415 = vmatmul.msk.bf16.gmra.mxu3 %vm133_vm0, %v2621_v57  ;;  %2483 = vmatmul.msk.bf16.gmra.mxu0 %vm133_vm0, %v2631_v59  ;;  %v2625_v57 = vld [vmem:[%s3417_s0 + $0x1f8] sm:$0xff] }
 0x11c   :  { %v617_v29 = vpop.f32.mrf.mxu3 }
 0x11d   :  { %v648_v30 = vadd.f32 %v617_v29, %v2983_v44  ;;  %v2632_v44 = vld [vmem:[%s3417_s0 + $0x220] sm:$0xff]  ;;  %v933_v29 = vpop.f32.mrf.mxu1 }
 0x11e   :  { %v782_v33 = vpop.f32.mrf.mxu0 }
 0x11f   :  { %v3102_v4 = vadd.f32 %v780_v0, %v648_v30  ;;  %v1098_v30 = vpop.f32.mrf.mxu2 }
 0x124   :  { %v619_v8 = vpop.f32.mrf.mxu3 }
 0x125   :  { %v649_v9 = vadd.f32 %v619_v8, %v486_v7  ;;  %v2641_v7 = vld [vmem:[%s3422_s1 + $0x8] sm:$0xff]  ;;  %v935_v8 = vpop.f32.mrf.mxu1 }
 0x126   :  { %v785_v12 = vpop.f32.mrf.mxu0  ;;  %2541 = vmatmul.msk.bf16.gmra.mxu2 %vm1730_vm1, %v2641_v7 }
 0x127   :  { %v3116_v13 = vadd.f32 %v782_v33, %v649_v9 }
 0x129   :  { %2416 = vmatmul.msk.bf16.gmra.mxu3 %vm133_vm0, %v2622_v10  ;;  %2484 = vmatmul.msk.bf16.gmra.mxu0 %vm133_vm0, %v2632_v44  ;;  %v1101_v44 = vpop.f32.mrf.mxu2 }
 0x12c   :  { %v622_v45 = vpop.f32.mrf.mxu3 }
 0x12d   :  { %v650_v46 = vadd.f32 %v622_v45, %v3009_v61  ;;  %v968_v45 = vadd.f32 %v928_v39, %v3058_v31  ;;  %v938_v18 = vpop.f32.mrf.mxu1 }
 0x12e   :  { %v787_v49 = vpop.f32.mrf.mxu0 }
 0x12f   :  { %v3121_v14 = vadd.f32 %v785_v12, %v650_v46 }
 0x134   :  { %v624_v22 = vpop.f32.mrf.mxu3 }
 0x135   :  { %v651_v23 = vadd.f32 %v624_v22, %v488_v20 }
 0x136   :  { %v790_v61 = vpop.f32.mrf.mxu0 }
 0x137   :  { %v3132_v27 = vadd.f32 %v787_v49, %v651_v23  ;;  %v969_v23 = vadd.f32 %v930_v51, %v3067_v38  ;;  %v3193_v38 = vld [vmem:[%s3421_s4] ss:$0 sm:$0xff] }
 0x139   :  { %2417 = vmatmul.msk.bf16.gmra.mxu3 %vm133_vm0, %v2623_v24  ;;  %2485 = vmatmul.msk.bf16.gmra.mxu0 %vm133_vm0, %v2633_v25  ;;  %v1103_v24 = vpop.f32.mrf.mxu2  ;;  %v1132_v31 = vadd.f32 %v1093_v47, %v969_v23 }
 0x13c   :  { %v627_v62 = vpop.f32.mrf.mxu3 }
 0x13d   :  { %v652_v1 = vadd.f32 %v627_v62, %v3040_v16 }
 0x13e   :  { %v792_v34 = vpop.f32.mrf.mxu0 }
 0x13f   :  { %v3137_v35 = vadd.f32 %v790_v61, %v652_v1 }
 0x141   :  { %v1106_v39 = vpop.f32.mrf.mxu2 }
 0x144   :  { %v629_v58 = vpop.f32.mrf.mxu3 }
 0x145   :  { %v653_v40 = vadd.f32 %v629_v58, %v490_v37 }
 0x146   :  { %v795_v43 = vpop.f32.mrf.mxu0 }
 0x147   :  { %v3146_v16 = vadd.f32 %v792_v34, %v653_v40  ;;  %v940_v34 = vpop.f32.mrf.mxu1 }
 0x149   :  { %2418 = vmatmul.msk.bf16.gmra.mxu3 %vm133_vm0, %v2624_v41  ;;  %2486 = vmatmul.msk.bf16.gmra.mxu0 %vm133_vm0, %v2634_v42 }
 0x14c   :  { %v632_v17 = vpop.f32.mrf.mxu3 }
 0x14d   :  { %v654_v48 = vadd.f32 %v632_v17, %v3007_v60  ;;  %v2635_v60 = vld [vmem:[%s3417_s0 + $0x238] sm:$0xff] }
 0x14e   :  { %v797_v11 = vpop.f32.mrf.mxu0 }
 0x14f   :  { %v3151_v52 = vadd.f32 %v795_v43, %v654_v48  ;;  %v943_v54 = vpop.f32.mrf.mxu1 }
 0x154   :  { %v634_v55 = vpop.f32.mrf.mxu3 }
 0x155   :  { %v655_v56 = vadd.f32 %v634_v55, %v3017_v2  ;;  %v2643_v55 = vld [vmem:[%s3422_s1 + $0x18] sm:$0xff] }
 0x156   :  { %v800_v59 = vpop.f32.mrf.mxu0 }
 0x157   :  { %v3164_v0 = vadd.f32 %v797_v11, %v655_v56  ;;  %v971_v11 = vadd.f32 %v935_v8, %v3081_v50  ;;  %v972_v50 = vadd.f32 %v938_v18, %v3086_v19  ;;  %v945_v8 = vpop.f32.mrf.mxu1  ;;  %v2644_v19 = vld [vmem:[%s3422_s1 + $0x20] sm:$0xff] }
 0x159   :  { %2419 = vmatmul.msk.bf16.gmra.mxu3 %vm133_vm0, %v2625_v57  ;;  %2487 = vmatmul.msk.bf16.gmra.mxu0 %vm133_vm0, %v2635_v60  ;;  %v1134_v56 = vadd.f32 %v1098_v30, %v971_v11  ;;  %v1135_v7 = vadd.f32 %v1101_v44, %v972_v50 }
 0x15c   :  { %v637_v33 = vpop.f32.mrf.mxu3 }
 0x15d   :  { %v656_v2 = vadd.f32 %v637_v33, %v3038_v15  ;;  %v1131_v15 = vadd.f32 %v1091_v32, %v968_v45  ;;  %v970_v32 = vadd.f32 %v933_v29, %v3072_v3 }
 0x15e   :  { %v802_v5 = vpop.f32.mrf.mxu0 }
 0x15f   :  { %v3169_v6 = vadd.f32 %v800_v59, %v656_v2  ;;  %v1133_v40 = vadd.f32 %v1096_v53, %v970_v32  ;;  %v1108_v53 = vpop.f32.mrf.mxu2 }
 0x164   :  { %v639_v9 = vpop.f32.mrf.mxu3 }
 0x165   :  { %v657_v10 = vadd.f32 %v639_v9, %v3047_v21  ;;  %v2642_v21 = vld [vmem:[%s3422_s1 + $0x10] sm:$0xff] }
 0x166   :  { %v1417_v12 = vpop.f32.mrf.mxu0  ;;  %2542 = vmatmul.msk.bf16.gmra.mxu2 %vm1730_vm1, %v2642_v21 }
 0x167   :  { %v3177_v46 = vadd.f32 %v802_v5, %v657_v10 }
 0x16c   :  { %v1254_v49 = vpop.f32.mrf.mxu3 }
 0x16d   :  { %v1294_v20 = vadd.f32 %v1254_v49, %v1131_v15  ;;  %v1111_v15 = vpop.f32.mrf.mxu2 }
 0x16e   :  { %v1419_v22 = vpop.f32.mrf.mxu0 }
 0x16f   :  { %v1457_v25 = vadd.f32 %v1417_v12, %v1294_v20  ;;  %v973_v20 = vadd.f32 %v940_v34, %v3097_v28 }
 0x171   :  { %v1477_v62 = vmul.f32 %v3183_v26, %v1457_v25  ;;  %v1136_v44 = vadd.f32 %v1103_v24, %v973_v20  ;;  %v948_v25 = vpop.f32.mrf.mxu1 }
 0x173   :  { %v1497_v37 = vadd.f32 %v3193_v38, %v1477_v62  ;;  %v974_v62 = vadd.f32 %v943_v54, %v3102_v4 }
 0x174   :  { %v1256_v61 = vpop.f32.mrf.mxu3 }
 0x175   :  { %v1295_v63 = vadd.f32 %v1256_v61, %v1132_v31  ;;  %v1513_v43 = vmax.f32 %v1497_v37, 0.0  ;;  %v1137_v34 = vadd.f32 %v1106_v39, %v974_v62 }
 0x176   :  { %v1422_v1 = vpop.f32.mrf.mxu0  ;;  %2543 = vmatmul.msk.bf16.gmra.mxu2 %vm1730_vm1, %v2643_v55 }
 0x177   :  { %v1458_v36 = vadd.f32 %v1419_v22, %v1295_v63  ;;  %v1113_v63 = vpop.f32.mrf.mxu2 }
 0x179   :  { %v1478_v58 = vmul.f32 %v3183_v26, %v1458_v36 }
 0x17b   :  { %v1498_v41 = vadd.f32 %v3193_v38, %v1478_v58 }
 0x17c   :  { %v1259_v42 = vpop.f32.mrf.mxu3 }
 0x17d   :  { %v1514_v47 = vmax.f32 %v1498_v41, 0.0  ;;  %v1296_v17 = vadd.f32 %v1259_v42, %v1133_v40  ;;  %v975_v42 = vadd.f32 %v945_v8, %v3116_v13  ;;  %v976_v13 = vadd.f32 %v948_v25, %v3121_v14  ;;  %v2646_v14 = vld [vmem:[%s3422_s1 + $0x30] sm:$0xff] }
 0x17e   :  { %v1424_v48 = vpop.f32.mrf.mxu0 }
 0x17f   :  { %v1529_v51 = vpack.c.bf16 %v1514_v47, %v1513_v43  ;;  %v1459_v3 = vadd.f32 %v1422_v1, %v1296_v17  ;;  %v950_v43 = vpop.f32.mrf.mxu1  ;;  %v1116_v4 = vpop.f32.mrf.mxu2  ;;  %v1138_v39 = vadd.f32 %v1108_v53, %v975_v42 }
 0x180   :  { %v977_v8 = vadd.f32 %v950_v43, %v3132_v27 }
 0x181   :  { %2496 = vmatmul.msk.bf16.vlgmr.msra.gmra.mxu1 %vm133_vm0, %v1529_v51  ;;  %v1479_v60 = vmul.f32 %v3183_v26, %v1459_v3 }
 0x183   :  { %v1499_v2 = vadd.f32 %v3193_v38, %v1479_v60 }
 0x184   :  { %v1261_v57 = vpop.f32.mrf.mxu3 }
 0x185   :  { %v1297_v59 = vadd.f32 %v1261_v57, %v1134_v56  ;;  %v1515_v10 = vmax.f32 %v1499_v2, 0.0 }
 0x186   :  { %v1427_v29 = vpop.f32.mrf.mxu0  ;;  %2544 = vmatmul.msk.bf16.gmra.mxu2 %vm1730_vm1, %v2644_v19 }
 0x187   :  { %v1460_v33 = vadd.f32 %v1424_v48, %v1297_v59  ;;  %v2645_v48 = vld [vmem:[%s3422_s1 + $0x28] sm:$0xff]  ;;  %v953_v56 = vpop.f32.mrf.mxu1  ;;  %v1139_v59 = vadd.f32 %v1111_v15, %v976_v13  ;;  %v1118_v50 = vpop.f32.mrf.mxu2 }
 0x188   :  { %v978_v27 = vadd.f32 %v953_v56, %v3137_v35  ;;  %v2647_v35 = vld [vmem:[%s3422_s1 + $0x38] sm:$0xff] }
 0x189   :  { %v1480_v5 = vmul.f32 %v3183_v26, %v1460_v33 }
 0x18b   :  { %v1500_v9 = vadd.f32 %v3193_v38, %v1480_v5 }
 0x18c   :  { %v1264_v30 = vpop.f32.mrf.mxu3 }
 0x18d   :  { %v1516_v12 = vmax.f32 %v1500_v9, 0.0  ;;  %v1298_v45 = vadd.f32 %v1264_v30, %v1135_v7 }
 0x18e   :  { %v1429_v49 = vpop.f32.mrf.mxu0 }
 0x18f   :  { %v1530_v22 = vpack.c.bf16 %v1516_v12, %v1515_v10  ;;  %v1461_v23 = vadd.f32 %v1427_v29, %v1298_v45  ;;  %v1140_v10 = vadd.f32 %v1113_v63, %v977_v8  ;;  %v955_v12 = vpop.f32.mrf.mxu1  ;;  %v1121_v20 = vpop.f32.mrf.mxu2 }
 0x191   :  { %2497 = vmatmul.msk.bf16.gmra.mxu1 %vm133_vm0, %v1530_v22  ;;  %v1481_v21 = vmul.f32 %v3183_v26, %v1461_v23 }
 0x193   :  { %v1501_v1 = vadd.f32 %v3193_v38, %v1481_v21 }
 0x194   :  { %v1266_v18 = vpop.f32.mrf.mxu3 }
 0x195   :  { %v1299_v31 = vadd.f32 %v1266_v18, %v1136_v44  ;;  %v1517_v37 = vmax.f32 %v1501_v1, 0.0  ;;  %v1141_v18 = vadd.f32 %v1116_v4, %v978_v27  ;;  %v979_v1 = vadd.f32 %v955_v12, %v3146_v16 }
 0x196   :  { %v1432_v61 = vpop.f32.mrf.mxu0  ;;  %2545 = vmatmul.msk.bf16.gmra.mxu2 %vm1730_vm1, %v2645_v48 }
 0x197   :  { %v1462_v28 = vadd.f32 %v1429_v49, %v1299_v31  ;;  %v958_v31 = vpop.f32.mrf.mxu1 }
 0x199   :  { %v1482_v32 = vmul.f32 %v3183_v26, %v1462_v28 }
 0x19b   :  { %v1502_v36 = vadd.f32 %v3193_v38, %v1482_v32 }
 0x19c   :  { %v1269_v24 = vpop.f32.mrf.mxu3 }
 0x19d   :  { %v1518_v58 = vmax.f32 %v1502_v36, 0.0  ;;  %v1300_v40 = vadd.f32 %v1269_v24, %v1137_v34  ;;  %v1123_v34 = vpop.f32.mrf.mxu2  ;;  %v1142_v24 = vadd.f32 %v1118_v50, %v979_v1  ;;  %v3271_v1 = vld [vmem:[%s3423_s9] ss:$0 sm:$0xff] }
 0x19e   :  { %v1434_v41 = vpop.f32.mrf.mxu0 }
 0x19f   :  { %v1531_v47 = vpack.c.bf16 %v1518_v58, %v1517_v37  ;;  %v1463_v17 = vadd.f32 %v1432_v61, %v1300_v40  ;;  %v960_v42 = vpop.f32.mrf.mxu1 }
 0x1a0   :  { %v981_v13 = vadd.f32 %v960_v42, %v3164_v0 }
 0x1a1   :  { %2498 = vmatmul.msk.bf16.gmra.mxu1 %vm133_vm0, %v1531_v47  ;;  %v1483_v51 = vmul.f32 %v3183_v26, %v1463_v17 }
 0x1a3   :  { %v1503_v57 = vadd.f32 %v3193_v38, %v1483_v51 }
 0x1a4   :  { %v1271_v11 = vpop.f32.mrf.mxu3 }
 0x1a5   :  { %v1301_v54 = vadd.f32 %v1271_v11, %v1138_v39  ;;  %v1519_v33 = vmax.f32 %v1503_v57, 0.0  ;;  %v1126_v4 = vpop.f32.mrf.mxu2 }
 0x1a6   :  { %v1437_v3 = vpop.f32.mrf.mxu0  ;;  %2546 = vmatmul.msk.bf16.gmra.mxu2 %vm1730_vm1, %v2646_v14 }
 0x1a7   :  { %v1464_v55 = vadd.f32 %v1434_v41, %v1301_v54  ;;  %v980_v41 = vadd.f32 %v958_v31, %v3151_v52  ;;  %v963_v56 = vpop.f32.mrf.mxu1 }
 0x1a9   :  { %v1484_v60 = vmul.f32 %v3183_v26, %v1464_v55  ;;  %v1143_v48 = vadd.f32 %v1121_v20, %v980_v41 }
 0x1ab   :  { %v1504_v29 = vadd.f32 %v3193_v38, %v1484_v60  ;;  %v1144_v60 = vadd.f32 %v1123_v34, %v981_v13 }
 0x1ac   :  { %v1274_v53 = vpop.f32.mrf.mxu3 }
 0x1ad   :  { %v1520_v2 = vmax.f32 %v1504_v29, 0.0  ;;  %v1302_v5 = vadd.f32 %v1274_v53, %v1139_v59  ;;  %v1128_v59 = vpop.f32.mrf.mxu2 }
 0x1ae   :  { %v1439_v7 = vpop.f32.mrf.mxu0 }
 0x1af   :  { %v1532_v9 = vpack.c.bf16 %v1520_v2, %v1519_v33  ;;  %v1465_v30 = vadd.f32 %v1437_v3, %v1302_v5  ;;  %v982_v33 = vadd.f32 %v963_v56, %v3169_v6  ;;  %v965_v8 = vpop.f32.mrf.mxu1 }
 0x1b1   :  { %2499 = vmatmul.msk.bf16.gmra.mxu1 %vm133_vm0, %v1532_v9  ;;  %v1485_v15 = vmul.f32 %v3183_v26, %v1465_v30  ;;  %v1145_v0 = vadd.f32 %v1126_v4, %v982_v33 }
 0x1b3   :  { %v1505_v19 = vadd.f32 %v3193_v38, %v1485_v15 }
 0x1b4   :  { %v1276_v45 = vpop.f32.mrf.mxu3 }
 0x1b5   :  { %v1303_v49 = vadd.f32 %v1276_v45, %v1140_v10  ;;  %v1521_v61 = vmax.f32 %v1505_v19, 0.0  ;;  %v1764_v10 = vpop.f32.mrf.mxu2 }
 0x1b6   :  { %v1442_v22 = vpop.f32.mrf.mxu0  ;;  %2547 = vmatmul.msk.bf16.gmra.mxu2 %vm1730_vm1, %v2647_v35  ;;  %v1808_v34 = vmul.f32 %v3271_v1, %v1764_v10 }
 0x1b7   :  { %v1466_v23 = vadd.f32 %v1439_v7, %v1303_v49  ;;  %v983_v49 = vadd.f32 %v965_v8, %v3177_v46 }
 0x1b9   :  { %v1486_v44 = vmul.f32 %v3183_v26, %v1466_v23  ;;  %v1146_v6 = vadd.f32 %v1128_v59, %v983_v49 }
 0x1bb   :  { %v1506_v25 = vadd.f32 %v3193_v38, %v1486_v44 }
 0x1bc   :  { %v1279_v21 = vpop.f32.mrf.mxu3 }
 0x1bd   :  { %v1522_v62 = vmax.f32 %v1506_v25, 0.0  ;;  %v1304_v28 = vadd.f32 %v1279_v21, %v1141_v18  ;;  %v1766_v18 = vpop.f32.mrf.mxu2 }
 0x1be   :  { %v1444_v63 = vpop.f32.mrf.mxu0 }
 0x1bf   :  { %v1533_v32 = vpack.c.bf16 %v1522_v62, %v1521_v61  ;;  %v1467_v36 = vadd.f32 %v1442_v22, %v1304_v28 }
 0x1c1   :  { %2500 = vmatmul.msk.bf16.gmra.mxu1 %vm133_vm0, %v1533_v32  ;;  %v1487_v58 = vmul.f32 %v3183_v26, %v1467_v36  ;;  %v3287_v36 = vld [vmem:[%s3426_s7] ss:$0 sm:$0xff] }
 0x1c3   :  { %v1507_v47 = vadd.f32 %v3193_v38, %v1487_v58 }
 0x1c4   :  { %v1281_v37 = vpop.f32.mrf.mxu3 }
 0x1c5   :  { %v1305_v40 = vadd.f32 %v1281_v37, %v1142_v24  ;;  %v1523_v51 = vmax.f32 %v1507_v47, 0.0 }
 0x1c6   :  { %v1447_v43 = vpop.f32.mrf.mxu0 }
 0x1c7   :  { %v1468_v16 = vadd.f32 %v1444_v63, %v1305_v40  ;;  %v1769_v63 = vpop.f32.mrf.mxu2 }
 0x1c9   :  { %v1488_v17 = vmul.f32 %v3183_v26, %v1468_v16  ;;  %v1809_v16 = vmul.f32 %v3271_v1, %v1766_v18 }
 0x1cb   :  { %v1508_v39 = vadd.f32 %v3193_v38, %v1488_v17 }
 0x1cc   :  { %v1284_v11 = vpop.f32.mrf.mxu3 }
 0x1cd   :  { %v1524_v54 = vmax.f32 %v1508_v39, 0.0  ;;  %v1306_v3 = vadd.f32 %v1284_v11, %v1143_v48  ;;  %v1810_v39 = vmul.f32 %v3271_v1, %v1769_v63 }
 0x1ce   :  { %v1449_v57 = vpop.f32.mrf.mxu0 }
 0x1cf   :  { %v1534_v55 = vpack.c.bf16 %v1524_v54, %v1523_v51  ;;  %v1469_v52 = vadd.f32 %v1447_v43, %v1306_v3  ;;  %v1771_v32 = vpop.f32.mrf.mxu2 }
 0x1d1   :  { %2501 = vmatmul.msk.bf16.gmra.mxu1 %vm133_vm0, %v1534_v55  ;;  %v1489_v50 = vmul.f32 %v3183_v26, %v1469_v52 }
 0x1d3   :  { %v1509_v5 = vadd.f32 %v3193_v38, %v1489_v50 }
 0x1d4   :  { %v1286_v29 = vpop.f32.mrf.mxu3 }
 0x1d5   :  { %v1307_v53 = vadd.f32 %v1286_v29, %v1144_v60  ;;  %v1525_v12 = vmax.f32 %v1509_v5, 0.0 }
 0x1d6   :  { %v1452_v30 = vpop.f32.mrf.mxu0 }
 0x1d7   :  { %v1470_v2 = vadd.f32 %v1449_v57, %v1307_v53  ;;  %v1811_v57 = vmul.f32 %v3271_v1, %v1771_v32 }
 0x1d9   :  { %v1490_v7 = vmul.f32 %v3183_v26, %v1470_v2 }
 0x1db   :  { %v1510_v9 = vadd.f32 %v3193_v38, %v1490_v7 }
 0x1dc   :  { %v1289_v14 = vpop.f32.mrf.mxu3 }
 0x1dd   :  { %v1526_v45 = vmax.f32 %v1510_v9, 0.0  ;;  %v1308_v15 = vadd.f32 %v1289_v14, %v1145_v0 }
 0x1de   :  { %v1454_v44 = vpop.f32.mrf.mxu0 }
 0x1df   :  { %v1535_v20 = vpack.c.bf16 %v1526_v45, %v1525_v12  ;;  %v1471_v22 = vadd.f32 %v1452_v30, %v1308_v15 }
 0x1e1   :  { %2502 = vmatmul.msk.bf16.gmra.mxu1 %vm133_vm0, %v1535_v20  ;;  %v1491_v23 = vmul.f32 %v3183_v26, %v1471_v22 }
 0x1e3   :  { %v1511_v21 = vadd.f32 %v3193_v38, %v1491_v23 }
 0x1e4   :  { %v1291_v27 = vpop.f32.mrf.mxu3 }
 0x1e5   :  { %v1309_v19 = vadd.f32 %v1291_v27, %v1146_v6  ;;  %v1527_v62 = vmax.f32 %v1511_v21, 0.0 }
 0x1e7   :  { %v1472_v25 = vadd.f32 %v1454_v44, %v1309_v19 }
 0x1e9   :  { %v1492_v31 = vmul.f32 %v3183_v26, %v1472_v25  ;;  %v3277_v26 = vld [vmem:[%s3424_s10] ss:$0 sm:$0xff]  ;;  %v1774_v41 = vpop.f32.mrf.mxu2 }
 0x1ea   :  { %v1828_v24 = vadd.f32 %v3277_v26, %v1808_v34  ;;  %v1829_v17 = vadd.f32 %v3277_v26, %v1809_v16  ;;  %v1830_v3 = vadd.f32 %v3277_v26, %v1810_v39  ;;  %v1831_v50 = vadd.f32 %v3277_v26, %v1811_v57 }
 0x1eb   :  { %v1512_v61 = vadd.f32 %v3193_v38, %v1492_v31  ;;  %v3282_v38 = vld [vmem:[%s3425_s6] ss:$0 sm:$0xff]  ;;  %v1812_v2 = vmul.f32 %v3271_v1, %v1774_v41 }
 0x1ed   :  { %v1528_v46 = vmax.f32 %v1512_v61, 0.0  ;;  %v1832_v0 = vadd.f32 %v3277_v26, %v1812_v2 }
 0x1ef   :  { %v1536_v28 = vpack.c.bf16 %v1528_v46, %v1527_v62 }
 0x1f1   :  { %2503 = vmatmul.msk.bf16.gmra.mxu1 %vm133_vm0, %v1536_v28  ;;  %v1776_v54 = vpop.f32.mrf.mxu2 }
 0x1f2   :  { %v1813_v12 = vmul.f32 %v3271_v1, %v1776_v54 }
 0x1f4   :  { %v1833_v49 = vadd.f32 %v3277_v26, %v1813_v12 }
 0x1f9   :  { %v1779_v29 = vpop.f32.mrf.mxu2 }
 0x1fa   :  { %v1814_v6 = vmul.f32 %v3271_v1, %v1779_v29 }
 0x1fc   :  { %v1834_v44 = vadd.f32 %v3277_v26, %v1814_v6 }
 0x1fe   :  { %v1586_v35 = vpop.f32.mrf.mxu1 }
 0x1ff   :  { %v1630_v37 = vmul.f32 %v3282_v38, %v1586_v35 }
 0x201   :  { %v1650_v58 = vadd.f32 %v3287_v36, %v1630_v37  ;;  %v1781_v30 = vpop.f32.mrf.mxu2 }
 0x202   :  { %v1815_v61 = vmul.f32 %v3271_v1, %v1781_v30 }
 0x203   :  { %v1844_v40 = vadd.f32 %v1828_v24, %v1650_v58 }
 0x204   :  { %v1835_v63 = vadd.f32 %v3277_v26, %v1815_v61 }
 0x205   :  { %v1860_v42 = vmax.f32 %v1844_v40, 0.0 }
 0x206   :  { %v1588_v43 = vpop.f32.mrf.mxu1 }
 0x207   :  { %1876 = vst.msk [vmem:[%s3427_s11] sm:$0xff] %vm133_vm0, %v1860_v42  ;;  %v1631_v47 = vmul.f32 %v3282_v38, %v1588_v43 }
 0x209   :  { %v1651_v4 = vadd.f32 %v3287_v36, %v1631_v47  ;;  %v1784_v27 = vpop.f32.mrf.mxu2 }
 0x20a   :  { %v1816_v35 = vmul.f32 %v3271_v1, %v1784_v27 }
 0x20b   :  { %v1845_v48 = vadd.f32 %v1829_v17, %v1651_v4 }
 0x20c   :  { %v1836_v58 = vadd.f32 %v3277_v26, %v1816_v35 }
 0x20d   :  { %v1861_v11 = vmax.f32 %v1845_v48, 0.0 }
 0x20e   :  { %v1591_v51 = vpop.f32.mrf.mxu1 }
 0x20f   :  { %1877 = vst.msk [vmem:[%s3427_s11 + $0x8] sm:$0xff] %vm133_vm0, %v1861_v11  ;;  %v1632_v13 = vmul.f32 %v3282_v38, %v1591_v51 }
 0x211   :  { %v1652_v55 = vadd.f32 %v3287_v36, %v1632_v13  ;;  %v1786_v46 = vpop.f32.mrf.mxu2 }
 0x212   :  { %v1817_v47 = vmul.f32 %v3271_v1, %v1786_v46 }
 0x213   :  { %v1846_v56 = vadd.f32 %v1830_v3, %v1652_v55 }
 0x214   :  { %v1837_v48 = vadd.f32 %v3277_v26, %v1817_v47 }
 0x215   :  { %v1862_v52 = vmax.f32 %v1846_v56, 0.0 }
 0x216   :  { %v1593_v60 = vpop.f32.mrf.mxu1 }
 0x217   :  { %1878 = vst.msk [vmem:[%s3427_s11 + $0x10] sm:$0xff] %vm133_vm0, %v1862_v52  ;;  %v1633_v59 = vmul.f32 %v3282_v38, %v1593_v60 }
 0x219   :  { %v1653_v53 = vadd.f32 %v3287_v36, %v1633_v59  ;;  %v1789_v41 = vpop.f32.mrf.mxu2 }
 0x21a   :  { %v1818_v54 = vmul.f32 %v3271_v1, %v1789_v41 }
 0x21b   :  { %v1847_v33 = vadd.f32 %v1831_v50, %v1653_v53 }
 0x21c   :  { %v1838_v55 = vadd.f32 %v3277_v26, %v1818_v54 }
 0x21d   :  { %v1863_v5 = vmax.f32 %v1847_v33, 0.0 }
 0x21e   :  { %v1596_v7 = vpop.f32.mrf.mxu1 }
 0x21f   :  { %1879 = vst.msk [vmem:[%s3427_s11 + $0x18] sm:$0xff] %vm133_vm0, %v1863_v5  ;;  %v1634_v8 = vmul.f32 %v3282_v38, %v1596_v7 }
 0x221   :  { %v1654_v9 = vadd.f32 %v3287_v36, %v1634_v8  ;;  %v1791_v11 = vpop.f32.mrf.mxu2 }
 0x222   :  { %v1819_v29 = vmul.f32 %v3271_v1, %v1791_v11 }
 0x223   :  { %v1848_v14 = vadd.f32 %v1832_v0, %v1654_v9 }
 0x224   :  { %v1839_v33 = vadd.f32 %v3277_v26, %v1819_v29 }
 0x225   :  { %v1864_v10 = vmax.f32 %v1848_v14, 0.0 }
 0x226   :  { %v1598_v45 = vpop.f32.mrf.mxu1 }
 0x227   :  { %1880 = vst.msk [vmem:[%s3427_s11 + $0x20] sm:$0xff] %vm133_vm0, %v1864_v10  ;;  %v1635_v15 = vmul.f32 %v3282_v38, %v1598_v45 }
 0x229   :  { %v1655_v20 = vadd.f32 %v3287_v36, %v1635_v15  ;;  %v1794_v60 = vpop.f32.mrf.mxu2 }
 0x22a   :  { %v1820_v7 = vmul.f32 %v3271_v1, %v1794_v60 }
 0x22b   :  { %v1849_v22 = vadd.f32 %v1833_v49, %v1655_v20 }
 0x22c   :  { %v1840_v30 = vadd.f32 %v3277_v26, %v1820_v7 }
 0x22d   :  { %v1865_v23 = vmax.f32 %v1849_v22, 0.0 }
 0x22e   :  { %v1601_v19 = vpop.f32.mrf.mxu1 }
 0x22f   :  { %1881 = vst.msk [vmem:[%s3427_s11 + $0x28] sm:$0xff] %vm133_vm0, %v1865_v23  ;;  %v1636_v18 = vmul.f32 %v3282_v38, %v1601_v19 }
 0x231   :  { %v1656_v25 = vadd.f32 %v3287_v36, %v1636_v18  ;;  %v1796_v9 = vpop.f32.mrf.mxu2 }
 0x232   :  { %v1821_v15 = vmul.f32 %v3271_v1, %v1796_v9 }
 0x233   :  { %v1850_v21 = vadd.f32 %v1834_v44, %v1656_v25 }
 0x234   :  { %v1841_v6 = vadd.f32 %v3277_v26, %v1821_v15 }
 0x235   :  { %v1866_v31 = vmax.f32 %v1850_v21, 0.0 }
 0x236   :  { %v1603_v62 = vpop.f32.mrf.mxu1 }
 0x237   :  { %1882 = vst.msk [vmem:[%s3427_s11 + $0x30] sm:$0xff] %vm133_vm0, %v1866_v31  ;;  %v1637_v28 = vmul.f32 %v3282_v38, %v1603_v62 }
 0x239   :  { %v1657_v32 = vadd.f32 %v3287_v36, %v1637_v28  ;;  %v1799_v22 = vpop.f32.mrf.mxu2 }
 0x23a   :  { %v1822_v19 = vmul.f32 %v3271_v1, %v1799_v22 }
 0x23b   :  { %v1851_v34 = vadd.f32 %v1835_v63, %v1657_v32 }
 0x23c   :  { %v1842_v25 = vadd.f32 %v3277_v26, %v1822_v19 }
 0x23d   :  { %v1867_v24 = vmax.f32 %v1851_v34, 0.0 }
 0x23e   :  { %v1606_v37 = vpop.f32.mrf.mxu1 }
 0x23f   :  { %1883 = vst.msk [vmem:[%s3427_s11 + $0x38] sm:$0xff] %vm133_vm0, %v1867_v24  ;;  %v1638_v40 = vmul.f32 %v3282_v38, %v1606_v37 }
 0x241   :  { %v1658_v42 = vadd.f32 %v3287_v36, %v1638_v40  ;;  %v1801_v61 = vpop.f32.mrf.mxu2 }
 0x242   :  { %v1823_v28 = vmul.f32 %v3271_v1, %v1801_v61 }
 0x243   :  { %v1852_v16 = vadd.f32 %v1836_v58, %v1658_v42 }
 0x244   :  { %v1843_v34 = vadd.f32 %v3277_v26, %v1823_v28 }
 0x245   :  { %v1868_v43 = vmax.f32 %v1852_v16, 0.0 }
 0x246   :  { %v1608_v17 = vpop.f32.mrf.mxu1 }
 0x247   :  { %1884 = vst.msk [vmem:[%s3427_s11 + $0x40] sm:$0xff] %vm133_vm0, %v1868_v43  ;;  %v1639_v4 = vmul.f32 %v3282_v38, %v1608_v17 }
 0x249   :  { %v1659_v39 = vadd.f32 %v3287_v36, %v1639_v4 }
 0x24b   :  { %v1853_v51 = vadd.f32 %v1837_v48, %v1659_v39 }
 0x24d   :  { %v1869_v3 = vmax.f32 %v1853_v51, 0.0 }
 0x24e   :  { %v1611_v13 = vpop.f32.mrf.mxu1 }
 0x24f   :  { %1885 = vst.msk [vmem:[%s3427_s11 + $0x48] sm:$0xff] %vm133_vm0, %v1869_v3  ;;  %v1640_v56 = vmul.f32 %v3282_v38, %v1611_v13 }
 0x251   :  { %v1660_v52 = vadd.f32 %v3287_v36, %v1640_v56 }
 0x253   :  { %v1854_v57 = vadd.f32 %v1838_v55, %v1660_v52 }
 0x255   :  { %v1870_v59 = vmax.f32 %v1854_v57, 0.0 }
 0x256   :  { %v1613_v50 = vpop.f32.mrf.mxu1 }
 0x257   :  { %1886 = vst.msk [vmem:[%s3427_s11 + $0x50] sm:$0xff] %vm133_vm0, %v1870_v59  ;;  %v1641_v53 = vmul.f32 %v3282_v38, %v1613_v50 }
 0x259   :  { %v1661_v2 = vadd.f32 %v3287_v36, %v1641_v53 }
 0x25b   :  { %v1855_v5 = vadd.f32 %v1839_v33, %v1661_v2 }
 0x25d   :  { %v1871_v0 = vmax.f32 %v1855_v5, 0.0 }
 0x25e   :  { %v1616_v8 = vpop.f32.mrf.mxu1 }
 0x25f   :  { %1887 = vst.msk [vmem:[%s3427_s11 + $0x58] sm:$0xff] %vm133_vm0, %v1871_v0  ;;  %v1642_v14 = vmul.f32 %v3282_v38, %v1616_v8 }
 0x261   :  { %v1662_v10 = vadd.f32 %v3287_v36, %v1642_v14 }
 0x263   :  { %v1856_v12 = vadd.f32 %v1840_v30, %v1662_v10 }
 0x265   :  { %v1872_v45 = vmax.f32 %v1856_v12, 0.0 }
 0x266   :  { %v1618_v49 = vpop.f32.mrf.mxu1 }
 0x267   :  { %1888 = vst.msk [vmem:[%s3427_s11 + $0x60] sm:$0xff] %vm133_vm0, %v1872_v45  ;;  %v1643_v20 = vmul.f32 %v3282_v38, %v1618_v49 }
 0x269   :  { %v1663_v27 = vadd.f32 %v3287_v36, %v1643_v20 }
 0x26b   :  { %v1857_v23 = vadd.f32 %v1841_v6, %v1663_v27 }
 0x26d   :  { %v1873_v44 = vmax.f32 %v1857_v23, 0.0 }
 0x26e   :  { %v1621_v18 = vpop.f32.mrf.mxu1 }
 0x26f   :  { %1889 = vst.msk [vmem:[%s3427_s11 + $0x68] sm:$0xff] %vm133_vm0, %v1873_v44  ;;  %v1644_v21 = vmul.f32 %v3282_v38, %v1621_v18 }
 0x271   :  { %v1664_v31 = vadd.f32 %v3287_v36, %v1644_v21 }
 0x273   :  { %v1858_v62 = vadd.f32 %v1842_v25, %v1664_v31 }
 0x275   :  { %v1874_v46 = vmax.f32 %v1858_v62, 0.0 }
 0x276   :  { %v1623_v63 = vpop.f32.mrf.mxu1 }
 0x277   :  { %1890 = vst.msk [vmem:[%s3427_s11 + $0x70] sm:$0xff] %vm133_vm0, %v1874_v46  ;;  %v1645_v32 = vmul.f32 %v3282_v38, %v1623_v63 }
 0x279   :  { %v1665_v35 = vadd.f32 %v3287_v36, %v1645_v32 }
 0x27b   :  { %v1859_v24 = vadd.f32 %v1843_v34, %v1665_v35 }
 0x27d   :  { %v1875_v37 = vmax.f32 %v1859_v24, 0.0 }
 0x27f   :  { %1891 = vst.msk [vmem:[%s3427_s11 + $0x78] sm:$0xff] %vm133_vm0, %v1875_v37 }

// kernel: encoder_forward.14
= control target key start
LH: loop header
LB: loop body
LE: loop exit
PB: predicated region body
PF: predicated region fallthrough
CT: control target
= control target key end

     0   :  { %9 = vsyncpa [#allocation3], 0  ;;  %s312_s0 = inlined_call_operand.vmem [shape: bf16[32,64], index: 0, kind: input, shape index: {}]   ;;  %s313_s1 = inlined_call_operand.vmem [shape: bf16[64,128], index: 1, kind: input, shape index: {}]   ;;  %s314_s2 = inlined_call_operand.hbm [shape: f32[1,128], index: 2, kind: input, shape index: {}]   ;;  %s315_s3 = inlined_call_operand.hbm [shape: f32[1,128], index: 3, kind: input, shape index: {}]   ;;  %s316_s4 = inlined_call_operand.vmem [shape: bf16[32,128], index: 4, kind: output, shape index: {}]  }
   0x1   :  { %s20_s17 = sshll.u32 %s314_s2, 4  ;;  %s21_s17 = int_to_ptr.hbm [resolvable:$true] %s20_s17 }
   0x2   :  { %10 = vsyncpa [#allocation5], 0  ;;  %s255_s18 = smov [#allocation2]   ;;  %s31_s22 = sshll.u32 %s315_s3, 4  ;;  %s32_s22 = int_to_ptr.hbm [resolvable:$true] %s31_s22 }
   0x3   :  { %s22_s19 = sshll.u32 %s255_s18, 4  ;;  %s256_s23 = smov [#allocation4]   ;;  %s23_s19 = int_to_ptr.vmem [resolvable:$true] %s22_s19 }
   0x4   :  { %25 = dma.hbm_to_vmem [thread:$0]  %s21_s17, 16, %s23_s19, [#allocation3]  }
   0x5   :  { %s33_s24 = sshll.u32 %s256_s23, 4  ;;  %s34_s24 = int_to_ptr.vmem [resolvable:$true] %s33_s24 }
   0x6   :  { %36 = dma.hbm_to_vmem [thread:$0]  %s32_s22, 16, %s34_s24, [#allocation5]  }
   0x7   :  { %251 = dma.done.wait [#allocation3], 16  }
   0x8   :  { %252 = vsyncadd [#allocation3], 4294967280 }
   0x9   :  { %253 = dma.done.wait [#allocation5], 16  }
   0xa   :  { %254 = vsyncadd [#allocation5], 4294967280  ;;  %v183_v0 = vld [vmem:[%s313_s1 + $0x18] sm:$0xff]  ;;  %v182_v1 = vld [vmem:[%s313_s1 + $0x10] sm:$0xff]  ;;  %vm92_vm0 = vcmask 523264  }
   0xb   :  { %103 = vmatpush.bf16.msra.mxu0 %v183_v0  ;;  %195 = vmatpush.bf16.msra.mxu1 %v183_v0  ;;  %v181_v2 = vld [vmem:[%s313_s1 + $0x8] sm:$0xff]  ;;  %v180_v3 = vld [vmem:[%s313_s1] sm:$0xff] }
   0xc   :  { %v178_v4 = vld [vmem:[%s312_s0] sm:$0xff]  ;;  %v179_v5 = vld [vmem:[%s312_s0 + $0x8] sm:$0xff] }
   0xd   :  { %v201_v8 = vld [vmem:[#allocation2] ss:$0 sm:$0xff]  ;;  %v202_v10 = vld [vmem:[#allocation4] ss:$0 sm:$0xff] }
   0xf   :  { %104 = vmatpush.bf16.msra.mxu0 %v182_v1  ;;  %196 = vmatpush.bf16.msra.mxu1 %v182_v1 }
  0x13   :  { %105 = vmatpush.bf16.msra.mxu0 %v181_v2  ;;  %197 = vmatpush.bf16.msra.mxu1 %v181_v2 }
  0x17   :  { %106 = vmatpush.bf16.msra.mxu0 %v180_v3  ;;  %198 = vmatpush.bf16.msra.mxu1 %v180_v3 }
  0x1a   :  { %176 = vmatmul.msk.bf16.vlgmr.msra.gmra.mxu0 %vm92_vm0, %v178_v4  ;;  %177 = vmatmul.msk.bf16.vlgmr.msra.gmra.mxu1 %vm92_vm0, %v179_v5 }
  0x97   :  { %v108_v6 = vpop.f32.mrf.mxu0  ;;  %v113_v7 = vpop.f32.mrf.mxu1 }
  0x98   :  { %v122_v9 = vmul.f32 %v201_v8, %v108_v6  ;;  %v124_v11 = vmul.f32 %v201_v8, %v113_v7 }
  0x9a   :  { %v130_v14 = vadd.f32 %v202_v10, %v122_v9  ;;  %v132_v15 = vadd.f32 %v202_v10, %v124_v11 }
  0x9c   :  { %v134_v20 = vmax.f32 %v130_v14, 0.0  ;;  %v136_v21 = vmax.f32 %v132_v15, 0.0 }
  0x9f   :  { %v110_v12 = vpop.f32.mrf.mxu0  ;;  %v115_v13 = vpop.f32.mrf.mxu1 }
  0xa0   :  { %v123_v16 = vmul.f32 %v201_v8, %v110_v12  ;;  %v125_v17 = vmul.f32 %v201_v8, %v115_v13 }
  0xa2   :  { %v131_v18 = vadd.f32 %v202_v10, %v123_v16  ;;  %v133_v19 = vadd.f32 %v202_v10, %v125_v17 }
  0xa4   :  { %v135_v22 = vmax.f32 %v131_v18, 0.0  ;;  %v137_v23 = vmax.f32 %v133_v19, 0.0 }
  0xa6   :  { %v187_v24 = vpack.c.bf16 %v135_v22, %v134_v20  ;;  %v192_v25 = vpack.c.bf16 %v137_v23, %v136_v21 }
  0xa8   :  { %188 = vst [vmem:[%s316_s4] sm:$0xff] %v187_v24  }
  0xa9   :  { %194 = vst [vmem:[%s316_s4 + $0x8] sm:$0xff] %v192_v25  }
  0xaa   :  { %150 = vsyncpa [#allocation3], 1 }
  0xab   :  { %151 = vsyncpa [#allocation5], 1 }

// kernel: encoder_forward.13
= control target key start
LH: loop header
LB: loop body
LE: loop exit
PB: predicated region body
PF: predicated region fallthrough
CT: control target
= control target key end

     0   :  { %16 = vsyncpa [#allocation3], 0  ;;  %s1896_s0 = inlined_call_operand.vmem [shape: bf16[9,32,64], index: 0, kind: input, shape index: {}]   ;;  %s1897_s1 = inlined_call_operand.vmem [shape: bf16[32,32], index: 1, kind: input, shape index: {}]   ;;  %s1898_s2 = inlined_call_operand.vmem [shape: bf16[9,64,64], index: 2, kind: input, shape index: {}]   ;;  %s1899_s3 = inlined_call_operand.hbm [shape: f32[1,64], index: 3, kind: input, shape index: {}]   ;;  %s1900_s4 = inlined_call_operand.hbm [shape: f32[1,64], index: 4, kind: input, shape index: {}]   ;;  %s1901_s5 = inlined_call_operand.vmem [shape: bf16[64,64], index: 5, kind: input, shape index: {}]   ;;  %s1902_s6 = inlined_call_operand.hbm [shape: f32[1,64], index: 6, kind: input, shape index: {}]   ;;  %s1903_s7 = inlined_call_operand.hbm [shape: f32[1,64], index: 7, kind: input, shape index: {}]   ;;  %s1904_s8 = inlined_call_operand.vmem [shape: bf16[32,64], index: 8, kind: input, shape index: {}]   ;;  %s1905_s9 = inlined_call_operand.hbm [shape: f32[1,64], index: 9, kind: input, shape index: {}]   ;;  %s1906_s10 = inlined_call_operand.hbm [shape: f32[1,64], index: 10, kind: input, shape index: {}]   ;;  %s1907_s11 = inlined_call_operand.vmem [shape: f32[32,64], index: 11, kind: output, shape index: {}]  }
   0x1   :  { %17 = vsyncpa [#allocation5], 0 }
   0x2   :  { %18 = vsyncpa [#allocation8], 0  ;;  %s42_s19 = sshll.u32 %s1900_s4, 4  ;;  %s43_s19 = int_to_ptr.hbm [resolvable:$true] %s42_s19 }
   0x3   :  { %19 = vsyncpa [#allocation11], 0  ;;  %s1588_s20 = smov [#allocation4]   ;;  %s66_s24 = sshll.u32 %s1903_s7, 4  ;;  %s67_s24 = int_to_ptr.hbm [resolvable:$true] %s66_s24 }
   0x4   :  { %s44_s21 = sshll.u32 %s1588_s20, 4  ;;  %s1589_s25 = smov [#allocation7]   ;;  %s45_s21 = int_to_ptr.vmem [resolvable:$true] %s44_s21 }
   0x5   :  { %47 = dma.hbm_to_vmem [thread:$0]  %s43_s19, 16, %s45_s21, [#allocation5]  }
   0x6   :  { %s68_s26 = sshll.u32 %s1589_s25, 4  ;;  %s31_s29 = sshll.u32 %s1899_s3, 4  ;;  %s69_s26 = int_to_ptr.vmem [resolvable:$true] %s68_s26  ;;  %s32_s29 = int_to_ptr.hbm [resolvable:$true] %s31_s29 }
   0x7   :  { %71 = dma.hbm_to_vmem [thread:$0]  %s67_s24, 16, %s69_s26, [#allocation8]  }
   0x8   :  { %s55_s12 = sshll.u32 %s1902_s6, 4  ;;  %s1590_s13 = smov [#allocation2]   ;;  %s56_s12 = int_to_ptr.hbm [resolvable:$true] %s55_s12 }
   0x9   :  { %s33_s14 = sshll.u32 %s1590_s13, 4  ;;  %s1591_s7 = smov [#allocation6]   ;;  %s34_s14 = int_to_ptr.vmem [resolvable:$true] %s33_s14 }
   0xa   :  { %36 = dma.hbm_to_vmem [thread:$0]  %s32_s29, 16, %s34_s14, [#allocation3]  }
   0xb   :  { %s57_s15 = sshll.u32 %s1591_s7, 4  ;;  %s79_s18 = sshll.u32 %s1905_s9, 4  ;;  %s58_s15 = int_to_ptr.vmem [resolvable:$true] %s57_s15  ;;  %s80_s18 = int_to_ptr.hbm [resolvable:$true] %s79_s18 }
   0xc   :  { %60 = dma.hbm_to_vmem [thread:$0]  %s56_s12, 16, %s58_s15, [#allocation5]  }
   0xd   :  { %s90_s20 = sshll.u32 %s1906_s10, 4  ;;  %s1592_s21 = smov [#allocation9]   ;;  %s91_s20 = int_to_ptr.hbm [resolvable:$true] %s90_s20 }
   0xe   :  { %s81_s6 = sshll.u32 %s1592_s21, 4  ;;  %s1593_s22 = smov [#allocation10]   ;;  %s82_s6 = int_to_ptr.vmem [resolvable:$true] %s81_s6 }
   0xf   :  { %84 = dma.hbm_to_vmem [thread:$0]  %s80_s18, 16, %s82_s6, [#allocation8]  }
  0x10   :  { %s92_s23 = sshll.u32 %s1593_s22, 4  ;;  %s93_s23 = int_to_ptr.vmem [resolvable:$true] %s92_s23 }
  0x11   :  { %95 = dma.hbm_to_vmem [thread:$0]  %s91_s20, 16, %s93_s23, [#allocation11]  }
  0x12   :  { %1580 = dma.done.wait [#allocation3], 16  }
  0x13   :  { %1581 = vsyncadd [#allocation3], 4294967280 }
  0x14   :  { %1582 = dma.done.wait [#allocation5], 32  }
  0x15   :  { %1583 = vsyncadd [#allocation5], 4294967264 }
  0x16   :  { %1584 = dma.done.wait [#allocation8], 32  }
  0x17   :  { %1585 = vsyncadd [#allocation8], 4294967264 }
  0x18   :  { %1586 = dma.done.wait [#allocation11], 16  }
  0x19   :  { %1587 = vsyncadd [#allocation11], 4294967280  ;;  %v1369_v0 = vld [vmem:[%s1898_s2 + $0x38] sm:$0xff]  ;;  %v1368_v3 = vld [vmem:[%s1898_s2 + $0x30] sm:$0xff]  ;;  %vm181_vm0 = vcmask 523264   ;;  %vm930_vm1 = vcmask 261120  }
  0x1a   :  { %v1363_v1 = vld [vmem:[%s1898_s2 + $0x18] sm:$0xff]  ;;  %192 = vmatpush.bf16.msra.mxu0 %v1369_v0  ;;  %1420 = vmatpush.bf16.msra.mxu3 %v1369_v0  ;;  %v1362_v4 = vld [vmem:[%s1898_s2 + $0x10] sm:$0xff]  ;;  %v1367_v6 = vld [vmem:[%s1898_s2 + $0x28] sm:$0xff] }
  0x1b   :  { %v1375_v2 = vld [vmem:[%s1898_s2 + $0x58] sm:$0xff]  ;;  %251 = vmatpush.bf16.msra.mxu1 %v1363_v1  ;;  %v1374_v5 = vld [vmem:[%s1898_s2 + $0x50] sm:$0xff]  ;;  %v1361_v7 = vld [vmem:[%s1898_s2 + $0x8] sm:$0xff] }
  0x1c   :  { %324 = vmatpush.bf16.msra.mxu2 %v1375_v2  ;;  %v1373_v8 = vld [vmem:[%s1898_s2 + $0x48] sm:$0xff]  ;;  %v1366_v9 = vld [vmem:[%s1898_s2 + $0x20] sm:$0xff]  ;;  %v1364_v12 = vld [vmem:[%s1896_s0 + $0x10] sm:$0xff] }
  0x1d   :  { %v1360_v10 = vld [vmem:[%s1898_s2] sm:$0xff]  ;;  %v1365_v13 = vld [vmem:[%s1896_s0 + $0x18] sm:$0xff]  ;;  %v1380_v20 = vld [vmem:[%s1898_s2 + $0x70] sm:$0xff] }
  0x1e   :  { %193 = vmatpush.bf16.msra.mxu0 %v1368_v3  ;;  %1421 = vmatpush.bf16.msra.mxu3 %v1368_v3  ;;  %v1372_v11 = vld [vmem:[%s1898_s2 + $0x40] sm:$0xff]  ;;  %v1381_v15 = vld [vmem:[%s1898_s2 + $0x78] sm:$0xff]  ;;  %v1386_v21 = vld [vmem:[%s1898_s2 + $0x90] sm:$0xff] }
  0x1f   :  { %252 = vmatpush.bf16.msra.mxu1 %v1362_v4  ;;  %v1358_v14 = vld [vmem:[%s1896_s0] sm:$0xff]  ;;  %v1387_v16 = vld [vmem:[%s1898_s2 + $0x98] sm:$0xff]  ;;  %v1392_v22 = vld [vmem:[%s1898_s2 + $0xb0] sm:$0xff] }
  0x20   :  { %325 = vmatpush.bf16.msra.mxu2 %v1374_v5  ;;  %v1370_v17 = vld [vmem:[%s1896_s0 + $0x20] sm:$0xff]  ;;  %v1399_v18 = vld [vmem:[%s1898_s2 + $0xd8] sm:$0xff]  ;;  %v1398_v23 = vld [vmem:[%s1898_s2 + $0xd0] sm:$0xff] }
  0x21   :  { %v1393_v19 = vld [vmem:[%s1898_s2 + $0xb8] sm:$0xff]  ;;  %v1379_v24 = vld [vmem:[%s1898_s2 + $0x68] sm:$0xff]  ;;  %v1378_v28 = vld [vmem:[%s1898_s2 + $0x60] sm:$0xff] }
  0x22   :  { %194 = vmatpush.bf16.msra.mxu0 %v1367_v6  ;;  %1422 = vmatpush.bf16.msra.mxu3 %v1367_v6  ;;  %v1385_v25 = vld [vmem:[%s1898_s2 + $0x88] sm:$0xff]  ;;  %v1384_v29 = vld [vmem:[%s1898_s2 + $0x80] sm:$0xff]  ;;  %v1405_v30 = vld [vmem:[%s1898_s2 + $0xf8] sm:$0xff] }
  0x23   :  { %253 = vmatpush.bf16.msra.mxu1 %v1361_v7  ;;  %v1391_v26 = vld [vmem:[%s1898_s2 + $0xa8] sm:$0xff]  ;;  %v1411_v31 = vld [vmem:[%s1898_s2 + $0x118] sm:$0xff]  ;;  %v1390_v32 = vld [vmem:[%s1898_s2 + $0xa0] sm:$0xff] }
  0x24   :  { %326 = vmatpush.bf16.msra.mxu2 %v1373_v8  ;;  %v1397_v27 = vld [vmem:[%s1898_s2 + $0xc8] sm:$0xff]  ;;  %v1396_v33 = vld [vmem:[%s1898_s2 + $0xc0] sm:$0xff]  ;;  %v1376_v34 = vld [vmem:[%s1896_s0 + $0x30] sm:$0xff] }
  0x25   :  { %v1382_v35 = vld [vmem:[%s1896_s0 + $0x40] sm:$0xff]  ;;  %v1359_v36 = vld [vmem:[%s1896_s0 + $0x8] sm:$0xff]  ;;  %v1404_v38 = vld [vmem:[%s1898_s2 + $0xf0] sm:$0xff] }
  0x26   :  { %195 = vmatpush.bf16.msra.mxu0 %v1366_v9  ;;  %1423 = vmatpush.bf16.msra.mxu3 %v1366_v9  ;;  %v1371_v37 = vld [vmem:[%s1896_s0 + $0x28] sm:$0xff]  ;;  %v1410_v39 = vld [vmem:[%s1898_s2 + $0x110] sm:$0xff]  ;;  %v1402_v42 = vld [vmem:[%s1898_s2 + $0xe0] sm:$0xff] }
  0x27   :  { %254 = vmatpush.bf16.msra.mxu1 %v1360_v10  ;;  %v1403_v40 = vld [vmem:[%s1898_s2 + $0xe8] sm:$0xff]  ;;  %v1408_v43 = vld [vmem:[%s1898_s2 + $0x100] sm:$0xff]  ;;  %v1377_v44 = vld [vmem:[%s1896_s0 + $0x38] sm:$0xff] }
  0x28   :  { %327 = vmatpush.bf16.msra.mxu2 %v1372_v11  ;;  %v1409_v41 = vld [vmem:[%s1898_s2 + $0x108] sm:$0xff]  ;;  %v1388_v46 = vld [vmem:[%s1896_s0 + $0x50] sm:$0xff]  ;;  %v1394_v47 = vld [vmem:[%s1896_s0 + $0x60] sm:$0xff] }
  0x29   :  { %1028 = vmatmul.msk.bf16.vlgmr.msra.gmra.mxu0 %vm181_vm0, %v1364_v12  ;;  %1029 = vmatmul.msk.bf16.vlgmr.msra.gmra.mxu3 %vm181_vm0, %v1365_v13  ;;  %v1383_v45 = vld [vmem:[%s1896_s0 + $0x48] sm:$0xff]  ;;  %v1400_v48 = vld [vmem:[%s1896_s0 + $0x70] sm:$0xff]  ;;  %v1406_v49 = vld [vmem:[%s1896_s0 + $0x80] sm:$0xff] }
  0x2a   :  { %401 = vmatpush.bf16.msrb.mxu3 %v1381_v15  ;;  %478 = vmatpush.bf16.msrb.mxu0 %v1387_v16  ;;  %v1389_v50 = vld [vmem:[%s1896_s0 + $0x58] sm:$0xff]  ;;  %v1395_v51 = vld [vmem:[%s1896_s0 + $0x68] sm:$0xff]  ;;  %v1414_v1 = vld [vmem:[%s1901_s5 + $0x10] sm:$0xff] }
  0x2b   :  { %1054 = vmatmul.msk.bf16.vlgmr.msra.gmra.mxu1 %vm181_vm0, %v1358_v14  ;;  %1092 = vmatmul.msk.bf16.vlgmr.msra.gmra.mxu2 %vm181_vm0, %v1370_v17  ;;  %v1401_v52 = vld [vmem:[%s1896_s0 + $0x78] sm:$0xff]  ;;  %v1407_v53 = vld [vmem:[%s1896_s0 + $0x88] sm:$0xff]  ;;  %v1418_v2 = vld [vmem:[%s1904_s8] sm:$0xff] }
  0x2c   :  { %632 = vmatpush.bf16.msrb.mxu2 %v1399_v18  ;;  %555 = vmatpush.bf16.msrb.mxu1 %v1393_v19  ;;  %v1419_v56 = vld [vmem:[%s1904_s8 + $0x8] sm:$0xff]  ;;  %v1415_v60 = vld [vmem:[%s1901_s5 + $0x18] sm:$0xff]  ;;  %v1416_v7 = vld [vmem:[%s1897_s1] sm:$0xff] }
  0x2d   :  { %v1413_v9 = vld [vmem:[%s1901_s5 + $0x8] sm:$0xff]  ;;  %v1412_v15 = vld [vmem:[%s1901_s5] sm:$0xff] }
  0x2e   :  { %402 = vmatpush.bf16.msrb.mxu3 %v1380_v20  ;;  %479 = vmatpush.bf16.msrb.mxu0 %v1386_v21  ;;  %v1417_v19 = vld [vmem:[%s1897_s1 + $0x8] sm:$0xff] }
  0x30   :  { %556 = vmatpush.bf16.msrb.mxu1 %v1392_v22  ;;  %633 = vmatpush.bf16.msrb.mxu2 %v1398_v23 }
  0x32   :  { %403 = vmatpush.bf16.msrb.mxu3 %v1379_v24  ;;  %480 = vmatpush.bf16.msrb.mxu0 %v1385_v25 }
  0x34   :  { %557 = vmatpush.bf16.msrb.mxu1 %v1391_v26  ;;  %634 = vmatpush.bf16.msrb.mxu2 %v1397_v27 }
  0x36   :  { %404 = vmatpush.bf16.msrb.mxu3 %v1378_v28  ;;  %481 = vmatpush.bf16.msrb.mxu0 %v1384_v29 }
  0x38   :  { %558 = vmatpush.bf16.msrb.mxu1 %v1390_v32  ;;  %635 = vmatpush.bf16.msrb.mxu2 %v1396_v33 }
  0x39   :  { %1130 = vmatmul.msk.bf16.vlgmr.msrb.gmra.mxu3 %vm181_vm0, %v1376_v34  ;;  %1168 = vmatmul.msk.bf16.vlgmr.msrb.gmra.mxu0 %vm181_vm0, %v1382_v35 }
  0x3a   :  { %709 = vmatpush.bf16.msra.mxu3 %v1405_v30  ;;  %786 = vmatpush.bf16.msra.mxu0 %v1411_v31 }
  0x3b   :  { %1055 = vmatmul.msk.bf16.gmra.mxu1 %vm181_vm0, %v1359_v36  ;;  %1093 = vmatmul.msk.bf16.gmra.mxu2 %vm181_vm0, %v1371_v37 }
  0x3c   :  { %943 = vmatpush.bf16.msra.mxu2 %v1419_v56  ;;  %869 = vmatpush.bf16.msra.mxu1 %v1415_v60 }
  0x3e   :  { %710 = vmatpush.bf16.msra.mxu3 %v1404_v38  ;;  %787 = vmatpush.bf16.msra.mxu0 %v1410_v39  ;;  %v1430_v39 = vld [vmem:[#allocation2] ss:$0 sm:$0xff] }
  0x40   :  { %870 = vmatpush.bf16.msra.mxu1 %v1414_v1  ;;  %944 = vmatpush.bf16.msra.mxu2 %v1418_v2 }
  0x42   :  { %711 = vmatpush.bf16.msra.mxu3 %v1403_v40  ;;  %788 = vmatpush.bf16.msra.mxu0 %v1409_v41 }
  0x44   :  { %871 = vmatpush.bf16.msra.mxu1 %v1413_v9 }
  0x46   :  { %712 = vmatpush.bf16.msra.mxu3 %v1402_v42  ;;  %789 = vmatpush.bf16.msra.mxu0 %v1408_v43 }
  0x48   :  { %872 = vmatpush.bf16.msra.mxu1 %v1412_v15 }
  0x49   :  { %1131 = vmatmul.msk.bf16.gmra.mxu3 %vm181_vm0, %v1377_v44  ;;  %1169 = vmatmul.msk.bf16.gmra.mxu0 %vm181_vm0, %v1383_v45 }
  0x4b   :  { %1206 = vmatmul.msk.bf16.vlgmr.msrb.gmra.mxu1 %vm181_vm0, %v1388_v46  ;;  %1244 = vmatmul.msk.bf16.vlgmr.msrb.gmra.mxu2 %vm181_vm0, %v1394_v47  ;;  %v1431_v46 = vld [vmem:[#allocation4] ss:$0 sm:$0xff] }
  0x59   :  { %1282 = vmatmul.msk.bf16.vlgmr.msra.gmra.mxu3 %vm181_vm0, %v1400_v48  ;;  %1320 = vmatmul.msk.bf16.vlgmr.msra.gmra.mxu0 %vm181_vm0, %v1406_v49 }
  0x5b   :  { %1207 = vmatmul.msk.bf16.gmra.mxu1 %vm181_vm0, %v1389_v50  ;;  %1245 = vmatmul.msk.bf16.gmra.mxu2 %vm181_vm0, %v1395_v51 }
  0x69   :  { %1283 = vmatmul.msk.bf16.gmra.mxu3 %vm181_vm0, %v1401_v52  ;;  %1321 = vmatmul.msk.bf16.gmra.mxu0 %vm181_vm0, %v1407_v53 }
  0x6b   :  { %1356 = vmatmul.msk.bf16.vlgmr.msra.gmra.mxu2 %vm930_vm1, %v1416_v7 }
  0x7b   :  { %1357 = vmatmul.msk.bf16.gmra.mxu2 %vm930_vm1, %v1417_v19  ;;  %v1432_v19 = vld [vmem:[#allocation9] ss:$0 sm:$0xff] }
  0xa6   :  { %v197_v54 = vpop.f32.mrf.mxu0 }
  0xa8   :  { %v256_v55 = vpop.f32.mrf.mxu1 }
  0xa9   :  { %v257_v14 = vadd.f32 %v256_v55, %v197_v54 }
  0xac   :  { %v202_v57 = vpop.f32.mrf.mxu3 }
  0xae   :  { %v329_v58 = vpop.f32.mrf.mxu2  ;;  %v199_v59 = vpop.f32.mrf.mxu0 }
  0xaf   :  { %v339_v18 = vadd.f32 %v329_v58, %v257_v14 }
  0xb0   :  { %v258_v61 = vpop.f32.mrf.mxu1 }
  0xb1   :  { %v259_v23 = vadd.f32 %v258_v61, %v199_v59 }
  0xb4   :  { %v204_v62 = vpop.f32.mrf.mxu3 }
  0xb6   :  { %v331_v63 = vpop.f32.mrf.mxu2  ;;  %v483_v0 = vpop.f32.mrf.mxu0 }
  0xb7   :  { %v340_v26 = vadd.f32 %v331_v63, %v259_v23  ;;  %v1435_v23 = vld [vmem:[#allocation7] ss:$0 sm:$0xff] }
  0xb8   :  { %v261_v3 = vpop.f32.mrf.mxu1 }
  0xb9   :  { %v262_v34 = vadd.f32 %v261_v3, %v202_v57 }
  0xbc   :  { %v406_v4 = vpop.f32.mrf.mxu3 }
  0xbd   :  { %v416_v21 = vadd.f32 %v406_v4, %v339_v18 }
  0xbe   :  { %v334_v5 = vpop.f32.mrf.mxu2  ;;  %v485_v6 = vpop.f32.mrf.mxu0 }
  0xbf   :  { %v493_v24 = vadd.f32 %v483_v0, %v416_v21  ;;  %v341_v36 = vadd.f32 %v334_v5, %v262_v34  ;;  %v1433_v21 = vld [vmem:[#allocation10] ss:$0 sm:$0xff] }
  0xc0   :  { %v263_v10 = vpop.f32.mrf.mxu1 }
  0xc1   :  { %v264_v49 = vadd.f32 %v263_v10, %v204_v62 }
  0xc4   :  { %v408_v8 = vpop.f32.mrf.mxu3 }
  0xc5   :  { %v417_v29 = vadd.f32 %v408_v8, %v340_v26 }
  0xc6   :  { %v488_v11 = vpop.f32.mrf.mxu0  ;;  %v336_v12 = vpop.f32.mrf.mxu2 }
  0xc7   :  { %v494_v35 = vadd.f32 %v485_v6, %v417_v29  ;;  %v342_v52 = vadd.f32 %v336_v12, %v264_v49 }
  0xc8   :  { %v560_v17 = vpop.f32.mrf.mxu1 }
  0xc9   :  { %v570_v27 = vadd.f32 %v560_v17, %v493_v24 }
  0xcc   :  { %v411_v13 = vpop.f32.mrf.mxu3 }
  0xcd   :  { %v418_v41 = vadd.f32 %v411_v13, %v341_v36 }
  0xce   :  { %v490_v16 = vpop.f32.mrf.mxu0  ;;  %v637_v20 = vpop.f32.mrf.mxu2 }
  0xcf   :  { %v647_v30 = vadd.f32 %v637_v20, %v570_v27  ;;  %v495_v50 = vadd.f32 %v488_v11, %v418_v41 }
  0xd0   :  { %v562_v28 = vpop.f32.mrf.mxu1 }
  0xd1   :  { %v571_v37 = vadd.f32 %v562_v28, %v494_v35 }
  0xd4   :  { %v413_v22 = vpop.f32.mrf.mxu3 }
  0xd5   :  { %v419_v56 = vadd.f32 %v413_v22, %v342_v52  ;;  %v1434_v22 = vld [vmem:[#allocation6] ss:$0 sm:$0xff] }
  0xd6   :  { %v791_v25 = vpop.f32.mrf.mxu0  ;;  %v639_v31 = vpop.f32.mrf.mxu2 }
  0xd7   :  { %v648_v42 = vadd.f32 %v639_v31, %v571_v37  ;;  %v496_v2 = vadd.f32 %v490_v16, %v419_v56 }
  0xd8   :  { %v565_v43 = vpop.f32.mrf.mxu1 }
  0xd9   :  { %v572_v53 = vadd.f32 %v565_v43, %v495_v50 }
  0xdc   :  { %v714_v32 = vpop.f32.mrf.mxu3 }
  0xdd   :  { %v724_v33 = vadd.f32 %v714_v32, %v647_v30 }
  0xde   :  { %v793_v40 = vpop.f32.mrf.mxu0  ;;  %v642_v48 = vpop.f32.mrf.mxu2 }
  0xdf   :  { %v801_v38 = vadd.f32 %v791_v25, %v724_v33  ;;  %v649_v57 = vadd.f32 %v642_v48, %v572_v53 }
  0xe0   :  { %v567_v1 = vpop.f32.mrf.mxu1 }
  0xe1   :  { %v809_v45 = vmul.f32 %v1430_v39, %v801_v38  ;;  %v573_v5 = vadd.f32 %v567_v1, %v496_v2 }
  0xe3   :  { %v817_v54 = vadd.f32 %v1431_v46, %v809_v45 }
  0xe4   :  { %v716_v44 = vpop.f32.mrf.mxu3 }
  0xe5   :  { %v725_v47 = vadd.f32 %v716_v44, %v648_v42  ;;  %v821_v61 = vmax.f32 %v817_v54, 0.0 }
  0xe6   :  { %v796_v59 = vpop.f32.mrf.mxu0  ;;  %v644_v4 = vpop.f32.mrf.mxu2 }
  0xe7   :  { %v802_v51 = vadd.f32 %v793_v40, %v725_v47  ;;  %v650_v6 = vadd.f32 %v644_v4, %v573_v5 }
  0xe9   :  { %v810_v55 = vmul.f32 %v1430_v39, %v802_v51 }
  0xeb   :  { %v818_v58 = vadd.f32 %v1431_v46, %v810_v55 }
  0xec   :  { %v719_v60 = vpop.f32.mrf.mxu3 }
  0xed   :  { %v822_v63 = vmax.f32 %v818_v58, 0.0  ;;  %v726_v0 = vadd.f32 %v719_v60, %v649_v57 }
  0xee   :  { %v798_v10 = vpop.f32.mrf.mxu0  ;;  %v946_v16 = vpop.f32.mrf.mxu2 }
  0xef   :  { %v825_v3 = vpack.c.bf16 %v822_v63, %v821_v61  ;;  %v803_v62 = vadd.f32 %v796_v59, %v726_v0  ;;  %v960_v20 = vmul.f32 %v1432_v19, %v946_v16 }
  0xf1   :  { %1338 = vmatmul.msk.bf16.vlgmr.msra.gmra.mxu1 %vm181_vm0, %v825_v3  ;;  %v811_v8 = vmul.f32 %v1430_v39, %v803_v62  ;;  %v968_v26 = vadd.f32 %v1433_v21, %v960_v20 }
  0xf3   :  { %v819_v13 = vadd.f32 %v1431_v46, %v811_v8 }
  0xf4   :  { %v721_v7 = vpop.f32.mrf.mxu3 }
  0xf5   :  { %v727_v9 = vadd.f32 %v721_v7, %v650_v6  ;;  %v823_v15 = vmax.f32 %v819_v13, 0.0 }
  0xf6   :  { %v948_v25 = vpop.f32.mrf.mxu2 }
  0xf7   :  { %v804_v11 = vadd.f32 %v798_v10, %v727_v9  ;;  %v961_v31 = vmul.f32 %v1432_v19, %v948_v25 }
  0xf9   :  { %v812_v12 = vmul.f32 %v1430_v39, %v804_v11  ;;  %v969_v35 = vadd.f32 %v1433_v21, %v961_v31 }
  0xfb   :  { %v820_v14 = vadd.f32 %v1431_v46, %v812_v12 }
  0xfd   :  { %v824_v17 = vmax.f32 %v820_v14, 0.0 }
  0xfe   :  { %v951_v34 = vpop.f32.mrf.mxu2 }
  0xff   :  { %v826_v18 = vpack.c.bf16 %v824_v17, %v823_v15  ;;  %v962_v38 = vmul.f32 %v1432_v19, %v951_v34 }
 0x101   :  { %1339 = vmatmul.msk.bf16.gmra.mxu1 %vm181_vm0, %v826_v18  ;;  %v970_v41 = vadd.f32 %v1433_v21, %v962_v38 }
 0x106   :  { %v953_v44 = vpop.f32.mrf.mxu2 }
 0x107   :  { %v963_v47 = vmul.f32 %v1432_v19, %v953_v44 }
 0x109   :  { %v971_v50 = vadd.f32 %v1433_v21, %v963_v47 }
 0x16e   :  { %v874_v24 = vpop.f32.mrf.mxu1 }
 0x16f   :  { %v888_v27 = vmul.f32 %v1434_v22, %v874_v24 }
 0x171   :  { %v896_v28 = vadd.f32 %v1435_v23, %v888_v27 }
 0x173   :  { %v972_v29 = vadd.f32 %v968_v26, %v896_v28 }
 0x175   :  { %v976_v30 = vmax.f32 %v972_v29, 0.0 }
 0x176   :  { %v876_v32 = vpop.f32.mrf.mxu1 }
 0x177   :  { %980 = vst.msk [vmem:[%s1907_s11] sm:$0xff] %vm181_vm0, %v976_v30  ;;  %v889_v33 = vmul.f32 %v1434_v22, %v876_v32 }
 0x179   :  { %v897_v36 = vadd.f32 %v1435_v23, %v889_v33 }
 0x17b   :  { %v973_v37 = vadd.f32 %v969_v35, %v897_v36 }
 0x17d   :  { %v977_v39 = vmax.f32 %v973_v37, 0.0 }
 0x17e   :  { %v879_v40 = vpop.f32.mrf.mxu1 }
 0x17f   :  { %981 = vst.msk [vmem:[%s1907_s11 + $0x8] sm:$0xff] %vm181_vm0, %v977_v39  ;;  %v890_v42 = vmul.f32 %v1434_v22, %v879_v40 }
 0x181   :  { %v898_v43 = vadd.f32 %v1435_v23, %v890_v42 }
 0x183   :  { %v974_v45 = vadd.f32 %v970_v41, %v898_v43 }
 0x185   :  { %v978_v46 = vmax.f32 %v974_v45, 0.0 }
 0x186   :  { %v881_v48 = vpop.f32.mrf.mxu1 }
 0x187   :  { %982 = vst.msk [vmem:[%s1907_s11 + $0x10] sm:$0xff] %vm181_vm0, %v978_v46  ;;  %v891_v49 = vmul.f32 %v1434_v22, %v881_v48 }
 0x189   :  { %v899_v51 = vadd.f32 %v1435_v23, %v891_v49 }
 0x18b   :  { %v975_v52 = vadd.f32 %v971_v50, %v899_v51 }
 0x18d   :  { %v979_v53 = vmax.f32 %v975_v52, 0.0 }
 0x18f   :  { %983 = vst.msk [vmem:[%s1907_s11 + $0x18] sm:$0xff] %vm181_vm0, %v979_v53 }
 0x190   :  { %988 = vsyncpa [#allocation3], 1 }
 0x191   :  { %989 = vsyncpa [#allocation5], 1 }
 0x192   :  { %990 = vsyncpa [#allocation8], 1 }
 0x193   :  { %991 = vsyncpa [#allocation11], 1 }

// kernel: encoder_forward.15
= control target key start
LH: loop header
LB: loop body
LE: loop exit
PB: predicated region body
PF: predicated region fallthrough
CT: control target
= control target key end

     0   :  { %16 = vsyncpa [#allocation3], 0  ;;  %s2107_s0 = inlined_call_operand.vmem [shape: bf16[9,8,128], index: 0, kind: input, shape index: {}]   ;;  %s2108_s1 = inlined_call_operand.vmem [shape: bf16[8,64], index: 1, kind: input, shape index: {}]   ;;  %s2109_s2 = inlined_call_operand.vmem [shape: bf16[9,128,128], index: 2, kind: input, shape index: {}]   ;;  %s2110_s3 = inlined_call_operand.hbm [shape: f32[1,128], index: 3, kind: input, shape index: {}]   ;;  %s2111_s4 = inlined_call_operand.hbm [shape: f32[1,128], index: 4, kind: input, shape index: {}]   ;;  %s2112_s5 = inlined_call_operand.vmem [shape: bf16[128,128], index: 5, kind: input, shape index: {}]   ;;  %s2113_s6 = inlined_call_operand.hbm [shape: f32[1,128], index: 6, kind: input, shape index: {}]   ;;  %s2114_s7 = inlined_call_operand.hbm [shape: f32[1,128], index: 7, kind: input, shape index: {}]   ;;  %s2115_s8 = inlined_call_operand.vmem [shape: bf16[64,128], index: 8, kind: input, shape index: {}]   ;;  %s2116_s9 = inlined_call_operand.hbm [shape: f32[1,128], index: 9, kind: input, shape index: {}]   ;;  %s2117_s10 = inlined_call_operand.hbm [shape: f32[1,128], index: 10, kind: input, shape index: {}]   ;;  %s2118_s11 = inlined_call_operand.vmem [shape: bf16[8,128], index: 11, kind: output, shape index: {}]  }
   0x1   :  { %17 = vsyncpa [#allocation5], 0 }
   0x2   :  { %18 = vsyncpa [#allocation8], 0  ;;  %s42_s19 = sshll.u32 %s2111_s4, 4  ;;  %s43_s19 = int_to_ptr.hbm [resolvable:$true] %s42_s19 }
   0x3   :  { %19 = vsyncpa [#allocation11], 0  ;;  %s1738_s20 = smov [#allocation4]   ;;  %s66_s24 = sshll.u32 %s2114_s7, 4  ;;  %s67_s24 = int_to_ptr.hbm [resolvable:$true] %s66_s24 }
   0x4   :  { %s44_s21 = sshll.u32 %s1738_s20, 4  ;;  %s1739_s25 = smov [#allocation7]   ;;  %s45_s21 = int_to_ptr.vmem [resolvable:$true] %s44_s21 }
   0x5   :  { %47 = dma.hbm_to_vmem [thread:$0]  %s43_s19, 16, %s45_s21, [#allocation5]  }
   0x6   :  { %s68_s26 = sshll.u32 %s1739_s25, 4  ;;  %s31_s29 = sshll.u32 %s2110_s3, 4  ;;  %s69_s26 = int_to_ptr.vmem [resolvable:$true] %s68_s26  ;;  %s32_s29 = int_to_ptr.hbm [resolvable:$true] %s31_s29 }
   0x7   :  { %71 = dma.hbm_to_vmem [thread:$0]  %s67_s24, 16, %s69_s26, [#allocation8]  }
   0x8   :  { %s55_s12 = sshll.u32 %s2113_s6, 4  ;;  %s1740_s13 = smov [#allocation2]   ;;  %s56_s12 = int_to_ptr.hbm [resolvable:$true] %s55_s12 }
   0x9   :  { %s33_s14 = sshll.u32 %s1740_s13, 4  ;;  %s1741_s7 = smov [#allocation6]   ;;  %s34_s14 = int_to_ptr.vmem [resolvable:$true] %s33_s14 }
   0xa   :  { %36 = dma.hbm_to_vmem [thread:$0]  %s32_s29, 16, %s34_s14, [#allocation3]  }
   0xb   :  { %s57_s15 = sshll.u32 %s1741_s7, 4  ;;  %s79_s18 = sshll.u32 %s2116_s9, 4  ;;  %s58_s15 = int_to_ptr.vmem [resolvable:$true] %s57_s15  ;;  %s80_s18 = int_to_ptr.hbm [resolvable:$true] %s79_s18 }
   0xc   :  { %60 = dma.hbm_to_vmem [thread:$0]  %s56_s12, 16, %s58_s15, [#allocation5]  }
   0xd   :  { %s90_s20 = sshll.u32 %s2117_s10, 4  ;;  %s1742_s21 = smov [#allocation9]   ;;  %s91_s20 = int_to_ptr.hbm [resolvable:$true] %s90_s20 }
   0xe   :  { %s81_s6 = sshll.u32 %s1742_s21, 4  ;;  %s1743_s22 = smov [#allocation10]   ;;  %s82_s6 = int_to_ptr.vmem [resolvable:$true] %s81_s6 }
   0xf   :  { %84 = dma.hbm_to_vmem [thread:$0]  %s80_s18, 16, %s82_s6, [#allocation8]  }
  0x10   :  { %s92_s23 = sshll.u32 %s1743_s22, 4  ;;  %s93_s23 = int_to_ptr.vmem [resolvable:$true] %s92_s23 }
  0x11   :  { %95 = dma.hbm_to_vmem [thread:$0]  %s91_s20, 16, %s93_s23, [#allocation11]  }
  0x12   :  { %1730 = dma.done.wait [#allocation3], 16  }
  0x13   :  { %1731 = vsyncadd [#allocation3], 4294967280 }
  0x14   :  { %1732 = dma.done.wait [#allocation5], 32  }
  0x15   :  { %1733 = vsyncadd [#allocation5], 4294967264 }
  0x16   :  { %1734 = dma.done.wait [#allocation8], 32  }
  0x17   :  { %1735 = vsyncadd [#allocation8], 4294967264 }
  0x18   :  { %1736 = dma.done.wait [#allocation11], 16  }
  0x19   :  { %1737 = vsyncadd [#allocation11], 4294967280  ;;  %v1505_v0 = vld [vmem:[%s2109_s2 + $0x78] sm:$0xff]  ;;  %v1504_v4 = vld [vmem:[%s2109_s2 + $0x70] sm:$0xff]  ;;  %vm978_vm0 = vcmask 523264  }
  0x1a   :  { %v1513_v1 = vld [vmem:[%s2109_s2 + $0xb8] sm:$0xff]  ;;  %205 = vmatpush.bf16.msra.mxu0 %v1505_v0  ;;  %v1512_v5 = vld [vmem:[%s2109_s2 + $0xb0] sm:$0xff]  ;;  %v1503_v8 = vld [vmem:[%s2109_s2 + $0x68] sm:$0xff] }
  0x1b   :  { %v1521_v2 = vld [vmem:[%s2109_s2 + $0xf8] sm:$0xff]  ;;  %346 = vmatpush.bf16.msra.mxu2 %v1513_v1  ;;  %v1520_v6 = vld [vmem:[%s2109_s2 + $0xf0] sm:$0xff]  ;;  %v1511_v9 = vld [vmem:[%s2109_s2 + $0xa8] sm:$0xff] }
  0x1c   :  { %v1497_v3 = vld [vmem:[%s2109_s2 + $0x38] sm:$0xff]  ;;  %427 = vmatpush.bf16.msra.mxu3 %v1521_v2  ;;  %v1496_v7 = vld [vmem:[%s2109_s2 + $0x30] sm:$0xff]  ;;  %v1519_v10 = vld [vmem:[%s2109_s2 + $0xe8] sm:$0xff] }
  0x1d   :  { %266 = vmatpush.bf16.msra.mxu1 %v1497_v3  ;;  %v1495_v11 = vld [vmem:[%s2109_s2 + $0x28] sm:$0xff]  ;;  %v1502_v12 = vld [vmem:[%s2109_s2 + $0x60] sm:$0xff]  ;;  %v1501_v16 = vld [vmem:[%s2109_s2 + $0x58] sm:$0xff] }
  0x1e   :  { %206 = vmatpush.bf16.msra.mxu0 %v1504_v4  ;;  %v1510_v13 = vld [vmem:[%s2109_s2 + $0xa0] sm:$0xff]  ;;  %v1509_v17 = vld [vmem:[%s2109_s2 + $0x98] sm:$0xff]  ;;  %v1500_v20 = vld [vmem:[%s2109_s2 + $0x50] sm:$0xff] }
  0x1f   :  { %347 = vmatpush.bf16.msra.mxu2 %v1512_v5  ;;  %v1518_v14 = vld [vmem:[%s2109_s2 + $0xe0] sm:$0xff]  ;;  %v1517_v18 = vld [vmem:[%s2109_s2 + $0xd8] sm:$0xff]  ;;  %v1508_v21 = vld [vmem:[%s2109_s2 + $0x90] sm:$0xff] }
  0x20   :  { %428 = vmatpush.bf16.msra.mxu3 %v1520_v6  ;;  %v1494_v15 = vld [vmem:[%s2109_s2 + $0x20] sm:$0xff]  ;;  %v1493_v19 = vld [vmem:[%s2109_s2 + $0x18] sm:$0xff]  ;;  %v1516_v22 = vld [vmem:[%s2109_s2 + $0xd0] sm:$0xff] }
  0x21   :  { %267 = vmatpush.bf16.msra.mxu1 %v1496_v7  ;;  %v1492_v23 = vld [vmem:[%s2109_s2 + $0x10] sm:$0xff]  ;;  %v1499_v24 = vld [vmem:[%s2109_s2 + $0x48] sm:$0xff]  ;;  %v1498_v28 = vld [vmem:[%s2109_s2 + $0x40] sm:$0xff] }
  0x22   :  { %207 = vmatpush.bf16.msra.mxu0 %v1503_v8  ;;  %v1507_v25 = vld [vmem:[%s2109_s2 + $0x88] sm:$0xff]  ;;  %v1506_v29 = vld [vmem:[%s2109_s2 + $0x80] sm:$0xff]  ;;  %v1529_v30 = vld [vmem:[%s2109_s2 + $0x138] sm:$0xff] }
  0x23   :  { %348 = vmatpush.bf16.msra.mxu2 %v1511_v9  ;;  %v1515_v26 = vld [vmem:[%s2109_s2 + $0xc8] sm:$0xff]  ;;  %v1545_v31 = vld [vmem:[%s2109_s2 + $0x1b8] sm:$0xff]  ;;  %v1514_v32 = vld [vmem:[%s2109_s2 + $0xc0] sm:$0xff] }
  0x24   :  { %429 = vmatpush.bf16.msra.mxu3 %v1519_v10  ;;  %v1491_v27 = vld [vmem:[%s2109_s2 + $0x8] sm:$0xff]  ;;  %v1490_v33 = vld [vmem:[%s2109_s2] sm:$0xff]  ;;  %v1553_v34 = vld [vmem:[%s2109_s2 + $0x1f8] sm:$0xff] }
  0x25   :  { %268 = vmatpush.bf16.msra.mxu1 %v1495_v11  ;;  %v1537_v35 = vld [vmem:[%s2109_s2 + $0x178] sm:$0xff]  ;;  %v1528_v36 = vld [vmem:[%s2109_s2 + $0x130] sm:$0xff]  ;;  %v1098_v38 = vld [vmem:[%s2107_s0 + $0x8] sm:$0xf] }
  0x26   :  { %208 = vmatpush.bf16.msra.mxu0 %v1502_v12  ;;  %v1544_v37 = vld [vmem:[%s2109_s2 + $0x1b0] sm:$0xff]  ;;  %v1017_v39 = vld [vmem:[%s2107_s0 + $0x4] sm:$0xf]  ;;  %v1147_v42 = vld [vmem:[%s2107_s0 + $0xc] sm:$0xf] }
  0x27   :  { %349 = vmatpush.bf16.msra.mxu2 %v1510_v13  ;;  %v1552_v40 = vld [vmem:[%s2109_s2 + $0x1f0] sm:$0xff]  ;;  %v121_v43 = vld [vmem:[%s2107_s0] sm:$0xf]  ;;  %v1527_v44 = vld [vmem:[%s2109_s2 + $0x128] sm:$0xff] }
  0x28   :  { %430 = vmatpush.bf16.msra.mxu3 %v1518_v14  ;;  %v1536_v41 = vld [vmem:[%s2109_s2 + $0x170] sm:$0xff]  ;;  %v1543_v45 = vld [vmem:[%s2109_s2 + $0x1a8] sm:$0xff]  ;;  %v1526_v48 = vld [vmem:[%s2109_s2 + $0x120] sm:$0xff] }
  0x29   :  { %269 = vmatpush.bf16.msra.mxu1 %v1494_v15  ;;  %v1551_v46 = vld [vmem:[%s2109_s2 + $0x1e8] sm:$0xff]  ;;  %v1542_v49 = vld [vmem:[%s2109_s2 + $0x1a0] sm:$0xff]  ;;  %v1525_v52 = vld [vmem:[%s2109_s2 + $0x118] sm:$0xff] }
  0x2a   :  { %209 = vmatpush.bf16.msra.mxu0 %v1501_v16  ;;  %v1535_v47 = vld [vmem:[%s2109_s2 + $0x168] sm:$0xff]  ;;  %v1550_v50 = vld [vmem:[%s2109_s2 + $0x1e0] sm:$0xff]  ;;  %v1541_v53 = vld [vmem:[%s2109_s2 + $0x198] sm:$0xff] }
  0x2b   :  { %350 = vmatpush.bf16.msra.mxu2 %v1509_v17  ;;  %v1534_v51 = vld [vmem:[%s2109_s2 + $0x160] sm:$0xff]  ;;  %v1549_v54 = vld [vmem:[%s2109_s2 + $0x1d8] sm:$0xff]  ;;  %v1524_v56 = vld [vmem:[%s2109_s2 + $0x110] sm:$0xff] }
  0x2c   :  { %431 = vmatpush.bf16.msra.mxu3 %v1517_v18  ;;  %v1533_v55 = vld [vmem:[%s2109_s2 + $0x158] sm:$0xff]  ;;  %v1540_v57 = vld [vmem:[%s2109_s2 + $0x190] sm:$0xff]  ;;  %v1523_v60 = vld [vmem:[%s2109_s2 + $0x108] sm:$0xff] }
  0x2d   :  { %270 = vmatpush.bf16.msra.mxu1 %v1493_v19  ;;  %v1548_v58 = vld [vmem:[%s2109_s2 + $0x1d0] sm:$0xff]  ;;  %v1539_v61 = vld [vmem:[%s2109_s2 + $0x188] sm:$0xff]  ;;  %v1522_v0 = vld [vmem:[%s2109_s2 + $0x100] sm:$0xff] }
  0x2e   :  { %210 = vmatpush.bf16.msra.mxu0 %v1500_v20  ;;  %v1532_v59 = vld [vmem:[%s2109_s2 + $0x150] sm:$0xff]  ;;  %v1547_v62 = vld [vmem:[%s2109_s2 + $0x1c8] sm:$0xff]  ;;  %v1538_v1 = vld [vmem:[%s2109_s2 + $0x180] sm:$0xff] }
  0x2f   :  { %351 = vmatpush.bf16.msra.mxu2 %v1508_v21  ;;  %v1531_v63 = vld [vmem:[%s2109_s2 + $0x148] sm:$0xff]  ;;  %v1561_v2 = vld [vmem:[%s2109_s2 + $0x238] sm:$0xff]  ;;  %v1546_v3 = vld [vmem:[%s2109_s2 + $0x1c0] sm:$0xff] }
  0x30   :  { %432 = vmatpush.bf16.msra.mxu3 %v1516_v22  ;;  %v1530_v4 = vld [vmem:[%s2109_s2 + $0x140] sm:$0xff]  ;;  %v1294_v5 = vld [vmem:[%s2107_s0 + $0x18] sm:$0xf]  ;;  %v1196_v6 = vld [vmem:[%s2107_s0 + $0x10] sm:$0xf] }
  0x31   :  { %271 = vmatpush.bf16.msra.mxu1 %v1492_v23  ;;  %v1560_v7 = vld [vmem:[%s2109_s2 + $0x230] sm:$0xff]  ;;  %v1343_v8 = vld [vmem:[%s2107_s0 + $0x1c] sm:$0xf]  ;;  %v1559_v10 = vld [vmem:[%s2109_s2 + $0x228] sm:$0xff] }
  0x32   :  { %211 = vmatpush.bf16.msra.mxu0 %v1499_v24  ;;  %v1245_v9 = vld [vmem:[%s2107_s0 + $0x14] sm:$0xf]  ;;  %v1558_v11 = vld [vmem:[%s2109_s2 + $0x220] sm:$0xff]  ;;  %v1557_v12 = vld [vmem:[%s2109_s2 + $0x218] sm:$0xff] }
  0x33   :  { %352 = vmatpush.bf16.msra.mxu2 %v1507_v25  ;;  %v1556_v13 = vld [vmem:[%s2109_s2 + $0x210] sm:$0xff]  ;;  %v1555_v14 = vld [vmem:[%s2109_s2 + $0x208] sm:$0xff]  ;;  %v1554_v15 = vld [vmem:[%s2109_s2 + $0x200] sm:$0xff] }
  0x34   :  { %433 = vmatpush.bf16.msra.mxu3 %v1515_v26  ;;  %v1392_v16 = vld [vmem:[%s2107_s0 + $0x20] sm:$0xf]  ;;  %v1569_v19 = vld [vmem:[%s2112_s5 + $0x38] sm:$0xff]  ;;  %v1568_v21 = vld [vmem:[%s2112_s5 + $0x30] sm:$0xff] }
  0x35   :  { %272 = vmatpush.bf16.msra.mxu1 %v1491_v27  ;;  %v1573_v20 = vld [vmem:[%s2115_s8 + $0x18] sm:$0xff]  ;;  %v1572_v23 = vld [vmem:[%s2115_s8 + $0x10] sm:$0xff]  ;;  %v1567_v26 = vld [vmem:[%s2112_s5 + $0x28] sm:$0xff] }
  0x36   :  { %212 = vmatpush.bf16.msra.mxu0 %v1498_v28  ;;  %v1571_v28 = vld [vmem:[%s2115_s8 + $0x8] sm:$0xff] }
  0x37   :  { %353 = vmatpush.bf16.msra.mxu2 %v1506_v29  ;;  %v1566_v29 = vld [vmem:[%s2112_s5 + $0x20] sm:$0xff] }
  0x38   :  { %434 = vmatpush.bf16.msra.mxu3 %v1514_v32 }
  0x39   :  { %273 = vmatpush.bf16.msra.mxu1 %v1490_v33  ;;  %213 = vmatmul.bf16.vlgmr.msra.gmra.mxu0 %v1017_v39  ;;  %v1565_v33 = vld [vmem:[%s2112_s5 + $0x18] sm:$0xff]  ;;  %v1562_v39 = vld [vmem:[%s2112_s5] sm:$0xff] }
  0x3a   :  { %508 = vmatpush.bf16.msrb.mxu0 %v1529_v30  ;;  %354 = vmatmul.bf16.vlgmr.msra.gmra.mxu2 %v1098_v38 }
  0x3b   :  { %670 = vmatpush.bf16.msrb.mxu2 %v1545_v31  ;;  %435 = vmatmul.bf16.vlgmr.msra.gmra.mxu3 %v1147_v42  ;;  %v1570_v31 = vld [vmem:[%s2115_s8] sm:$0xff] }
  0x3c   :  { %751 = vmatpush.bf16.msrb.mxu3 %v1553_v34  ;;  %274 = vmatmul.bf16.vlgmr.msra.gmra.mxu1 %v121_v43  ;;  %v945_v34 = vld [vmem:[%s2108_s1] sm:$0xf] }
  0x3d   :  { %589 = vmatpush.bf16.msrb.mxu1 %v1537_v35  ;;  %v1564_v35 = vld [vmem:[%s2112_s5 + $0x10] sm:$0xff] }
  0x3e   :  { %509 = vmatpush.bf16.msrb.mxu0 %v1528_v36  ;;  %v1563_v36 = vld [vmem:[%s2112_s5 + $0x8] sm:$0xff] }
  0x3f   :  { %671 = vmatpush.bf16.msrb.mxu2 %v1544_v37 }
  0x40   :  { %752 = vmatpush.bf16.msrb.mxu3 %v1552_v40 }
  0x41   :  { %590 = vmatpush.bf16.msrb.mxu1 %v1536_v41 }
  0x42   :  { %510 = vmatpush.bf16.msrb.mxu0 %v1527_v44 }
  0x43   :  { %672 = vmatpush.bf16.msrb.mxu2 %v1543_v45 }
  0x44   :  { %753 = vmatpush.bf16.msrb.mxu3 %v1551_v46 }
  0x45   :  { %591 = vmatpush.bf16.msrb.mxu1 %v1535_v47 }
  0x46   :  { %511 = vmatpush.bf16.msrb.mxu0 %v1526_v48 }
  0x47   :  { %673 = vmatpush.bf16.msrb.mxu2 %v1542_v49 }
  0x48   :  { %754 = vmatpush.bf16.msrb.mxu3 %v1550_v50 }
  0x49   :  { %592 = vmatpush.bf16.msrb.mxu1 %v1534_v51 }
  0x4a   :  { %512 = vmatpush.bf16.msrb.mxu0 %v1525_v52 }
  0x4b   :  { %674 = vmatpush.bf16.msrb.mxu2 %v1541_v53  ;;  %v1580_v53 = vld [vmem:[#allocation2] ss:$0 sm:$0xff] }
  0x4c   :  { %755 = vmatpush.bf16.msrb.mxu3 %v1549_v54 }
  0x4d   :  { %593 = vmatpush.bf16.msrb.mxu1 %v1533_v55 }
  0x4e   :  { %513 = vmatpush.bf16.msrb.mxu0 %v1524_v56  ;;  %v1581_v56 = vld [vmem:[#allocation4] ss:$0 sm:$0xff] }
  0x4f   :  { %675 = vmatpush.bf16.msrb.mxu2 %v1540_v57 }
  0x50   :  { %756 = vmatpush.bf16.msrb.mxu3 %v1548_v58 }
  0x51   :  { %594 = vmatpush.bf16.msrb.mxu1 %v1532_v59 }
  0x52   :  { %514 = vmatpush.bf16.msrb.mxu0 %v1523_v60 }
  0x53   :  { %676 = vmatpush.bf16.msrb.mxu2 %v1539_v61 }
  0x54   :  { %757 = vmatpush.bf16.msrb.mxu3 %v1547_v62 }
  0x55   :  { %595 = vmatpush.bf16.msrb.mxu1 %v1531_v63 }
  0x56   :  { %515 = vmatpush.bf16.msrb.mxu0 %v1522_v0  ;;  %v1582_v0 = vld [vmem:[#allocation9] ss:$0 sm:$0xff] }
  0x57   :  { %677 = vmatpush.bf16.msrb.mxu2 %v1538_v1 }
  0x58   :  { %758 = vmatpush.bf16.msrb.mxu3 %v1546_v3  ;;  %v1584_v3 = vld [vmem:[#allocation6] ss:$0 sm:$0xff] }
  0x59   :  { %596 = vmatpush.bf16.msrb.mxu1 %v1530_v4  ;;  %516 = vmatmul.bf16.vlgmr.msrb.gmra.mxu0 %v1196_v6  ;;  %v1585_v4 = vld [vmem:[#allocation7] ss:$0 sm:$0xff] }
  0x5a   :  { %832 = vmatpush.bf16.msra.mxu0 %v1561_v2  ;;  %678 = vmatmul.bf16.vlgmr.msrb.gmra.mxu2 %v1294_v5  ;;  %v1583_v2 = vld [vmem:[#allocation10] ss:$0 sm:$0xff] }
  0x5b   :  { %759 = vmatmul.bf16.vlgmr.msrb.gmra.mxu3 %v1343_v8  ;;  %986 = vmatpush.bf16.msra.mxu2 %v1573_v20 }
  0x5c   :  { %597 = vmatmul.bf16.vlgmr.msrb.gmra.mxu1 %v1245_v9 }
  0x5d   :  { %922 = vmatpush.bf16.msra.mxu1 %v1569_v19 }
  0x5e   :  { %833 = vmatpush.bf16.msra.mxu0 %v1560_v7 }
  0x5f   :  { %987 = vmatpush.bf16.msra.mxu2 %v1572_v23 }
  0x61   :  { %923 = vmatpush.bf16.msra.mxu1 %v1568_v21 }
  0x62   :  { %834 = vmatpush.bf16.msra.mxu0 %v1559_v10 }
  0x63   :  { %988 = vmatpush.bf16.msra.mxu2 %v1571_v28 }
  0x65   :  { %924 = vmatpush.bf16.msra.mxu1 %v1567_v26 }
  0x66   :  { %835 = vmatpush.bf16.msra.mxu0 %v1558_v11 }
  0x67   :  { %989 = vmatpush.bf16.msra.mxu2 %v1570_v31 }
  0x69   :  { %925 = vmatpush.bf16.msra.mxu1 %v1566_v29 }
  0x6a   :  { %836 = vmatpush.bf16.msra.mxu0 %v1557_v12  ;;  %1489 = vmatmul.msk.bf16.vlgmr.msra.gmra.mxu2 %vm978_vm0, %v945_v34 }
  0x6d   :  { %926 = vmatpush.bf16.msra.mxu1 %v1565_v33 }
  0x6e   :  { %837 = vmatpush.bf16.msra.mxu0 %v1556_v13 }
  0x71   :  { %927 = vmatpush.bf16.msra.mxu1 %v1564_v35 }
  0x72   :  { %838 = vmatpush.bf16.msra.mxu0 %v1555_v14 }
  0x75   :  { %928 = vmatpush.bf16.msra.mxu1 %v1563_v36 }
  0x76   :  { %839 = vmatpush.bf16.msra.mxu0 %v1554_v15 }
  0x79   :  { %840 = vmatmul.bf16.vlgmr.msra.gmra.mxu0 %v1392_v16  ;;  %929 = vmatpush.bf16.msra.mxu1 %v1562_v39 }
  0xb6   :  { %v214_v17 = vpop.f32.mrf.mxu0 }
  0xb9   :  { %v275_v18 = vpop.f32.mrf.mxu1 }
  0xba   :  { %v276_v40 = vadd.f32 %v275_v18, %v214_v17 }
  0xbd   :  { %v355_v22 = vpop.f32.mrf.mxu2 }
  0xbe   :  { %v436_v24 = vpop.f32.mrf.mxu3  ;;  %v216_v25 = vpop.f32.mrf.mxu0  ;;  %v359_v42 = vadd.f32 %v355_v22, %v276_v40 }
  0xc0   :  { %v440_v46 = vadd.f32 %v436_v24, %v359_v42 }
  0xc1   :  { %v277_v27 = vpop.f32.mrf.mxu1 }
  0xc5   :  { %v357_v30 = vpop.f32.mrf.mxu2 }
  0xc6   :  { %v438_v32 = vpop.f32.mrf.mxu3 }
  0xd6   :  { %v517_v37 = vpop.f32.mrf.mxu0 }
  0xd7   :  { %v521_v48 = vadd.f32 %v517_v37, %v440_v46 }
  0xd9   :  { %v598_v38 = vpop.f32.mrf.mxu1 }
  0xda   :  { %v602_v50 = vadd.f32 %v598_v38, %v521_v48 }
  0xdd   :  { %v679_v41 = vpop.f32.mrf.mxu2 }
  0xde   :  { %v760_v43 = vpop.f32.mrf.mxu3  ;;  %v519_v44 = vpop.f32.mrf.mxu0  ;;  %v683_v51 = vadd.f32 %v679_v41, %v602_v50 }
  0xe0   :  { %v764_v52 = vadd.f32 %v760_v43, %v683_v51 }
  0xe1   :  { %v600_v45 = vpop.f32.mrf.mxu1 }
  0xe5   :  { %v681_v47 = vpop.f32.mrf.mxu2 }
  0xe6   :  { %v762_v49 = vpop.f32.mrf.mxu3 }
  0xed   :  { %v991_v62 = vpop.f32.mrf.mxu2 }
  0xee   :  { %v999_v1 = vmul.f32 %v1582_v0, %v991_v62 }
  0xf0   :  { %v1004_v6 = vadd.f32 %v1583_v2, %v999_v1 }
  0xf5   :  { %v993_v63 = vpop.f32.mrf.mxu2 }
  0xf6   :  { %v841_v54 = vpop.f32.mrf.mxu0 }
  0xf7   :  { %v845_v55 = vadd.f32 %v841_v54, %v764_v52 }
  0xf9   :  { %v850_v57 = vmul.f32 %v1580_v53, %v845_v55 }
  0xfb   :  { %v855_v58 = vadd.f32 %v1581_v56, %v850_v57 }
  0xfd   :  { %v856_v59 = vmax.f32 %v855_v58, 0.0 }
  0xfe   :  { %v843_v60 = vpop.f32.mrf.mxu0 }
  0xff   :  { %v857_v61 = vpack.c.bf16 %v856_v59, %v856_v59 }
 0x101   :  { %930 = vmatmul.bf16.vlgmr.msra.gmra.mxu1 %v857_v61 }
 0x17e   :  { %v931_v5 = vpop.f32.mrf.mxu1 }
 0x17f   :  { %v939_v7 = vmul.f32 %v1584_v3, %v931_v5 }
 0x181   :  { %v944_v8 = vadd.f32 %v1585_v4, %v939_v7 }
 0x183   :  { %v1005_v9 = vadd.f32 %v1004_v6, %v944_v8 }
 0x185   :  { %v1006_v10 = vmax.f32 %v1005_v9, 0.0 }
 0x186   :  { %v933_v11 = vpop.f32.mrf.mxu1 }
 0x187   :  { %v1007_v12 = vpack.c.bf16 %v1006_v10, %v1006_v10 }
 0x189   :  { %1008 = vst [vmem:[%s2118_s11] sm:$0xf] %v1007_v12 }
 0x18a   :  { %1013 = vsyncpa [#allocation3], 1 }
 0x18b   :  { %1014 = vsyncpa [#allocation5], 1 }
 0x18c   :  { %1015 = vsyncpa [#allocation8], 1 }
 0x18d   :  { %1016 = vsyncpa [#allocation11], 1 }

// kernel: encoder_forward.16
= control target key start
LH: loop header
LB: loop body
LE: loop exit
PB: predicated region body
PF: predicated region fallthrough
CT: control target
= control target key end

     0   :  { %s3735_s22 = smov 0   ;;  %s3737_s23 = smov 0   ;;  %s4131_s0 = inlined_call_operand.vmem [shape: bf16[2,4,128], index: 0, kind: input, shape index: {}]   ;;  %s4132_s1 = inlined_call_operand.vmem [shape: bf16[128,128], index: 1, kind: input, shape index: {}]   ;;  %s4133_s2 = inlined_call_operand.vmem [shape: f32[1,128], index: 2, kind: input, shape index: {}]   ;;  %s4134_s3 = inlined_call_operand.vmem [shape: f32[4,128], index: 3, kind: input, shape index: {}]   ;;  %s4135_s4 = inlined_call_operand.vmem [shape: bf16[2,4,128,32], index: 4, kind: input, shape index: {}]   ;;  %s4136_s5 = inlined_call_operand.vmem [shape: f32[2,4,1,32], index: 5, kind: input, shape index: {}]   ;;  %s4137_s6 = inlined_call_operand.vmem [shape: bf16[2,4,128,32], index: 6, kind: input, shape index: {}]   ;;  %s4138_s7 = inlined_call_operand.vmem [shape: f32[2,4,1,32], index: 7, kind: input, shape index: {}]   ;;  %s4139_s8 = inlined_call_operand.vmem [shape: bf16[2,4,128,32], index: 8, kind: input, shape index: {}]   ;;  %s4140_s9 = inlined_call_operand.vmem [shape: f32[2,4,1,32], index: 9, kind: input, shape index: {}]   ;;  %s4141_s10 = inlined_call_operand.vmem [shape: bf16[2,4,32,128], index: 10, kind: input, shape index: {}]   ;;  %s4142_s11 = inlined_call_operand.vmem [shape: f32[2,1,128], index: 11, kind: input, shape index: {}]   ;;  %s4143_s12 = inlined_call_operand.vmem [shape: f32[2,1,128], index: 12, kind: input, shape index: {}]   ;;  %s4144_s13 = inlined_call_operand.vmem [shape: f32[2,1,128], index: 13, kind: input, shape index: {}]   ;;  %s4145_s14 = inlined_call_operand.vmem [shape: f32[2,1,128], index: 14, kind: input, shape index: {}]   ;;  %s4146_s15 = inlined_call_operand.vmem [shape: f32[2,1,128], index: 15, kind: input, shape index: {}]   ;;  %s4147_s16 = inlined_call_operand.vmem [shape: bf16[2,128,128], index: 16, kind: input, shape index: {}]   ;;  %s4148_s17 = inlined_call_operand.vmem [shape: f32[2,1,128], index: 17, kind: input, shape index: {}]   ;;  %s4149_s18 = inlined_call_operand.vmem [shape: bf16[2,128,128], index: 18, kind: input, shape index: {}]   ;;  %s4150_s19 = inlined_call_operand.vmem [shape: f32[2,1,128], index: 19, kind: input, shape index: {}]   ;;  %s4151_s20 = inlined_call_operand.vmem [shape: bf16[2,4,128], index: 20, kind: output, shape index: {}]  }
   0x1   :  { %4161 = sst [smem:[#allocation14_spill]] %s4131_s0  ;;  %s3739_s24 = smov 0  }
   0x2   :  { %4162 = sst [smem:[#allocation15_spill]] %s4132_s1  ;;  %s3733_s1 = smov 0  }
   0x3   :  { %4163 = sst [smem:[#allocation16_spill]] %s4133_s2  ;;  %s3741_s2 = smov 0  }
   0x4   :  { %4164 = sst [smem:[#allocation17_spill]] %s4134_s3 }
   0x5   :  { %4165 = sst [smem:[#allocation18_spill]] %s4135_s4 }
   0x6   :  { %4166 = sst [smem:[#allocation19_spill]] %s4136_s5 }
   0x7   :  { %4167 = sst [smem:[#allocation20_spill]] %s4137_s6 }
   0x8   :  { %4168 = sst [smem:[#allocation21_spill]] %s4138_s7 }
   0x9   :  { %4169 = sst [smem:[#allocation22_spill]] %s4139_s8 }
   0xa   :  { %4170 = sst [smem:[#allocation23_spill]] %s4140_s9 }
   0xb   :  { %4171 = sst [smem:[#allocation24_spill]] %s4141_s10 }
   0xc   :  { %4172 = sst [smem:[#allocation25_spill]] %s4150_s19 }
   0xd   :  { %4173 = sst [smem:[#allocation26_spill]] %s4151_s20 }
   0xe LB: > { %4174 = sst [smem:[#allocation3_spill]] %s3609_s1  ;;  %s39_s25 = sadd.s32 1, %s3617_s23  ;;  %s3625_s2 = sphi %s3741_s2, %s30_s2   ;;  %s3621_s24 = sphi %s3739_s24, %s4215_s24   ;;  %s3617_s23 = sphi %s3737_s23, %s4214_s23   ;;  %s3613_s22 = sphi %s3735_s22, %s4213_s22   ;;  %s3609_s1 = sphi %s3733_s1, %s4212_s1  }
   0xf   : > { %4175 = sst [smem:[#allocation4_spill]] %s3617_s23  ;;  %s42_s3 = sadd.s32 1, %s3621_s24 }
  0x10   : > { %4176 = sst [smem:[#allocation5_spill]] %s3621_s24  ;;  %p40_p0 = scmp.ge.s32.totalorder %s39_s25, 2 }
  0x11   : > { %4177 = sst [smem:[#allocation6_spill]] %s3625_s2  ;;  %p2823_p1 = scmp.ge.s32.totalorder %s3625_s2, 1 }
  0x12   : > { %p716_p2 = scmp.lt.s32.totalorder %s3625_s2, 5  ;;  %s4217_s25 = smov (%p40_p0, %s39_s25), 0 }
  0x13   : > { %4178 = sst [smem:[#allocation7_spill]] %s4217_s25  ;;  %s4219_s3 = smov (!%p40_p0, %s42_s3), %s3621_s24 }
  0x14   : > { %p717_p3 = pnand %p2823_p1, %p716_p2  ;;  %p44_p4 = scmp.ge.s32.totalorder %s4219_s3, 2 }
  0x16   : > { %s4221_s3 = smov (%p44_p4, %s4219_s3), 0  ;;  %720 = sbr.rel (%p717_p3) target bundleno = 1944 (0x798), region = 100 }
  0x17   : > { %4179 = sst [smem:[#allocation8_spill]] %s4221_s3 }
  0x1b   : > { %p835_p5 = scmp.lt.s32.totalorder %s3613_s22, 1  ;;  %p839_p6 = scmp.lt.s32.totalorder %s3609_s1, 1 }
  0x1c   : > { %s4180_s29 = sld [smem:[#allocation14_spill]] }
  0x1d   : > { %s4223_s22 = smov (!%p835_p5, %s3613_s22), 1  ;;  %s4182_s25 = sld [smem:[#allocation18_spill]] }
  0x1e   : > { %s3767_s26 = scalar_select %p839_p6, %s3609_s1, 1 }
  0x1f   : > { %s2824_s27 = sshll.u32 %s4223_s22, 1  ;;  %s4184_s5 = sld [smem:[#allocation19_spill]] }
  0x20   : > { %s3368_s0 = sshll.u32 %s3767_s26, 8  ;;  %s2827_s23 = sshll.u32 %s3767_s26, 2 }
  0x21   : > { %s4186_s6 = sld [smem:[#allocation20_spill]] }
  0x22   : > { %s3772_s30 = scalar_lea.vmem %s4180_s29, %s2824_s27  ;;  %s4187_s7 = sld [smem:[#allocation21_spill]] }
  0x23   : > { %4181 = sst [smem:[#allocation9_spill]] %s3772_s30  ;;  %s3778_s24 = scalar_lea.vmem %s4182_s25, %s3368_s0 }
  0x24   : > { %4183 = sst [smem:[#allocation10_spill]] %s3778_s24 }
  0x25   : > { %s3784_s20 = scalar_lea.vmem %s4184_s5, %s2827_s23  ;;  %s4189_s8 = sld [smem:[#allocation22_spill]] }
  0x26   : > { %4185 = sst [smem:[#allocation11_spill]] %s3784_s20  ;;  %s3371_s5 = sshll.u32 %s3767_s26, 6 }
  0x27   : > { %s3789_s28 = scalar_lea.vmem %s4186_s6, %s3368_s0  ;;  %s4190_s9 = sld [smem:[#allocation23_spill]] }
  0x28   : > { %s3794_s30 = scalar_lea.vmem %s4187_s7, %s2827_s23  ;;  %s4191_s10 = sld [smem:[#allocation24_spill]] }
  0x29   : > { %4188 = sst [smem:[#allocation12_spill]] %s3794_s30  ;;  %s3835_s6 = scalar_lea.vmem %s4147_s16, %s3371_s5 }
  0x2a   : > { %s3844_s25 = scalar_lea.vmem %s4149_s18, %s3371_s5  ;;  %s4194_s19 = sld [smem:[#allocation26_spill]] }
  0x2b   : > { %s3799_s21 = scalar_lea.vmem %s4189_s8, %s3368_s0  ;;  %s4193_s8 = sld [smem:[#allocation25_spill]] }
  0x2d   : > { %s3804_s2 = scalar_lea.vmem %s4190_s9, %s2827_s23 }
  0x2e   : > { %s3810_s22 = scalar_lea.vmem %s4191_s10, %s3371_s5  ;;  %s4195_s10 = sld [smem:[#allocation3_spill]] }
  0x2f   : > { %4192 = sst [smem:[#allocation13_spill]] %s3810_s22 }
  0x30   : > { %s3853_s29 = scalar_lea.vmem %s4194_s19, %s2824_s27 }
  0x31   : > { %s901_s24 = scalar_lea.vmem %s4193_s8, %s3767_s26 }
  0x34   : > { %p2841_p7 = scmp.ne.s32.totalorder %s4195_s10, 0 }
  0x35   : > { %s4196_s7 = sld [smem:[#allocation15_spill]] (!%p2841_p7) }
  0x36   : > { %910 = sbr.rel (%p2841_p7) target bundleno = 225 (0xe1), region = 104  ;;  %s4197_s30 = sld [smem:[#allocation9_spill]] (!%p2841_p7) }
  0x37   : > { %s4198_s3 = sld [smem:[#allocation16_spill]] (!%p2841_p7) }
  0x38   : > { %s4199_s23 = sld [smem:[#allocation17_spill]] (!%p2841_p7) }
  0x3b   : > { %v3381_v0 = vld [vmem:[%s4196_s7 + $0x38] sm:$0xff]  ;;  %v3380_v1 = vld [vmem:[%s4196_s7 + $0x30] sm:$0xff]  ;;  %v3379_v2 = vld [vmem:[%s4196_s7 + $0x28] sm:$0xff] }
  0x3c   : > { %980 = vmatpush.bf16.msra.mxu0 %v3381_v0  ;;  %v3378_v3 = vld [vmem:[%s4196_s7 + $0x20] sm:$0xff]  ;;  %v3377_v4 = vld [vmem:[%s4196_s7 + $0x18] sm:$0xff]  ;;  %v3376_v5 = vld [vmem:[%s4196_s7 + $0x10] sm:$0xff] }
  0x3d   : > { %v3375_v6 = vld [vmem:[%s4196_s7 + $0x8] sm:$0xff]  ;;  %v3374_v7 = vld [vmem:[%s4196_s7] sm:$0xff] }
  0x3e   : > { %v911_v8 = vld [vmem:[%s4197_s30] sm:$0x3] }
  0x3f   : > { %v3543_v9 = vld [vmem:[%s4198_s3] ss:$0 sm:$0xff] }
  0x40   : > { %981 = vmatpush.bf16.msra.mxu0 %v3380_v1  ;;  %v993_v11 = vld [vmem:[%s4199_s23] sm:$0xf] }
  0x44   : > { %982 = vmatpush.bf16.msra.mxu0 %v3379_v2 }
  0x48   : > { %983 = vmatpush.bf16.msra.mxu0 %v3378_v3 }
  0x4c   : > { %984 = vmatpush.bf16.msra.mxu0 %v3377_v4 }
  0x50   : > { %985 = vmatpush.bf16.msra.mxu0 %v3376_v5 }
  0x54   : > { %986 = vmatpush.bf16.msra.mxu0 %v3375_v6 }
  0x58   : > { %987 = vmatpush.bf16.msra.mxu0 %v3374_v7 }
  0x5b   : > { %988 = vmatmul.bf16.vlgmr.msra.gmra.mxu0 %v911_v8 }
  0xd8   : > { %v989_v10 = vpop.f32.mrf.mxu0 }
  0xd9   : > { %v990_v12 = vadd.f32 %v3543_v9, %v989_v10 }
  0xdb   : > { %v994_v13 = vadd.f32 %v993_v11, %v990_v12 }
  0xdd   : > { %995 = vst [vmem:[#allocation2] sm:$0xf] %v994_v13 }
  0xe0   : > { %v991_v14 = vpop.f32.mrf.mxu0 }
  0xe1 PF: > { %s4200_s1 = sld [smem:[#allocation10_spill]]  ;;  %v3421_v46 = vld [vmem:[%s3789_s28 + $0x38] sm:$0xff]  ;;  %v3420_v52 = vld [vmem:[%s3789_s28 + $0x30] sm:$0xff]  ;;  %v3419_v56 = vld [vmem:[%s3789_s28 + $0x28] sm:$0xff]  ;;  %vm1978_vm0 = vcmask 261120   ;;  %vm2116_vm1 = vcmask 1041408   ;;  %s4204_s20 = scalar_lea.vmem %s4142_s11, %s3767_s26 }
  0xe2   : > { %v3429_v47 = vld [vmem:[%s3789_s28 + $0x78] sm:$0xff]  ;;  %v3428_v53 = vld [vmem:[%s3789_s28 + $0x70] sm:$0xff]  ;;  %v3427_v57 = vld [vmem:[%s3789_s28 + $0x68] sm:$0xff]  ;;  %s4202_s30 = sld [smem:[#allocation11_spill]]  ;;  %vm2059_vm2 = vcmask 27648   ;;  %vm2112_vm3 = vcmask 31744   ;;  %s4205_s22 = scalar_lea.vmem %s4143_s12, %s3767_s26 }
  0xe3   : > { %v3437_v49 = vld [vmem:[%s3789_s28 + $0xb8] sm:$0xff]  ;;  %v3436_v55 = vld [vmem:[%s3789_s28 + $0xb0] sm:$0xff]  ;;  %v3435_v59 = vld [vmem:[%s3789_s28 + $0xa8] sm:$0xff]  ;;  %vm2322_vm4 = vcmask 1043456   ;;  %s4206_s0 = scalar_lea.vmem %s4144_s13, %s3767_s26  ;;  %s4207_s27 = scalar_lea.vmem %s4148_s17, %s3767_s26 }
  0xe4   : > { %v3917_v45 = vld [vmem:[#allocation2] sm:$0xf]  ;;  %v3445_v54 = vld [vmem:[%s3789_s28 + $0xf8] sm:$0xff]  ;;  %v3444_v58 = vld [vmem:[%s3789_s28 + $0xf0] sm:$0xff] }
  0xe5   : > { %v3925_v50 = vpack.c.bf16 %v3917_v45, %v3917_v45  ;;  %v3418_v60 = vld [vmem:[%s3789_s28 + $0x20] sm:$0xff]  ;;  %v3443_v62 = vld [vmem:[%s3789_s28 + $0xe8] sm:$0xff]  ;;  %v3417_v0 = vld [vmem:[%s3789_s28 + $0x18] sm:$0xff] }
  0xe6   : > { %v3426_v61 = vld [vmem:[%s3789_s28 + $0x60] sm:$0xff]  ;;  %v3425_v1 = vld [vmem:[%s3789_s28 + $0x58] sm:$0xff]  ;;  %v3416_v4 = vld [vmem:[%s3789_s28 + $0x10] sm:$0xff] }
  0xe7   : > { %v3389_v15 = vld [vmem:[%s4200_s1 + $0x38] sm:$0xff]  ;;  %v3388_v18 = vld [vmem:[%s4200_s1 + $0x30] sm:$0xff]  ;;  %v3387_v23 = vld [vmem:[%s4200_s1 + $0x28] sm:$0xff] }
  0xe8   : > { %v3397_v16 = vld [vmem:[%s4200_s1 + $0x78] sm:$0xff]  ;;  %1126 = vmatpush.bf16.msra.mxu0 %v3389_v15  ;;  %v3396_v19 = vld [vmem:[%s4200_s1 + $0x70] sm:$0xff]  ;;  %v3395_v24 = vld [vmem:[%s4200_s1 + $0x68] sm:$0xff] }
  0xe9   : > { %v3405_v17 = vld [vmem:[%s4200_s1 + $0xb8] sm:$0xff]  ;;  %1187 = vmatpush.bf16.msra.mxu1 %v3397_v16  ;;  %v3404_v20 = vld [vmem:[%s4200_s1 + $0xb0] sm:$0xff]  ;;  %v3403_v25 = vld [vmem:[%s4200_s1 + $0xa8] sm:$0xff] }
  0xea   : > { %1248 = vmatpush.bf16.msra.mxu2 %v3405_v17  ;;  %v3413_v21 = vld [vmem:[%s4200_s1 + $0xf8] sm:$0xff]  ;;  %v3412_v22 = vld [vmem:[%s4200_s1 + $0xf0] sm:$0xff]  ;;  %v3411_v26 = vld [vmem:[%s4200_s1 + $0xe8] sm:$0xff] }
  0xeb   : > { %1309 = vmatpush.bf16.msra.mxu3 %v3413_v21  ;;  %v3386_v27 = vld [vmem:[%s4200_s1 + $0x20] sm:$0xff]  ;;  %v3385_v31 = vld [vmem:[%s4200_s1 + $0x18] sm:$0xff]  ;;  %v3384_v34 = vld [vmem:[%s4200_s1 + $0x10] sm:$0xff] }
  0xec   : > { %1127 = vmatpush.bf16.msra.mxu0 %v3388_v18  ;;  %v3394_v28 = vld [vmem:[%s4200_s1 + $0x60] sm:$0xff]  ;;  %v3393_v32 = vld [vmem:[%s4200_s1 + $0x58] sm:$0xff]  ;;  %v3392_v35 = vld [vmem:[%s4200_s1 + $0x50] sm:$0xff] }
  0xed   : > { %1188 = vmatpush.bf16.msra.mxu1 %v3396_v19  ;;  %v3402_v29 = vld [vmem:[%s4200_s1 + $0xa0] sm:$0xff]  ;;  %v3401_v33 = vld [vmem:[%s4200_s1 + $0x98] sm:$0xff]  ;;  %v3400_v37 = vld [vmem:[%s4200_s1 + $0x90] sm:$0xff] }
  0xee   : > { %1249 = vmatpush.bf16.msra.mxu2 %v3404_v20  ;;  %v3410_v30 = vld [vmem:[%s4200_s1 + $0xe0] sm:$0xff]  ;;  %v3409_v36 = vld [vmem:[%s4200_s1 + $0xd8] sm:$0xff]  ;;  %v3383_v38 = vld [vmem:[%s4200_s1 + $0x8] sm:$0xff] }
  0xef   : > { %1310 = vmatpush.bf16.msra.mxu3 %v3412_v22  ;;  %v3391_v39 = vld [vmem:[%s4200_s1 + $0x48] sm:$0xff]  ;;  %v3408_v40 = vld [vmem:[%s4200_s1 + $0xd0] sm:$0xff]  ;;  %v3382_v42 = vld [vmem:[%s4200_s1] sm:$0xff] }
  0xf0   : > { %1128 = vmatpush.bf16.msra.mxu0 %v3387_v23  ;;  %v3399_v41 = vld [vmem:[%s4200_s1 + $0x88] sm:$0xff]  ;;  %v3390_v43 = vld [vmem:[%s4200_s1 + $0x40] sm:$0xff]  ;;  %v3433_v3 = vld [vmem:[%s3789_s28 + $0x98] sm:$0xff] }
  0xf1   : > { %1189 = vmatpush.bf16.msra.mxu1 %v3395_v24  ;;  %v3407_v44 = vld [vmem:[%s4200_s1 + $0xc8] sm:$0xff]  ;;  %v3398_v48 = vld [vmem:[%s4200_s1 + $0x80] sm:$0xff]  ;;  %v3424_v5 = vld [vmem:[%s3789_s28 + $0x50] sm:$0xff] }
  0xf2   : > { %1250 = vmatpush.bf16.msra.mxu2 %v3403_v25  ;;  %v3406_v51 = vld [vmem:[%s4200_s1 + $0xc0] sm:$0xff]  ;;  %v3441_v6 = vld [vmem:[%s3789_s28 + $0xd8] sm:$0xff]  ;;  %v3432_v7 = vld [vmem:[%s3789_s28 + $0x90] sm:$0xff] }
  0xf3   : > { %1311 = vmatpush.bf16.msra.mxu3 %v3411_v26  ;;  %v3434_v63 = vld [vmem:[%s3789_s28 + $0xa0] sm:$0xff]  ;;  %v3415_v8 = vld [vmem:[%s3789_s28 + $0x8] sm:$0xff]  ;;  %v3440_v10 = vld [vmem:[%s3789_s28 + $0xd0] sm:$0xff] }
  0xf4   : > { %1129 = vmatpush.bf16.msra.mxu0 %v3386_v27  ;;  %v3442_v2 = vld [vmem:[%s3789_s28 + $0xe0] sm:$0xff]  ;;  %v3423_v9 = vld [vmem:[%s3789_s28 + $0x48] sm:$0xff]  ;;  %v3469_v16 = vld [vmem:[%s3799_s21 + $0xb8] sm:$0xff] }
  0xf5   : > { %1190 = vmatpush.bf16.msra.mxu1 %v3394_v28  ;;  %v3431_v11 = vld [vmem:[%s3789_s28 + $0x88] sm:$0xff]  ;;  %v3414_v12 = vld [vmem:[%s3789_s28] sm:$0xff]  ;;  %v3477_v18 = vld [vmem:[%s3799_s21 + $0xf8] sm:$0xff] }
  0xf6   : > { %1251 = vmatpush.bf16.msra.mxu2 %v3402_v29  ;;  %v3422_v13 = vld [vmem:[%s3789_s28 + $0x40] sm:$0xff]  ;;  %v3439_v14 = vld [vmem:[%s3789_s28 + $0xc8] sm:$0xff]  ;;  %v3468_v19 = vld [vmem:[%s3799_s21 + $0xb0] sm:$0xff] }
  0xf7   : > { %1312 = vmatpush.bf16.msra.mxu3 %v3410_v30  ;;  %v3430_v15 = vld [vmem:[%s3789_s28 + $0x80] sm:$0xff]  ;;  %v3476_v20 = vld [vmem:[%s3799_s21 + $0xf0] sm:$0xff]  ;;  %v3467_v21 = vld [vmem:[%s3799_s21 + $0xa8] sm:$0xff] }
  0xf8   : > { %1130 = vmatpush.bf16.msra.mxu0 %v3385_v31  ;;  %v3438_v17 = vld [vmem:[%s3789_s28 + $0xc0] sm:$0xff]  ;;  %v3475_v22 = vld [vmem:[%s3799_s21 + $0xe8] sm:$0xff]  ;;  %v3465_v24 = vld [vmem:[%s3799_s21 + $0x98] sm:$0xff]  ;;  %s4201_s28 = sld [smem:[#allocation12_spill]] }
  0xf9   : > { %1191 = vmatpush.bf16.msra.mxu1 %v3393_v32  ;;  %v3466_v23 = vld [vmem:[%s3799_s21 + $0xa0] sm:$0xff]  ;;  %v3473_v26 = vld [vmem:[%s3799_s21 + $0xd8] sm:$0xff]  ;;  %v3464_v27 = vld [vmem:[%s3799_s21 + $0x90] sm:$0xff] }
  0xfa   : > { %1252 = vmatpush.bf16.msra.mxu2 %v3401_v33  ;;  %v3474_v25 = vld [vmem:[%s3799_s21 + $0xe0] sm:$0xff]  ;;  %v3463_v28 = vld [vmem:[%s3799_s21 + $0x88] sm:$0xff]  ;;  %v3472_v29 = vld [vmem:[%s3799_s21 + $0xd0] sm:$0xff] }
  0xfb   : > { %1313 = vmatpush.bf16.msra.mxu3 %v3409_v36  ;;  %v3462_v30 = vld [vmem:[%s3799_s21 + $0x80] sm:$0xff]  ;;  %v3471_v31 = vld [vmem:[%s3799_s21 + $0xc8] sm:$0xff] }
  0xfc   : > { %1131 = vmatpush.bf16.msra.mxu0 %v3384_v34  ;;  %v3470_v32 = vld [vmem:[%s3799_s21 + $0xc0] sm:$0xff] }
  0xfd   : > { %1192 = vmatpush.bf16.msra.mxu1 %v3392_v35 }
  0xfe   : > { %1253 = vmatpush.bf16.msra.mxu2 %v3400_v37 }
  0xff   : > { %1314 = vmatpush.bf16.msra.mxu3 %v3408_v40 }
 0x100   : > { %1132 = vmatpush.bf16.msra.mxu0 %v3383_v38 }
 0x101   : > { %1193 = vmatpush.bf16.msra.mxu1 %v3391_v39 }
 0x102   : > { %1254 = vmatpush.bf16.msra.mxu2 %v3399_v41  ;;  %v3548_v41 = vld [vmem:[%s4201_s28] ss:$0 sm:$0xff] }
 0x103   : > { %1315 = vmatpush.bf16.msra.mxu3 %v3407_v44 }
 0x104   : > { %1133 = vmatpush.bf16.msra.mxu0 %v3382_v42  ;;  %v3549_v42 = vld [vmem:[%s4201_s28 + $0x1] ss:$0 sm:$0xff] }
 0x105   : > { %1194 = vmatpush.bf16.msra.mxu1 %v3390_v43 }
 0x106   : > { %1255 = vmatpush.bf16.msra.mxu2 %v3398_v48  ;;  %v3544_v48 = vld [vmem:[%s4202_s30] ss:$0 sm:$0xff] }
 0x107   : > { %1134 = vmatmul.bf16.vlgmr.msra.gmra.mxu0 %v3925_v50  ;;  %1316 = vmatpush.bf16.msra.mxu3 %v3406_v51 }
 0x108   : > { %1450 = vmatpush.bf16.msrb.mxu0 %v3421_v46  ;;  %1195 = vmatmul.bf16.vlgmr.msra.gmra.mxu1 %v3925_v50 }
 0x109   : > { %1511 = vmatpush.bf16.msrb.mxu1 %v3429_v47  ;;  %1256 = vmatmul.bf16.vlgmr.msra.gmra.mxu2 %v3925_v50 }
 0x10a   : > { %1572 = vmatpush.bf16.msrb.mxu2 %v3437_v49  ;;  %1317 = vmatmul.bf16.vlgmr.msra.gmra.mxu3 %v3925_v50  ;;  %v3545_v49 = vld [vmem:[%s4202_s30 + $0x1] ss:$0 sm:$0xff] }
 0x10b   : > { %1633 = vmatpush.bf16.msrb.mxu3 %v3445_v54 }
 0x10c   : > { %1451 = vmatpush.bf16.msrb.mxu0 %v3420_v52 }
 0x10d   : > { %1512 = vmatpush.bf16.msrb.mxu1 %v3428_v53 }
 0x10e   : > { %1573 = vmatpush.bf16.msrb.mxu2 %v3436_v55  ;;  %v3550_v55 = vld [vmem:[%s4201_s28 + $0x2] ss:$0 sm:$0xff] }
 0x10f   : > { %1634 = vmatpush.bf16.msrb.mxu3 %v3444_v58 }
 0x110   : > { %1452 = vmatpush.bf16.msrb.mxu0 %v3419_v56 }
 0x111   : > { %1513 = vmatpush.bf16.msrb.mxu1 %v3427_v57 }
 0x112   : > { %1574 = vmatpush.bf16.msrb.mxu2 %v3435_v59 }
 0x113   : > { %1635 = vmatpush.bf16.msrb.mxu3 %v3443_v62 }
 0x114   : > { %1453 = vmatpush.bf16.msrb.mxu0 %v3418_v60  ;;  %v3551_v60 = vld [vmem:[%s4201_s28 + $0x3] ss:$0 sm:$0xff]  ;;  %s4209_s28 = scalar_lea.vmem %s4145_s14, %s3767_s26 }
 0x115   : > { %1514 = vmatpush.bf16.msrb.mxu1 %v3426_v61 }
 0x116   : > { %1575 = vmatpush.bf16.msrb.mxu2 %v3434_v63 }
 0x117   : > { %1636 = vmatpush.bf16.msrb.mxu3 %v3442_v2 }
 0x118   : > { %1454 = vmatpush.bf16.msrb.mxu0 %v3417_v0 }
 0x119   : > { %1515 = vmatpush.bf16.msrb.mxu1 %v3425_v1 }
 0x11a   : > { %1576 = vmatpush.bf16.msrb.mxu2 %v3433_v3 }
 0x11b   : > { %1637 = vmatpush.bf16.msrb.mxu3 %v3441_v6 }
 0x11c   : > { %1455 = vmatpush.bf16.msrb.mxu0 %v3416_v4 }
 0x11d   : > { %1516 = vmatpush.bf16.msrb.mxu1 %v3424_v5 }
 0x11e   : > { %1577 = vmatpush.bf16.msrb.mxu2 %v3432_v7 }
 0x11f   : > { %1638 = vmatpush.bf16.msrb.mxu3 %v3440_v10 }
 0x120   : > { %1456 = vmatpush.bf16.msrb.mxu0 %v3415_v8  ;;  %v3546_v8 = vld [vmem:[%s4202_s30 + $0x2] ss:$0 sm:$0xff] }
 0x121   : > { %1517 = vmatpush.bf16.msrb.mxu1 %v3423_v9  ;;  %v3547_v9 = vld [vmem:[%s4202_s30 + $0x3] ss:$0 sm:$0xff] }
 0x122   : > { %1578 = vmatpush.bf16.msrb.mxu2 %v3431_v11 }
 0x123   : > { %1639 = vmatpush.bf16.msrb.mxu3 %v3439_v14 }
 0x124   : > { %1457 = vmatpush.bf16.msrb.mxu0 %v3414_v12 }
 0x125   : > { %1518 = vmatpush.bf16.msrb.mxu1 %v3422_v13 }
 0x126   : > { %1579 = vmatpush.bf16.msrb.mxu2 %v3430_v15  ;;  %v3552_v15 = vld [vmem:[%s3804_s2 + $0x2] ss:$0 sm:$0xff] }
 0x127   : > { %1458 = vmatmul.bf16.vlgmr.msrb.gmra.mxu0 %v3925_v50  ;;  %1640 = vmatpush.bf16.msrb.mxu3 %v3438_v17 }
 0x128   : > { %1519 = vmatmul.bf16.vlgmr.msrb.gmra.mxu1 %v3925_v50 }
 0x129   : > { %1580 = vmatmul.bf16.vlgmr.msrb.gmra.mxu2 %v3925_v50 }
 0x12a   : > { %1896 = vmatpush.bf16.msra.mxu2 %v3469_v16  ;;  %1641 = vmatmul.bf16.vlgmr.msrb.gmra.mxu3 %v3925_v50 }
 0x12b   : > { %1957 = vmatpush.bf16.msra.mxu3 %v3477_v18 }
 0x12e   : > { %1897 = vmatpush.bf16.msra.mxu2 %v3468_v19  ;;  %v3553_v19 = vld [vmem:[%s3804_s2 + $0x3] ss:$0 sm:$0xff] }
 0x12f   : > { %1958 = vmatpush.bf16.msra.mxu3 %v3476_v20 }
 0x132   : > { %1898 = vmatpush.bf16.msra.mxu2 %v3467_v21 }
 0x133   : > { %1959 = vmatpush.bf16.msra.mxu3 %v3475_v22 }
 0x136   : > { %1899 = vmatpush.bf16.msra.mxu2 %v3466_v23 }
 0x137   : > { %1960 = vmatpush.bf16.msra.mxu3 %v3474_v25 }
 0x13a   : > { %1900 = vmatpush.bf16.msra.mxu2 %v3465_v24 }
 0x13b   : > { %1961 = vmatpush.bf16.msra.mxu3 %v3473_v26 }
 0x13e   : > { %1901 = vmatpush.bf16.msra.mxu2 %v3464_v27  ;;  %v3453_v27 = vld [vmem:[%s3799_s21 + $0x38] sm:$0xff] }
 0x13f   : > { %1962 = vmatpush.bf16.msra.mxu3 %v3472_v29  ;;  %1774 = vmatpush.bf16.msra.mxu0 %v3453_v27  ;;  %v3452_v29 = vld [vmem:[%s3799_s21 + $0x30] sm:$0xff] }
 0x142   : > { %1902 = vmatpush.bf16.msra.mxu2 %v3463_v28  ;;  %v3461_v28 = vld [vmem:[%s3799_s21 + $0x78] sm:$0xff] }
 0x143   : > { %1963 = vmatpush.bf16.msra.mxu3 %v3471_v31  ;;  %1835 = vmatpush.bf16.msra.mxu1 %v3461_v28 }
 0x144   : > { %1775 = vmatpush.bf16.msra.mxu0 %v3452_v29 }
 0x146   : > { %1903 = vmatpush.bf16.msra.mxu2 %v3462_v30  ;;  %v3460_v30 = vld [vmem:[%s3799_s21 + $0x70] sm:$0xff] }
 0x147   : > { %1964 = vmatpush.bf16.msra.mxu3 %v3470_v32  ;;  %1836 = vmatpush.bf16.msra.mxu1 %v3460_v30 }
 0x149   : > { %1904 = vmatmul.bf16.vlgmr.msra.gmra.mxu2 %v3925_v50 }
 0x14a   : > { %1965 = vmatmul.bf16.vlgmr.msra.gmra.mxu3 %v3925_v50 }
 0x184   : > { %v1135_v33 = vpop.f32.mrf.mxu0 }
 0x185   : > { %v1196_v34 = vpop.f32.mrf.mxu1  ;;  %v1136_v56 = vadd.f32 %v3544_v48, %v1135_v33 }
 0x186   : > { %v1197_v57 = vadd.f32 %v3545_v49, %v1196_v34  ;;  %v3451_v34 = vld [vmem:[%s3799_s21 + $0x28] sm:$0xff] }
 0x187   : > { %v1970_v63 = vpack.c.bf16 %v1136_v56, %v1136_v56  ;;  %1776 = vmatpush.bf16.msra.mxu0 %v3451_v34 }
 0x188   : > { %v1971_v0 = vpack.c.bf16 %v1197_v57, %v1197_v57  ;;  %v3446_v57 = vld [vmem:[%s3799_s21] sm:$0xff] }
 0x18c   : > { %v1137_v35 = vpop.f32.mrf.mxu0  ;;  %v1257_v37 = vpop.f32.mrf.mxu2 }
 0x18d   : > { %v1198_v36 = vpop.f32.mrf.mxu1  ;;  %v1318_v38 = vpop.f32.mrf.mxu3  ;;  %v1258_v11 = vadd.f32 %v3546_v8, %v1257_v37  ;;  %v3450_v37 = vld [vmem:[%s3799_s21 + $0x20] sm:$0xff] }
 0x18e   : > { %v1319_v12 = vadd.f32 %v3547_v9, %v1318_v38  ;;  %v3459_v36 = vld [vmem:[%s3799_s21 + $0x68] sm:$0xff]  ;;  %1777 = vmatpush.bf16.msra.mxu0 %v3450_v37 }
 0x18f   : > { %v1972_v13 = vpack.c.bf16 %v1258_v11, %v1258_v11  ;;  %1837 = vmatpush.bf16.msra.mxu1 %v3459_v36 }
 0x190   : > { %v1973_v14 = vpack.c.bf16 %v1319_v12, %v1319_v12 }
 0x194   : > { %v1259_v39 = vpop.f32.mrf.mxu2 }
 0x195   : > { %v1320_v40 = vpop.f32.mrf.mxu3  ;;  %v3458_v39 = vld [vmem:[%s3799_s21 + $0x60] sm:$0xff] }
 0x196   : > { %1838 = vmatpush.bf16.msra.mxu1 %v3458_v39 }
 0x1a4   : > { %v1459_v43 = vpop.f32.mrf.mxu0 }
 0x1a5   : > { %v1520_v44 = vpop.f32.mrf.mxu1  ;;  %v1460_v46 = vadd.f32 %v3548_v41, %v1459_v43 }
 0x1a6   : > { %v1521_v47 = vadd.f32 %v3549_v42, %v1520_v44  ;;  %v3449_v42 = vld [vmem:[%s3799_s21 + $0x18] sm:$0xff] }
 0x1a7   : > { %v1974_v51 = vpack.c.bf16 %v1460_v46, %v1460_v46  ;;  %v3457_v44 = vld [vmem:[%s3799_s21 + $0x58] sm:$0xff]  ;;  %1778 = vmatpush.bf16.msra.mxu0 %v3449_v42  ;;  %v3448_v46 = vld [vmem:[%s3799_s21 + $0x10] sm:$0xff] }
 0x1a8   : > { %v1975_v52 = vpack.c.bf16 %v1521_v47, %v1521_v47  ;;  %1839 = vmatpush.bf16.msra.mxu1 %v3457_v44 }
 0x1a9   : > { %v1983_v53 = vsel %vm1978_vm0, %v1974_v51, 0  ;;  %v3447_v51 = vld [vmem:[%s3799_s21 + $0x8] sm:$0xff] }
 0x1aa   : > { %v2002_v54 = vsel %vm1978_vm0, %v1975_v52, 0  ;;  %1992 = vmatpush.bf16.xpose.msrb.mxu2 %v1983_v53 }
 0x1ab   : > { %2011 = vmatpush.bf16.xpose.msrb.mxu3 %v2002_v54  ;;  %1779 = vmatpush.bf16.msra.mxu0 %v3448_v46 }
 0x1ac   : > { %v1461_v58 = vpop.f32.mrf.mxu0  ;;  %v1581_v61 = vpop.f32.mrf.mxu2 }
 0x1ad   : > { %v1522_v59 = vpop.f32.mrf.mxu1  ;;  %v1582_v62 = vadd.f32 %v3550_v55, %v1581_v61  ;;  %v1642_v1 = vpop.f32.mrf.mxu3  ;;  %v3456_v58 = vld [vmem:[%s3799_s21 + $0x50] sm:$0xff] }
 0x1ae   : > { %v1643_v3 = vadd.f32 %v3551_v60, %v1642_v1  ;;  %1840 = vmatpush.bf16.msra.mxu1 %v3456_v58  ;;  %v3455_v59 = vld [vmem:[%s3799_s21 + $0x48] sm:$0xff]  ;;  %v3454_v60 = vld [vmem:[%s3799_s21 + $0x40] sm:$0xff]  ;;  %s4203_s21 = sld [smem:[#allocation13_spill]] }
 0x1af   : > { %v1976_v2 = vpack.c.bf16 %v1582_v62, %v1582_v62  ;;  %1780 = vmatpush.bf16.msra.mxu0 %v3447_v51 }
 0x1b0   : > { %v1977_v5 = vpack.c.bf16 %v1643_v3, %v1643_v3 }
 0x1b1   : > { %3258 = vmatmul.msk.bf16.vlgmr.msrb.gmra.mxu2 %vm1978_vm0, %v1970_v63  ;;  %v2021_v4 = vsel %vm1978_vm0, %v1976_v2, 0 }
 0x1b2   : > { %3259 = vmatmul.msk.bf16.vlgmr.msrb.gmra.mxu3 %vm1978_vm0, %v1971_v0  ;;  %2030 = vmatpush.bf16.xpose.msra.mxu2 %v2021_v4  ;;  %v2040_v6 = vsel %vm1978_vm0, %v1977_v5, 0 }
 0x1b3   : > { %2049 = vmatpush.bf16.xpose.msra.mxu3 %v2040_v6  ;;  %1781 = vmatpush.bf16.msra.mxu0 %v3446_v57 }
 0x1b4   : > { %v1583_v7 = vpop.f32.mrf.mxu2  ;;  %1841 = vmatpush.bf16.msra.mxu1 %v3455_v59  ;;  %v3479_v29 = vld [vmem:[%s4203_s21 + $0x8] sm:$0xff]  ;;  %v3478_v46 = vld [vmem:[%s4203_s21] sm:$0xff] }
 0x1b5   : > { %v1644_v10 = vpop.f32.mrf.mxu3  ;;  %v3482_v51 = vld [vmem:[%s4203_s21 + $0x20] sm:$0xff] }
 0x1b6   : > { %1782 = vmatmul.bf16.vlgmr.msra.gmra.mxu0 %v3925_v50 }
 0x1b8   : > { %1842 = vmatpush.bf16.msra.mxu1 %v3454_v60 }
 0x1bb   : > { %1843 = vmatmul.bf16.vlgmr.msra.gmra.mxu1 %v3925_v50 }
 0x1c1   : > { %3260 = vmatmul.msk.bf16.vlgmr.msra.gmra.mxu2 %vm1978_vm0, %v1972_v13 }
 0x1c2   : > { %3261 = vmatmul.msk.bf16.vlgmr.msra.gmra.mxu3 %vm1978_vm0, %v1973_v14 }
 0x1cc   : > { %v1905_v16 = vpop.f32.mrf.mxu2 }
 0x1cd   : > { %v1906_v17 = vadd.f32 %v3552_v15, %v1905_v16  ;;  %v1966_v21 = vpop.f32.mrf.mxu3  ;;  %v3554_v16 = vld [vmem:[%s3804_s2] ss:$0 sm:$0xff] }
 0x1ce   : > { %v1967_v22 = vadd.f32 %v3553_v19, %v1966_v21  ;;  %v3555_v21 = vld [vmem:[%s3804_s2 + $0x1] ss:$0 sm:$0xff]  ;;  %s4210_s2 = scalar_lea.vmem %s4146_s15, %s3767_s26 }
 0x1cf   : > { %v2110_v18 = vpack.c.bf16 %v1906_v17, %v1906_v17 }
 0x1d0   : > { %v2111_v24 = vpack.c.bf16 %v1967_v22, %v1967_v22 }
 0x1d1   : > { %v2156_v20 = vsel %vm2116_vm1, %v2110_v18, 0 }
 0x1d2   : > { %2165 = vmatpush.bf16.msrb.mxu2 %v2156_v20  ;;  %v2175_v25 = vsel %vm2116_vm1, %v2111_v24, 0 }
 0x1d3   : > { %2184 = vmatpush.bf16.msrb.mxu3 %v2175_v25 }
 0x1d4   : > { %v1907_v23 = vpop.f32.mrf.mxu2 }
 0x1d5   : > { %v1968_v26 = vpop.f32.mrf.mxu3 }
 0x233   : > { %v1783_v17 = vpop.f32.mrf.mxu0 }
 0x234   : > { %v1994_v31 = vpop.f32.mrf.mxu2  ;;  %v1784_v18 = vadd.f32 %v3554_v16, %v1783_v17 }
 0x235   : > { %v2013_v32 = vpop.f32.mrf.mxu3  ;;  %v2055_v33 = vmul.f32 0.17677669, %v1994_v31 }
 0x236   : > { %v2056_v38 = vmul.f32 0.17677669, %v2013_v32  ;;  %v2108_v19 = vpack.c.bf16 %v1784_v18, %v1784_v18 }
 0x237   : > { %v2060_v35 = vsel %vm2059_vm2, %v2055_v33, -inf }
 0x238   : > { %2061 = vmax.xlane.f32.xlu1 %v2060_v35  ;;  %v2063_v43 = vsel %vm2059_vm2, %v2056_v38, -inf  ;;  %v2118_v20 = vsel %vm2116_vm1, %v2108_v19, 0  ;;  %v1844_v22 = vpop.f32.mrf.mxu1 }
 0x239   : > { %2127 = vmatpush.bf16.msrb.mxu0 %v2118_v20  ;;  %v1845_v24 = vadd.f32 %v3555_v21, %v1844_v22  ;;  %v3627_v20 = vmov 128.0   ;;  %v3493_v21 = vld [vmem:[%s3835_s6 + $0x38] sm:$0xff] }
 0x23b   : > { %v1785_v23 = vpop.f32.mrf.mxu0  ;;  %v2109_v25 = vpack.c.bf16 %v1845_v24, %v1845_v24 }
 0x23c   : > { %v1996_v40 = vpop.f32.mrf.mxu2 }
 0x23d   : > { %v2015_v41 = vpop.f32.mrf.mxu3  ;;  %v2137_v26 = vsel %vm2116_vm1, %v2109_v25, 0  ;;  %2231 = vmatpush.bf16.msra.mxu0 %v3479_v29 }
 0x23e   : > { %2146 = vmatpush.bf16.msrb.mxu1 %v2137_v26 }
 0x240   : > { %2064 = vmax.xlane.f32.xlu1 %v2063_v43  ;;  %v1846_v27 = vpop.f32.mrf.mxu1 }
 0x241   : > { %2232 = vmatpush.bf16.msra.mxu0 %v3478_v46 }
 0x244   : > { %v2032_v47 = vpop.f32.mrf.mxu2 }
 0x245   : > { %v2051_v48 = vpop.f32.mrf.mxu3  ;;  %v2057_v49 = vmul.f32 0.17677669, %v2032_v47  ;;  %v3481_v47 = vld [vmem:[%s4203_s21 + $0x18] sm:$0xff] }
 0x246   : > { %v2058_v53 = vmul.f32 0.17677669, %v2051_v48  ;;  %2259 = vmatpush.bf16.msra.mxu1 %v3481_v47  ;;  %v3480_v48 = vld [vmem:[%s4203_s21 + $0x10] sm:$0xff] }
 0x247   : > { %v2066_v52 = vsel %vm2059_vm2, %v2057_v49, -inf }
 0x248   : > { %2067 = vmax.xlane.f32.xlu0 %v2066_v52  ;;  %v2069_v56 = vsel %vm2059_vm2, %v2058_v53, -inf  ;;  %v3485_v52 = vld [vmem:[%s4203_s21 + $0x38] sm:$0xff] }
 0x249   : > { %2315 = vmatpush.bf16.msra.mxu3 %v3485_v52 }
 0x24a   : > { %2260 = vmatpush.bf16.msra.mxu1 %v3480_v48 }
 0x24c   : > { %v2034_v54 = vpop.f32.mrf.mxu2 }
 0x24d   : > { %v2053_v55 = vpop.f32.mrf.mxu3 }
 0x250   : > { %2070 = vmax.xlane.f32.xlu0 %v2069_v56 }
 0x2ab   : > { %v2062_v61 = vpop.xlane.xlu1 %2061 }
 0x2ac   : > { %v2072_v62 = vsub.f32 %v2055_v33, %v2062_v61 }
 0x2ae   : > { %v2076_v63 = vmul.f32 1.442695, %v2072_v62 }
 0x2b0   : > { %3563 = vpow2.f32 %v2076_v63 }
 0x2b3   : > { %v2065_v0 = vpop.xlane.xlu1 %2064 }
 0x2b4   : > { %v2073_v1 = vsub.f32 %v2056_v38, %v2065_v0 }
 0x2b6   : > { %v3564_v2 = vpop.eup %3563  ;;  %v2078_v3 = vmul.f32 1.442695, %v2073_v1 }
 0x2b7   : > { %v2084_v4 = vsel %vm2059_vm2, %v3564_v2, 0.0 }
 0x2b8   : > { %3565 = vpow2.f32 %v2078_v3  ;;  %2085 = vadd.xlane.f32.xlu0 %v2084_v4 }
 0x2bb   : > { %v2068_v5 = vpop.xlane.xlu0 %2067 }
 0x2bc   : > { %v2074_v6 = vsub.f32 %v2057_v49, %v2068_v5  ;;  %v3483_v49 = vld [vmem:[%s4203_s21 + $0x28] sm:$0xff] }
 0x2bd   : > { %2287 = vmatpush.bf16.msra.mxu2 %v3483_v49 }
 0x2be   : > { %v3566_v7 = vpop.eup %3565  ;;  %v2080_v8 = vmul.f32 1.442695, %v2074_v6 }
 0x2bf   : > { %v2087_v9 = vsel %vm2059_vm2, %v3566_v7, 0.0 }
 0x2c0   : > { %3567 = vpow2.f32 %v2080_v8  ;;  %2088 = vadd.xlane.f32.xlu1 %v2087_v9 }
 0x2c1   : > { %2288 = vmatpush.bf16.msra.mxu2 %v3482_v51  ;;  %v3557_v51 = vld [vmem:[%s4205_s22] ss:$0 sm:$0xff] }
 0x2c3   : > { %v2071_v50 = vpop.xlane.xlu0 %2070 }
 0x2c4   : > { %v2075_v10 = vsub.f32 %v2058_v53, %v2071_v50  ;;  %v3484_v53 = vld [vmem:[%s4203_s21 + $0x30] sm:$0xff] }
 0x2c5   : > { %2316 = vmatpush.bf16.msra.mxu3 %v3484_v53 }
 0x2c6   : > { %v3568_v11 = vpop.eup %3567  ;;  %v2082_v12 = vmul.f32 1.442695, %v2075_v10 }
 0x2c7   : > { %v2090_v13 = vsel %vm2059_vm2, %v3568_v11, 0.0 }
 0x2c8   : > { %3569 = vpow2.f32 %v2082_v12  ;;  %2091 = vadd.xlane.f32.xlu2 %v2090_v13  ;;  %v3556_v13 = vld [vmem:[%s4204_s20] ss:$0 sm:$0xff] }
 0x2ce   : > { %v3570_v14 = vpop.eup %3569 }
 0x2cf   : > { %v2093_v15 = vsel %vm2059_vm2, %v3570_v14, 0.0 }
 0x2d0   : > { %2094 = vadd.xlane.f32.xlu2 %v2093_v15 }
 0x32b   : > { %v2086_v28 = vpop.xlane.xlu0 %2085 }
 0x32c   : > { %3571 = vrcp.f32 %v2086_v28 }
 0x332   : > { %v3572_v30 = vpop.eup %3571 }
 0x333   : > { %v2100_v31 = vmul.f32 %v3572_v30, %v3564_v2  ;;  %v2089_v32 = vpop.xlane.xlu1 %2088 }
 0x334   : > { %3573 = vrcp.f32 %v2089_v32  ;;  %v3492_v32 = vld [vmem:[%s3835_s6 + $0x30] sm:$0xff] }
 0x335   : > { %v2104_v33 = vpack.c.bf16 %v2100_v31, %v2100_v31 }
 0x337   : > { %3262 = vmatmul.msk.bf16.vlgmr.msrb.gmra.mxu0 %vm2112_vm3, %v2104_v33  ;;  %v3491_v33 = vld [vmem:[%s3835_s6 + $0x28] sm:$0xff] }
 0x338   : > { %2444 = vmatpush.bf16.msrb.mxu0 %v3493_v21 }
 0x33a   : > { %v3574_v34 = vpop.eup %3573 }
 0x33b   : > { %v2101_v35 = vmul.f32 %v3574_v34, %v3566_v7  ;;  %v2092_v36 = vpop.xlane.xlu2 %2091  ;;  %v3490_v34 = vld [vmem:[%s3835_s6 + $0x20] sm:$0xff] }
 0x33c   : > { %3575 = vrcp.f32 %v2092_v36  ;;  %2445 = vmatpush.bf16.msrb.mxu0 %v3492_v32  ;;  %v3488_v36 = vld [vmem:[%s3835_s6 + $0x10] sm:$0xff] }
 0x33d   : > { %v2105_v37 = vpack.c.bf16 %v2101_v35, %v2101_v35  ;;  %v3489_v35 = vld [vmem:[%s3835_s6 + $0x18] sm:$0xff] }
 0x33f   : > { %3263 = vmatmul.msk.bf16.vlgmr.msrb.gmra.mxu1 %vm2112_vm3, %v2105_v37  ;;  %v3487_v37 = vld [vmem:[%s3835_s6 + $0x8] sm:$0xff] }
 0x340   : > { %2446 = vmatpush.bf16.msrb.mxu0 %v3491_v33 }
 0x342   : > { %v3576_v38 = vpop.eup %3575 }
 0x343   : > { %v2102_v39 = vmul.f32 %v3576_v38, %v3568_v11  ;;  %v2095_v40 = vpop.xlane.xlu2 %2094  ;;  %v3486_v38 = vld [vmem:[%s3835_s6] sm:$0xff] }
 0x344   : > { %3577 = vrcp.f32 %v2095_v40  ;;  %2447 = vmatpush.bf16.msrb.mxu0 %v3490_v34  ;;  %v3561_v34 = vld [vmem:[%s4209_s28] ss:$0 sm:$0xff] }
 0x345   : > { %v2106_v41 = vpack.c.bf16 %v2102_v39, %v2102_v39  ;;  %3579 = vrcp.f32 %v3627_v20  ;;  %v3501_v39 = vld [vmem:[%s3844_s25 + $0x38] sm:$0xff] }
 0x346   : > { %2535 = vmatpush.bf16.msrb.mxu1 %v3501_v39 }
 0x347   : > { %3264 = vmatmul.msk.bf16.vlgmr.msrb.gmra.mxu2 %vm2112_vm3, %v2106_v41 }
 0x348   : > { %2448 = vmatpush.bf16.msrb.mxu0 %v3489_v35 }
 0x34a   : > { %v3578_v42 = vpop.eup %3577 }
 0x34b   : > { %v2103_v43 = vmul.f32 %v3578_v42, %v3570_v14  ;;  %v3580_v22 = vpop.eup %3579 }
 0x34c   : > { %v2342_v23 = vmul.f32 128.0, %v3580_v22  ;;  %vm2346_vm5 = vweird.f32 %v3580_v22  ;;  %2449 = vmatpush.bf16.msrb.mxu0 %v3488_v36 }
 0x34d   : > { %v2107_v44 = vpack.c.bf16 %v2103_v43, %v2103_v43 }
 0x34e   : > { %v2343_v24 = vsub.f32 1.0, %v2342_v23 }
 0x34f   : > { %3265 = vmatmul.msk.bf16.vlgmr.msrb.gmra.mxu3 %vm2112_vm3, %v2107_v44 }
 0x350   : > { %v2344_v25 = vmul.f32 %v3580_v22, %v2343_v24  ;;  %2450 = vmatpush.bf16.msrb.mxu0 %v3487_v37 }
 0x352   : > { %v2345_v26 = vadd.f32 %v3580_v22, %v2344_v25 }
 0x354   : > { %2451 = vmatpush.bf16.msrb.mxu0 %v3486_v38 }
 0x3b4   : > { %v2129_v54 = vpop.f32.mrf.mxu0 }
 0x3b5   : > { %v2190_v55 = vpack.c.bf16 %v2129_v54, %v2129_v54  ;;  %v3558_v54 = vld [vmem:[%s4206_s0] ss:$0 sm:$0xff] }
 0x3b7   : > { %3274 = vmatmul.msk.bf16.vlgmr.msra.gmra.mxu0 %vm1978_vm0, %v2190_v55 }
 0x3bc   : > { %v2131_v56 = vpop.f32.mrf.mxu0  ;;  %v2148_v57 = vpop.f32.mrf.mxu1 }
 0x3bd   : > { %v2191_v58 = vpack.c.bf16 %v2148_v57, %v2148_v57 }
 0x3bf   : > { %3283 = vmatmul.msk.bf16.vlgmr.msra.gmra.mxu1 %vm1978_vm0, %v2191_v58  ;;  %v3500_v58 = vld [vmem:[%s3844_s25 + $0x30] sm:$0xff] }
 0x3c0   : > { %2536 = vmatpush.bf16.msrb.mxu1 %v3500_v58 }
 0x3c4   : > { %v2150_v59 = vpop.f32.mrf.mxu1 }
 0x3c5   : > { %v3499_v59 = vld [vmem:[%s3844_s25 + $0x28] sm:$0xff] }
 0x3c6   : > { %2537 = vmatpush.bf16.msrb.mxu1 %v3499_v59 }
 0x3ca   : > { %v2167_v60 = vpop.f32.mrf.mxu2 }
 0x3cb   : > { %v2192_v61 = vpack.c.bf16 %v2167_v60, %v2167_v60  ;;  %v3498_v60 = vld [vmem:[%s3844_s25 + $0x20] sm:$0xff] }
 0x3cc   : > { %2538 = vmatpush.bf16.msrb.mxu1 %v3498_v60 }
 0x3cd   : > { %3292 = vmatmul.msk.bf16.vlgmr.msra.gmra.mxu2 %vm1978_vm0, %v2192_v61  ;;  %v3497_v61 = vld [vmem:[%s3844_s25 + $0x18] sm:$0xff] }
 0x3d0   : > { %2539 = vmatpush.bf16.msrb.mxu1 %v3497_v61 }
 0x3d2   : > { %v2169_v62 = vpop.f32.mrf.mxu2  ;;  %v2186_v63 = vpop.f32.mrf.mxu3 }
 0x3d3   : > { %v2193_v0 = vpack.c.bf16 %v2186_v63, %v2186_v63  ;;  %v3496_v62 = vld [vmem:[%s3844_s25 + $0x10] sm:$0xff]  ;;  %v3495_v63 = vld [vmem:[%s3844_s25 + $0x8] sm:$0xff] }
 0x3d4   : > { %2540 = vmatpush.bf16.msrb.mxu1 %v3496_v62 }
 0x3d5   : > { %3301 = vmatmul.msk.bf16.vlgmr.msra.gmra.mxu3 %vm1978_vm0, %v2193_v0  ;;  %v3494_v0 = vld [vmem:[%s3844_s25] sm:$0xff] }
 0x3d8   : > { %2541 = vmatpush.bf16.msrb.mxu1 %v3495_v63 }
 0x3da   : > { %v2188_v1 = vpop.f32.mrf.mxu3 }
 0x3db   : > { %v3559_v1 = vld [vmem:[%s4207_s27] ss:$0 sm:$0xff] }
 0x3dc   : > { %2542 = vmatpush.bf16.msrb.mxu1 %v3494_v0 }
 0x434   : > { %v2234_v2 = vpop.f32.mrf.mxu0 }
 0x435   : > { %v2323_v8 = vsel %vm2322_vm4, %v2234_v2, 0.0 }
 0x43c   : > { %v2236_v3 = vpop.f32.mrf.mxu0  ;;  %v2262_v4 = vpop.f32.mrf.mxu1 }
 0x43d   : > { %v2324_v7 = vsel %vm2322_vm4, %v2262_v4, 0.0 }
 0x43e   : > { %v2325_v50 = vadd.f32 %v2324_v7, %v2323_v8 }
 0x444   : > { %v2264_v5 = vpop.f32.mrf.mxu1 }
 0x450   : > { %v2290_v6 = vpop.f32.mrf.mxu2 }
 0x451   : > { %v2326_v9 = vsel %vm2322_vm4, %v2290_v6, 0.0 }
 0x452   : > { %v2327_v10 = vadd.f32 %v2326_v9, %v2325_v50 }
 0x458   : > { %v2292_v11 = vpop.f32.mrf.mxu2  ;;  %v2318_v12 = vpop.f32.mrf.mxu3 }
 0x459   : > { %v2328_v14 = vsel %vm2322_vm4, %v2318_v12, 0.0 }
 0x45a   : > { %v2329_v15 = vadd.f32 %v2328_v14, %v2327_v10  ;;  %v3560_v14 = vld [vmem:[%s901_s24] ss:$0 sm:$0xff] }
 0x45c   : > { %v2334_v16 = vadd.f32 %v3556_v13, %v2329_v15 }
 0x45e   : > { %v2335_v17 = vadd.f32 %v2334_v16, %v3917_v45  ;;  %v4061_v45 = vsel %vm2346_vm5, %v3580_v22, %v2345_v26 }
 0x460   : > { %v2320_v18 = vpop.f32.mrf.mxu3  ;;  %v2338_v19 = vsel %vm2322_vm4, %v2335_v17, 0.0 }
 0x461   : > { %2339 = vadd.xlane.f32.xlu2 %v2338_v19 }
 0x4d4   : > { %v2340_v27 = vpop.xlane.xlu2 %2339 }
 0x4d5   : > { %v2348_v28 = vmul.f32 %v4061_v45, %v2340_v27 }
 0x4d7   : > { %v2349_v29 = vsub.f32 %v2335_v17, %v2348_v28 }
 0x4d9   : > { %v2350_v30 = vmul.f32 %v2349_v29, %v2349_v29 }
 0x4db   : > { %v2351_v31 = vsel %vm2322_vm4, %v2350_v30, 0.0 }
 0x4dc   : > { %2352 = vadd.xlane.f32.xlu0 %v2351_v31 }
 0x54f   : > { %v2353_v40 = vpop.xlane.xlu0 %2352 }
 0x550   : > { %v2354_v41 = vmul.f32 %v2353_v40, %v4061_v45 }
 0x552   : > { %v2355_v42 = vadd.f32 1e-05, %v2354_v41 }
 0x554   : > { %3581 = vrsqrt.f32 %v2355_v42  ;;  %vm2362_vm7 = vweird.f32 %v2355_v42 }
 0x55a   : > { %v3582_v43 = vpop.eup %3581 }
 0x55b   : > { %v2357_v44 = vmul.f32 %v3582_v43, %v2355_v42  ;;  %vm2363_vm6 = vweird.f32 %v3582_v43 }
 0x55c   : > { %vm2364_vm8 = vmor %vm2362_vm7, %vm2363_vm6 }
 0x55d   : > { %v2358_v46 = vmul.f32 %v3582_v43, %v2357_v44 }
 0x55f   : > { %v2359_v47 = vmul.f32 0.5, %v2358_v46 }
 0x561   : > { %v2360_v48 = vsub.f32 1.5, %v2359_v47 }
 0x563   : > { %v2361_v49 = vmul.f32 %v3582_v43, %v2360_v48 }
 0x565   : > { %v2365_v52 = vsel %vm2364_vm8, %v3582_v43, %v2361_v49 }
 0x566   : > { %v2366_v53 = vmul.f32 %v2365_v52, %v2349_v29 }
 0x568   : > { %v2370_v55 = vmul.f32 %v3557_v51, %v2366_v53 }
 0x56a   : > { %v2374_v56 = vadd.f32 %v3558_v54, %v2370_v55 }
 0x56c   : > { %v2375_v57 = vpack.c.bf16 %v2374_v56, %v2374_v56 }
 0x56e   : > { %2452 = vmatmul.bf16.vlgmr.msrb.gmra.mxu0 %v2375_v57 }
 0x5eb   : > { %v2453_v2 = vpop.f32.mrf.mxu0 }
 0x5ec   : > { %v2454_v3 = vadd.f32 %v3559_v1, %v2453_v2 }
 0x5ee   : > { %v2457_v4 = vmul.f32 %v2454_v3, %v2454_v3 }
 0x5f0   : > { %v2458_v5 = vmul.f32 %v2457_v4, %v2454_v3 }
 0x5f2   : > { %v2459_v6 = vmul.f32 0.044715, %v2458_v5 }
 0x5f3   : > { %v2455_v7 = vpop.f32.mrf.mxu0 }
 0x5f4   : > { %v2460_v8 = vadd.f32 %v2459_v6, %v2454_v3 }
 0x5f6   : > { %v2461_v9 = vmul.f32 0.7978846, %v2460_v8 }
 0x5f8   : > { %3583 = vtanh.f32 %v2461_v9 }
 0x5fe   : > { %v3584_v50 = vpop.eup %3583 }
 0x5ff   : > { %v2463_v10 = vadd.f32 1.0, %v3584_v50 }
 0x601   : > { %v2464_v11 = vmul.f32 0.5, %v2463_v10 }
 0x603   : > { %v2465_v12 = vmul.f32 %v2464_v11, %v2454_v3 }
 0x605   : > { %v2466_v13 = vpack.c.bf16 %v2465_v12, %v2465_v12 }
 0x607   : > { %2543 = vmatmul.bf16.vlgmr.msrb.gmra.mxu1 %v2466_v13 }
 0x684   : > { %v2544_v15 = vpop.f32.mrf.mxu1 }
 0x685   : > { %v2545_v16 = vadd.f32 %v3560_v14, %v2544_v15 }
 0x687   : > { %v2548_v17 = vadd.f32 %v2545_v16, %v2374_v56 }
 0x689   : > { %v2551_v18 = vsel %vm2322_vm4, %v2548_v17, 0.0 }
 0x68a   : > { %2552 = vadd.xlane.f32.xlu1 %v2551_v18 }
 0x68c   : > { %v2546_v19 = vpop.f32.mrf.mxu1 }
 0x6fd   : > { %v2553_v20 = vpop.xlane.xlu1 %2552 }
 0x6fe   : > { %v2554_v21 = vmul.f32 %v2553_v20, %v4061_v45 }
 0x700   : > { %v2555_v22 = vsub.f32 %v2548_v17, %v2554_v21 }
 0x702   : > { %v2556_v23 = vmul.f32 %v2555_v22, %v2555_v22 }
 0x704   : > { %v2557_v24 = vsel %vm2322_vm4, %v2556_v23, 0.0 }
 0x705   : > { %2558 = vadd.xlane.f32.xlu2 %v2557_v24 }
 0x778   : > { %v2559_v25 = vpop.xlane.xlu2 %2558 }
 0x779   : > { %v2560_v26 = vmul.f32 %v2559_v25, %v4061_v45  ;;  %v3562_v45 = vld [vmem:[%s4210_s2] ss:$0 sm:$0xff] }
 0x77b   : > { %v2561_v27 = vadd.f32 1e-05, %v2560_v26 }
 0x77d   : > { %3585 = vrsqrt.f32 %v2561_v27  ;;  %vm2568_vm10 = vweird.f32 %v2561_v27 }
 0x783   : > { %v3586_v28 = vpop.eup %3585 }
 0x784   : > { %v2563_v29 = vmul.f32 %v3586_v28, %v2561_v27  ;;  %vm2569_vm9 = vweird.f32 %v3586_v28 }
 0x785   : > { %vm2570_vm11 = vmor %vm2568_vm10, %vm2569_vm9 }
 0x786   : > { %v2564_v30 = vmul.f32 %v3586_v28, %v2563_v29 }
 0x788   : > { %v2565_v31 = vmul.f32 0.5, %v2564_v30 }
 0x78a   : > { %v2566_v32 = vsub.f32 1.5, %v2565_v31 }
 0x78c   : > { %v2567_v33 = vmul.f32 %v3586_v28, %v2566_v32 }
 0x78e   : > { %v2571_v35 = vsel %vm2570_vm11, %v3586_v28, %v2567_v33 }
 0x78f   : > { %v2572_v36 = vmul.f32 %v2571_v35, %v2555_v22 }
 0x791   : > { %v2576_v37 = vmul.f32 %v3561_v34, %v2572_v36 }
 0x793   : > { %v2580_v38 = vadd.f32 %v3562_v45, %v2576_v37 }
 0x795   : > { %2581 = vst [vmem:[#allocation2] sm:$0xf] %v2580_v38  ;;  %v2582_v39 = vpack.c.bf16 %v2580_v38, %v2580_v38 }
 0x797   : > { %2583 = vst [vmem:[%s3853_s29] sm:$0x3] %v2582_v39 }
 0x798 PF: > { %s4211_s9 = sld [smem:[#allocation6_spill]] }
 0x799   : > { %s4212_s1 = sld [smem:[#allocation4_spill]] }
 0x79a   : > { %s4213_s22 = sld [smem:[#allocation5_spill]] }
 0x79b   : > { %s4214_s23 = sld [smem:[#allocation7_spill]] }
 0x79c   : > { %s4215_s24 = sld [smem:[#allocation8_spill]] }
 0x79e   : > { %s30_s2 = sadd.s32 1, %s4211_s9  }
 0x79f   : > { %p27_p8 = scmp.ge.s32.totalorder %s30_s2, 6  }
 0x7a1   :  { %29 = sbr.rel (!%p27_p8) target bundleno = 14 (0xe), region = 182 }

// kernel: encoder_forward.17
= control target key start
LH: loop header
LB: loop body
LE: loop exit
PB: predicated region body
PF: predicated region fallthrough
CT: control target
= control target key end

     0   :  { %s5621_s1 = inlined_call_operand.vmem [shape: bf16[1152,512], index: 1, kind: input, shape index: {}]   ;;  %s5622_s0 = inlined_call_operand.vmem [shape: bf16[8,1152], index: 0, kind: input, shape index: {}]   ;;  %s5623_s2 = inlined_call_operand.vmem [shape: f32[1,512], index: 2, kind: input, shape index: {}]   ;;  %s5624_s3 = inlined_call_operand.vmem [shape: f32[1,512], index: 3, kind: input, shape index: {}]   ;;  %s5625_s4 = inlined_call_operand.vmem [shape: f32[8,512], index: 4, kind: output, shape index: {}]  }
   0x1   :  { %v2404_v0 = vld [vmem:[%s5621_s1 + $0xe0] sm:$0xf]  ;;  %v3472_v1 = vld [vmem:[%s5621_s1 + $0xec] sm:$0xf0] }
   0x2   :  { %v2532_v2 = vld [vmem:[%s5621_s1 + $0x1e0] sm:$0xf]  ;;  %v2405_v3 = vor.u32 %v3472_v1, %v2404_v0  ;;  %v3504_v4 = vld [vmem:[%s5621_s1 + $0x1ec] sm:$0xf0] }
   0x3   :  { %v2660_v5 = vld [vmem:[%s5621_s1 + $0x2e0] sm:$0xf]  ;;  %v3536_v6 = vld [vmem:[%s5621_s1 + $0x2ec] sm:$0xf0]  ;;  %v2533_v7 = vor.u32 %v3504_v4, %v2532_v2 }
   0x4   :  { %v2661_v8 = vor.u32 %v3536_v6, %v2660_v5  ;;  %v2788_v9 = vld [vmem:[%s5621_s1 + $0x3e0] sm:$0xf]  ;;  %v3568_v10 = vld [vmem:[%s5621_s1 + $0x3ec] sm:$0xf0]  ;;  %1782 = vmatpush.bf16.msra.mxu0 %v2405_v3 }
   0x5   :  { %v2388_v11 = vld [vmem:[%s5621_s1 + $0xc0] sm:$0xf]  ;;  %v2789_v12 = vor.u32 %v3568_v10, %v2788_v9  ;;  %v3468_v13 = vld [vmem:[%s5621_s1 + $0xcc] sm:$0xf0]  ;;  %1795 = vmatpush.bf16.msra.mxu1 %v2533_v7 }
   0x6   :  { %v2516_v14 = vld [vmem:[%s5621_s1 + $0x1c0] sm:$0xf]  ;;  %v3500_v15 = vld [vmem:[%s5621_s1 + $0x1cc] sm:$0xf0]  ;;  %1808 = vmatpush.bf16.msra.mxu2 %v2661_v8  ;;  %v2389_v16 = vor.u32 %v3468_v13, %v2388_v11 }
   0x7   :  { %v2517_v17 = vor.u32 %v3500_v15, %v2516_v14  ;;  %v2644_v18 = vld [vmem:[%s5621_s1 + $0x2c0] sm:$0xf]  ;;  %v3532_v19 = vld [vmem:[%s5621_s1 + $0x2cc] sm:$0xf0]  ;;  %1821 = vmatpush.bf16.msra.mxu3 %v2789_v12 }
   0x8   :  { %v2772_v20 = vld [vmem:[%s5621_s1 + $0x3c0] sm:$0xf]  ;;  %v2645_v21 = vor.u32 %v3532_v19, %v2644_v18  ;;  %v3564_v22 = vld [vmem:[%s5621_s1 + $0x3cc] sm:$0xf0]  ;;  %1783 = vmatpush.bf16.msra.mxu0 %v2389_v16 }
   0x9   :  { %v2372_v23 = vld [vmem:[%s5621_s1 + $0xa0] sm:$0xf]  ;;  %v3464_v24 = vld [vmem:[%s5621_s1 + $0xac] sm:$0xf0]  ;;  %v2773_v25 = vor.u32 %v3564_v22, %v2772_v20  ;;  %1796 = vmatpush.bf16.msra.mxu1 %v2517_v17 }
   0xa   :  { %v2500_v26 = vld [vmem:[%s5621_s1 + $0x1a0] sm:$0xf]  ;;  %v3496_v27 = vld [vmem:[%s5621_s1 + $0x1ac] sm:$0xf0]  ;;  %v2373_v29 = vor.u32 %v3464_v24, %v2372_v23  ;;  %1809 = vmatpush.bf16.msra.mxu2 %v2645_v21 }
   0xb   :  { %v2628_v28 = vld [vmem:[%s5621_s1 + $0x2a0] sm:$0xf]  ;;  %v3528_v30 = vld [vmem:[%s5621_s1 + $0x2ac] sm:$0xf0]  ;;  %v2501_v33 = vor.u32 %v3496_v27, %v2500_v26  ;;  %1822 = vmatpush.bf16.msra.mxu3 %v2773_v25 }
   0xc   :  { %v2756_v31 = vld [vmem:[%s5621_s1 + $0x3a0] sm:$0xf]  ;;  %v3560_v32 = vld [vmem:[%s5621_s1 + $0x3ac] sm:$0xf0]  ;;  %v2629_v34 = vor.u32 %v3528_v30, %v2628_v28  ;;  %1784 = vmatpush.bf16.msra.mxu0 %v2373_v29 }
   0xd   :  { %v2356_v35 = vld [vmem:[%s5621_s1 + $0x80] sm:$0xf]  ;;  %v3460_v36 = vld [vmem:[%s5621_s1 + $0x8c] sm:$0xf0]  ;;  %v2757_v38 = vor.u32 %v3560_v32, %v2756_v31  ;;  %1797 = vmatpush.bf16.msra.mxu1 %v2501_v33 }
   0xe   :  { %v2484_v37 = vld [vmem:[%s5621_s1 + $0x180] sm:$0xf]  ;;  %v3492_v39 = vld [vmem:[%s5621_s1 + $0x18c] sm:$0xf0]  ;;  %v2357_v44 = vor.u32 %v3460_v36, %v2356_v35  ;;  %1810 = vmatpush.bf16.msra.mxu2 %v2629_v34 }
   0xf   :  { %v2612_v40 = vld [vmem:[%s5621_s1 + $0x280] sm:$0xf]  ;;  %v3524_v41 = vld [vmem:[%s5621_s1 + $0x28c] sm:$0xf0]  ;;  %v2485_v45 = vor.u32 %v3492_v39, %v2484_v37  ;;  %1823 = vmatpush.bf16.msra.mxu3 %v2757_v38 }
  0x10   :  { %v2740_v42 = vld [vmem:[%s5621_s1 + $0x380] sm:$0xf]  ;;  %v3556_v43 = vld [vmem:[%s5621_s1 + $0x38c] sm:$0xf0]  ;;  %v2613_v46 = vor.u32 %v3524_v41, %v2612_v40  ;;  %1785 = vmatpush.bf16.msra.mxu0 %v2357_v44 }
  0x11   :  { %v2340_v47 = vld [vmem:[%s5621_s1 + $0x60] sm:$0xf]  ;;  %v3456_v48 = vld [vmem:[%s5621_s1 + $0x6c] sm:$0xf0]  ;;  %v2741_v50 = vor.u32 %v3556_v43, %v2740_v42  ;;  %1798 = vmatpush.bf16.msra.mxu1 %v2485_v45 }
  0x12   :  { %v2468_v49 = vld [vmem:[%s5621_s1 + $0x160] sm:$0xf]  ;;  %v3488_v51 = vld [vmem:[%s5621_s1 + $0x16c] sm:$0xf0]  ;;  %v2341_v56 = vor.u32 %v3456_v48, %v2340_v47  ;;  %1811 = vmatpush.bf16.msra.mxu2 %v2613_v46 }
  0x13   :  { %v2596_v52 = vld [vmem:[%s5621_s1 + $0x260] sm:$0xf]  ;;  %v3520_v53 = vld [vmem:[%s5621_s1 + $0x26c] sm:$0xf0]  ;;  %v2469_v57 = vor.u32 %v3488_v51, %v2468_v49  ;;  %1824 = vmatpush.bf16.msra.mxu3 %v2741_v50 }
  0x14   :  { %v2724_v54 = vld [vmem:[%s5621_s1 + $0x360] sm:$0xf]  ;;  %v3552_v55 = vld [vmem:[%s5621_s1 + $0x36c] sm:$0xf0]  ;;  %v2597_v58 = vor.u32 %v3520_v53, %v2596_v52  ;;  %1786 = vmatpush.bf16.msra.mxu0 %v2341_v56 }
  0x15   :  { %v2324_v59 = vld [vmem:[%s5621_s1 + $0x40] sm:$0xf]  ;;  %v3452_v60 = vld [vmem:[%s5621_s1 + $0x4c] sm:$0xf0]  ;;  %v2725_v62 = vor.u32 %v3552_v55, %v2724_v54  ;;  %1799 = vmatpush.bf16.msra.mxu1 %v2469_v57 }
  0x16   :  { %v2452_v61 = vld [vmem:[%s5621_s1 + $0x140] sm:$0xf]  ;;  %v3484_v63 = vld [vmem:[%s5621_s1 + $0x14c] sm:$0xf0]  ;;  %v2325_v4 = vor.u32 %v3452_v60, %v2324_v59  ;;  %1812 = vmatpush.bf16.msra.mxu2 %v2597_v58  ;;  %v18_v58 = vld [vmem:[%s5622_s0 + $0x8] sm:$0xff] }
  0x17   :  { %v2580_v0 = vld [vmem:[%s5621_s1 + $0x240] sm:$0xf]  ;;  %v3516_v1 = vld [vmem:[%s5621_s1 + $0x24c] sm:$0xf0]  ;;  %v2453_v5 = vor.u32 %v3484_v63, %v2452_v61  ;;  %1825 = vmatpush.bf16.msra.mxu3 %v2725_v62  ;;  %v317_v63 = vunpack.c.l.b16 %v18_v58 }
  0x18   :  { %v2708_v2 = vld [vmem:[%s5621_s1 + $0x340] sm:$0xf]  ;;  %v3548_v3 = vld [vmem:[%s5621_s1 + $0x34c] sm:$0xf0]  ;;  %v2581_v6 = vor.u32 %v3516_v1, %v2580_v0  ;;  %1787 = vmatpush.bf16.msra.mxu0 %v2325_v4  ;;  %v318_v0 = vunpack.c.h.b16 %v18_v58 }
  0x19   :  { %v2308_v7 = vld [vmem:[%s5621_s1 + $0x20] sm:$0xf]  ;;  %v3448_v8 = vld [vmem:[%s5621_s1 + $0x2c] sm:$0xf0]  ;;  %v2709_v10 = vor.u32 %v3548_v3, %v2708_v2  ;;  %1800 = vmatpush.bf16.msra.mxu1 %v2453_v5  ;;  %v4022_v4 = vpack.c.b16 %v317_v63, %v317_v63 }
  0x1a   :  { %v2436_v9 = vld [vmem:[%s5621_s1 + $0x120] sm:$0xf]  ;;  %v3480_v11 = vld [vmem:[%s5621_s1 + $0x12c] sm:$0xf0]  ;;  %v2309_v16 = vor.u32 %v3448_v8, %v2308_v7  ;;  %1813 = vmatpush.bf16.msra.mxu2 %v2581_v6  ;;  %v4027_v6 = vpack.c.b16 %v318_v0, %v318_v0 }
  0x1b   :  { %v2564_v12 = vld [vmem:[%s5621_s1 + $0x220] sm:$0xf]  ;;  %v3512_v13 = vld [vmem:[%s5621_s1 + $0x22c] sm:$0xf0]  ;;  %v2437_v19 = vor.u32 %v3480_v11, %v2436_v9  ;;  %1826 = vmatpush.bf16.msra.mxu3 %v2709_v10 }
  0x1c   :  { %v2692_v14 = vld [vmem:[%s5621_s1 + $0x320] sm:$0xf]  ;;  %v3544_v15 = vld [vmem:[%s5621_s1 + $0x32c] sm:$0xf0]  ;;  %v2565_v20 = vor.u32 %v3512_v13, %v2564_v12  ;;  %1788 = vmatpush.bf16.msra.mxu0 %v2309_v16 }
  0x1d   :  { %v2292_v17 = vld [vmem:[%s5621_s1] sm:$0xf]  ;;  %v3444_v18 = vld [vmem:[%s5621_s1 + $0xc] sm:$0xf0]  ;;  %v2693_v24 = vor.u32 %v3544_v15, %v2692_v14  ;;  %1801 = vmatpush.bf16.msra.mxu1 %v2437_v19 }
  0x1e   :  { %v2420_v21 = vld [vmem:[%s5621_s1 + $0x100] sm:$0xf]  ;;  %v3476_v22 = vld [vmem:[%s5621_s1 + $0x10c] sm:$0xf0]  ;;  %v2293_v31 = vor.u32 %v3444_v18, %v2292_v17  ;;  %1814 = vmatpush.bf16.msra.mxu2 %v2565_v20 }
  0x1f   :  { %v2548_v23 = vld [vmem:[%s5621_s1 + $0x200] sm:$0xf]  ;;  %v3508_v25 = vld [vmem:[%s5621_s1 + $0x20c] sm:$0xf0]  ;;  %v2421_v35 = vor.u32 %v3476_v22, %v2420_v21  ;;  %1827 = vmatpush.bf16.msra.mxu3 %v2693_v24 }
  0x20   :  { %v2676_v26 = vld [vmem:[%s5621_s1 + $0x300] sm:$0xf]  ;;  %v3540_v27 = vld [vmem:[%s5621_s1 + $0x30c] sm:$0xf0]  ;;  %v2549_v36 = vor.u32 %v3508_v25, %v2548_v23  ;;  %1789 = vmatpush.bf16.msra.mxu0 %v2293_v31 }
  0x21   :  { %v2916_v28 = vld [vmem:[%s5621_s1 + $0x4e0] sm:$0xf]  ;;  %v3600_v29 = vld [vmem:[%s5621_s1 + $0x4ec] sm:$0xf0]  ;;  %v2677_v39 = vor.u32 %v3540_v27, %v2676_v26  ;;  %1802 = vmatpush.bf16.msra.mxu1 %v2421_v35 }
  0x22   :  { %v3044_v30 = vld [vmem:[%s5621_s1 + $0x5e0] sm:$0xf]  ;;  %v3632_v32 = vld [vmem:[%s5621_s1 + $0x5ec] sm:$0xf0]  ;;  %v2917_v40 = vor.u32 %v3600_v29, %v2916_v28  ;;  %1815 = vmatpush.bf16.msra.mxu2 %v2549_v36 }
  0x23   :  { %v3172_v33 = vld [vmem:[%s5621_s1 + $0x6e0] sm:$0xf]  ;;  %v3664_v34 = vld [vmem:[%s5621_s1 + $0x6ec] sm:$0xf0]  ;;  %v3045_v41 = vor.u32 %v3632_v32, %v3044_v30  ;;  %1828 = vmatpush.bf16.msra.mxu3 %v2677_v39 }
  0x24   :  { %v3300_v37 = vld [vmem:[%s5621_s1 + $0x7e0] sm:$0xf]  ;;  %v3696_v38 = vld [vmem:[%s5621_s1 + $0x7ec] sm:$0xf0]  ;;  %v3173_v42 = vor.u32 %v3664_v34, %v3172_v33  ;;  %1834 = vmatpush.bf16.msrb.mxu0 %v2917_v40 }
  0x25   :  { %v2900_v43 = vld [vmem:[%s5621_s1 + $0x4c0] sm:$0xf]  ;;  %v3596_v44 = vld [vmem:[%s5621_s1 + $0x4cc] sm:$0xf0]  ;;  %v3301_v46 = vor.u32 %v3696_v38, %v3300_v37  ;;  %1847 = vmatpush.bf16.msrb.mxu1 %v3045_v41  ;;  %1816 = vmatmul.bf16.vlgmr.msra.gmra.mxu2 %v4022_v4 }
  0x26   :  { %v3028_v45 = vld [vmem:[%s5621_s1 + $0x5c0] sm:$0xf]  ;;  %v3628_v47 = vld [vmem:[%s5621_s1 + $0x5cc] sm:$0xf0]  ;;  %v2901_v52 = vor.u32 %v3596_v44, %v2900_v43  ;;  %1860 = vmatpush.bf16.msrb.mxu2 %v3173_v42  ;;  %1829 = vmatmul.bf16.vlgmr.msra.gmra.mxu3 %v4027_v6 }
  0x27   :  { %v3156_v48 = vld [vmem:[%s5621_s1 + $0x6c0] sm:$0xf]  ;;  %v3660_v49 = vld [vmem:[%s5621_s1 + $0x6cc] sm:$0xf0]  ;;  %v3029_v54 = vor.u32 %v3628_v47, %v3028_v45  ;;  %1873 = vmatpush.bf16.msrb.mxu3 %v3301_v46 }
  0x28   :  { %v3284_v50 = vld [vmem:[%s5621_s1 + $0x7c0] sm:$0xf]  ;;  %v3692_v51 = vld [vmem:[%s5621_s1 + $0x7cc] sm:$0xf0]  ;;  %v3157_v55 = vor.u32 %v3660_v49, %v3156_v48  ;;  %1835 = vmatpush.bf16.msrb.mxu0 %v2901_v52 }
  0x29   :  { %v2884_v53 = vld [vmem:[%s5621_s1 + $0x4a0] sm:$0xf]  ;;  %v3592_v56 = vld [vmem:[%s5621_s1 + $0x4ac] sm:$0xf0]  ;;  %v3285_v59 = vor.u32 %v3692_v51, %v3284_v50  ;;  %1848 = vmatpush.bf16.msrb.mxu1 %v3029_v54 }
  0x2a   :  { %v3012_v57 = vld [vmem:[%s5621_s1 + $0x5a0] sm:$0xf]  ;;  %v3624_v60 = vld [vmem:[%s5621_s1 + $0x5ac] sm:$0xf0]  ;;  %v2885_v3 = vor.u32 %v3592_v56, %v2884_v53  ;;  %1861 = vmatpush.bf16.msrb.mxu2 %v3157_v55 }
  0x2b   :  { %v3140_v61 = vld [vmem:[%s5621_s1 + $0x6a0] sm:$0xf]  ;;  %v3656_v62 = vld [vmem:[%s5621_s1 + $0x6ac] sm:$0xf0]  ;;  %v3013_v7 = vor.u32 %v3624_v60, %v3012_v57  ;;  %1874 = vmatpush.bf16.msrb.mxu3 %v3285_v59 }
  0x2c   :  { %v3268_v1 = vld [vmem:[%s5621_s1 + $0x7a0] sm:$0xf]  ;;  %v3688_v2 = vld [vmem:[%s5621_s1 + $0x7ac] sm:$0xf0]  ;;  %v3141_v8 = vor.u32 %v3656_v62, %v3140_v61  ;;  %1836 = vmatpush.bf16.msrb.mxu0 %v2885_v3  ;;  %v20_v3 = vld [vmem:[%s5622_s0 + $0x18] sm:$0xff] }
  0x2d   :  { %v17_v5 = vld [vmem:[%s5622_s0] sm:$0xff]  ;;  %v3588_v10 = vld [vmem:[%s5621_s1 + $0x48c] sm:$0xf0]  ;;  %v3269_v14 = vor.u32 %v3688_v2, %v3268_v1  ;;  %1849 = vmatpush.bf16.msrb.mxu1 %v3013_v7 }
  0x2e   :  { %v2868_v9 = vld [vmem:[%s5621_s1 + $0x480] sm:$0xf]  ;;  %v315_v12 = vunpack.c.l.b16 %v17_v5  ;;  %v316_v13 = vunpack.c.h.b16 %v17_v5  ;;  %v3620_v15 = vld [vmem:[%s5621_s1 + $0x58c] sm:$0xf0]  ;;  %1862 = vmatpush.bf16.msrb.mxu2 %v3141_v8 }
  0x2f   :  { %v2996_v11 = vld [vmem:[%s5621_s1 + $0x580] sm:$0xf]  ;;  %v3652_v17 = vld [vmem:[%s5621_s1 + $0x68c] sm:$0xf0]  ;;  %v2869_v22 = vor.u32 %v3588_v10, %v2868_v9  ;;  %1875 = vmatpush.bf16.msrb.mxu3 %v3269_v14  ;;  %v2406_v14 = vld [vmem:[%s5621_s1 + $0xf0] sm:$0xf0] }
  0x30   :  { %v3124_v16 = vld [vmem:[%s5621_s1 + $0x680] sm:$0xf]  ;;  %v3684_v19 = vld [vmem:[%s5621_s1 + $0x78c] sm:$0xf0]  ;;  %v4054_v20 = vpack.c.b16 %v315_v12, %v315_v12  ;;  %v4057_v21 = vpack.c.b16 %v316_v13, %v316_v13  ;;  %v2997_v23 = vor.u32 %v3620_v15, %v2996_v11  ;;  %v3470_v12 = vld [vmem:[%s5621_s1 + $0xe4] sm:$0xf] }
  0x31   :  { %v3252_v18 = vld [vmem:[%s5621_s1 + $0x780] sm:$0xf]  ;;  %v3125_v24 = vor.u32 %v3652_v17, %v3124_v16  ;;  %v3584_v26 = vld [vmem:[%s5621_s1 + $0x46c] sm:$0xf0]  ;;  %1837 = vmatpush.bf16.msrb.mxu0 %v2869_v22  ;;  %v3502_v15 = vld [vmem:[%s5621_s1 + $0x1e4] sm:$0xf]  ;;  %v321_v17 = vunpack.c.l.b16 %v20_v3 }
  0x32   :  { %v2852_v25 = vld [vmem:[%s5621_s1 + $0x460] sm:$0xf]  ;;  %v3253_v28 = vor.u32 %v3684_v19, %v3252_v18  ;;  %v3616_v29 = vld [vmem:[%s5621_s1 + $0x56c] sm:$0xf0]  ;;  %1790 = vmatmul.bf16.vlgmr.msra.gmra.mxu0 %v4054_v20  ;;  %1803 = vmatmul.bf16.vlgmr.msra.gmra.mxu1 %v4057_v21  ;;  %v2534_v16 = vld [vmem:[%s5621_s1 + $0x1f0] sm:$0xf0] }
  0x33   :  { %v2980_v27 = vld [vmem:[%s5621_s1 + $0x560] sm:$0xf]  ;;  %v3648_v31 = vld [vmem:[%s5621_s1 + $0x66c] sm:$0xf0]  ;;  %v2853_v34 = vor.u32 %v3584_v26, %v2852_v25  ;;  %1850 = vmatpush.bf16.msrb.mxu1 %v2997_v23  ;;  %1863 = vmatpush.bf16.msrb.mxu2 %v3125_v24  ;;  %v3534_v22 = vld [vmem:[%s5621_s1 + $0x2e4] sm:$0xf]  ;;  %v322_v25 = vunpack.c.h.b16 %v20_v3 }
  0x34   :  { %v3108_v30 = vld [vmem:[%s5621_s1 + $0x660] sm:$0xf]  ;;  %v3680_v33 = vld [vmem:[%s5621_s1 + $0x76c] sm:$0xf0]  ;;  %v2981_v35 = vor.u32 %v3616_v29, %v2980_v27  ;;  %1876 = vmatpush.bf16.msrb.mxu3 %v3253_v28  ;;  %v2662_v23 = vld [vmem:[%s5621_s1 + $0x2f0] sm:$0xf0]  ;;  %v2409_v29 = vor.u32 %v3470_v12, %v2406_v14 }
  0x35   :  { %v3236_v32 = vld [vmem:[%s5621_s1 + $0x760] sm:$0xf]  ;;  %v3109_v36 = vor.u32 %v3648_v31, %v3108_v30  ;;  %v3580_v38 = vld [vmem:[%s5621_s1 + $0x44c] sm:$0xf0]  ;;  %1838 = vmatpush.bf16.msrb.mxu0 %v2853_v34  ;;  %v2537_v30 = vor.u32 %v3502_v15, %v2534_v16  ;;  %v2665_v34 = vor.u32 %v3534_v22, %v2662_v23  ;;  %v2614_v3 = vld [vmem:[%s5621_s1 + $0x290] sm:$0xf0] }
  0x36   :  { %v2836_v37 = vld [vmem:[%s5621_s1 + $0x440] sm:$0xf]  ;;  %v3237_v40 = vor.u32 %v3680_v33, %v3236_v32  ;;  %v3612_v41 = vld [vmem:[%s5621_s1 + $0x54c] sm:$0xf0]  ;;  %v3466_v33 = vld [vmem:[%s5621_s1 + $0xc4] sm:$0xf] }
  0x37   :  { %v2964_v39 = vld [vmem:[%s5621_s1 + $0x540] sm:$0xf]  ;;  %v3644_v43 = vld [vmem:[%s5621_s1 + $0x64c] sm:$0xf0]  ;;  %v2837_v46 = vor.u32 %v3580_v38, %v2836_v37  ;;  %1851 = vmatpush.bf16.msrb.mxu1 %v2981_v35  ;;  %1864 = vmatpush.bf16.msrb.mxu2 %v3109_v36  ;;  %v2390_v35 = vld [vmem:[%s5621_s1 + $0xd0] sm:$0xf0]  ;;  %v4205_v38 = vpack.c.b16 %v321_v17, %v321_v17 }
  0x38   :  { %v3092_v42 = vld [vmem:[%s5621_s1 + $0x640] sm:$0xf]  ;;  %v3676_v45 = vld [vmem:[%s5621_s1 + $0x74c] sm:$0xf0]  ;;  %v2965_v47 = vor.u32 %v3612_v41, %v2964_v39  ;;  %1877 = vmatpush.bf16.msrb.mxu3 %v3237_v40  ;;  %v3498_v36 = vld [vmem:[%s5621_s1 + $0x1c4] sm:$0xf] }
  0x39   :  { %v3220_v44 = vld [vmem:[%s5621_s1 + $0x740] sm:$0xf]  ;;  %v3093_v48 = vor.u32 %v3644_v43, %v3092_v42  ;;  %v3576_v50 = vld [vmem:[%s5621_s1 + $0x42c] sm:$0xf0]  ;;  %1839 = vmatpush.bf16.msrb.mxu0 %v2837_v46  ;;  %v2518_v37 = vld [vmem:[%s5621_s1 + $0x1d0] sm:$0xf0]  ;;  %v4215_v42 = vpack.c.b16 %v322_v25, %v322_v25 }
  0x3a   :  { %v2820_v49 = vld [vmem:[%s5621_s1 + $0x420] sm:$0xf]  ;;  %v3221_v52 = vor.u32 %v3676_v45, %v3220_v44  ;;  %v3608_v53 = vld [vmem:[%s5621_s1 + $0x52c] sm:$0xf0]  ;;  %v3530_v39 = vld [vmem:[%s5621_s1 + $0x2c4] sm:$0xf]  ;;  %v2393_v45 = vor.u32 %v3466_v33, %v2390_v35  ;;  %v2521_v46 = vor.u32 %v3498_v36, %v2518_v37 }
  0x3b   :  { %v2948_v51 = vld [vmem:[%s5621_s1 + $0x520] sm:$0xf]  ;;  %v3640_v55 = vld [vmem:[%s5621_s1 + $0x62c] sm:$0xf0]  ;;  %v2821_v59 = vor.u32 %v3576_v50, %v2820_v49  ;;  %1852 = vmatpush.bf16.msrb.mxu1 %v2965_v47  ;;  %1865 = vmatpush.bf16.msrb.mxu2 %v3093_v48  ;;  %v2646_v40 = vld [vmem:[%s5621_s1 + $0x2d0] sm:$0xf0] }
  0x3c   :  { %v3076_v54 = vld [vmem:[%s5621_s1 + $0x620] sm:$0xf]  ;;  %v3672_v57 = vld [vmem:[%s5621_s1 + $0x72c] sm:$0xf0]  ;;  %v2949_v63 = vor.u32 %v3608_v53, %v2948_v51  ;;  %1878 = vmatpush.bf16.msrb.mxu3 %v3221_v52  ;;  %v3462_v49 = vld [vmem:[%s5621_s1 + $0xa4] sm:$0xf]  ;;  %v2649_v50 = vor.u32 %v3530_v39, %v2646_v40 }
  0x3d   :  { %v3204_v56 = vld [vmem:[%s5621_s1 + $0x720] sm:$0xf]  ;;  %v3572_v60 = vld [vmem:[%s5621_s1 + $0x40c] sm:$0xf0]  ;;  %v3077_v0 = vor.u32 %v3640_v55, %v3076_v54  ;;  %1840 = vmatpush.bf16.msrb.mxu0 %v2821_v59  ;;  %v2374_v51 = vld [vmem:[%s5621_s1 + $0xb0] sm:$0xf0] }
  0x3e   :  { %v2804_v58 = vld [vmem:[%s5621_s1 + $0x400] sm:$0xf]  ;;  %v3604_v62 = vld [vmem:[%s5621_s1 + $0x50c] sm:$0xf0]  ;;  %v3205_v5 = vor.u32 %v3672_v57, %v3204_v56  ;;  %v3494_v52 = vld [vmem:[%s5621_s1 + $0x1a4] sm:$0xf]  ;;  %v2377_v57 = vor.u32 %v3462_v49, %v2374_v51 }
  0x3f   :  { %v2932_v61 = vld [vmem:[%s5621_s1 + $0x500] sm:$0xf]  ;;  %v3636_v2 = vld [vmem:[%s5621_s1 + $0x60c] sm:$0xf0]  ;;  %v2805_v13 = vor.u32 %v3572_v60, %v2804_v58  ;;  %1853 = vmatpush.bf16.msrb.mxu1 %v2949_v63  ;;  %1866 = vmatpush.bf16.msrb.mxu2 %v3077_v0  ;;  %v2502_v53 = vld [vmem:[%s5621_s1 + $0x1b0] sm:$0xf0] }
  0x40   :  { %v3060_v1 = vld [vmem:[%s5621_s1 + $0x600] sm:$0xf]  ;;  %v3668_v8 = vld [vmem:[%s5621_s1 + $0x70c] sm:$0xf0]  ;;  %v2933_v18 = vor.u32 %v3604_v62, %v2932_v61  ;;  %1879 = vmatpush.bf16.msrb.mxu3 %v3205_v5  ;;  %v3526_v54 = vld [vmem:[%s5621_s1 + $0x2a4] sm:$0xf]  ;;  %v2505_v58 = vor.u32 %v3494_v52, %v2502_v53 }
  0x41   :  { %v3188_v7 = vld [vmem:[%s5621_s1 + $0x700] sm:$0xf]  ;;  %v19_v9 = vld [vmem:[%s5622_s0 + $0x10] sm:$0xff]  ;;  %v3061_v19 = vor.u32 %v3636_v2, %v3060_v1  ;;  %1841 = vmatpush.bf16.msrb.mxu0 %v2805_v13  ;;  %v3458_v61 = vld [vmem:[%s5621_s1 + $0x84] sm:$0xf] }
  0x42   :  { %v3428_v10 = vld [vmem:[%s5621_s1 + $0x8e0] sm:$0xf]  ;;  %v3728_v11 = vld [vmem:[%s5621_s1 + $0x8ec] sm:$0xf0]  ;;  %v319_v24 = vunpack.c.l.b16 %v19_v9  ;;  %v3189_v26 = vor.u32 %v3668_v8, %v3188_v7  ;;  %v320_v28 = vunpack.c.h.b16 %v19_v9  ;;  %v2630_v55 = vld [vmem:[%s5621_s1 + $0x2b0] sm:$0xf0] }
  0x43   :  { %v3429_v27 = vor.u32 %v3728_v11, %v3428_v10  ;;  %v3412_v31 = vld [vmem:[%s5621_s1 + $0x8c0] sm:$0xf]  ;;  %v3724_v32 = vld [vmem:[%s5621_s1 + $0x8cc] sm:$0xf0]  ;;  %1854 = vmatpush.bf16.msrb.mxu1 %v2933_v18  ;;  %1867 = vmatpush.bf16.msrb.mxu2 %v3061_v19  ;;  %v2633_v62 = vor.u32 %v3526_v54, %v2630_v55  ;;  %v2358_v63 = vld [vmem:[%s5621_s1 + $0x90] sm:$0xf0] }
  0x44   :  { %v4213_v41 = vpack.c.b16 %v319_v24, %v319_v24  ;;  %1880 = vmatpush.bf16.msrb.mxu3 %v3189_v26  ;;  %v3413_v43 = vor.u32 %v3724_v32, %v3412_v31  ;;  %v4217_v44 = vpack.c.b16 %v320_v28, %v320_v28  ;;  %v3396_v47 = vld [vmem:[%s5621_s1 + $0x8a0] sm:$0xf]  ;;  %v3720_v48 = vld [vmem:[%s5621_s1 + $0x8ac] sm:$0xf0]  ;;  %v3490_v0 = vld [vmem:[%s5621_s1 + $0x184] sm:$0xf]  ;;  %v2361_v7 = vor.u32 %v3458_v61, %v2358_v63 }
  0x45   :  { %1886 = vmatpush.bf16.msra.mxu0 %v3429_v27  ;;  %v3397_v56 = vor.u32 %v3720_v48, %v3396_v47  ;;  %v3380_v59 = vld [vmem:[%s5621_s1 + $0x880] sm:$0xf]  ;;  %v3716_v60 = vld [vmem:[%s5621_s1 + $0x88c] sm:$0xf0]  ;;  %v2486_v1 = vld [vmem:[%s5621_s1 + $0x190] sm:$0xf0] }
  0x46   :  { %1868 = vmatmul.bf16.vlgmr.msrb.gmra.mxu2 %v4205_v38  ;;  %1842 = vmatmul.bf16.vlgmr.msrb.gmra.mxu0 %v4213_v41  ;;  %v3522_v2 = vld [vmem:[%s5621_s1 + $0x284] sm:$0xf]  ;;  %v3381_v5 = vor.u32 %v3716_v60, %v3380_v59  ;;  %v2489_v8 = vor.u32 %v3490_v0, %v2486_v1  ;;  %v3364_v9 = vld [vmem:[%s5621_s1 + $0x860] sm:$0xf]  ;;  %v3712_v10 = vld [vmem:[%s5621_s1 + $0x86c] sm:$0xf0] }
  0x47   :  { %1899 = vmatpush.bf16.msra.mxu1 %v2409_v29  ;;  %1912 = vmatpush.bf16.msra.mxu2 %v2537_v30  ;;  %v3454_v11 = vld [vmem:[%s5621_s1 + $0x64] sm:$0xf]  ;;  %v2617_v12 = vor.u32 %v3522_v2, %v2614_v3  ;;  %v2342_v13 = vld [vmem:[%s5621_s1 + $0x70] sm:$0xf0]  ;;  %v3365_v18 = vor.u32 %v3712_v10, %v3364_v9  ;;  %v3348_v23 = vld [vmem:[%s5621_s1 + $0x840] sm:$0xf] }
  0x48   :  { %1925 = vmatpush.bf16.msra.mxu3 %v2665_v34  ;;  %1855 = vmatmul.bf16.vlgmr.msrb.gmra.mxu1 %v4217_v44  ;;  %v3486_v14 = vld [vmem:[%s5621_s1 + $0x164] sm:$0xf]  ;;  %v2470_v15 = vld [vmem:[%s5621_s1 + $0x170] sm:$0xf0]  ;;  %v2345_v19 = vor.u32 %v3454_v11, %v2342_v13  ;;  %v3708_v24 = vld [vmem:[%s5621_s1 + $0x84c] sm:$0xf0] }
  0x49   :  { %1881 = vmatmul.bf16.vlgmr.msrb.gmra.mxu3 %v4215_v42  ;;  %1887 = vmatpush.bf16.msra.mxu0 %v3413_v43  ;;  %v3518_v16 = vld [vmem:[%s5621_s1 + $0x264] sm:$0xf]  ;;  %v2598_v17 = vld [vmem:[%s5621_s1 + $0x270] sm:$0xf0]  ;;  %v2473_v22 = vor.u32 %v3486_v14, %v2470_v15  ;;  %v3349_v32 = vor.u32 %v3708_v24, %v3348_v23  ;;  %v3332_v35 = vld [vmem:[%s5621_s1 + $0x820] sm:$0xf] }
  0x4a   :  { %v3450_v25 = vld [vmem:[%s5621_s1 + $0x44] sm:$0xf]  ;;  %v2601_v26 = vor.u32 %v3518_v16, %v2598_v17  ;;  %v2326_v27 = vld [vmem:[%s5621_s1 + $0x50] sm:$0xf0]  ;;  %v3704_v36 = vld [vmem:[%s5621_s1 + $0x82c] sm:$0xf0] }
  0x4b   :  { %1900 = vmatpush.bf16.msra.mxu1 %v2393_v45  ;;  %1913 = vmatpush.bf16.msra.mxu2 %v2521_v46  ;;  %v3482_v28 = vld [vmem:[%s5621_s1 + $0x144] sm:$0xf]  ;;  %v2454_v29 = vld [vmem:[%s5621_s1 + $0x150] sm:$0xf0]  ;;  %v2329_v33 = vor.u32 %v3450_v25, %v2326_v27  ;;  %v3333_v48 = vor.u32 %v3704_v36, %v3332_v35  ;;  %v3316_v49 = vld [vmem:[%s5621_s1 + $0x800] sm:$0xf] }
  0x4c   :  { %1926 = vmatpush.bf16.msra.mxu3 %v2649_v50  ;;  %v3514_v30 = vld [vmem:[%s5621_s1 + $0x244] sm:$0xf]  ;;  %v2582_v31 = vld [vmem:[%s5621_s1 + $0x250] sm:$0xf0]  ;;  %v2457_v34 = vor.u32 %v3482_v28, %v2454_v29  ;;  %v3700_v50 = vld [vmem:[%s5621_s1 + $0x80c] sm:$0xf0] }
  0x4d   :  { %1888 = vmatpush.bf16.msra.mxu0 %v3397_v56  ;;  %v3446_v37 = vld [vmem:[%s5621_s1 + $0x24] sm:$0xf]  ;;  %v2585_v39 = vor.u32 %v3514_v30, %v2582_v31  ;;  %v2310_v40 = vld [vmem:[%s5621_s1 + $0x30] sm:$0xf0]  ;;  %v21_v56 = vld [vmem:[%s5622_s0 + $0x20] sm:$0xf]  ;;  %v3317_v0 = vor.u32 %v3700_v50, %v3316_v49 }
  0x4e   :  { %v3478_v43 = vld [vmem:[%s5621_s1 + $0x124] sm:$0xf]  ;;  %v2438_v45 = vld [vmem:[%s5621_s1 + $0x130] sm:$0xf0]  ;;  %v2313_v52 = vor.u32 %v3446_v37, %v2310_v40 }
  0x4f   :  { %1901 = vmatpush.bf16.msra.mxu1 %v2377_v57  ;;  %1914 = vmatpush.bf16.msra.mxu2 %v2505_v58  ;;  %v3510_v46 = vld [vmem:[%s5621_s1 + $0x224] sm:$0xf]  ;;  %v2566_v47 = vld [vmem:[%s5621_s1 + $0x230] sm:$0xf0]  ;;  %v2441_v53 = vor.u32 %v3478_v43, %v2438_v45 }
  0x50   :  { %1927 = vmatpush.bf16.msra.mxu3 %v2633_v62  ;;  %v3442_v51 = vld [vmem:[%s5621_s1 + $0x4] sm:$0xf]  ;;  %v2294_v54 = vld [vmem:[%s5621_s1 + $0x10] sm:$0xf0]  ;;  %v2569_v57 = vor.u32 %v3510_v46, %v2566_v47 }
  0x51   :  { %1889 = vmatpush.bf16.msra.mxu0 %v3381_v5  ;;  %v3474_v55 = vld [vmem:[%s5621_s1 + $0x104] sm:$0xf]  ;;  %v2422_v58 = vld [vmem:[%s5621_s1 + $0x110] sm:$0xf0]  ;;  %v323_v5 = vunpack.c.l.b16 %v21_v56 }
  0x52   :  { %v3506_v59 = vld [vmem:[%s5621_s1 + $0x204] sm:$0xf]  ;;  %v2550_v60 = vld [vmem:[%s5621_s1 + $0x210] sm:$0xf0] }
  0x53   :  { %1902 = vmatpush.bf16.msra.mxu1 %v2361_v7  ;;  %1915 = vmatpush.bf16.msra.mxu2 %v2489_v8  ;;  %v3566_v61 = vld [vmem:[%s5621_s1 + $0x3e4] sm:$0xf]  ;;  %v2790_v62 = vld [vmem:[%s5621_s1 + $0x3f0] sm:$0xf0]  ;;  %v2297_v7 = vor.u32 %v3442_v51, %v2294_v54  ;;  %v2425_v8 = vor.u32 %v3474_v55, %v2422_v58  ;;  %v2553_v11 = vor.u32 %v3506_v59, %v2550_v60 }
  0x54   :  { %1928 = vmatpush.bf16.msra.mxu3 %v2617_v12  ;;  %v3598_v63 = vld [vmem:[%s5621_s1 + $0x4e4] sm:$0xf]  ;;  %v2918_v1 = vld [vmem:[%s5621_s1 + $0x4f0] sm:$0xf0]  ;;  %v2793_v12 = vor.u32 %v3566_v61, %v2790_v62 }
  0x55   :  { %1890 = vmatpush.bf16.msra.mxu0 %v3365_v18  ;;  %v3630_v2 = vld [vmem:[%s5621_s1 + $0x5e4] sm:$0xf]  ;;  %v3046_v3 = vld [vmem:[%s5621_s1 + $0x5f0] sm:$0xf0]  ;;  %v2921_v13 = vor.u32 %v3598_v63, %v2918_v1 }
  0x56   :  { %v3662_v9 = vld [vmem:[%s5621_s1 + $0x6e4] sm:$0xf]  ;;  %v3174_v10 = vld [vmem:[%s5621_s1 + $0x6f0] sm:$0xf0]  ;;  %v3049_v14 = vor.u32 %v3630_v2, %v3046_v3 }
  0x57   :  { %1903 = vmatpush.bf16.msra.mxu1 %v2345_v19  ;;  %1916 = vmatpush.bf16.msra.mxu2 %v2473_v22  ;;  %v3562_v15 = vld [vmem:[%s5621_s1 + $0x3c4] sm:$0xf]  ;;  %v2774_v16 = vld [vmem:[%s5621_s1 + $0x3d0] sm:$0xf0]  ;;  %v3177_v18 = vor.u32 %v3662_v9, %v3174_v10  ;;  %v4403_v19 = vpack.c.b16 %v323_v5, %v323_v5 }
  0x58   :  { %1929 = vmatpush.bf16.msra.mxu3 %v2601_v26  ;;  %v3594_v17 = vld [vmem:[%s5621_s1 + $0x4c4] sm:$0xf]  ;;  %v2902_v22 = vld [vmem:[%s5621_s1 + $0x4d0] sm:$0xf0]  ;;  %v2777_v27 = vor.u32 %v3562_v15, %v2774_v16 }
  0x59   :  { %1891 = vmatpush.bf16.msra.mxu0 %v3349_v32  ;;  %v3626_v23 = vld [vmem:[%s5621_s1 + $0x5c4] sm:$0xf]  ;;  %v3030_v24 = vld [vmem:[%s5621_s1 + $0x5d0] sm:$0xf0]  ;;  %v2905_v28 = vor.u32 %v3594_v17, %v2902_v22 }
  0x5a   :  { %v3658_v25 = vld [vmem:[%s5621_s1 + $0x6c4] sm:$0xf]  ;;  %v3158_v26 = vld [vmem:[%s5621_s1 + $0x6d0] sm:$0xf0]  ;;  %v3033_v29 = vor.u32 %v3626_v23, %v3030_v24 }
  0x5b   :  { %1904 = vmatpush.bf16.msra.mxu1 %v2329_v33  ;;  %1917 = vmatpush.bf16.msra.mxu2 %v2457_v34  ;;  %v3558_v30 = vld [vmem:[%s5621_s1 + $0x3a4] sm:$0xf]  ;;  %v2758_v31 = vld [vmem:[%s5621_s1 + $0x3b0] sm:$0xf0]  ;;  %v3161_v33 = vor.u32 %v3658_v25, %v3158_v26 }
  0x5c   :  { %1930 = vmatpush.bf16.msra.mxu3 %v2585_v39  ;;  %v3590_v32 = vld [vmem:[%s5621_s1 + $0x4a4] sm:$0xf]  ;;  %v2886_v34 = vld [vmem:[%s5621_s1 + $0x4b0] sm:$0xf0]  ;;  %v2761_v40 = vor.u32 %v3558_v30, %v2758_v31 }
  0x5d   :  { %1892 = vmatpush.bf16.msra.mxu0 %v3333_v48  ;;  %v3622_v35 = vld [vmem:[%s5621_s1 + $0x5a4] sm:$0xf]  ;;  %v3014_v36 = vld [vmem:[%s5621_s1 + $0x5b0] sm:$0xf0]  ;;  %v2889_v43 = vor.u32 %v3590_v32, %v2886_v34 }
  0x5e   :  { %v3654_v37 = vld [vmem:[%s5621_s1 + $0x6a4] sm:$0xf]  ;;  %v3142_v39 = vld [vmem:[%s5621_s1 + $0x6b0] sm:$0xf0]  ;;  %v3017_v45 = vor.u32 %v3622_v35, %v3014_v36 }
  0x5f   :  { %1905 = vmatpush.bf16.msra.mxu1 %v2313_v52  ;;  %1918 = vmatpush.bf16.msra.mxu2 %v2441_v53  ;;  %v3554_v46 = vld [vmem:[%s5621_s1 + $0x384] sm:$0xf]  ;;  %v2742_v47 = vld [vmem:[%s5621_s1 + $0x390] sm:$0xf0]  ;;  %v3145_v49 = vor.u32 %v3654_v37, %v3142_v39 }
  0x60   :  { %1931 = vmatpush.bf16.msra.mxu3 %v2569_v57  ;;  %v3586_v48 = vld [vmem:[%s5621_s1 + $0x484] sm:$0xf]  ;;  %v2870_v50 = vld [vmem:[%s5621_s1 + $0x490] sm:$0xf0]  ;;  %v2745_v55 = vor.u32 %v3554_v46, %v2742_v47 }
  0x61   :  { %1893 = vmatpush.bf16.msra.mxu0 %v3317_v0  ;;  %v3618_v51 = vld [vmem:[%s5621_s1 + $0x584] sm:$0xf]  ;;  %v2998_v52 = vld [vmem:[%s5621_s1 + $0x590] sm:$0xf0]  ;;  %v2873_v56 = vor.u32 %v3586_v48, %v2870_v50 }
  0x62   :  { %v3650_v53 = vld [vmem:[%s5621_s1 + $0x684] sm:$0xf]  ;;  %v3126_v54 = vld [vmem:[%s5621_s1 + $0x690] sm:$0xf0]  ;;  %v3001_v57 = vor.u32 %v3618_v51, %v2998_v52 }
  0x63   :  { %1906 = vmatpush.bf16.msra.mxu1 %v2297_v7  ;;  %1919 = vmatpush.bf16.msra.mxu2 %v2425_v8  ;;  %v3550_v58 = vld [vmem:[%s5621_s1 + $0x364] sm:$0xf]  ;;  %v2726_v59 = vld [vmem:[%s5621_s1 + $0x370] sm:$0xf0]  ;;  %v3129_v61 = vor.u32 %v3650_v53, %v3126_v54  ;;  %v2412_v53 = vld [vmem:[%s5621_s1 + $0xe8] sm:$0xf] }
  0x64   :  { %1932 = vmatpush.bf16.msra.mxu3 %v2553_v11  ;;  %1894 = vmatmul.bf16.vlgmr.msra.gmra.mxu0 %v4403_v19  ;;  %v3582_v60 = vld [vmem:[%s5621_s1 + $0x464] sm:$0xf]  ;;  %v2854_v62 = vld [vmem:[%s5621_s1 + $0x470] sm:$0xf0]  ;;  %v2729_v3 = vor.u32 %v3550_v58, %v2726_v59  ;;  %v3473_v54 = vld [vmem:[%s5621_s1 + $0xf4] sm:$0xf0] }
  0x65   :  { %1938 = vmatpush.bf16.msrb.mxu0 %v2793_v12  ;;  %v3614_v63 = vld [vmem:[%s5621_s1 + $0x564] sm:$0xf]  ;;  %v2982_v0 = vld [vmem:[%s5621_s1 + $0x570] sm:$0xf0]  ;;  %v2857_v5 = vor.u32 %v3582_v60, %v2854_v62  ;;  %v3505_v58 = vld [vmem:[%s5621_s1 + $0x1f4] sm:$0xf0]  ;;  %v2413_v62 = vor.u32 %v3473_v54, %v2412_v53 }
  0x66   :  { %1920 = vmatmul.bf16.vlgmr.msra.gmra.mxu2 %v4057_v21  ;;  %1907 = vmatmul.bf16.vlgmr.msra.gmra.mxu1 %v4054_v20  ;;  %v3646_v1 = vld [vmem:[%s5621_s1 + $0x664] sm:$0xf]  ;;  %v3110_v2 = vld [vmem:[%s5621_s1 + $0x670] sm:$0xf0]  ;;  %v2985_v7 = vor.u32 %v3614_v63, %v2982_v0 }
  0x67   :  { %1951 = vmatpush.bf16.msrb.mxu1 %v2921_v13  ;;  %1964 = vmatpush.bf16.msrb.mxu2 %v3049_v14  ;;  %v3546_v8 = vld [vmem:[%s5621_s1 + $0x344] sm:$0xf]  ;;  %v2710_v9 = vld [vmem:[%s5621_s1 + $0x350] sm:$0xf0]  ;;  %v3113_v11 = vor.u32 %v3646_v1, %v3110_v2 }
  0x68   :  { %1977 = vmatpush.bf16.msrb.mxu3 %v3177_v18  ;;  %v3578_v10 = vld [vmem:[%s5621_s1 + $0x444] sm:$0xf]  ;;  %v2838_v12 = vld [vmem:[%s5621_s1 + $0x450] sm:$0xf0]  ;;  %v2713_v17 = vor.u32 %v3546_v8, %v2710_v9  ;;  %v2524_v8 = vld [vmem:[%s5621_s1 + $0x1c8] sm:$0xf] }
  0x69   :  { %1933 = vmatmul.bf16.vlgmr.msra.gmra.mxu3 %v4022_v4  ;;  %1939 = vmatpush.bf16.msrb.mxu0 %v2777_v27  ;;  %v3610_v13 = vld [vmem:[%s5621_s1 + $0x544] sm:$0xf]  ;;  %v2966_v14 = vld [vmem:[%s5621_s1 + $0x550] sm:$0xf0]  ;;  %v2841_v18 = vor.u32 %v3578_v10, %v2838_v12  ;;  %v3501_v9 = vld [vmem:[%s5621_s1 + $0x1d4] sm:$0xf0] }
  0x6a   :  { %v3642_v15 = vld [vmem:[%s5621_s1 + $0x644] sm:$0xf]  ;;  %v3094_v16 = vld [vmem:[%s5621_s1 + $0x650] sm:$0xf0]  ;;  %v2969_v22 = vor.u32 %v3610_v13, %v2966_v14 }
  0x6b   :  { %1952 = vmatpush.bf16.msrb.mxu1 %v2905_v28  ;;  %1965 = vmatpush.bf16.msrb.mxu2 %v3033_v29  ;;  %v3542_v23 = vld [vmem:[%s5621_s1 + $0x324] sm:$0xf]  ;;  %v2694_v24 = vld [vmem:[%s5621_s1 + $0x330] sm:$0xf0]  ;;  %v3097_v26 = vor.u32 %v3642_v15, %v3094_v16  ;;  %v2525_v16 = vor.u32 %v3501_v9, %v2524_v8 }
  0x6c   :  { %1978 = vmatpush.bf16.msrb.mxu3 %v3161_v33  ;;  %v3574_v25 = vld [vmem:[%s5621_s1 + $0x424] sm:$0xf]  ;;  %v2822_v27 = vld [vmem:[%s5621_s1 + $0x430] sm:$0xf0]  ;;  %v2697_v32 = vor.u32 %v3542_v23, %v2694_v24  ;;  %v2508_v23 = vld [vmem:[%s5621_s1 + $0x1a8] sm:$0xf] }
  0x6d   :  { %1940 = vmatpush.bf16.msrb.mxu0 %v2761_v40  ;;  %v3606_v28 = vld [vmem:[%s5621_s1 + $0x524] sm:$0xf]  ;;  %v2950_v29 = vld [vmem:[%s5621_s1 + $0x530] sm:$0xf0]  ;;  %v2825_v35 = vor.u32 %v3574_v25, %v2822_v27  ;;  %v3497_v24 = vld [vmem:[%s5621_s1 + $0x1b4] sm:$0xf0] }
  0x6e   :  { %v3638_v30 = vld [vmem:[%s5621_s1 + $0x624] sm:$0xf]  ;;  %v3078_v31 = vld [vmem:[%s5621_s1 + $0x630] sm:$0xf0]  ;;  %v2953_v36 = vor.u32 %v3606_v28, %v2950_v29 }
  0x6f   :  { %1953 = vmatpush.bf16.msrb.mxu1 %v2889_v43  ;;  %1966 = vmatpush.bf16.msrb.mxu2 %v3017_v45  ;;  %v3538_v33 = vld [vmem:[%s5621_s1 + $0x304] sm:$0xf]  ;;  %v2678_v34 = vld [vmem:[%s5621_s1 + $0x310] sm:$0xf0]  ;;  %v3081_v43 = vor.u32 %v3638_v30, %v3078_v31  ;;  %v2509_v31 = vor.u32 %v3497_v24, %v2508_v23 }
  0x70   :  { %1979 = vmatpush.bf16.msrb.mxu3 %v3145_v49  ;;  %v3570_v37 = vld [vmem:[%s5621_s1 + $0x404] sm:$0xf]  ;;  %v2806_v39 = vld [vmem:[%s5621_s1 + $0x410] sm:$0xf0]  ;;  %v2681_v51 = vor.u32 %v3538_v33, %v2678_v34  ;;  %v2364_v33 = vld [vmem:[%s5621_s1 + $0x88] sm:$0xf] }
  0x71   :  { %1941 = vmatpush.bf16.msrb.mxu0 %v2745_v55  ;;  %v3602_v40 = vld [vmem:[%s5621_s1 + $0x504] sm:$0xf]  ;;  %v2934_v45 = vld [vmem:[%s5621_s1 + $0x510] sm:$0xf0]  ;;  %v2809_v55 = vor.u32 %v3570_v37, %v2806_v39  ;;  %v3461_v34 = vld [vmem:[%s5621_s1 + $0x94] sm:$0xf0] }
  0x72   :  { %v3634_v46 = vld [vmem:[%s5621_s1 + $0x604] sm:$0xf]  ;;  %v3062_v47 = vld [vmem:[%s5621_s1 + $0x610] sm:$0xf0] }
  0x73   :  { %1954 = vmatpush.bf16.msrb.mxu1 %v2873_v56  ;;  %1967 = vmatpush.bf16.msrb.mxu2 %v3001_v57  ;;  %v3694_v48 = vld [vmem:[%s5621_s1 + $0x7e4] sm:$0xf]  ;;  %v3302_v49 = vld [vmem:[%s5621_s1 + $0x7f0] sm:$0xf0]  ;;  %v2937_v56 = vor.u32 %v3602_v40, %v2934_v45  ;;  %v2540_v57 = vld [vmem:[%s5621_s1 + $0x1e8] sm:$0xf]  ;;  %v3065_v59 = vor.u32 %v3634_v46, %v3062_v47  ;;  %v2365_v40 = vor.u32 %v3461_v34, %v2364_v33 }
  0x74   :  { %1980 = vmatpush.bf16.msrb.mxu3 %v3129_v61  ;;  %v3726_v50 = vld [vmem:[%s5621_s1 + $0x8e4] sm:$0xf]  ;;  %v3430_v52 = vld [vmem:[%s5621_s1 + $0x8f0] sm:$0xf0]  ;;  %v3305_v60 = vor.u32 %v3694_v48, %v3302_v49  ;;  %v2541_v2 = vor.u32 %v3505_v58, %v2540_v57  ;;  %v2348_v49 = vld [vmem:[%s5621_s1 + $0x68] sm:$0xf] }
  0x75   :  { %1942 = vmatpush.bf16.msrb.mxu0 %v2729_v3  ;;  %v3433_v61 = vor.u32 %v3726_v50, %v3430_v52  ;;  %v3690_v63 = vld [vmem:[%s5621_s1 + $0x7c4] sm:$0xf]  ;;  %v3286_v0 = vld [vmem:[%s5621_s1 + $0x7d0] sm:$0xf0]  ;;  %v3457_v50 = vld [vmem:[%s5621_s1 + $0x74] sm:$0xf0] }
  0x76   :  { %v3722_v1 = vld [vmem:[%s5621_s1 + $0x8c4] sm:$0xf]  ;;  %v3414_v3 = vld [vmem:[%s5621_s1 + $0x8d0] sm:$0xf0]  ;;  %v3289_v10 = vor.u32 %v3690_v63, %v3286_v0  ;;  %v3489_v52 = vld [vmem:[%s5621_s1 + $0x174] sm:$0xf0] }
  0x77   :  { %1955 = vmatpush.bf16.msrb.mxu1 %v2857_v5  ;;  %1968 = vmatpush.bf16.msrb.mxu2 %v2985_v7  ;;  %v2396_v5 = vld [vmem:[%s5621_s1 + $0xc8] sm:$0xf]  ;;  %v3469_v7 = vld [vmem:[%s5621_s1 + $0xd4] sm:$0xf0]  ;;  %v3686_v13 = vld [vmem:[%s5621_s1 + $0x7a4] sm:$0xf] }
  0x78   :  { %1981 = vmatpush.bf16.msrb.mxu3 %v3113_v11  ;;  %v3417_v11 = vor.u32 %v3722_v1, %v3414_v3  ;;  %v2397_v12 = vor.u32 %v3469_v7, %v2396_v5  ;;  %v3270_v14 = vld [vmem:[%s5621_s1 + $0x7b0] sm:$0xf0]  ;;  %v3718_v15 = vld [vmem:[%s5621_s1 + $0x8a4] sm:$0xf]  ;;  %v2460_v63 = vld [vmem:[%s5621_s1 + $0x148] sm:$0xf] }
  0x79   :  { %1943 = vmatpush.bf16.msrb.mxu0 %v2713_v17  ;;  %v3398_v17 = vld [vmem:[%s5621_s1 + $0x8b0] sm:$0xf0]  ;;  %v3273_v25 = vor.u32 %v3686_v13, %v3270_v14  ;;  %v3682_v28 = vld [vmem:[%s5621_s1 + $0x784] sm:$0xf]  ;;  %v3485_v0 = vld [vmem:[%s5621_s1 + $0x154] sm:$0xf0] }
  0x7a   :  { %v3254_v29 = vld [vmem:[%s5621_s1 + $0x790] sm:$0xf0]  ;;  %v3714_v30 = vld [vmem:[%s5621_s1 + $0x884] sm:$0xf]  ;;  %v2461_v9 = vor.u32 %v3485_v0, %v2460_v63  ;;  %v2444_v13 = vld [vmem:[%s5621_s1 + $0x128] sm:$0xf] }
  0x7b   :  { %1956 = vmatpush.bf16.msrb.mxu1 %v2841_v18  ;;  %1969 = vmatpush.bf16.msrb.mxu2 %v2969_v22  ;;  %v2380_v18 = vld [vmem:[%s5621_s1 + $0xa8] sm:$0xf]  ;;  %v3465_v22 = vld [vmem:[%s5621_s1 + $0xb4] sm:$0xf0]  ;;  %v3257_v37 = vor.u32 %v3682_v28, %v3254_v29  ;;  %v3238_v45 = vld [vmem:[%s5621_s1 + $0x770] sm:$0xf0] }
  0x7c   :  { %1982 = vmatpush.bf16.msrb.mxu3 %v3097_v26  ;;  %v3401_v26 = vor.u32 %v3718_v15, %v3398_v17  ;;  %v2381_v27 = vor.u32 %v3465_v22, %v2380_v18  ;;  %v3710_v46 = vld [vmem:[%s5621_s1 + $0x864] sm:$0xf]  ;;  %v3366_v48 = vld [vmem:[%s5621_s1 + $0x870] sm:$0xf0]  ;;  %v3481_v14 = vld [vmem:[%s5621_s1 + $0x134] sm:$0xf0] }
  0x7d   :  { %1944 = vmatpush.bf16.msrb.mxu0 %v2697_v32  ;;  %v3382_v32 = vld [vmem:[%s5621_s1 + $0x890] sm:$0xf0]  ;;  %v3369_v54 = vor.u32 %v3710_v46, %v3366_v48  ;;  %v3706_v58 = vld [vmem:[%s5621_s1 + $0x844] sm:$0xf]  ;;  %v2428_v28 = vld [vmem:[%s5621_s1 + $0x108] sm:$0xf] }
  0x7e   :  { %v3385_v39 = vor.u32 %v3714_v30, %v3382_v32  ;;  %v3222_v57 = vld [vmem:[%s5621_s1 + $0x750] sm:$0xf0]  ;;  %v3670_v5 = vld [vmem:[%s5621_s1 + $0x724] sm:$0xf]  ;;  %v3477_v29 = vld [vmem:[%s5621_s1 + $0x114] sm:$0xf0] }
  0x7f   :  { %1957 = vmatpush.bf16.msrb.mxu1 %v2825_v35  ;;  %1970 = vmatpush.bf16.msrb.mxu2 %v2953_v36  ;;  %v2492_v35 = vld [vmem:[%s5621_s1 + $0x188] sm:$0xf]  ;;  %v3493_v36 = vld [vmem:[%s5621_s1 + $0x194] sm:$0xf0]  ;;  %v3206_v7 = vld [vmem:[%s5621_s1 + $0x730] sm:$0xf0] }
  0x80   :  { %1983 = vmatpush.bf16.msrb.mxu3 %v3081_v43  ;;  %v3678_v43 = vld [vmem:[%s5621_s1 + $0x764] sm:$0xf]  ;;  %v2493_v47 = vor.u32 %v3493_v36, %v2492_v35  ;;  %v3209_v15 = vor.u32 %v3670_v5, %v3206_v7  ;;  %v3190_v17 = vld [vmem:[%s5621_s1 + $0x710] sm:$0xf0]  ;;  %v2668_v30 = vld [vmem:[%s5621_s1 + $0x2e8] sm:$0xf] }
  0x81   :  { %1945 = vmatpush.bf16.msrb.mxu0 %v2681_v51  ;;  %v2476_v51 = vld [vmem:[%s5621_s1 + $0x168] sm:$0xf]  ;;  %v3241_v53 = vor.u32 %v3678_v43, %v3238_v45  ;;  %v3702_v8 = vld [vmem:[%s5621_s1 + $0x824] sm:$0xf]  ;;  %v3318_v24 = vld [vmem:[%s5621_s1 + $0x810] sm:$0xf0]  ;;  %v2429_v45 = vor.u32 %v3477_v29, %v2428_v28 }
  0x82   :  { %v3698_v23 = vld [vmem:[%s5621_s1 + $0x804] sm:$0xf]  ;;  %v2796_v32 = vld [vmem:[%s5621_s1 + $0x3e8] sm:$0xf]  ;;  %v3569_v34 = vld [vmem:[%s5621_s1 + $0x3f4] sm:$0xf0] }
  0x83   :  { %1958 = vmatpush.bf16.msrb.mxu1 %v2809_v55  ;;  %1971 = vmatpush.bf16.msrb.mxu2 %v2937_v56  ;;  %v2349_v55 = vor.u32 %v3457_v50, %v2348_v49  ;;  %v3674_v56 = vld [vmem:[%s5621_s1 + $0x744] sm:$0xf]  ;;  %v2924_v35 = vld [vmem:[%s5621_s1 + $0x4e8] sm:$0xf]  ;;  %v3601_v36 = vld [vmem:[%s5621_s1 + $0x4f4] sm:$0xf0] }
  0x84   :  { %1984 = vmatpush.bf16.msrb.mxu3 %v3065_v59  ;;  %1946 = vmatmul.bf16.vlgmr.msrb.gmra.mxu0 %v4027_v6  ;;  %v2477_v59 = vor.u32 %v3489_v52, %v2476_v51  ;;  %v3225_v1 = vor.u32 %v3674_v56, %v3222_v57  ;;  %v3633_v43 = vld [vmem:[%s5621_s1 + $0x5f4] sm:$0xf0]  ;;  %v2925_v48 = vor.u32 %v3601_v36, %v2924_v35  ;;  %v2652_v49 = vld [vmem:[%s5621_s1 + $0x2c8] sm:$0xf] }
  0x85   :  { %1990 = vmatpush.bf16.msra.mxu0 %v3305_v60  ;;  %v3350_v60 = vld [vmem:[%s5621_s1 + $0x850] sm:$0xf0]  ;;  %v3533_v50 = vld [vmem:[%s5621_s1 + $0x2d4] sm:$0xf0]  ;;  %v2780_v51 = vld [vmem:[%s5621_s1 + $0x3c8] sm:$0xf] }
  0x86   :  { %1972 = vmatmul.bf16.vlgmr.msrb.gmra.mxu2 %v4217_v44  ;;  %1959 = vmatmul.bf16.vlgmr.msrb.gmra.mxu1 %v4213_v41  ;;  %v3036_v56 = vld [vmem:[%s5621_s1 + $0x5c8] sm:$0xf]  ;;  %v3629_v57 = vld [vmem:[%s5621_s1 + $0x5d4] sm:$0xf0] }
  0x87   :  { %2003 = vmatpush.bf16.msra.mxu1 %v3433_v61  ;;  %2016 = vmatpush.bf16.msra.mxu2 %v2413_v62  ;;  %v2332_v61 = vld [vmem:[%s5621_s1 + $0x48] sm:$0xf]  ;;  %v3453_v62 = vld [vmem:[%s5621_s1 + $0x54] sm:$0xf0]  ;;  %v3037_v0 = vor.u32 %v3629_v57, %v3036_v56 }
  0x88   :  { %2029 = vmatpush.bf16.msra.mxu3 %v2541_v2  ;;  %v3353_v2 = vor.u32 %v3706_v58, %v3350_v60  ;;  %v2333_v3 = vor.u32 %v3453_v62, %v2332_v61  ;;  %v2653_v58 = vor.u32 %v3533_v50, %v2652_v49  ;;  %v2636_v61 = vld [vmem:[%s5621_s1 + $0x2a8] sm:$0xf]  ;;  %v3529_v62 = vld [vmem:[%s5621_s1 + $0x2b4] sm:$0xf0] }
  0x89   :  { %1985 = vmatmul.bf16.vlgmr.msrb.gmra.mxu3 %v4205_v38  ;;  %1991 = vmatpush.bf16.msra.mxu0 %v3289_v10  ;;  %v3334_v10 = vld [vmem:[%s5621_s1 + $0x830] sm:$0xf0]  ;;  %v2764_v63 = vld [vmem:[%s5621_s1 + $0x3a8] sm:$0xf]  ;;  %v3625_v7 = vld [vmem:[%s5621_s1 + $0x5b4] sm:$0xf0] }
  0x8a   :  { %v3337_v18 = vor.u32 %v3702_v8, %v3334_v10  ;;  %v3020_v5 = vld [vmem:[%s5621_s1 + $0x5a8] sm:$0xf]  ;;  %v2637_v8 = vor.u32 %v3529_v62, %v2636_v61  ;;  %v3613_v50 = vld [vmem:[%s5621_s1 + $0x554] sm:$0xf0] }
  0x8b   :  { %2004 = vmatpush.bf16.msra.mxu1 %v3417_v11  ;;  %2017 = vmatpush.bf16.msra.mxu2 %v2397_v12  ;;  %v2316_v11 = vld [vmem:[%s5621_s1 + $0x28] sm:$0xf]  ;;  %v3449_v12 = vld [vmem:[%s5621_s1 + $0x34] sm:$0xf0] }
  0x8c   :  { %2030 = vmatpush.bf16.msra.mxu3 %v2525_v16  ;;  %v3666_v16 = vld [vmem:[%s5621_s1 + $0x704] sm:$0xf]  ;;  %v2317_v22 = vor.u32 %v3449_v12, %v2316_v11  ;;  %v2620_v11 = vld [vmem:[%s5621_s1 + $0x288] sm:$0xf]  ;;  %v3525_v12 = vld [vmem:[%s5621_s1 + $0x294] sm:$0xf0] }
  0x8d   :  { %1992 = vmatpush.bf16.msra.mxu0 %v3273_v25  ;;  %v2300_v25 = vld [vmem:[%s5621_s1 + $0x8] sm:$0xf]  ;;  %v3193_v33 = vor.u32 %v3666_v16, %v3190_v17  ;;  %v3589_v17 = vld [vmem:[%s5621_s1 + $0x494] sm:$0xf0] }
  0x8e   :  { %v2876_v16 = vld [vmem:[%s5621_s1 + $0x488] sm:$0xf]  ;;  %v3513_v57 = vld [vmem:[%s5621_s1 + $0x234] sm:$0xf0] }
  0x8f   :  { %2005 = vmatpush.bf16.msra.mxu1 %v3401_v26  ;;  %2018 = vmatpush.bf16.msra.mxu2 %v2381_v27  ;;  %v2445_v26 = vor.u32 %v3481_v14, %v2444_v13  ;;  %v3445_v27 = vld [vmem:[%s5621_s1 + $0x14] sm:$0xf0]  ;;  %v2748_v13 = vld [vmem:[%s5621_s1 + $0x388] sm:$0xf]  ;;  %v3021_v14 = vor.u32 %v3625_v7, %v3020_v5 }
  0x90   :  { %2031 = vmatpush.bf16.msra.mxu3 %v2509_v31  ;;  %v3537_v31 = vld [vmem:[%s5621_s1 + $0x2f4] sm:$0xf0]  ;;  %v2732_v28 = vld [vmem:[%s5621_s1 + $0x368] sm:$0xf] }
  0x91   :  { %1993 = vmatpush.bf16.msra.mxu0 %v3257_v37  ;;  %v3321_v37 = vor.u32 %v3698_v23, %v3318_v24  ;;  %v2669_v46 = vor.u32 %v3537_v31, %v2668_v30  ;;  %v2621_v23 = vor.u32 %v3525_v12, %v2620_v11  ;;  %v3553_v30 = vld [vmem:[%s5621_s1 + $0x374] sm:$0xf0]  ;;  %v2860_v31 = vld [vmem:[%s5621_s1 + $0x468] sm:$0xf] }
  0x92   :  { %v2733_v36 = vor.u32 %v3553_v30, %v2732_v28  ;;  %v2972_v49 = vld [vmem:[%s5621_s1 + $0x548] sm:$0xf]  ;;  %v3545_v61 = vld [vmem:[%s5621_s1 + $0x334] sm:$0xf0] }
  0x93   :  { %2006 = vmatpush.bf16.msra.mxu1 %v3385_v39  ;;  %2019 = vmatpush.bf16.msra.mxu2 %v2365_v40  ;;  %v2301_v39 = vor.u32 %v3445_v27, %v2300_v25  ;;  %v3052_v40 = vld [vmem:[%s5621_s1 + $0x5e8] sm:$0xf]  ;;  %v2877_v25 = vor.u32 %v3589_v17, %v2876_v16  ;;  %v3521_v27 = vld [vmem:[%s5621_s1 + $0x274] sm:$0xf0] }
  0x94   :  { %2032 = vmatpush.bf16.msra.mxu3 %v2493_v47  ;;  %v2797_v47 = vor.u32 %v3569_v34, %v2796_v32  ;;  %v3053_v52 = vor.u32 %v3633_v43, %v3052_v40  ;;  %v3585_v32 = vld [vmem:[%s5621_s1 + $0x474] sm:$0xf0]  ;;  %v2716_v43 = vld [vmem:[%s5621_s1 + $0x348] sm:$0xf] }
  0x95   :  { %1994 = vmatpush.bf16.msra.mxu0 %v3241_v53  ;;  %v3565_v53 = vld [vmem:[%s5621_s1 + $0x3d4] sm:$0xf0]  ;;  %v2572_v56 = vld [vmem:[%s5621_s1 + $0x228] sm:$0xf] }
  0x96   :  { %v3617_v34 = vld [vmem:[%s5621_s1 + $0x574] sm:$0xf0]  ;;  %v2828_v62 = vld [vmem:[%s5621_s1 + $0x428] sm:$0xf] }
  0x97   :  { %2007 = vmatpush.bf16.msra.mxu1 %v3369_v54  ;;  %2020 = vmatpush.bf16.msra.mxu2 %v2349_v55  ;;  %v2908_v54 = vld [vmem:[%s5621_s1 + $0x4c8] sm:$0xf]  ;;  %v3597_v55 = vld [vmem:[%s5621_s1 + $0x4d4] sm:$0xf0] }
  0x98   :  { %2033 = vmatpush.bf16.msra.mxu3 %v2477_v59  ;;  %v2781_v59 = vor.u32 %v3565_v53, %v2780_v51  ;;  %v2909_v60 = vor.u32 %v3597_v55, %v2908_v54  ;;  %v3517_v40 = vld [vmem:[%s5621_s1 + $0x254] sm:$0xf0]  ;;  %v2556_v5 = vld [vmem:[%s5621_s1 + $0x208] sm:$0xf] }
  0x99   :  { %1995 = vmatpush.bf16.msra.mxu0 %v3225_v1  ;;  %v3561_v1 = vld [vmem:[%s5621_s1 + $0x3b4] sm:$0xf0]  ;;  %v2812_v12 = vld [vmem:[%s5621_s1 + $0x408] sm:$0xf] }
  0x9a   :  { %v3509_v7 = vld [vmem:[%s5621_s1 + $0x214] sm:$0xf0]  ;;  %v3180_v17 = vld [vmem:[%s5621_s1 + $0x6e8] sm:$0xf] }
  0x9b   :  { %2008 = vmatpush.bf16.msra.mxu1 %v3353_v2  ;;  %2021 = vmatpush.bf16.msra.mxu2 %v2333_v3  ;;  %v2892_v2 = vld [vmem:[%s5621_s1 + $0x4a8] sm:$0xf]  ;;  %v3593_v3 = vld [vmem:[%s5621_s1 + $0x4b4] sm:$0xf0] }
  0x9c   :  { %2034 = vmatpush.bf16.msra.mxu3 %v2461_v9  ;;  %v2765_v9 = vor.u32 %v3561_v1, %v2764_v63  ;;  %v2893_v10 = vor.u32 %v3593_v3, %v2892_v2  ;;  %v3577_v63 = vld [vmem:[%s5621_s1 + $0x434] sm:$0xf0]  ;;  %v2956_v1 = vld [vmem:[%s5621_s1 + $0x528] sm:$0xf]  ;;  %v2573_v3 = vor.u32 %v3513_v57, %v2572_v56 }
  0x9d   :  { %1996 = vmatpush.bf16.msra.mxu0 %v3209_v15  ;;  %v3557_v15 = vld [vmem:[%s5621_s1 + $0x394] sm:$0xf0]  ;;  %v3148_v57 = vld [vmem:[%s5621_s1 + $0x6a8] sm:$0xf] }
  0x9e   :  { %v2749_v24 = vor.u32 %v3557_v15, %v2748_v13  ;;  %v3609_v2 = vld [vmem:[%s5621_s1 + $0x534] sm:$0xf0]  ;;  %v2940_v15 = vld [vmem:[%s5621_s1 + $0x508] sm:$0xf] }
  0x9f   :  { %2009 = vmatpush.bf16.msra.mxu1 %v3337_v18  ;;  %2022 = vmatpush.bf16.msra.mxu2 %v2317_v22  ;;  %v3004_v18 = vld [vmem:[%s5621_s1 + $0x588] sm:$0xf]  ;;  %v3621_v22 = vld [vmem:[%s5621_s1 + $0x594] sm:$0xf0]  ;;  %v2957_v13 = vor.u32 %v3609_v2, %v2956_v1  ;;  %v3463_v2 = vld [vmem:[%s5621_s1 + $0xac] sm:$0xf] }
  0xa0   :  { %2035 = vmatpush.bf16.msra.mxu3 %v2445_v26  ;;  %v2604_v26 = vld [vmem:[%s5621_s1 + $0x268] sm:$0xf]  ;;  %v3005_v29 = vor.u32 %v3621_v22, %v3004_v18  ;;  %v3541_v11 = vld [vmem:[%s5621_s1 + $0x314] sm:$0xf0] }
  0xa1   :  { %1997 = vmatpush.bf16.msra.mxu0 %v3193_v33  ;;  %v2988_v33 = vld [vmem:[%s5621_s1 + $0x568] sm:$0xf]  ;;  %v2605_v35 = vor.u32 %v3521_v27, %v2604_v26  ;;  %v3605_v16 = vld [vmem:[%s5621_s1 + $0x514] sm:$0xf0] }
  0xa2   :  { %v3665_v18 = vld [vmem:[%s5621_s1 + $0x6f4] sm:$0xf0]  ;;  %v3308_v22 = vld [vmem:[%s5621_s1 + $0x7e8] sm:$0xf] }
  0xa3   :  { %2010 = vmatpush.bf16.msra.mxu1 %v3321_v37  ;;  %2023 = vmatpush.bf16.msra.mxu2 %v2301_v39  ;;  %v2861_v37 = vor.u32 %v3585_v32, %v2860_v31  ;;  %v2588_v39 = vld [vmem:[%s5621_s1 + $0x248] sm:$0xf]  ;;  %v3729_v27 = vld [vmem:[%s5621_s1 + $0x8f4] sm:$0xf0]  ;;  %v3471_v31 = vld [vmem:[%s5621_s1 + $0xec] sm:$0xf] }
  0xa4   :  { %2036 = vmatpush.bf16.msra.mxu3 %v2429_v45  ;;  %1998 = vmatmul.bf16.vlgmr.msra.gmra.mxu0 %v4215_v42  ;;  %v2989_v45 = vor.u32 %v3617_v34, %v2988_v33  ;;  %v3436_v26 = vld [vmem:[%s5621_s1 + $0x8e8] sm:$0xf]  ;;  %v2414_v32 = vld [vmem:[%s5621_s1 + $0xf8] sm:$0xf0]  ;;  %v2941_v34 = vor.u32 %v3605_v16, %v2940_v15  ;;  %v3721_v1 = vld [vmem:[%s5621_s1 + $0x8b4] sm:$0xf0] }
  0xa5   :  { %2042 = vmatpush.bf16.msrb.mxu0 %v2669_v46  ;;  %v3549_v46 = vld [vmem:[%s5621_s1 + $0x354] sm:$0xf0]  ;;  %v3459_v16 = vld [vmem:[%s5621_s1 + $0x8c] sm:$0xf] }
  0xa6   :  { %2011 = vmatmul.bf16.vlgmr.msra.gmra.mxu1 %v4403_v19  ;;  %2024 = vmatmul.bf16.vlgmr.msra.gmra.mxu2 %v4054_v20  ;;  %v2717_v54 = vor.u32 %v3549_v46, %v2716_v43  ;;  %v3661_v43 = vld [vmem:[%s5621_s1 + $0x6d4] sm:$0xf0]  ;;  %v2417_v46 = vor.u32 %v3471_v31, %v2414_v32  ;;  %v3372_v31 = vld [vmem:[%s5621_s1 + $0x868] sm:$0xf] }
  0xa7   :  { %2055 = vmatpush.bf16.msrb.mxu1 %v2797_v47  ;;  %2068 = vmatpush.bf16.msrb.mxu2 %v2925_v48  ;;  %v2844_v47 = vld [vmem:[%s5621_s1 + $0x448] sm:$0xf]  ;;  %v3581_v48 = vld [vmem:[%s5621_s1 + $0x454] sm:$0xf0] }
  0xa8   :  { %2081 = vmatpush.bf16.msrb.mxu3 %v3053_v52  ;;  %v2589_v52 = vor.u32 %v3517_v40, %v2588_v39  ;;  %v2845_v55 = vor.u32 %v3581_v48, %v2844_v47  ;;  %v3437_v39 = vor.u32 %v3729_v27, %v3436_v26  ;;  %v3164_v40 = vld [vmem:[%s5621_s1 + $0x6c8] sm:$0xf]  ;;  %v3693_v47 = vld [vmem:[%s5621_s1 + $0x7d4] sm:$0xf0] }
  0xa9   :  { %2043 = vmatpush.bf16.msrb.mxu0 %v2653_v58  ;;  %2037 = vmatmul.bf16.vlgmr.msra.gmra.mxu3 %v4057_v21  ;;  %v2700_v58 = vld [vmem:[%s5621_s1 + $0x328] sm:$0xf]  ;;  %v3717_v15 = vld [vmem:[%s5621_s1 + $0x894] sm:$0xf0] }
  0xaa   :  { %v3420_v48 = vld [vmem:[%s5621_s1 + $0x8c8] sm:$0xf]  ;;  %v3649_v26 = vld [vmem:[%s5621_s1 + $0x674] sm:$0xf0] }
  0xab   :  { %2056 = vmatpush.bf16.msrb.mxu1 %v2781_v59  ;;  %2069 = vmatpush.bf16.msrb.mxu2 %v2909_v60  ;;  %v4925_v59 = vpop.f32.mrf.mxu2  ;;  %v2973_v60 = vor.u32 %v3613_v50, %v2972_v49  ;;  %v3725_v49 = vld [vmem:[%s5621_s1 + $0x8d4] sm:$0xf0]  ;;  %v3467_v50 = vld [vmem:[%s5621_s1 + $0xcc] sm:$0xf]  ;;  %v3244_v27 = vld [vmem:[%s5621_s1 + $0x768] sm:$0xf] }
  0xac   :  { %2082 = vmatpush.bf16.msrb.mxu3 %v3037_v0  ;;  %v4936_v0 = vpop.f32.mrf.mxu3  ;;  %v3421_v56 = vor.u32 %v3725_v49, %v3420_v48  ;;  %v3713_v32 = vld [vmem:[%s5621_s1 + $0x874] sm:$0xf0] }
  0xad   :  { %2044 = vmatpush.bf16.msrb.mxu0 %v2637_v8  ;;  %v2701_v8 = vor.u32 %v3545_v61, %v2700_v58  ;;  %v3657_v58 = vld [vmem:[%s5621_s1 + $0x6b4] sm:$0xf0] }
  0xae   :  { %v3709_v48 = vld [vmem:[%s5621_s1 + $0x854] sm:$0xf0] }
  0xaf   :  { %2057 = vmatpush.bf16.msrb.mxu1 %v2765_v9  ;;  %2070 = vmatpush.bf16.msrb.mxu2 %v2893_v10  ;;  %v4912_v51 = vpop.f32.mrf.mxu0  ;;  %v4914_v53 = vpop.f32.mrf.mxu1  ;;  %v2829_v9 = vor.u32 %v3577_v63, %v2828_v62  ;;  %v2684_v10 = vld [vmem:[%s5621_s1 + $0x308] sm:$0xf]  ;;  %v3689_v62 = vld [vmem:[%s5621_s1 + $0x7b4] sm:$0xf0] }
  0xb0   :  { %2083 = vmatpush.bf16.msrb.mxu3 %v3021_v14  ;;  %v3573_v14 = vld [vmem:[%s5621_s1 + $0x414] sm:$0xf0]  ;;  %v3404_v63 = vld [vmem:[%s5621_s1 + $0x8a8] sm:$0xf] }
  0xb1   :  { %2045 = vmatpush.bf16.msrb.mxu0 %v2621_v23  ;;  %v2813_v30 = vor.u32 %v3573_v14, %v2812_v12  ;;  %v3388_v14 = vld [vmem:[%s5621_s1 + $0x888] sm:$0xf] }
  0xb3   :  { %2058 = vmatpush.bf16.msrb.mxu1 %v2749_v24  ;;  %2071 = vmatpush.bf16.msrb.mxu2 %v2877_v25  ;;  %v2557_v24 = vor.u32 %v3509_v7, %v2556_v5  ;;  %v3697_v25 = vld [vmem:[%s5621_s1 + $0x7f4] sm:$0xf0]  ;;  %v1819_v33 = vpop.f32.mrf.mxu2  ;;  %v3149_v5 = vor.u32 %v3657_v58, %v3148_v57 }
  0xb4   :  { %2084 = vmatpush.bf16.msrb.mxu3 %v3005_v29  ;;  %v2685_v29 = vor.u32 %v3541_v11, %v2684_v10  ;;  %v3653_v10 = vld [vmem:[%s5621_s1 + $0x694] sm:$0xf0]  ;;  %v3260_v11 = vld [vmem:[%s5621_s1 + $0x788] sm:$0xf]  ;;  %v3455_v33 = vld [vmem:[%s5621_s1 + $0x6c] sm:$0xf] }
  0xb5   :  { %2046 = vmatpush.bf16.msrb.mxu0 %v2605_v35  ;;  %v3181_v35 = vor.u32 %v3665_v18, %v3180_v17  ;;  %v2366_v17 = vld [vmem:[%s5621_s1 + $0x98] sm:$0xf0] }
  0xb7   :  { %2059 = vmatpush.bf16.msrb.mxu1 %v2733_v36  ;;  %2072 = vmatpush.bf16.msrb.mxu2 %v2861_v37  ;;  %v1793_v23 = vpop.f32.mrf.mxu0  ;;  %v1806_v28 = vpop.f32.mrf.mxu1  ;;  %v3309_v37 = vor.u32 %v3697_v25, %v3308_v22  ;;  %v3116_v25 = vld [vmem:[%s5621_s1 + $0x668] sm:$0xf] }
  0xb8   :  { %2085 = vmatpush.bf16.msrb.mxu3 %v2989_v45  ;;  %v1832_v36 = vpop.f32.mrf.mxu3  ;;  %v3292_v45 = vld [vmem:[%s5621_s1 + $0x7c8] sm:$0xf] }
  0xb9   :  { %2047 = vmatpush.bf16.msrb.mxu0 %v2589_v52  ;;  %v2398_v52 = vld [vmem:[%s5621_s1 + $0xd8] sm:$0xf0]  ;;  %v3117_v36 = vor.u32 %v3649_v26, %v3116_v25  ;;  %v3503_v26 = vld [vmem:[%s5621_s1 + $0x1ec] sm:$0xf] }
  0xba   :  { %v2401_v61 = vor.u32 %v3467_v50, %v2398_v52  ;;  %v3451_v50 = vld [vmem:[%s5621_s1 + $0x4c] sm:$0xf]  ;;  %v2334_v52 = vld [vmem:[%s5621_s1 + $0x58] sm:$0xf0] }
  0xbb   :  { %2060 = vmatpush.bf16.msrb.mxu1 %v2717_v54  ;;  %2073 = vmatpush.bf16.msrb.mxu2 %v2845_v55  ;;  %v3165_v54 = vor.u32 %v3661_v43, %v3164_v40  ;;  %v3293_v55 = vor.u32 %v3693_v47, %v3292_v45  ;;  %v3100_v40 = vld [vmem:[%s5621_s1 + $0x648] sm:$0xf]  ;;  %v3645_v43 = vld [vmem:[%s5621_s1 + $0x654] sm:$0xf0] }
  0xbc   :  { %2086 = vmatpush.bf16.msrb.mxu3 %v2973_v60  ;;  %v3276_v60 = vld [vmem:[%s5621_s1 + $0x7a8] sm:$0xf] }
  0xbd   :  { %2048 = vmatpush.bf16.msrb.mxu0 %v2573_v3  ;;  %v2382_v3 = vld [vmem:[%s5621_s1 + $0xb8] sm:$0xf0]  ;;  %v3277_v7 = vor.u32 %v3689_v62, %v3276_v60  ;;  %v3228_v45 = vld [vmem:[%s5621_s1 + $0x748] sm:$0xf] }
  0xbe   :  { %v2385_v12 = vor.u32 %v3463_v2, %v2382_v3  ;;  %v3356_v47 = vld [vmem:[%s5621_s1 + $0x848] sm:$0xf]  ;;  %v3705_v3 = vld [vmem:[%s5621_s1 + $0x834] sm:$0xf0] }
  0xbf   :  { %2061 = vmatpush.bf16.msrb.mxu1 %v2701_v8  ;;  %2074 = vmatpush.bf16.msrb.mxu2 %v2829_v9  ;;  %v3405_v8 = vor.u32 %v3721_v1, %v3404_v63  ;;  %v3132_v9 = vld [vmem:[%s5621_s1 + $0x688] sm:$0xf]  ;;  %v3357_v58 = vor.u32 %v3709_v48, %v3356_v47  ;;  %v2337_v63 = vor.u32 %v3451_v50, %v2334_v52  ;;  %v3673_v1 = vld [vmem:[%s5621_s1 + $0x734] sm:$0xf0]  ;;  %v3531_v47 = vld [vmem:[%s5621_s1 + $0x2cc] sm:$0xf] }
  0xc0   :  { %2087 = vmatpush.bf16.msrb.mxu3 %v2957_v13  ;;  %v3685_v13 = vld [vmem:[%s5621_s1 + $0x794] sm:$0xf0]  ;;  %v3133_v18 = vor.u32 %v3653_v10, %v3132_v9  ;;  %v3084_v60 = vld [vmem:[%s5621_s1 + $0x628] sm:$0xf]  ;;  %v2654_v52 = vld [vmem:[%s5621_s1 + $0x2d8] sm:$0xf0] }
  0xc1   :  { %2049 = vmatpush.bf16.msrb.mxu0 %v2557_v24  ;;  %v3261_v23 = vor.u32 %v3685_v13, %v3260_v11  ;;  %v3389_v24 = vor.u32 %v3717_v15, %v3388_v14  ;;  %v3212_v62 = vld [vmem:[%s5621_s1 + $0x728] sm:$0xf]  ;;  %v3637_v11 = vld [vmem:[%s5621_s1 + $0x614] sm:$0xf0] }
  0xc2   :  { %v3340_v2 = vld [vmem:[%s5621_s1 + $0x828] sm:$0xf] }
  0xc3   :  { %2062 = vmatpush.bf16.msrb.mxu1 %v2685_v29  ;;  %2075 = vmatpush.bf16.msrb.mxu2 %v2813_v30  ;;  %v5068_v22 = vpop.f32.mrf.mxu0  ;;  %v2369_v29 = vor.u32 %v3459_v16, %v2366_v17  ;;  %v3681_v30 = vld [vmem:[%s5621_s1 + $0x774] sm:$0xf0]  ;;  %v3068_v10 = vld [vmem:[%s5621_s1 + $0x608] sm:$0xf]  ;;  %v3341_v13 = vor.u32 %v3705_v3, %v3340_v2  ;;  %v2638_v3 = vld [vmem:[%s5621_s1 + $0x2b8] sm:$0xf0] }
  0xc4   :  { %2088 = vmatpush.bf16.msrb.mxu3 %v2941_v34  ;;  %2050 = vmatmul.bf16.vlgmr.msrb.gmra.mxu0 %v4022_v4  ;;  %v2350_v34 = vld [vmem:[%s5621_s1 + $0x78] sm:$0xf0]  ;;  %v3196_v14 = vld [vmem:[%s5621_s1 + $0x708] sm:$0xf] }
  0xc5   :  { %2094 = vmatpush.bf16.msra.mxu0 %v3181_v35  ;;  %v5079_v28 = vpop.f32.mrf.mxu1  ;;  %v1805_v35 = vadd.f32 %v4914_v53, %v4912_v51  ;;  %v2353_v51 = vor.u32 %v3455_v33, %v2350_v34  ;;  %v3677_v53 = vld [vmem:[%s5621_s1 + $0x754] sm:$0xf0]  ;;  %v3324_v15 = vld [vmem:[%s5621_s1 + $0x808] sm:$0xf]  ;;  %v3567_v33 = vld [vmem:[%s5621_s1 + $0x3ec] sm:$0xf] }
  0xc6   :  { %2076 = vmatmul.bf16.vlgmr.msrb.gmra.mxu2 %v4213_v41  ;;  %2063 = vmatmul.bf16.vlgmr.msrb.gmra.mxu1 %v4027_v6  ;;  %v3229_v57 = vor.u32 %v3677_v53, %v3228_v45  ;;  %v2798_v34 = vld [vmem:[%s5621_s1 + $0x3f8] sm:$0xf0] }
  0xc7   :  { %2107 = vmatpush.bf16.msra.mxu1 %v3309_v37  ;;  %2120 = vmatpush.bf16.msra.mxu2 %v3437_v39  ;;  %v3245_v37 = vor.u32 %v3681_v30, %v3244_v27  ;;  %v3373_v39 = vor.u32 %v3713_v32, %v3372_v31  ;;  %v2542_v27 = vld [vmem:[%s5621_s1 + $0x1f8] sm:$0xf0]  ;;  %v3069_v31 = vor.u32 %v3637_v11, %v3068_v10  ;;  %v5263_v11 = vld [vmem:[%s5624_s3] sm:$0xf] }
  0xc8   :  { %2133 = vmatpush.bf16.msra.mxu3 %v2417_v46  ;;  %v2670_v32 = vld [vmem:[%s5621_s1 + $0x2f8] sm:$0xf0]  ;;  %v2801_v45 = vor.u32 %v3567_v33, %v2798_v34  ;;  %v3519_v34 = vld [vmem:[%s5621_s1 + $0x26c] sm:$0xf] }
  0xc9   :  { %2089 = vmatmul.bf16.vlgmr.msrb.gmra.mxu3 %v4217_v44  ;;  %2095 = vmatpush.bf16.msra.mxu0 %v3165_v54  ;;  %v5107_v46 = vpop.f32.mrf.mxu2  ;;  %v1818_v54 = vadd.f32 %v4925_v59, %v1805_v35  ;;  %v2526_v53 = vld [vmem:[%s5621_s1 + $0x1d8] sm:$0xf0] }
  0xca   :  { %v2478_v33 = vld [vmem:[%s5621_s1 + $0x178] sm:$0xf0] }
  0xcb   :  { %2108 = vmatpush.bf16.msra.mxu1 %v3293_v55  ;;  %2121 = vmatpush.bf16.msra.mxu2 %v3421_v56  ;;  %v3101_v55 = vor.u32 %v3645_v43, %v3100_v40  ;;  %v1845_v56 = vpop.f32.mrf.mxu0  ;;  %v2545_v40 = vor.u32 %v3503_v26, %v2542_v27  ;;  %v2266_v27 = vperm.slane %v5263_v11, 0 }
  0xcc   :  { %2134 = vmatpush.bf16.msra.mxu3 %v2401_v61  ;;  %v5118_v49 = vpop.f32.mrf.mxu3  ;;  %v3641_v61 = vld [vmem:[%s5621_s1 + $0x634] sm:$0xf0]  ;;  %v2910_v56 = vld [vmem:[%s5621_s1 + $0x4d8] sm:$0xf0] }
  0xcd   :  { %2096 = vmatpush.bf16.msra.mxu0 %v3149_v5  ;;  %v1858_v59 = vpop.f32.mrf.mxu1  ;;  %v3447_v5 = vld [vmem:[%s5621_s1 + $0x2c] sm:$0xf]  ;;  %v3085_v9 = vor.u32 %v3641_v61, %v3084_v60  ;;  %v2657_v60 = vor.u32 %v3531_v47, %v2654_v52  ;;  %v2462_v52 = vld [vmem:[%s5621_s1 + $0x158] sm:$0xf0] }
  0xce   :  { %v3527_v59 = vld [vmem:[%s5621_s1 + $0x2ac] sm:$0xf] }
  0xcf   :  { %2109 = vmatpush.bf16.msra.mxu1 %v3277_v7  ;;  %2122 = vmatpush.bf16.msra.mxu2 %v3405_v8  ;;  %v2318_v7 = vld [vmem:[%s5621_s1 + $0x38] sm:$0xf0]  ;;  %v1831_v8 = vadd.f32 %v4936_v0, %v1818_v54  ;;  %v3669_v0 = vld [vmem:[%s5621_s1 + $0x714] sm:$0xf0]  ;;  %v3563_v54 = vld [vmem:[%s5621_s1 + $0x3cc] sm:$0xf] }
  0xd0   :  { %2135 = vmatpush.bf16.msra.mxu3 %v2385_v12  ;;  %v3213_v12 = vor.u32 %v3673_v1, %v3212_v62  ;;  %v2321_v17 = vor.u32 %v3447_v5, %v2318_v7  ;;  %v3197_v35 = vor.u32 %v3669_v0, %v3196_v14  ;;  %v2510_v62 = vld [vmem:[%s5621_s1 + $0x1b8] sm:$0xf0]  ;;  %v3559_v5 = vld [vmem:[%s5621_s1 + $0x3ac] sm:$0xf] }
  0xd1   :  { %2097 = vmatpush.bf16.msra.mxu0 %v3133_v18  ;;  %v1871_v16 = vpop.f32.mrf.mxu2  ;;  %v3701_v18 = vld [vmem:[%s5621_s1 + $0x814] sm:$0xf0]  ;;  %v1844_v30 = vadd.f32 %v5068_v22, %v1831_v8  ;;  %v3599_v22 = vld [vmem:[%s5621_s1 + $0x4ec] sm:$0xf]  ;;  %v2766_v7 = vld [vmem:[%s5621_s1 + $0x3b8] sm:$0xf0] }
  0xd2   :  { %v2894_v8 = vld [vmem:[%s5621_s1 + $0x4b8] sm:$0xf0]  ;;  %v3491_v14 = vld [vmem:[%s5621_s1 + $0x18c] sm:$0xf] }
  0xd3   :  { %2110 = vmatpush.bf16.msra.mxu1 %v3261_v23  ;;  %2123 = vmatpush.bf16.msra.mxu2 %v3389_v24  ;;  %v3443_v23 = vld [vmem:[%s5621_s1 + $0xc] sm:$0xf]  ;;  %v2302_v24 = vld [vmem:[%s5621_s1 + $0x18] sm:$0xf0]  ;;  %v1857_v48 = vadd.f32 %v5079_v28, %v1844_v30 }
  0xd4   :  { %2136 = vmatpush.bf16.msra.mxu3 %v2369_v29  ;;  %v1884_v25 = vpop.f32.mrf.mxu3  ;;  %v3535_v29 = vld [vmem:[%s5621_s1 + $0x2ec] sm:$0xf]  ;;  %v2494_v0 = vld [vmem:[%s5621_s1 + $0x198] sm:$0xf0] }
  0xd5   :  { %2098 = vmatpush.bf16.msra.mxu0 %v3117_v36  ;;  %v3325_v36 = vor.u32 %v3701_v18, %v3324_v15  ;;  %v2673_v43 = vor.u32 %v3535_v29, %v2670_v32  ;;  %v3595_v28 = vld [vmem:[%s5621_s1 + $0x4cc] sm:$0xf]  ;;  %v1870_v1 = vadd.f32 %v5107_v46, %v1857_v48  ;;  %v2497_v29 = vor.u32 %v3491_v14, %v2494_v0  ;;  %v2702_v14 = vld [vmem:[%s5621_s1 + $0x338] sm:$0xf0] }
  0xd6   :  { %v2913_v2 = vor.u32 %v3595_v28, %v2910_v56  ;;  %v3591_v46 = vld [vmem:[%s5621_s1 + $0x4ac] sm:$0xf] }
  0xd7   :  { %2111 = vmatpush.bf16.msra.mxu1 %v3245_v37  ;;  %2124 = vmatpush.bf16.msra.mxu2 %v3373_v39  ;;  %v2926_v37 = vld [vmem:[%s5621_s1 + $0x4f8] sm:$0xf0]  ;;  %v2305_v39 = vor.u32 %v3443_v23, %v2302_v24  ;;  %v3523_v15 = vld [vmem:[%s5621_s1 + $0x28c] sm:$0xf]  ;;  %v1883_v16 = vadd.f32 %v5118_v49, %v1870_v1 }
  0xd8   :  { %2137 = vmatpush.bf16.msra.mxu3 %v2353_v51  ;;  %v3499_v51 = vld [vmem:[%s5621_s1 + $0x1cc] sm:$0xf]  ;;  %v2929_v50 = vor.u32 %v3599_v22, %v2926_v37  ;;  %v2750_v23 = vld [vmem:[%s5621_s1 + $0x398] sm:$0xf0] }
  0xd9   :  { %2099 = vmatpush.bf16.msra.mxu0 %v3101_v55  ;;  %v2782_v55 = vld [vmem:[%s5621_s1 + $0x3d8] sm:$0xf0]  ;;  %v3555_v18 = vld [vmem:[%s5621_s1 + $0x38c] sm:$0xf] }
  0xda   :  { %v2785_v61 = vor.u32 %v3563_v54, %v2782_v55  ;;  %v3587_v25 = vld [vmem:[%s5621_s1 + $0x48c] sm:$0xf]  ;;  %v2878_v49 = vld [vmem:[%s5621_s1 + $0x498] sm:$0xf0] }
  0xdb   :  { %2112 = vmatpush.bf16.msra.mxu1 %v3229_v57  ;;  %2125 = vmatpush.bf16.msra.mxu2 %v3357_v58  ;;  %v2529_v57 = vor.u32 %v3499_v51, %v2526_v53  ;;  %v3495_v58 = vld [vmem:[%s5621_s1 + $0x1ac] sm:$0xf]  ;;  %v2881_v22 = vor.u32 %v3587_v25, %v2878_v49  ;;  %v2606_v37 = vld [vmem:[%s5621_s1 + $0x278] sm:$0xf0] }
  0xdc   :  { %2138 = vmatpush.bf16.msra.mxu3 %v2337_v63  ;;  %v5238_v63 = vld [vmem:[%s5623_s2] sm:$0xf]  ;;  %v3487_v32 = vld [vmem:[%s5621_s1 + $0x16c] sm:$0xf]  ;;  %v2609_v48 = vor.u32 %v3519_v34, %v2606_v37  ;;  %v2590_v55 = vld [vmem:[%s5621_s1 + $0x258] sm:$0xf0] }
  0xdd   :  { %2100 = vmatpush.bf16.msra.mxu0 %v3085_v9  ;;  %v2513_v9 = vor.u32 %v3495_v58, %v2510_v62  ;;  %v2252_v10 = vperm.slane %v5238_v63, 0  ;;  %v2481_v53 = vor.u32 %v3487_v32, %v2478_v33  ;;  %v3483_v47 = vld [vmem:[%s5621_s1 + $0x14c] sm:$0xf]  ;;  %v2718_v58 = vld [vmem:[%s5621_s1 + $0x358] sm:$0xf0] }
  0xde   :  { %v3515_v54 = vld [vmem:[%s5621_s1 + $0x24c] sm:$0xf]  ;;  %v2558_v25 = vld [vmem:[%s5621_s1 + $0x218] sm:$0xf0] }
  0xdf   :  { %2113 = vmatpush.bf16.msra.mxu1 %v3213_v12  ;;  %2126 = vmatpush.bf16.msra.mxu2 %v3341_v13  ;;  %v2641_v12 = vor.u32 %v3527_v59, %v2638_v3  ;;  %v2769_v13 = vor.u32 %v3559_v5, %v2766_v7  ;;  %v3579_v62 = vld [vmem:[%s5621_s1 + $0x44c] sm:$0xf]  ;;  %v2846_v59 = vld [vmem:[%s5621_s1 + $0x458] sm:$0xf0]  ;;  %v2593_v3 = vor.u32 %v3515_v54, %v2590_v55 }
  0xe0   :  { %2139 = vmatpush.bf16.msra.mxu3 %v2321_v17  ;;  %v2622_v17 = vld [vmem:[%s5621_s1 + $0x298] sm:$0xf0]  ;;  %v3479_v7 = vld [vmem:[%s5621_s1 + $0x12c] sm:$0xf] }
  0xe1   :  { %2101 = vmatpush.bf16.msra.mxu0 %v3069_v31  ;;  %v1895_v24 = vpop.f32.mrf.mxu0  ;;  %v2625_v30 = vor.u32 %v3523_v15, %v2622_v17  ;;  %v2753_v31 = vor.u32 %v3555_v18, %v2750_v23  ;;  %v3575_v0 = vld [vmem:[%s5621_s1 + $0x42c] sm:$0xf]  ;;  %v2830_v15 = vld [vmem:[%s5621_s1 + $0x438] sm:$0xf0] }
  0xe2   :  { %v1896_v26 = vadd.f32 %v1895_v24, %v1883_v16  ;;  %v2430_v17 = vld [vmem:[%s5621_s1 + $0x118] sm:$0xf0]  ;;  %v3507_v24 = vld [vmem:[%s5621_s1 + $0x20c] sm:$0xf] }
  0xe3   :  { %2114 = vmatpush.bf16.msra.mxu1 %v3197_v35  ;;  %2127 = vmatpush.bf16.msra.mxu2 %v3325_v36  ;;  %v5301_v35 = vpop.f32.mrf.mxu1  ;;  %v3539_v49 = vld [vmem:[%s5621_s1 + $0x30c] sm:$0xf]  ;;  %v3054_v34 = vld [vmem:[%s5621_s1 + $0x5f8] sm:$0xf0] }
  0xe4   :  { %2140 = vmatpush.bf16.msra.mxu3 %v2305_v39  ;;  %2102 = vmatmul.bf16.vlgmr.msra.gmra.mxu0 %v4205_v38  ;;  %v2260_v36 = vmul.f32 %v2252_v10, %v1896_v26  ;;  %v3551_v39 = vld [vmem:[%s5621_s1 + $0x36c] sm:$0xf]  ;;  %v2849_v10 = vor.u32 %v3579_v62, %v2846_v59  ;;  %v2833_v26 = vor.u32 %v3575_v0, %v2830_v15  ;;  %v3182_v37 = vld [vmem:[%s5621_s1 + $0x6f8] sm:$0xf0] }
  0xe5   :  { %2146 = vmatpush.bf16.msrb.mxu0 %v2545_v40  ;;  %v2734_v40 = vld [vmem:[%s5621_s1 + $0x378] sm:$0xf0]  ;;  %v3631_v33 = vld [vmem:[%s5621_s1 + $0x5ec] sm:$0xf] }
  0xe6   :  { %2128 = vmatmul.bf16.vlgmr.msra.gmra.mxu2 %v4403_v19  ;;  %2115 = vmatmul.bf16.vlgmr.msra.gmra.mxu1 %v4215_v42  ;;  %v2274_v51 = vadd.f32 %v2266_v27, %v2260_v36  ;;  %v2686_v27 = vld [vmem:[%s5621_s1 + $0x318] sm:$0xf0]  ;;  %v3663_v36 = vld [vmem:[%s5621_s1 + $0x6ec] sm:$0xf] }
  0xe7   :  { %2159 = vmatpush.bf16.msrb.mxu1 %v2673_v43  ;;  %2172 = vmatpush.bf16.msrb.mxu2 %v2801_v45  ;;  %v3583_v43 = vld [vmem:[%s5621_s1 + $0x46c] sm:$0xf]  ;;  %v2862_v45 = vld [vmem:[%s5621_s1 + $0x478] sm:$0xf0] }
  0xe8   :  { %2185 = vmatpush.bf16.msrb.mxu3 %v2929_v50  ;;  %v2737_v50 = vor.u32 %v3551_v39, %v2734_v40  ;;  %v2278_v28 = vmax.f32 %v2274_v51, 0.0  ;;  %v2865_v56 = vor.u32 %v3583_v43, %v2862_v45  ;;  %v3695_v39 = vld [vmem:[%s5621_s1 + $0x7ec] sm:$0xf]  ;;  %v3310_v40 = vld [vmem:[%s5621_s1 + $0x7f8] sm:$0xf0]  ;;  %v2561_v43 = vor.u32 %v3507_v24, %v2558_v25 }
  0xe9   :  { %2147 = vmatpush.bf16.msrb.mxu0 %v2529_v57  ;;  %2141 = vmatmul.bf16.vlgmr.msra.gmra.mxu3 %v4054_v20  ;;  %v2897_v20 = vor.u32 %v3591_v46, %v2894_v8  ;;  %v3547_v57 = vld [vmem:[%s5621_s1 + $0x34c] sm:$0xf]  ;;  %v1897_v1 = vpop.f32.mrf.mxu0  ;;  %v2446_v46 = vld [vmem:[%s5621_s1 + $0x138] sm:$0xf0]  ;;  %v2689_v45 = vor.u32 %v3539_v49, %v2686_v27 }
  0xea   :  { %2282 = vst [vmem:[%s5625_s4] sm:$0xff] %v2278_v28  ;;  %v2721_v5 = vor.u32 %v3547_v57, %v2718_v58  ;;  %v3511_v8 = vld [vmem:[%s5621_s1 + $0x22c] sm:$0xf]  ;;  %v2449_v16 = vor.u32 %v3479_v7, %v2446_v46  ;;  %v3038_v55 = vld [vmem:[%s5621_s1 + $0x5d8] sm:$0xf0] }
  0xeb   :  { %2160 = vmatpush.bf16.msrb.mxu1 %v2657_v60  ;;  %2173 = vmatpush.bf16.msrb.mxu2 %v2785_v61  ;;  %v5336_v60 = vpop.f32.mrf.mxu2  ;;  %v3727_v51 = vld [vmem:[%s5621_s1 + $0x8ec] sm:$0xf]  ;;  %v3166_v57 = vld [vmem:[%s5621_s1 + $0x6d8] sm:$0xf0] }
  0xec   :  { %2186 = vmatpush.bf16.msrb.mxu3 %v2913_v2  ;;  %v5338_v61 = vpop.f32.mrf.mxu3  ;;  %v2465_v2 = vor.u32 %v3483_v47, %v2462_v52  ;;  %v3313_v52 = vor.u32 %v3695_v39, %v3310_v40  ;;  %v3627_v54 = vld [vmem:[%s5621_s1 + $0x5cc] sm:$0xf]  ;;  %v3294_v62 = vld [vmem:[%s5621_s1 + $0x7d8] sm:$0xf0] }
  0xed   :  { %2148 = vmatpush.bf16.msrb.mxu0 %v2513_v9  ;;  %v1910_v9 = vpop.f32.mrf.mxu1  ;;  %v3659_v28 = vld [vmem:[%s5621_s1 + $0x6cc] sm:$0xf]  ;;  %v3422_v1 = vld [vmem:[%s5621_s1 + $0x8d8] sm:$0xf0] }
  0xee   :  { %v3691_v58 = vld [vmem:[%s5621_s1 + $0x7cc] sm:$0xf]  ;;  %v3022_v46 = vld [vmem:[%s5621_s1 + $0x5b8] sm:$0xf0] }
  0xef   :  { %2161 = vmatpush.bf16.msrb.mxu1 %v2641_v12  ;;  %2174 = vmatpush.bf16.msrb.mxu2 %v2769_v13  ;;  %v2574_v12 = vld [vmem:[%s5621_s1 + $0x238] sm:$0xf0]  ;;  %v3543_v13 = vld [vmem:[%s5621_s1 + $0x32c] sm:$0xf] }
  0xf0   :  { %2187 = vmatpush.bf16.msrb.mxu3 %v2897_v20  ;;  %v3475_v20 = vld [vmem:[%s5621_s1 + $0x10c] sm:$0xf]  ;;  %v2577_v18 = vor.u32 %v3511_v8, %v2574_v12  ;;  %v2705_v23 = vor.u32 %v3543_v13, %v2702_v14  ;;  %v3278_v13 = vld [vmem:[%s5621_s1 + $0x7b8] sm:$0xf0] }
  0xf1   :  { %2149 = vmatpush.bf16.msrb.mxu0 %v2497_v29  ;;  %v3571_v29 = vld [vmem:[%s5621_s1 + $0x40c] sm:$0xf]  ;;  %v3406_v14 = vld [vmem:[%s5621_s1 + $0x8b8] sm:$0xf0] }
  0xf2   :  { %v3723_v59 = vld [vmem:[%s5621_s1 + $0x8cc] sm:$0xf]  ;;  %v3390_v25 = vld [vmem:[%s5621_s1 + $0x898] sm:$0xf0] }
  0xf3   :  { %2162 = vmatpush.bf16.msrb.mxu1 %v2625_v30  ;;  %2175 = vmatpush.bf16.msrb.mxu2 %v2753_v31  ;;  %v2814_v30 = vld [vmem:[%s5621_s1 + $0x418] sm:$0xf0]  ;;  %v1923_v31 = vpop.f32.mrf.mxu2  ;;  %v3623_v7 = vld [vmem:[%s5621_s1 + $0x5ac] sm:$0xf]  ;;  %v3425_v9 = vor.u32 %v3723_v59, %v3422_v1 }
  0xf4   :  { %2188 = vmatpush.bf16.msrb.mxu3 %v2881_v22  ;;  %v1936_v32 = vpop.f32.mrf.mxu3  ;;  %v2433_v22 = vor.u32 %v3475_v20, %v2430_v17  ;;  %v2817_v47 = vor.u32 %v3571_v29, %v2814_v30  ;;  %v3655_v8 = vld [vmem:[%s5621_s1 + $0x6ac] sm:$0xf]  ;;  %v3025_v0 = vor.u32 %v3623_v7, %v3022_v46  ;;  %v2990_v31 = vld [vmem:[%s5621_s1 + $0x578] sm:$0xf0] }
  0xf5   :  { %2150 = vmatpush.bf16.msrb.mxu0 %v2481_v53  ;;  %v3438_v53 = vld [vmem:[%s5621_s1 + $0x8f8] sm:$0xf0]  ;;  %v3687_v12 = vld [vmem:[%s5621_s1 + $0x7ac] sm:$0xf] }
  0xf6   :  { %v3651_v20 = vld [vmem:[%s5621_s1 + $0x68c] sm:$0xf]  ;;  %v3374_v40 = vld [vmem:[%s5621_s1 + $0x878] sm:$0xf0] }
  0xf7   :  { %2163 = vmatpush.bf16.msrb.mxu1 %v2609_v48  ;;  %2176 = vmatpush.bf16.msrb.mxu2 %v2737_v50  ;;  %v3057_v48 = vor.u32 %v3631_v33, %v3054_v34  ;;  %v3185_v50 = vor.u32 %v3663_v36, %v3182_v37  ;;  %v3715_v24 = vld [vmem:[%s5621_s1 + $0x88c] sm:$0xf]  ;;  %v3118_v36 = vld [vmem:[%s5621_s1 + $0x678] sm:$0xf0] }
  0xf8   :  { %2189 = vmatpush.bf16.msrb.mxu3 %v2865_v56  ;;  %v3441_v56 = vor.u32 %v3727_v51, %v3438_v53  ;;  %v3615_v30 = vld [vmem:[%s5621_s1 + $0x56c] sm:$0xf]  ;;  %v3393_v34 = vor.u32 %v3715_v24, %v3390_v25  ;;  %v3246_v37 = vld [vmem:[%s5621_s1 + $0x778] sm:$0xf0] }
  0xf9   :  { %2151 = vmatpush.bf16.msrb.mxu0 %v2465_v2  ;;  %v3041_v2 = vor.u32 %v3627_v54, %v3038_v55  ;;  %v3647_v32 = vld [vmem:[%s5621_s1 + $0x66c] sm:$0xf]  ;;  %v3102_v54 = vld [vmem:[%s5621_s1 + $0x658] sm:$0xf0] }
  0xfa   :  { %v3711_v39 = vld [vmem:[%s5621_s1 + $0x86c] sm:$0xf]  ;;  %v2958_v7 = vld [vmem:[%s5621_s1 + $0x538] sm:$0xf0] }
  0xfb   :  { %2164 = vmatpush.bf16.msrb.mxu1 %v2593_v3  ;;  %2177 = vmatpush.bf16.msrb.mxu2 %v2721_v5  ;;  %v3169_v3 = vor.u32 %v3659_v28, %v3166_v57  ;;  %v3297_v5 = vor.u32 %v3691_v58, %v3294_v62  ;;  %v3611_v53 = vld [vmem:[%s5621_s1 + $0x54c] sm:$0xf]  ;;  %v3230_v28 = vld [vmem:[%s5621_s1 + $0x758] sm:$0xf0]  ;;  %v1922_v62 = vadd.f32 %v5336_v60, %v5301_v35 }
  0xfc   :  { %2190 = vmatpush.bf16.msrb.mxu3 %v2849_v10  ;;  %v3150_v10 = vld [vmem:[%s5621_s1 + $0x6b8] sm:$0xf0]  ;;  %v3675_v55 = vld [vmem:[%s5621_s1 + $0x74c] sm:$0xf] }
  0xfd   :  { %2152 = vmatpush.bf16.msrb.mxu0 %v2449_v16  ;;  %v3153_v15 = vor.u32 %v3655_v8, %v3150_v10  ;;  %v3281_v16 = vor.u32 %v3687_v12, %v3278_v13  ;;  %v3707_v57 = vld [vmem:[%s5621_s1 + $0x84c] sm:$0xf]  ;;  %v3358_v58 = vld [vmem:[%s5621_s1 + $0x858] sm:$0xf0] }
  0xfe   :  { %v3639_v46 = vld [vmem:[%s5621_s1 + $0x62c] sm:$0xf]  ;;  %v3361_v60 = vor.u32 %v3707_v57, %v3358_v58  ;;  %v3086_v8 = vld [vmem:[%s5621_s1 + $0x638] sm:$0xf0] }
  0xff   :  { %2165 = vmatpush.bf16.msrb.mxu1 %v2577_v18  ;;  %2178 = vmatpush.bf16.msrb.mxu2 %v2705_v23  ;;  %v3683_v18 = vld [vmem:[%s5621_s1 + $0x78c] sm:$0xf]  ;;  %v3262_v23 = vld [vmem:[%s5621_s1 + $0x798] sm:$0xf0] }
 0x100   :  { %2191 = vmatpush.bf16.msrb.mxu3 %v2833_v26  ;;  %v3265_v29 = vor.u32 %v3683_v18, %v3262_v23  ;;  %v3214_v10 = vld [vmem:[%s5621_s1 + $0x738] sm:$0xf0]  ;;  %v3703_v12 = vld [vmem:[%s5621_s1 + $0x82c] sm:$0xf] }
 0x101   :  { %2153 = vmatpush.bf16.msrb.mxu0 %v2433_v22  ;;  %v5497_v26 = vpop.f32.mrf.mxu0  ;;  %v3679_v22 = vld [vmem:[%s5621_s1 + $0x76c] sm:$0xf]  ;;  %v3342_v13 = vld [vmem:[%s5621_s1 + $0x838] sm:$0xf0] }
 0x102   :  { %v3249_v51 = vor.u32 %v3679_v22, %v3246_v37  ;;  %v3198_v18 = vld [vmem:[%s5621_s1 + $0x718] sm:$0xf0]  ;;  %v3699_v24 = vld [vmem:[%s5621_s1 + $0x80c] sm:$0xf] }
 0x103   :  { %2166 = vmatpush.bf16.msrb.mxu1 %v2561_v43  ;;  %2179 = vmatpush.bf16.msrb.mxu2 %v2689_v45  ;;  %v5508_v33 = vpop.f32.mrf.mxu1  ;;  %v2993_v43 = vor.u32 %v3615_v30, %v2990_v31  ;;  %v3121_v45 = vor.u32 %v3647_v32, %v3118_v36  ;;  %v3326_v25 = vld [vmem:[%s5621_s1 + $0x818] sm:$0xf0] }
 0x104   :  { %2192 = vmatpush.bf16.msrb.mxu3 %v2817_v47  ;;  %2154 = vmatmul.bf16.vlgmr.msrb.gmra.mxu0 %v4057_v21  ;;  %v3619_v21 = vld [vmem:[%s5621_s1 + $0x58c] sm:$0xf]  ;;  %v2974_v47 = vld [vmem:[%s5621_s1 + $0x558] sm:$0xf0]  ;;  %v3329_v31 = vor.u32 %v3699_v24, %v3326_v25 }
 0x105   :  { %2198 = vmatpush.bf16.msra.mxu0 %v3057_v48  ;;  %v3643_v48 = vld [vmem:[%s5621_s1 + $0x64c] sm:$0xf]  ;;  %v2977_v59 = vor.u32 %v3611_v53, %v2974_v47 }
 0x106   :  { %2180 = vmatmul.bf16.vlgmr.msrb.gmra.mxu2 %v4027_v6  ;;  %v3719_v6 = vld [vmem:[%s5621_s1 + $0x8ac] sm:$0xf]  ;;  %2167 = vmatmul.bf16.vlgmr.msrb.gmra.mxu1 %v4022_v4  ;;  %v3134_v4 = vld [vmem:[%s5621_s1 + $0x698] sm:$0xf0] }
 0x107   :  { %2211 = vmatpush.bf16.msra.mxu1 %v3185_v50  ;;  %2224 = vmatpush.bf16.msra.mxu2 %v3313_v52  ;;  %v3409_v17 = vor.u32 %v3719_v6, %v3406_v14  ;;  %v3137_v27 = vor.u32 %v3651_v20, %v3134_v4  ;;  %v3377_v52 = vor.u32 %v3711_v39, %v3374_v40  ;;  %v3667_v4 = vld [vmem:[%s5621_s1 + $0x70c] sm:$0xf]  ;;  %v2253_v39 = vperm.slane %v5238_v63, 1 }
 0x108   :  { %2237 = vmatpush.bf16.msra.mxu3 %v3441_v56  ;;  %v1935_v6 = vadd.f32 %v5338_v61, %v1922_v62  ;;  %v3345_v61 = vor.u32 %v3703_v12, %v3342_v13  ;;  %v3201_v30 = vor.u32 %v3667_v4, %v3198_v18  ;;  %v2267_v40 = vperm.slane %v5263_v11, 1 }
 0x109   :  { %2193 = vmatmul.bf16.vlgmr.msrb.gmra.mxu3 %v4213_v41  ;;  %2199 = vmatpush.bf16.msra.mxu0 %v3041_v2  ;;  %v3006_v41 = vld [vmem:[%s5621_s1 + $0x598] sm:$0xf0]  ;;  %v1973_v50 = vpop.f32.mrf.mxu2  ;;  %v1949_v1 = vpop.f32.mrf.mxu0  ;;  %v3105_v2 = vor.u32 %v3643_v48, %v3102_v54 }
 0x10a   :  { %v3009_v49 = vor.u32 %v3619_v21, %v3006_v41  ;;  %v2942_v21 = vld [vmem:[%s5621_s1 + $0x518] sm:$0xf0]  ;;  %v3635_v41 = vld [vmem:[%s5621_s1 + $0x60c] sm:$0xf] }
 0x10b   :  { %2212 = vmatpush.bf16.msra.mxu1 %v3169_v3  ;;  %2225 = vmatpush.bf16.msra.mxu2 %v3297_v5  ;;  %v3233_v3 = vor.u32 %v3675_v55, %v3230_v28  ;;  %v3607_v5 = vld [vmem:[%s5621_s1 + $0x52c] sm:$0xf]  ;;  %v1962_v35 = vpop.f32.mrf.mxu1 }
 0x10c   :  { %2238 = vmatpush.bf16.msra.mxu3 %v3425_v9  ;;  %v1986_v56 = vpop.f32.mrf.mxu3  ;;  %v3671_v9 = vld [vmem:[%s5621_s1 + $0x72c] sm:$0xf]  ;;  %v2961_v14 = vor.u32 %v3607_v5, %v2958_v7  ;;  %v2254_v35 = vperm.slane %v5238_v63, 2 }
 0x10d   :  { %2200 = vmatpush.bf16.msra.mxu0 %v3025_v0  ;;  %v3089_v0 = vor.u32 %v3639_v46, %v3086_v8 }
 0x10f   :  { %2213 = vmatpush.bf16.msra.mxu1 %v3153_v15  ;;  %2226 = vmatpush.bf16.msra.mxu2 %v3281_v16  ;;  %v3217_v15 = vor.u32 %v3671_v9, %v3214_v10  ;;  %v3603_v16 = vld [vmem:[%s5621_s1 + $0x50c] sm:$0xf]  ;;  %v2268_v9 = vperm.slane %v5263_v11, 2 }
 0x110   :  { %2239 = vmatpush.bf16.msra.mxu3 %v3409_v17  ;;  %v3070_v17 = vld [vmem:[%s5621_s1 + $0x618] sm:$0xf0] }
 0x111   :  { %2201 = vmatpush.bf16.msra.mxu0 %v3009_v49  ;;  %v1975_v20 = vpop.f32.mrf.mxu2  ;;  %v1948_v49 = vadd.f32 %v5497_v26, %v1935_v6 }
 0x113   :  { %2214 = vmatpush.bf16.msra.mxu1 %v3137_v27  ;;  %2227 = vmatpush.bf16.msra.mxu2 %v3265_v29  ;;  %v2945_v27 = vor.u32 %v3603_v16, %v2942_v21  ;;  %v3073_v29 = vor.u32 %v3635_v41, %v3070_v17  ;;  %v1961_v32 = vadd.f32 %v5508_v33, %v1948_v49 }
 0x114   :  { %2240 = vmatpush.bf16.msra.mxu3 %v3393_v34  ;;  %v1988_v23 = vpop.f32.mrf.mxu3 }
 0x115   :  { %2202 = vmatpush.bf16.msra.mxu0 %v2993_v43  ;;  %v1974_v34 = vadd.f32 %v1973_v50, %v1961_v32 }
 0x117   :  { %2215 = vmatpush.bf16.msra.mxu1 %v3121_v45  ;;  %2228 = vmatpush.bf16.msra.mxu2 %v3249_v51  ;;  %v1987_v26 = vadd.f32 %v1986_v56, %v1974_v34 }
 0x118   :  { %2241 = vmatpush.bf16.msra.mxu3 %v3377_v52 }
 0x119   :  { %2203 = vmatpush.bf16.msra.mxu0 %v2977_v59 }
 0x11b   :  { %2216 = vmatpush.bf16.msra.mxu1 %v3105_v2  ;;  %2229 = vmatpush.bf16.msra.mxu2 %v3233_v3 }
 0x11c   :  { %2242 = vmatpush.bf16.msra.mxu3 %v3361_v60 }
 0x11d   :  { %2204 = vmatpush.bf16.msra.mxu0 %v2961_v14 }
 0x11f   :  { %2217 = vmatpush.bf16.msra.mxu1 %v3089_v0  ;;  %2230 = vmatpush.bf16.msra.mxu2 %v3217_v15 }
 0x120   :  { %2243 = vmatpush.bf16.msra.mxu3 %v3345_v61 }
 0x121   :  { %2205 = vmatpush.bf16.msra.mxu0 %v2945_v27  ;;  %v1999_v36 = vpop.f32.mrf.mxu0 }
 0x122   :  { %v2000_v22 = vadd.f32 %v1999_v36, %v1987_v26 }
 0x123   :  { %2218 = vmatpush.bf16.msra.mxu1 %v3073_v29  ;;  %2231 = vmatpush.bf16.msra.mxu2 %v3201_v30  ;;  %v2012_v37 = vpop.f32.mrf.mxu1 }
 0x124   :  { %2244 = vmatpush.bf16.msra.mxu3 %v3329_v31  ;;  %2206 = vmatmul.bf16.vlgmr.msra.gmra.mxu0 %v4217_v44  ;;  %v2013_v33 = vadd.f32 %v2012_v37, %v2000_v22  ;;  %v2255_v22 = vperm.slane %v5238_v63, 3 }
 0x126   :  { %2219 = vmatmul.bf16.vlgmr.msra.gmra.mxu1 %v4205_v38  ;;  %2232 = vmatmul.bf16.vlgmr.msra.gmra.mxu2 %v4215_v42  ;;  %v2261_v43 = vmul.f32 %v2253_v39, %v2013_v33 }
 0x127   :  { %2245 = vmatmul.bf16.vlgmr.msra.gmra.mxu3 %v4403_v19 }
 0x128   :  { %v2275_v45 = vadd.f32 %v2267_v40, %v2261_v43  ;;  %v2269_v40 = vperm.slane %v5263_v11, 3 }
 0x129   :  { %v2025_v51 = vpop.f32.mrf.mxu2  ;;  %v2001_v53 = vpop.f32.mrf.mxu0 }
 0x12a   :  { %v2279_v47 = vmax.f32 %v2275_v45, 0.0 }
 0x12b   :  { %v2014_v38 = vpop.f32.mrf.mxu1 }
 0x12c   :  { %v2038_v44 = vpop.f32.mrf.mxu3  ;;  %2283 = vst [vmem:[%s5625_s4 + $0x8] sm:$0xff] %v2279_v47 }
 0x12d   :  { %v2039_v56 = vadd.f32 %v2038_v44, %v2025_v51 }
 0x131   :  { %v2027_v42 = vpop.f32.mrf.mxu2 }
 0x134   :  { %v2040_v19 = vpop.f32.mrf.mxu3 }
 0x141   :  { %v2051_v48 = vpop.f32.mrf.mxu0 }
 0x142   :  { %v2052_v62 = vadd.f32 %v2051_v48, %v2039_v56 }
 0x143   :  { %v2064_v50 = vpop.f32.mrf.mxu1 }
 0x144   :  { %v2065_v59 = vadd.f32 %v2064_v50, %v2052_v62 }
 0x149   :  { %v2077_v52 = vpop.f32.mrf.mxu2  ;;  %v2053_v55 = vpop.f32.mrf.mxu0 }
 0x14a   :  { %v2078_v1 = vadd.f32 %v2077_v52, %v2065_v59 }
 0x14b   :  { %v2066_v28 = vpop.f32.mrf.mxu1 }
 0x14c   :  { %v2090_v54 = vpop.f32.mrf.mxu3 }
 0x14d   :  { %v2091_v2 = vadd.f32 %v2090_v54, %v2078_v1 }
 0x151   :  { %v2079_v57 = vpop.f32.mrf.mxu2 }
 0x154   :  { %v2092_v58 = vpop.f32.mrf.mxu3 }
 0x161   :  { %v2103_v3 = vpop.f32.mrf.mxu0 }
 0x162   :  { %v2104_v7 = vadd.f32 %v2103_v3, %v2091_v2 }
 0x163   :  { %v2116_v5 = vpop.f32.mrf.mxu1 }
 0x164   :  { %v2117_v46 = vadd.f32 %v2116_v5, %v2104_v7 }
 0x169   :  { %v2129_v60 = vpop.f32.mrf.mxu2  ;;  %v2105_v12 = vpop.f32.mrf.mxu0 }
 0x16a   :  { %v2130_v8 = vadd.f32 %v2129_v60, %v2117_v46 }
 0x16b   :  { %v2118_v13 = vpop.f32.mrf.mxu1 }
 0x16c   :  { %v2142_v10 = vpop.f32.mrf.mxu3  ;;  %v2262_v6 = vmul.f32 %v2254_v35, %v2130_v8 }
 0x16e   :  { %v2276_v14 = vadd.f32 %v2268_v9, %v2262_v6 }
 0x170   :  { %v2280_v0 = vmax.f32 %v2276_v14, 0.0 }
 0x171   :  { %v2131_v15 = vpop.f32.mrf.mxu2 }
 0x172   :  { %2284 = vst [vmem:[%s5625_s4 + $0x10] sm:$0xff] %v2280_v0 }
 0x174   :  { %v2144_v16 = vpop.f32.mrf.mxu3 }
 0x181   :  { %v2155_v21 = vpop.f32.mrf.mxu0 }
 0x182   :  { %v2156_v24 = vadd.f32 %v2155_v21, %v2142_v10 }
 0x183   :  { %v2168_v41 = vpop.f32.mrf.mxu1 }
 0x184   :  { %v2169_v25 = vadd.f32 %v2168_v41, %v2156_v24 }
 0x189   :  { %v2181_v20 = vpop.f32.mrf.mxu2  ;;  %v2157_v17 = vpop.f32.mrf.mxu0 }
 0x18a   :  { %v2182_v49 = vadd.f32 %v2181_v20, %v2169_v25 }
 0x18b   :  { %v2170_v4 = vpop.f32.mrf.mxu1 }
 0x18c   :  { %v2194_v61 = vpop.f32.mrf.mxu3 }
 0x18d   :  { %v2195_v27 = vadd.f32 %v2194_v61, %v2182_v49 }
 0x191   :  { %v2183_v18 = vpop.f32.mrf.mxu2 }
 0x194   :  { %v2196_v23 = vpop.f32.mrf.mxu3 }
 0x1a1   :  { %v2207_v29 = vpop.f32.mrf.mxu0 }
 0x1a2   :  { %v2208_v31 = vadd.f32 %v2207_v29, %v2195_v27 }
 0x1a3   :  { %v2220_v30 = vpop.f32.mrf.mxu1 }
 0x1a4   :  { %v2221_v32 = vadd.f32 %v2220_v30, %v2208_v31 }
 0x1a9   :  { %v2233_v34 = vpop.f32.mrf.mxu2  ;;  %v2209_v37 = vpop.f32.mrf.mxu0 }
 0x1aa   :  { %v2234_v26 = vadd.f32 %v2233_v34, %v2221_v32  ;;  %v2246_v36 = vpop.f32.mrf.mxu3 }
 0x1ab   :  { %v2222_v39 = vpop.f32.mrf.mxu1 }
 0x1ac   :  { %v2247_v33 = vadd.f32 %v2246_v36, %v2234_v26 }
 0x1ae   :  { %v2263_v43 = vmul.f32 %v2255_v22, %v2247_v33 }
 0x1b0   :  { %v2277_v45 = vadd.f32 %v2269_v40, %v2263_v43 }
 0x1b1   :  { %v2235_v51 = vpop.f32.mrf.mxu2 }
 0x1b2   :  { %v2281_v44 = vmax.f32 %v2277_v45, 0.0  ;;  %v2248_v53 = vpop.f32.mrf.mxu3 }
 0x1b4   :  { %2285 = vst [vmem:[%s5625_s4 + $0x18] sm:$0xff] %v2281_v44 }

</bundles_post_ra>
